<compile_context>
chip_gen: v7x
topology: tpu7x:2x2x1
jax: 0.10.0
libtpu: 0.0.40
codegen_flags: <defaults>
</compile_context>

<pallas_src>
import jax
import jax.numpy as jnp
from jax.experimental import pallas as pl
from jax.experimental.pallas import tpu as pltpu


DIMS = [28 * 28, 1000, 1000, 500, 200, 10]  # fc1..fc4, out


def _round_up(n, m):
    return ((n + m - 1) // m) * m


# Padded per-layer dims. Layer 0 keeps its true K=784 (x fed unpadded);
# every hidden/output feature dim rounds up to 128 lanes.
KDIMS = [DIMS[0]] + [_round_up(d, 128) for d in DIMS[1:-1]]  # 784,1024,1024,512,256
NDIMS = [_round_up(d, 128) for d in DIMS[1:]]                # 1024,1024,512,256,128


def mlp_kernel(x_ref, w1, b1, w2, b2, w3, b3, w4, b4, w5, b5, o_ref):
    """One batch tile through the whole MLP: 4x (matmul+bias+ReLU) + matmul+bias."""
    h = x_ref[...].astype(jnp.bfloat16)  # (TM, 784): bf16 cast done in VMEM
    for w, b in ((w1, b1), (w2, b2), (w3, b3), (w4, b4)):
        a = jnp.dot(h, w[...], preferred_element_type=jnp.float32) + b[...]
        h = jnp.maximum(a, 0.0).astype(jnp.bfloat16)
    o_ref[...] = jnp.dot(h, w5[...], preferred_element_type=jnp.float32) + b5[...]


def init_params(key):
    """Deterministic init mimicking torch.nn.Linear (uniform +-1/sqrt(fan_in))."""
    params = []
    for i in range(5):
        key, kw, kb = jax.random.split(key, 3)
        fan_in, fan_out = DIMS[i], DIMS[i + 1]
        bound = 1.0 / (fan_in ** 0.5)
        W = jax.random.uniform(kw, (fan_in, fan_out), jnp.float32, -bound, bound)
        b = jax.random.uniform(kb, (fan_out,), jnp.float32, -bound, bound)
        params.append((W, b))
    return params


def prepare_params(params):
    """Pad to tile-aligned shapes and cast weights to bf16 ONCE (cache the result)."""
    padded = []
    for i, (W, b) in enumerate(params):
        Wp = jnp.pad(
            W, ((0, KDIMS[i] - W.shape[0]), (0, NDIMS[i] - W.shape[1]))
        ).astype(jnp.bfloat16)
        bp = jnp.pad(
            b.reshape(1, -1), ((0, 0), (0, NDIMS[i] - b.shape[0]))
        ).astype(jnp.float32)
        padded += [Wp, bp]
    return tuple(jax.device_put(p) for p in padded)


def _is_v5_chip():
    try:
        return "v5" in jax.devices()[0].device_kind.lower()
    except Exception:
        return False


def adagrad_network_forward(x_nchw, padded_params):
    """x_nchw: (B, 1, 28, 28) -> (B, 10). padded_params from prepare_params()."""
    B = x_nchw.shape[0]
    x = x_nchw.reshape(B, DIMS[0])  # same as torch .view(-1, 784); stays f32

    is_v5 = _is_v5_chip()
    big_tm = 128 if is_v5 else 512  # v5: 128-wide MXU; v6e/v7x: 256-wide MXU
    if B >= big_tm:
        TM = big_tm
    else:
        TM = min(big_tm, _round_up(max(B, 16), 16))  # bf16 packs 16 rows / vreg
    Bp = _round_up(B, TM)
    if Bp != B:
        x = jnp.pad(x, ((0, Bp - B), (0, 0)))  # batch-only pad (tiny / often no-op)

    num_tiles = Bp // TM
    # On v7x megacore, a "parallel" batch axis makes EACH TensorCore DMA its own
    # copy of the resident weights; only shard when there is enough work.
    semantics = ("parallel",) if num_tiles >= 8 else ("arbitrary",)

    in_specs = [pl.BlockSpec((TM, DIMS[0]), lambda i: (i, 0))]
    for k, n in zip(KDIMS, NDIMS):
        # Constant index map -> weights/biases resident in VMEM; single buffer.
        in_specs.append(
            pl.BlockSpec((k, n), lambda i: (0, 0), pipeline_mode=pl.Buffered(1))
        )
        in_specs.append(
            pl.BlockSpec((1, n), lambda i: (0, 0), pipeline_mode=pl.Buffered(1))
        )

    weight_bytes = sum(k * n * 2 + n * 4 for k, n in zip(KDIMS, NDIMS))
    cost = pl.CostEstimate(
        flops=2 * Bp * sum(k * n for k, n in zip(KDIMS, NDIMS)),
        transcendentals=0,
        bytes_accessed=weight_bytes + Bp * DIMS[0] * 4 + Bp * NDIMS[-1] * 4,
    )

    out = pl.pallas_call(
        mlp_kernel,
        out_shape=jax.ShapeDtypeStruct((Bp, NDIMS[-1]), jnp.float32),
        grid=(num_tiles,),
        in_specs=in_specs,
        out_specs=pl.BlockSpec((TM, NDIMS[-1]), lambda i: (i, 0)),
        compiler_params=pltpu.CompilerParams(
            dimension_semantics=semantics,
            vmem_limit_bytes=(32 if is_v5 else 48) * 1024 * 1024,
        ),
        cost_estimate=cost,
    )(x, *padded_params)

    return out[:B, :DIMS[-1]]


def reference_forward(x_nchw, params):
    """Pure-JAX reference with the same bf16 streaming / f32 accumulation."""
    h = x_nchw.reshape(x_nchw.shape[0], DIMS[0])
    for i, (W, b) in enumerate(params):
        h = jnp.dot(h.astype(jnp.bfloat16), W.astype(jnp.bfloat16),
                    preferred_element_type=jnp.float32) + b
        if i < 4:
            h = jnp.maximum(h, 0.0)
    return h


if __name__ == "__main__":
    key = jax.random.PRNGKey(0)
    kx, kp = jax.random.split(key)
    x = jax.random.normal(kx, (2, 1, 28, 28), jnp.float32)  # NCHW, like MNIST
    params = init_params(kp)
    padded_params = prepare_params(params)  # one-time pad + bf16 cast

    y = adagrad_network_forward(x, padded_params)
    jax.block_until_ready(y)

    assert y.shape == (2, 10), y.shape
    # Note: bf16 weight/activation streaming vs an f32 reference differs ~1e-2
    # relative; both paths here use the same bf16 rounding, tolerance reflects it.
    y_ref = reference_forward(x, params)
    assert jnp.allclose(y, y_ref, atol=2e-2, rtol=2e-2), "mismatch vs reference"

    print("KERNEL_OK")
</pallas_src>

<mosaic_0001>
module attributes {stable_mosaic.version = 11 : i64} {
  func.func @mlp_kernel(%arg0: i32, %arg1: memref<16x784xf32, #tpu.memory_space<vmem>>, %arg2: memref<784x1024xbf16, #tpu.memory_space<vmem>>, %arg3: memref<1x1024xf32, #tpu.memory_space<vmem>>, %arg4: memref<1024x1024xbf16, #tpu.memory_space<vmem>>, %arg5: memref<1x1024xf32, #tpu.memory_space<vmem>>, %arg6: memref<1024x512xbf16, #tpu.memory_space<vmem>>, %arg7: memref<1x512xf32, #tpu.memory_space<vmem>>, %arg8: memref<512x256xbf16, #tpu.memory_space<vmem>>, %arg9: memref<1x256xf32, #tpu.memory_space<vmem>>, %arg10: memref<256x128xbf16, #tpu.memory_space<vmem>>, %arg11: memref<1x128xf32, #tpu.memory_space<vmem>>, %arg12: memref<16x128xf32, #tpu.memory_space<vmem>>) attributes {dimension_semantics = [#tpu.dimension_semantics<arbitrary>], iteration_bounds = array<i64: 1>, scalar_prefetch = 0 : i64, scratch_operands = 0 : i64, tpu.core_type = #tpu.core_type<tc>, window_params = [{transform_indices = @transform_0, window_bounds = array<i64: 16, 784>}, {pipeline_mode = #tpu.pipeline_mode<synchronous>, transform_indices = @transform_1, window_bounds = array<i64: 784, 1024>}, {pipeline_mode = #tpu.pipeline_mode<synchronous>, transform_indices = @transform_2, window_bounds = array<i64: 1, 1024>}, {pipeline_mode = #tpu.pipeline_mode<synchronous>, transform_indices = @transform_3, window_bounds = array<i64: 1024, 1024>}, {pipeline_mode = #tpu.pipeline_mode<synchronous>, transform_indices = @transform_4, window_bounds = array<i64: 1, 1024>}, {pipeline_mode = #tpu.pipeline_mode<synchronous>, transform_indices = @transform_5, window_bounds = array<i64: 1024, 512>}, {pipeline_mode = #tpu.pipeline_mode<synchronous>, transform_indices = @transform_6, window_bounds = array<i64: 1, 512>}, {pipeline_mode = #tpu.pipeline_mode<synchronous>, transform_indices = @transform_7, window_bounds = array<i64: 512, 256>}, {pipeline_mode = #tpu.pipeline_mode<synchronous>, transform_indices = @transform_8, window_bounds = array<i64: 1, 256>}, {pipeline_mode = #tpu.pipeline_mode<synchronous>, transform_indices = @transform_9, window_bounds = array<i64: 256, 128>}, {pipeline_mode = #tpu.pipeline_mode<synchronous>, transform_indices = @transform_10, window_bounds = array<i64: 1, 128>}, {transform_indices = @transform_11, window_bounds = array<i64: 16, 128>}]} {
    %c0 = arith.constant 0 : index
    %c0_0 = arith.constant 0 : index
    %0 = vector.load %arg1[%c0, %c0_0] : memref<16x784xf32, #tpu.memory_space<vmem>>, vector<16x784xf32>
    %1 = arith.truncf %0 : vector<16x784xf32> to vector<16x784xbf16>
    %c0_1 = arith.constant 0 : index
    %c0_2 = arith.constant 0 : index
    %2 = vector.load %arg2[%c0_1, %c0_2] : memref<784x1024xbf16, #tpu.memory_space<vmem>>, vector<784x1024xbf16>
    %cst = arith.constant dense<0.000000e+00> : vector<16x1024xf32>
    %3 = tpu.matmul %1, %2, %cst {dimension_numbers = #tpu.dot_dimension_numbers<[1], [0], [0], [1], [0, 0, 1, 1], [], []>} : vector<16x784xbf16>, vector<784x1024xbf16>, vector<16x1024xf32> -> vector<16x1024xf32>
    %c0_3 = arith.constant 0 : index
    %c0_4 = arith.constant 0 : index
    %4 = vector.load %arg3[%c0_3, %c0_4] : memref<1x1024xf32, #tpu.memory_space<vmem>>, vector<1x1024xf32>
    %5 = vector.broadcast %4 : vector<1x1024xf32> to vector<16x1024xf32>
    %6 = arith.addf %3, %5 : vector<16x1024xf32>
    %cst_5 = arith.constant 0.000000e+00 : f32
    %7 = vector.broadcast %cst_5 : f32 to vector<16x1024xf32>
    %8 = arith.maximumf %6, %7 : vector<16x1024xf32>
    %9 = arith.truncf %8 : vector<16x1024xf32> to vector<16x1024xbf16>
    %c0_6 = arith.constant 0 : index
    %c0_7 = arith.constant 0 : index
    %10 = vector.load %arg4[%c0_6, %c0_7] : memref<1024x1024xbf16, #tpu.memory_space<vmem>>, vector<1024x1024xbf16>
    %cst_8 = arith.constant dense<0.000000e+00> : vector<16x1024xf32>
    %11 = tpu.matmul %9, %10, %cst_8 {dimension_numbers = #tpu.dot_dimension_numbers<[1], [0], [0], [1], [0, 0, 1, 1], [], []>} : vector<16x1024xbf16>, vector<1024x1024xbf16>, vector<16x1024xf32> -> vector<16x1024xf32>
    %c0_9 = arith.constant 0 : index
    %c0_10 = arith.constant 0 : index
    %12 = vector.load %arg5[%c0_9, %c0_10] : memref<1x1024xf32, #tpu.memory_space<vmem>>, vector<1x1024xf32>
    %13 = vector.broadcast %12 : vector<1x1024xf32> to vector<16x1024xf32>
    %14 = arith.addf %11, %13 : vector<16x1024xf32>
    %cst_11 = arith.constant 0.000000e+00 : f32
    %15 = vector.broadcast %cst_11 : f32 to vector<16x1024xf32>
    %16 = arith.maximumf %14, %15 : vector<16x1024xf32>
    %17 = arith.truncf %16 : vector<16x1024xf32> to vector<16x1024xbf16>
    %c0_12 = arith.constant 0 : index
    %c0_13 = arith.constant 0 : index
    %18 = vector.load %arg6[%c0_12, %c0_13] : memref<1024x512xbf16, #tpu.memory_space<vmem>>, vector<1024x512xbf16>
    %cst_14 = arith.constant dense<0.000000e+00> : vector<16x512xf32>
    %19 = tpu.matmul %17, %18, %cst_14 {dimension_numbers = #tpu.dot_dimension_numbers<[1], [0], [0], [1], [0, 0, 1, 1], [], []>} : vector<16x1024xbf16>, vector<1024x512xbf16>, vector<16x512xf32> -> vector<16x512xf32>
    %c0_15 = arith.constant 0 : index
    %c0_16 = arith.constant 0 : index
    %20 = vector.load %arg7[%c0_15, %c0_16] : memref<1x512xf32, #tpu.memory_space<vmem>>, vector<1x512xf32>
    %21 = vector.broadcast %20 : vector<1x512xf32> to vector<16x512xf32>
    %22 = arith.addf %19, %21 : vector<16x512xf32>
    %cst_17 = arith.constant 0.000000e+00 : f32
    %23 = vector.broadcast %cst_17 : f32 to vector<16x512xf32>
    %24 = arith.maximumf %22, %23 : vector<16x512xf32>
    %25 = arith.truncf %24 : vector<16x512xf32> to vector<16x512xbf16>
    %c0_18 = arith.constant 0 : index
    %c0_19 = arith.constant 0 : index
    %26 = vector.load %arg8[%c0_18, %c0_19] : memref<512x256xbf16, #tpu.memory_space<vmem>>, vector<512x256xbf16>
    %cst_20 = arith.constant dense<0.000000e+00> : vector<16x256xf32>
    %27 = tpu.matmul %25, %26, %cst_20 {dimension_numbers = #tpu.dot_dimension_numbers<[1], [0], [0], [1], [0, 0, 1, 1], [], []>} : vector<16x512xbf16>, vector<512x256xbf16>, vector<16x256xf32> -> vector<16x256xf32>
    %c0_21 = arith.constant 0 : index
    %c0_22 = arith.constant 0 : index
    %28 = vector.load %arg9[%c0_21, %c0_22] : memref<1x256xf32, #tpu.memory_space<vmem>>, vector<1x256xf32>
    %29 = vector.broadcast %28 : vector<1x256xf32> to vector<16x256xf32>
    %30 = arith.addf %27, %29 : vector<16x256xf32>
    %cst_23 = arith.constant 0.000000e+00 : f32
    %31 = vector.broadcast %cst_23 : f32 to vector<16x256xf32>
    %32 = arith.maximumf %30, %31 : vector<16x256xf32>
    %33 = arith.truncf %32 : vector<16x256xf32> to vector<16x256xbf16>
    %c0_24 = arith.constant 0 : index
    %c0_25 = arith.constant 0 : index
    %34 = vector.load %arg10[%c0_24, %c0_25] : memref<256x128xbf16, #tpu.memory_space<vmem>>, vector<256x128xbf16>
    %cst_26 = arith.constant dense<0.000000e+00> : vector<16x128xf32>
    %35 = tpu.matmul %33, %34, %cst_26 {dimension_numbers = #tpu.dot_dimension_numbers<[1], [0], [0], [1], [0, 0, 1, 1], [], []>} : vector<16x256xbf16>, vector<256x128xbf16>, vector<16x128xf32> -> vector<16x128xf32>
    %c0_27 = arith.constant 0 : index
    %c0_28 = arith.constant 0 : index
    %36 = vector.load %arg11[%c0_27, %c0_28] : memref<1x128xf32, #tpu.memory_space<vmem>>, vector<1x128xf32>
    %37 = vector.broadcast %36 : vector<1x128xf32> to vector<16x128xf32>
    %38 = arith.addf %35, %37 : vector<16x128xf32>
    %c0_29 = arith.constant 0 : index
    %c0_30 = arith.constant 0 : index
    %39 = vector.load %arg12[%c0_29, %c0_30] : memref<16x128xf32, #tpu.memory_space<vmem>>, vector<16x128xf32>
    tpu.vector_store %arg12[%c0_29, %c0_30], %38 {strides = array<i32>} : memref<16x128xf32, #tpu.memory_space<vmem>>, vector<16x128xf32>,
    return
  }
  func.func @transform_0(%arg0: i32) -> (i32, i32) {
    %c0_i32 = arith.constant 0 : i32
    %c0_i32_0 = arith.constant 0 : i32
    return %arg0, %c0_i32 : i32, i32
  }
  func.func @transform_1(%arg0: i32) -> (i32, i32) {
    %c0_i32 = arith.constant 0 : i32
    %c0_i32_0 = arith.constant 0 : i32
    %c0_i32_1 = arith.constant 0 : i32
    return %c0_i32, %c0_i32_0 : i32, i32
  }
  func.func @transform_2(%arg0: i32) -> (i32, i32) {
    %c0_i32 = arith.constant 0 : i32
    %c0_i32_0 = arith.constant 0 : i32
    %c0_i32_1 = arith.constant 0 : i32
    return %c0_i32, %c0_i32_0 : i32, i32
  }
  func.func @transform_3(%arg0: i32) -> (i32, i32) {
    %c0_i32 = arith.constant 0 : i32
    %c0_i32_0 = arith.constant 0 : i32
    %c0_i32_1 = arith.constant 0 : i32
    return %c0_i32, %c0_i32_0 : i32, i32
  }
  func.func @transform_4(%arg0: i32) -> (i32, i32) {
    %c0_i32 = arith.constant 0 : i32
    %c0_i32_0 = arith.constant 0 : i32
    %c0_i32_1 = arith.constant 0 : i32
    return %c0_i32, %c0_i32_0 : i32, i32
  }
  func.func @transform_5(%arg0: i32) -> (i32, i32) {
    %c0_i32 = arith.constant 0 : i32
    %c0_i32_0 = arith.constant 0 : i32
    %c0_i32_1 = arith.constant 0 : i32
    return %c0_i32, %c0_i32_0 : i32, i32
  }
  func.func @transform_6(%arg0: i32) -> (i32, i32) {
    %c0_i32 = arith.constant 0 : i32
    %c0_i32_0 = arith.constant 0 : i32
    %c0_i32_1 = arith.constant 0 : i32
    return %c0_i32, %c0_i32_0 : i32, i32
  }
  func.func @transform_7(%arg0: i32) -> (i32, i32) {
    %c0_i32 = arith.constant 0 : i32
    %c0_i32_0 = arith.constant 0 : i32
    %c0_i32_1 = arith.constant 0 : i32
    return %c0_i32, %c0_i32_0 : i32, i32
  }
  func.func @transform_8(%arg0: i32) -> (i32, i32) {
    %c0_i32 = arith.constant 0 : i32
    %c0_i32_0 = arith.constant 0 : i32
    %c0_i32_1 = arith.constant 0 : i32
    return %c0_i32, %c0_i32_0 : i32, i32
  }
  func.func @transform_9(%arg0: i32) -> (i32, i32) {
    %c0_i32 = arith.constant 0 : i32
    %c0_i32_0 = arith.constant 0 : i32
    %c0_i32_1 = arith.constant 0 : i32
    return %c0_i32, %c0_i32_0 : i32, i32
  }
  func.func @transform_10(%arg0: i32) -> (i32, i32) {
    %c0_i32 = arith.constant 0 : i32
    %c0_i32_0 = arith.constant 0 : i32
    %c0_i32_1 = arith.constant 0 : i32
    return %c0_i32, %c0_i32_0 : i32, i32
  }
  func.func @transform_11(%arg0: i32) -> (i32, i32) {
    %c0_i32 = arith.constant 0 : i32
    %c0_i32_0 = arith.constant 0 : i32
    return %arg0, %c0_i32 : i32, i32
  }
}

</mosaic_0001>

<bundles_post_ra>
// kernel: tpu_custom_call.1
= control target key start
LH: loop header
LB: loop body
LE: loop exit
PB: predicated region body
PF: predicated region fallthrough
CT: control target
= control target key end

     0   :  { %16 = vsyncpa [#allocation3], 0  ;;  %s12450_s0 = inlined_call_operand.hbm [shape: f32[16,784], index: 0, kind: input, shape index: {}]   ;;  %s12451_s1 = inlined_call_operand.hbm [shape: bf16[784,1024], index: 1, kind: input, shape index: {}]   ;;  %s12452_s2 = inlined_call_operand.hbm [shape: f32[1,1024], index: 2, kind: input, shape index: {}]   ;;  %s12453_s3 = inlined_call_operand.hbm [shape: bf16[1024,1024], index: 3, kind: input, shape index: {}]   ;;  %s12454_s4 = inlined_call_operand.hbm [shape: f32[1,1024], index: 4, kind: input, shape index: {}]   ;;  %s12455_s5 = inlined_call_operand.hbm [shape: bf16[1024,512], index: 5, kind: input, shape index: {}]   ;;  %s12456_s6 = inlined_call_operand.hbm [shape: f32[1,512], index: 6, kind: input, shape index: {}]   ;;  %s12457_s7 = inlined_call_operand.hbm [shape: bf16[512,256], index: 7, kind: input, shape index: {}]   ;;  %s12458_s8 = inlined_call_operand.hbm [shape: f32[1,256], index: 8, kind: input, shape index: {}]   ;;  %s12459_s9 = inlined_call_operand.hbm [shape: bf16[256,128], index: 9, kind: input, shape index: {}]   ;;  %s12460_s10 = inlined_call_operand.hbm [shape: f32[1,128], index: 10, kind: input, shape index: {}]   ;;  %s12461_s11 = inlined_call_operand.hbm [shape: f32[16,128], index: 11, kind: output, shape index: {}]  }
   0x1   :  { %17 = vsyncpa [#allocation6], 0 }
   0x2   :  { %18 = vsyncpa [#allocation9], 0 }
   0x3   :  { %19 = vsyncpa [#allocation12], 0 }
   0x4   :  { %20 = vsyncpa [#allocation15], 0 }
   0x5   :  { %21 = vsyncpa [#allocation18], 0 }
   0x6   :  { %22 = vsyncpa [#allocation4], 0  ;;  %s11972_s17 = smov [#allocation5]   ;;  %s11694_s21 = scalar_lea.hbm %s12451_s1, 50176 }
   0x7   :  { %s40_s18 = sshll.u32 %s11972_s17, 4  ;;  %p11695_p0 = scmp.ne.s32.totalorder %s12451_s1, %s11694_s21  ;;  %s41_s18 = int_to_ptr.vmem [resolvable:$true] %s40_s18 }
   0x8   :  { %p11698_p1 = scmp.lt.u32.totalorder %s11694_s21, %s12451_s1 }
   0xa   :  { %p11700_p2 = pnand %p11698_p1, %p11695_p0 }
   0xc   :  { %11703 = shalt.err (!%p11700_p2)
}
   0xd   :  { %s11704_s26 = scalar_lea.vmem %s41_s18, 50176  ;;  %p11709_p4 = scmp.lt.s32.totalorder %s41_s18, %s41_s18 }
   0xe   :  { %p11705_p3 = scmp.ne.s32.totalorder %s41_s18, %s11704_s26  ;;  %p11710_p5 = scmp.lt.s32.totalorder %s11704_s26, %s11704_s26 }
  0x10   :  { %p11711_p6 = por %p11710_p5, %p11709_p4 }
  0x12   :  { %p11712_p7 = pnand %p11711_p6, %p11705_p3 }
  0x14   :  { %11715 = shalt.err (!%p11712_p7)
}
  0x15   :  { %s11973_s27 = smov 512   ;;  %s11974_s28 = smov 32  }
  0x16   :  { %46 = dma.hbm_to_vmem [thread:$0]  %s12451_s1, 50176, %s41_s18, [#allocation6], %s11973_s27, %s11973_s27, %s11974_s28  }
  0x17   :  { %s11975_s12 = smov [#allocation8]   ;;  %s11976_s14 = smov [#allocation11]  }
  0x18   :  { %s62_s13 = sshll.u32 %s11975_s12, 4  ;;  %s84_s15 = sshll.u32 %s11976_s14, 4  ;;  %s63_s13 = int_to_ptr.vmem [resolvable:$true] %s62_s13  ;;  %s85_s15 = int_to_ptr.vmem [resolvable:$true] %s84_s15 }
  0x19   :  { %s11716_s19 = scalar_lea.hbm %s12453_s3, 65536 }
  0x1a   :  { %p11717_p8 = scmp.ne.s32.totalorder %s12453_s3, %s11716_s19  ;;  %p11720_p9 = scmp.lt.u32.totalorder %s11716_s19, %s12453_s3 }
  0x1c   :  { %p11722_p10 = pnand %p11720_p9, %p11717_p8 }
  0x1e   :  { %11725 = shalt.err (!%p11722_p10)
}
  0x1f   :  { %s11726_s1 = scalar_lea.vmem %s63_s13, 65536  ;;  %p11731_p12 = scmp.lt.s32.totalorder %s63_s13, %s63_s13 }
  0x20   :  { %p11727_p11 = scmp.ne.s32.totalorder %s63_s13, %s11726_s1  ;;  %p11732_p13 = scmp.lt.s32.totalorder %s11726_s1, %s11726_s1 }
  0x22   :  { %p11733_p0 = por %p11732_p13, %p11731_p12 }
  0x24   :  { %p11734_p1 = pnand %p11733_p0, %p11727_p11 }
  0x26   :  { %11737 = shalt.err (!%p11734_p1)
}
  0x27   :  { %68 = dma.hbm_to_vmem [thread:$0]  %s12453_s3, 65536, %s63_s13, [#allocation9], %s11973_s27, %s11973_s27, %s11974_s28  }
  0x28   :  { %s11738_s29 = scalar_lea.hbm %s12455_s5, 32768 }
  0x29   :  { %p11739_p2 = scmp.ne.s32.totalorder %s12455_s5, %s11738_s29  ;;  %p11742_p3 = scmp.lt.u32.totalorder %s11738_s29, %s12455_s5 }
  0x2b   :  { %p11744_p4 = pnand %p11742_p3, %p11739_p2 }
  0x2d   :  { %11747 = shalt.err (!%p11744_p4)
}
  0x2e   :  { %s11748_s17 = scalar_lea.vmem %s85_s15, 32768  ;;  %p11753_p6 = scmp.lt.s32.totalorder %s85_s15, %s85_s15 }
  0x2f   :  { %p11749_p5 = scmp.ne.s32.totalorder %s85_s15, %s11748_s17  ;;  %p11754_p7 = scmp.lt.s32.totalorder %s11748_s17, %s11748_s17 }
  0x31   :  { %p11755_p8 = por %p11754_p7, %p11753_p6 }
  0x33   :  { %p11756_p9 = pnand %p11755_p8, %p11749_p5 }
  0x35   :  { %11759 = shalt.err (!%p11756_p9)
}
  0x36   :  { %s11977_s3 = smov 256   ;;  %s11978_s27 = smov 16  }
  0x37   :  { %90 = dma.hbm_to_vmem [thread:$0]  %s12455_s5, 32768, %s85_s15, [#allocation12], %s11977_s3, %s11977_s3, %s11978_s27  }
  0x38   :  { %s11979_s19 = smov [#allocation14]   ;;  %s11760_s23 = scalar_lea.hbm %s12457_s7, 8192 }
  0x39   :  { %s106_s20 = sshll.u32 %s11979_s19, 4  ;;  %p11761_p10 = scmp.ne.s32.totalorder %s12457_s7, %s11760_s23  ;;  %s107_s20 = int_to_ptr.vmem [resolvable:$true] %s106_s20 }
  0x3a   :  { %p11764_p11 = scmp.lt.u32.totalorder %s11760_s23, %s12457_s7 }
  0x3c   :  { %p11766_p12 = pnand %p11764_p11, %p11761_p10 }
  0x3e   :  { %11769 = shalt.err (!%p11766_p12)
}
  0x3f   :  { %s11770_s26 = scalar_lea.vmem %s107_s20, 8192  ;;  %p11775_p0 = scmp.lt.s32.totalorder %s107_s20, %s107_s20 }
  0x40   :  { %p11771_p13 = scmp.ne.s32.totalorder %s107_s20, %s11770_s26  ;;  %p11776_p1 = scmp.lt.s32.totalorder %s11770_s26, %s11770_s26 }
  0x42   :  { %p11777_p2 = por %p11776_p1, %p11775_p0 }
  0x44   :  { %p11778_p3 = pnand %p11777_p2, %p11771_p13 }
  0x46   :  { %11781 = shalt.err (!%p11778_p3)
}
  0x47   :  { %s11980_s5 = smov 128   ;;  %s11981_s15 = smov 8  }
  0x48   :  { %112 = dma.hbm_to_vmem [thread:$0]  %s12457_s7, 8192, %s107_s20, [#allocation15], %s11980_s5, %s11980_s5, %s11981_s15  }
  0x49   :  { %s11982_s12 = smov [#allocation17]   ;;  %s11782_s3 = scalar_lea.hbm %s12459_s9, 2048 }
  0x4a   :  { %s128_s14 = sshll.u32 %s11982_s12, 4  ;;  %p11783_p4 = scmp.ne.s32.totalorder %s12459_s9, %s11782_s3  ;;  %s129_s14 = int_to_ptr.vmem [resolvable:$true] %s128_s14 }
  0x4b   :  { %p11786_p5 = scmp.lt.u32.totalorder %s11782_s3, %s12459_s9 }
  0x4d   :  { %p11788_p6 = pnand %p11786_p5, %p11783_p4 }
  0x4f   :  { %11791 = shalt.err (!%p11788_p6)
}
  0x50   :  { %s11792_s21 = scalar_lea.vmem %s129_s14, 2048  ;;  %p11797_p8 = scmp.lt.s32.totalorder %s129_s14, %s129_s14 }
  0x51   :  { %p11793_p7 = scmp.ne.s32.totalorder %s129_s14, %s11792_s21  ;;  %p11798_p9 = scmp.lt.s32.totalorder %s11792_s21, %s11792_s21 }
  0x53   :  { %p11799_p10 = por %p11798_p9, %p11797_p8 }
  0x55   :  { %p11800_p11 = pnand %p11799_p10, %p11793_p7 }
  0x57   :  { %11803 = shalt.err (!%p11800_p11)
}
  0x58   :  { %s11983_s7 = smov 64   ;;  %s11984_s20 = smov 4  }
  0x59   :  { %134 = dma.hbm_to_vmem [thread:$0]  %s12459_s9, 2048, %s129_s14, [#allocation18], %s11983_s7, %s11983_s7, %s11984_s20  }
  0x5a   :  { %s11985_s1 = smov [#allocation2]   ;;  %s11804_s26 = scalar_lea.hbm %s12450_s0, 1792 }
  0x5b   :  { %s28_s18 = sshll.u32 %s11985_s1, 4  ;;  %p11805_p12 = scmp.ne.s32.totalorder %s12450_s0, %s11804_s26  ;;  %s29_s18 = int_to_ptr.vmem [resolvable:$true] %s28_s18 }
  0x5c   :  { %p11808_p13 = scmp.lt.u32.totalorder %s11804_s26, %s12450_s0 }
  0x5e   :  { %p11810_p0 = pnand %p11808_p13, %p11805_p12 }
  0x60   :  { %11813 = shalt.err (!%p11810_p0)
}
  0x61   :  { %s11814_s17 = scalar_lea.vmem %s29_s18, 1792  ;;  %p11819_p2 = scmp.lt.s32.totalorder %s29_s18, %s29_s18 }
  0x62   :  { %p11815_p1 = scmp.ne.s32.totalorder %s29_s18, %s11814_s17  ;;  %p11820_p3 = scmp.lt.s32.totalorder %s11814_s17, %s11814_s17 }
  0x64   :  { %p11821_p4 = por %p11820_p3, %p11819_p2 }
  0x66   :  { %p11822_p5 = pnand %p11821_p4, %p11815_p1 }
  0x68   :  { %11825 = shalt.err (!%p11822_p5)
}
  0x69   :  { %s11986_s9 = smov 896   ;;  %s11987_s14 = smov 56  }
  0x6a   :  { %34 = dma.hbm_to_vmem [thread:$0]  %s12450_s0, 1792, %s29_s18, [#allocation3], %s11986_s9, %s11986_s9, %s11987_s14  }
  0x6b   :  { %s11988_s28 = smov [#allocation7]   ;;  %s11989_s19 = smov [#allocation10]  }
  0x6c   :  { %s53_s13 = sshll.u32 %s11988_s28, 4  ;;  %s75_s21 = sshll.u32 %s11989_s19, 4  ;;  %s54_s13 = int_to_ptr.vmem [resolvable:$true] %s53_s13  ;;  %s76_s21 = int_to_ptr.vmem [resolvable:$true] %s75_s21 }
  0x6d   :  { %s11826_s22 = scalar_lea.hbm %s12452_s2, 128 }
  0x6e   :  { %p11827_p6 = scmp.ne.s32.totalorder %s12452_s2, %s11826_s22  ;;  %p11830_p7 = scmp.lt.u32.totalorder %s11826_s22, %s12452_s2 }
  0x70   :  { %p11832_p8 = pnand %p11830_p7, %p11827_p6 }
  0x72   :  { %11835 = shalt.err (!%p11832_p8)
}
  0x73   :  { %s11836_s0 = scalar_lea.vmem %s54_s13, 128  ;;  %p11841_p10 = scmp.lt.s32.totalorder %s54_s13, %s54_s13 }
  0x74   :  { %p11837_p9 = scmp.ne.s32.totalorder %s54_s13, %s11836_s0  ;;  %p11842_p11 = scmp.lt.s32.totalorder %s11836_s0, %s11836_s0 }
  0x76   :  { %p11843_p12 = por %p11842_p11, %p11841_p10 }
  0x78   :  { %p11844_p13 = pnand %p11843_p12, %p11837_p9 }
  0x7a   :  { %11847 = shalt.err (!%p11844_p13)
}
  0x7b   :  { %56 = dma.hbm_to_vmem [thread:$0]  %s12452_s2, 128, %s54_s13, [#allocation6]  }
  0x7c   :  { %s11848_s12 = scalar_lea.hbm %s12454_s4, 128 }
  0x7d   :  { %p11849_p0 = scmp.ne.s32.totalorder %s12454_s4, %s11848_s12  ;;  %p11852_p1 = scmp.lt.u32.totalorder %s11848_s12, %s12454_s4 }
  0x7f   :  { %p11854_p2 = pnand %p11852_p1, %p11849_p0 }
  0x81   :  { %11857 = shalt.err (!%p11854_p2)
}
  0x82   :  { %s11858_s3 = scalar_lea.vmem %s76_s21, 128  ;;  %p11863_p4 = scmp.lt.s32.totalorder %s76_s21, %s76_s21 }
  0x83   :  { %p11859_p3 = scmp.ne.s32.totalorder %s76_s21, %s11858_s3  ;;  %p11864_p5 = scmp.lt.s32.totalorder %s11858_s3, %s11858_s3 }
  0x85   :  { %p11865_p6 = por %p11864_p5, %p11863_p4 }
  0x87   :  { %p11866_p7 = pnand %p11865_p6, %p11859_p3 }
  0x89   :  { %11869 = shalt.err (!%p11866_p7)
}
  0x8a   :  { %78 = dma.hbm_to_vmem [thread:$0]  %s12454_s4, 128, %s76_s21, [#allocation9]  }
  0x8b   :  { %s11990_s28 = smov [#allocation13]   ;;  %s11991_s19 = smov [#allocation16]  }
  0x8c   :  { %s97_s13 = sshll.u32 %s11990_s28, 4  ;;  %s119_s7 = sshll.u32 %s11991_s19, 4  ;;  %s98_s13 = int_to_ptr.vmem [resolvable:$true] %s97_s13  ;;  %s120_s7 = int_to_ptr.vmem [resolvable:$true] %s119_s7 }
  0x8d   :  { %s11870_s23 = scalar_lea.hbm %s12456_s6, 64 }
  0x8e   :  { %p11871_p8 = scmp.ne.s32.totalorder %s12456_s6, %s11870_s23  ;;  %p11874_p9 = scmp.lt.u32.totalorder %s11870_s23, %s12456_s6 }
  0x90   :  { %p11876_p10 = pnand %p11874_p9, %p11871_p8 }
  0x92   :  { %11879 = shalt.err (!%p11876_p10)
}
  0x93   :  { %s11880_s4 = scalar_lea.vmem %s98_s13, 64  ;;  %p11885_p12 = scmp.lt.s32.totalorder %s98_s13, %s98_s13 }
  0x94   :  { %p11881_p11 = scmp.ne.s32.totalorder %s98_s13, %s11880_s4  ;;  %p11886_p13 = scmp.lt.s32.totalorder %s11880_s4, %s11880_s4 }
  0x96   :  { %p11887_p0 = por %p11886_p13, %p11885_p12 }
  0x98   :  { %p11888_p1 = pnand %p11887_p0, %p11881_p11 }
  0x9a   :  { %11891 = shalt.err (!%p11888_p1)
}
  0x9b   :  { %100 = dma.hbm_to_vmem [thread:$0]  %s12456_s6, 64, %s98_s13, [#allocation12]  }
  0x9c   :  { %s11892_s30 = scalar_lea.hbm %s12458_s8, 32 }
  0x9d   :  { %p11893_p2 = scmp.ne.s32.totalorder %s12458_s8, %s11892_s30  ;;  %p11896_p3 = scmp.lt.u32.totalorder %s11892_s30, %s12458_s8 }
  0x9f   :  { %p11898_p4 = pnand %p11896_p3, %p11893_p2 }
  0xa1   :  { %11901 = shalt.err (!%p11898_p4)
}
  0xa2   :  { %s11902_s14 = scalar_lea.vmem %s120_s7, 32  ;;  %p11907_p6 = scmp.lt.s32.totalorder %s120_s7, %s120_s7 }
  0xa3   :  { %p11903_p5 = scmp.ne.s32.totalorder %s120_s7, %s11902_s14  ;;  %p11908_p7 = scmp.lt.s32.totalorder %s11902_s14, %s11902_s14 }
  0xa5   :  { %p11909_p8 = por %p11908_p7, %p11907_p6 }
  0xa7   :  { %p11910_p9 = pnand %p11909_p8, %p11903_p5 }
  0xa9   :  { %11913 = shalt.err (!%p11910_p9)
}
  0xaa   :  { %122 = dma.hbm_to_vmem [thread:$0]  %s12458_s8, 32, %s120_s7, [#allocation15]  }
  0xab   :  { %s11992_s2 = smov [#allocation19]   ;;  %s11914_s19 = scalar_lea.hbm %s12460_s10, 16 }
  0xac   :  { %s141_s27 = sshll.u32 %s11992_s2, 4  ;;  %p11915_p10 = scmp.ne.s32.totalorder %s12460_s10, %s11914_s19  ;;  %s142_s27 = int_to_ptr.vmem [resolvable:$true] %s141_s27 }
  0xad   :  { %p11918_p11 = scmp.lt.u32.totalorder %s11914_s19, %s12460_s10 }
  0xaf   :  { %p11920_p12 = pnand %p11918_p11, %p11915_p10 }
  0xb1   :  { %11923 = shalt.err (!%p11920_p12)
}
  0xb2   :  { %s11924_s24 = scalar_lea.vmem %s142_s27, 16  ;;  %s11928_s8 = scalar_lea.vmem %s142_s27, 32 }
  0xb3   :  { %p11925_p13 = scmp.ne.s32.totalorder %s142_s27, %s11924_s24  ;;  %p11929_p0 = scmp.lt.s32.totalorder %s142_s27, %s142_s27 }
  0xb4   :  { %p11930_p1 = scmp.lt.s32.totalorder %s11928_s8, %s11924_s24 }
  0xb6   :  { %p11931_p2 = por %p11930_p1, %p11929_p0 }
  0xb8   :  { %p11932_p3 = pnand %p11931_p2, %p11925_p13 }
  0xba   :  { %11935 = shalt.err (!%p11932_p3)
}
  0xbb   :  { %144 = dma.hbm_to_vmem [thread:$0]  %s12460_s10, 16, %s142_s27, [#allocation18]  }
  0xbc   :  { %11958 = dma.done.wait [#allocation3], 1792  }
  0xbd   :  { %11959 = vsyncadd [#allocation3], 4294965504 }
  0xbe   :  { %11960 = dma.done.wait [#allocation6], 50304  }
  0xbf   :  { %11961 = vsyncadd [#allocation6], 4294916992 }
  0xc0   :  { %11962 = dma.done.wait [#allocation9], 65664  }
  0xc1   :  { %11963 = vsyncadd [#allocation9], 4294901632 }
  0xc2   :  { %11964 = dma.done.wait [#allocation12], 32832  }
  0xc3   :  { %11965 = vsyncadd [#allocation12], 4294934464 }
  0xc4   :  { %11966 = dma.done.wait [#allocation15], 8224  }
  0xc5   :  { %11967 = vsyncadd [#allocation15], 4294959072 }
  0xc6   :  { %11968 = dma.done.wait [#allocation18], 2064  }
  0xc7   :  { %11969 = vsyncadd [#allocation18], 4294965232  ;;  %v200_v0 = vld [vmem:[#allocation5] sm:$0xff]  ;;  %v180_v53 = vld [vmem:[#allocation2 + $0x8] sm:$0xff]  ;;  %vm2594_vm0 = vcmask 130048   ;;  %s11994_s10 = smov [#allocation20]  }
  0xc8   :  { %v204_v1 = vld [vmem:[#allocation5 + $0x20] sm:$0xff]  ;;  %v187_v54 = vld [vmem:[#allocation2 + $0x40] sm:$0xff]  ;;  %v182_v59 = vld [vmem:[#allocation2 + $0x18] sm:$0xff]  ;;  %s9721_s0 = sshll.u32 %s11994_s10, 4  ;;  %s9722_s0 = int_to_ptr.vmem [resolvable:$true] %s9721_s0 }
  0xc9   :  { %v328_v2 = vld [vmem:[#allocation5 + $0x400] sm:$0xff]  ;;  %v9739_v3 = vcombine.high %v200_v0, %v204_v1  ;;  %v9738_v5 = vcombine.low %v200_v0, %v204_v1  ;;  %v12190_v58 = vpack.c.bf16 %v187_v54, %v180_v53  ;;  %s11936_s4 = scalar_lea.vmem %s9722_s0, 256  ;;  %p11941_p5 = scmp.lt.s32.totalorder %s9722_s0, %s9722_s0 }
  0xca   :  { %v332_v4 = vld [vmem:[#allocation5 + $0x420] sm:$0xff]  ;;  %p11937_p4 = scmp.ne.s32.totalorder %s9722_s0, %s11936_s4  ;;  %p11942_p6 = scmp.lt.s32.totalorder %s11936_s4, %s11936_s4 }
  0xcb   :  { %v208_v6 = vld [vmem:[#allocation5 + $0x40] sm:$0xff]  ;;  %v9867_v8 = vcombine.high %v328_v2, %v332_v4  ;;  %v9866_v9 = vcombine.low %v328_v2, %v332_v4  ;;  %2598 = vmatprep.subr.bf16.mxu1 %v9739_v3  ;;  %2630 = vmatprep.mubr.bf16.mxu1 %v12190_v58 }
  0xcc   :  { %v212_v7 = vld [vmem:[#allocation5 + $0x60] sm:$0xff]  ;;  %2599 = vmatpush1.bf16.msra.mxu1 %v9738_v5  ;;  %p11943_p7 = por %p11942_p6, %p11941_p5 }
  0xcd   :  { %v9747_v10 = vcombine.high %v208_v6, %v212_v7  ;;  %v336_v11 = vld [vmem:[#allocation5 + $0x440] sm:$0xff]  ;;  %2641 = vmatprep.subr.bf16.mxu0 %v9867_v8  ;;  %v9746_v18 = vcombine.low %v208_v6, %v212_v7 }
  0xce   :  { %v340_v12 = vld [vmem:[#allocation5 + $0x460] sm:$0xff]  ;;  %2642 = vmatpush1.bf16.msra.mxu0 %v9866_v9  ;;  %p11944_p8 = pnand %p11943_p7, %p11937_p4 }
  0xcf   :  { %v216_v13 = vld [vmem:[#allocation5 + $0x80] sm:$0xff]  ;;  %v9875_v14 = vcombine.high %v336_v11, %v340_v12  ;;  %2600 = vmatprep.subr.bf16.mxu1 %v9747_v10  ;;  %v9874_v19 = vcombine.low %v336_v11, %v340_v12 }
  0xd0   :  { %v220_v15 = vld [vmem:[#allocation5 + $0xa0] sm:$0xff]  ;;  %2601 = vmatpush1.bf16.msra.mxu1 %v9746_v18 }
  0xd1   :  { %v344_v16 = vld [vmem:[#allocation5 + $0x480] sm:$0xff]  ;;  %v9755_v20 = vcombine.high %v216_v13, %v220_v15  ;;  %2643 = vmatprep.subr.bf16.mxu0 %v9875_v14  ;;  %v9754_v26 = vcombine.low %v216_v13, %v220_v15 }
  0xd2   :  { %v348_v17 = vld [vmem:[#allocation5 + $0x4a0] sm:$0xff]  ;;  %2644 = vmatpush1.bf16.msra.mxu0 %v9874_v19 }
  0xd3   :  { %v9883_v21 = vcombine.high %v344_v16, %v348_v17  ;;  %v224_v22 = vld [vmem:[#allocation5 + $0xc0] sm:$0xff]  ;;  %2602 = vmatprep.subr.bf16.mxu1 %v9755_v20  ;;  %v9882_v27 = vcombine.low %v344_v16, %v348_v17 }
  0xd4   :  { %v228_v23 = vld [vmem:[#allocation5 + $0xe0] sm:$0xff]  ;;  %2603 = vmatpush1.bf16.msra.mxu1 %v9754_v26 }
  0xd5   :  { %v352_v24 = vld [vmem:[#allocation5 + $0x4c0] sm:$0xff]  ;;  %v9763_v28 = vcombine.high %v224_v22, %v228_v23  ;;  %2645 = vmatprep.subr.bf16.mxu0 %v9883_v21  ;;  %v9762_v34 = vcombine.low %v224_v22, %v228_v23 }
  0xd6   :  { %v356_v25 = vld [vmem:[#allocation5 + $0x4e0] sm:$0xff]  ;;  %2646 = vmatpush1.bf16.msra.mxu0 %v9882_v27 }
  0xd7   :  { %v9891_v29 = vcombine.high %v352_v24, %v356_v25  ;;  %v232_v30 = vld [vmem:[#allocation5 + $0x100] sm:$0xff]  ;;  %2604 = vmatprep.subr.bf16.mxu1 %v9763_v28  ;;  %v9890_v35 = vcombine.low %v352_v24, %v356_v25 }
  0xd8   :  { %v236_v31 = vld [vmem:[#allocation5 + $0x120] sm:$0xff]  ;;  %2605 = vmatpush1.bf16.msra.mxu1 %v9762_v34 }
  0xd9   :  { %v360_v32 = vld [vmem:[#allocation5 + $0x500] sm:$0xff]  ;;  %v9771_v36 = vcombine.high %v232_v30, %v236_v31  ;;  %2647 = vmatprep.subr.bf16.mxu0 %v9891_v29  ;;  %v9770_v42 = vcombine.low %v232_v30, %v236_v31 }
  0xda   :  { %v364_v33 = vld [vmem:[#allocation5 + $0x520] sm:$0xff]  ;;  %2648 = vmatpush1.bf16.msra.mxu0 %v9890_v35 }
  0xdb   :  { %v9899_v37 = vcombine.high %v360_v32, %v364_v33  ;;  %v240_v38 = vld [vmem:[#allocation5 + $0x140] sm:$0xff]  ;;  %2606 = vmatprep.subr.bf16.mxu1 %v9771_v36  ;;  %v9898_v43 = vcombine.low %v360_v32, %v364_v33 }
  0xdc   :  { %v244_v39 = vld [vmem:[#allocation5 + $0x160] sm:$0xff]  ;;  %2607 = vmatpush1.bf16.msra.mxu1 %v9770_v42 }
  0xdd   :  { %v368_v40 = vld [vmem:[#allocation5 + $0x540] sm:$0xff]  ;;  %v9779_v44 = vcombine.high %v240_v38, %v244_v39  ;;  %2649 = vmatprep.subr.bf16.mxu0 %v9899_v37  ;;  %v9778_v50 = vcombine.low %v240_v38, %v244_v39 }
  0xde   :  { %v372_v41 = vld [vmem:[#allocation5 + $0x560] sm:$0xff]  ;;  %2650 = vmatpush1.bf16.msra.mxu0 %v9898_v43 }
  0xdf   :  { %v9907_v45 = vcombine.high %v368_v40, %v372_v41  ;;  %v248_v46 = vld [vmem:[#allocation5 + $0x180] sm:$0xff]  ;;  %2608 = vmatprep.subr.bf16.mxu1 %v9779_v44  ;;  %v9906_v51 = vcombine.low %v368_v40, %v372_v41 }
  0xe0   :  { %v252_v47 = vld [vmem:[#allocation5 + $0x1a0] sm:$0xff]  ;;  %2609 = vmatpush1.bf16.msra.mxu1 %v9778_v50 }
  0xe1   :  { %v376_v48 = vld [vmem:[#allocation5 + $0x580] sm:$0xff]  ;;  %v9787_v52 = vcombine.high %v248_v46, %v252_v47  ;;  %2651 = vmatprep.subr.bf16.mxu0 %v9907_v45  ;;  %v9786_v63 = vcombine.low %v248_v46, %v252_v47 }
  0xe2   :  { %v380_v49 = vld [vmem:[#allocation5 + $0x5a0] sm:$0xff]  ;;  %2652 = vmatpush1.bf16.msra.mxu0 %v9906_v51 }
  0xe3   :  { %v9915_v55 = vcombine.high %v376_v48, %v380_v49  ;;  %v256_v56 = vld [vmem:[#allocation5 + $0x1c0] sm:$0xff]  ;;  %2610 = vmatprep.subr.bf16.mxu1 %v9787_v52  ;;  %v9914_v1 = vcombine.low %v376_v48, %v380_v49 }
  0xe4   :  { %v260_v57 = vld [vmem:[#allocation5 + $0x1e0] sm:$0xff]  ;;  %2611 = vmatpush1.bf16.msra.mxu1 %v9786_v63 }
  0xe5   :  { %v384_v60 = vld [vmem:[#allocation5 + $0x5c0] sm:$0xff]  ;;  %v9795_v2 = vcombine.high %v256_v56, %v260_v57  ;;  %2653 = vmatprep.subr.bf16.mxu0 %v9915_v55  ;;  %v9794_v8 = vcombine.low %v256_v56, %v260_v57 }
  0xe6   :  { %v388_v61 = vld [vmem:[#allocation5 + $0x5e0] sm:$0xff]  ;;  %2654 = vmatpush1.bf16.msra.mxu0 %v9914_v1 }
  0xe7   :  { %v189_v62 = vld [vmem:[#allocation2 + $0x50] sm:$0xff]  ;;  %v9923_v3 = vcombine.high %v384_v60, %v388_v61  ;;  %2612 = vmatprep.subr.bf16.mxu1 %v9795_v2  ;;  %v9922_v9 = vcombine.low %v384_v60, %v388_v61 }
  0xe8   :  { %v12193_v0 = vpack.c.bf16 %v189_v62, %v182_v59  ;;  %v264_v4 = vld [vmem:[#allocation5 + $0x200] sm:$0xff]  ;;  %2613 = vmatpush1.bf16.msra.mxu1 %v9794_v8 }
  0xe9   :  { %v268_v5 = vld [vmem:[#allocation5 + $0x220] sm:$0xff]  ;;  %2655 = vmatprep.subr.bf16.mxu0 %v9923_v3 }
  0xea   :  { %2673 = vmatprep.mubr.bf16.mxu0 %v12193_v0  ;;  %v392_v6 = vld [vmem:[#allocation5 + $0x600] sm:$0xff]  ;;  %v9803_v10 = vcombine.high %v264_v4, %v268_v5  ;;  %v9802_v16 = vcombine.low %v264_v4, %v268_v5  ;;  %2656 = vmatpush1.bf16.msra.mxu0 %v9922_v9 }
  0xeb   :  { %v396_v7 = vld [vmem:[#allocation5 + $0x620] sm:$0xff] }
  0xec   :  { %v9931_v11 = vcombine.high %v392_v6, %v396_v7  ;;  %v272_v12 = vld [vmem:[#allocation5 + $0x240] sm:$0xff]  ;;  %2614 = vmatprep.subr.bf16.mxu1 %v9803_v10  ;;  %v9930_v17 = vcombine.low %v392_v6, %v396_v7  ;;  %v201_v6 = vld [vmem:[#allocation5 + $0x8] sm:$0xff] }
  0xed   :  { %v276_v13 = vld [vmem:[#allocation5 + $0x260] sm:$0xff]  ;;  %2615 = vmatpush1.bf16.msra.mxu1 %v9802_v16  ;;  %v205_v7 = vld [vmem:[#allocation5 + $0x28] sm:$0xff]  ;;  %v188_v16 = vld [vmem:[#allocation2 + $0x48] sm:$0xff] }
  0xee   :  { %v400_v14 = vld [vmem:[#allocation5 + $0x640] sm:$0xff]  ;;  %v9811_v18 = vcombine.high %v272_v12, %v276_v13  ;;  %2657 = vmatprep.subr.bf16.mxu0 %v9931_v11  ;;  %v9810_v24 = vcombine.low %v272_v12, %v276_v13  ;;  %v179_v11 = vld [vmem:[#allocation2] sm:$0xff]  ;;  %v186_v12 = vld [vmem:[#allocation2 + $0x38] sm:$0xff] }
  0xef   :  { %v404_v15 = vld [vmem:[#allocation5 + $0x660] sm:$0xff]  ;;  %2658 = vmatpush1.bf16.msra.mxu0 %v9930_v17 }
  0xf0   :  { %v9939_v19 = vcombine.high %v400_v14, %v404_v15  ;;  %v280_v20 = vld [vmem:[#allocation5 + $0x280] sm:$0xff]  ;;  %2616 = vmatprep.subr.bf16.mxu1 %v9811_v18  ;;  %v9938_v25 = vcombine.low %v400_v14, %v404_v15  ;;  %v9741_v14 = vcombine.high %v201_v6, %v205_v7 }
  0xf1   :  { %v284_v21 = vld [vmem:[#allocation5 + $0x2a0] sm:$0xff]  ;;  %2617 = vmatpush1.bf16.msra.mxu1 %v9810_v24  ;;  %v191_v24 = vld [vmem:[#allocation2 + $0x60] sm:$0xff] }
  0xf2   :  { %v408_v22 = vld [vmem:[#allocation5 + $0x680] sm:$0xff]  ;;  %v9819_v26 = vcombine.high %v280_v20, %v284_v21  ;;  %2659 = vmatprep.subr.bf16.mxu0 %v9939_v19  ;;  %v9818_v32 = vcombine.low %v280_v20, %v284_v21  ;;  %v209_v19 = vld [vmem:[#allocation5 + $0x48] sm:$0xff]  ;;  %v12196_v21 = vpack.c.bf16 %v186_v12, %v179_v11 }
  0xf3   :  { %v412_v23 = vld [vmem:[#allocation5 + $0x6a0] sm:$0xff]  ;;  %2660 = vmatpush1.bf16.msra.mxu0 %v9938_v25  ;;  %v213_v20 = vld [vmem:[#allocation5 + $0x68] sm:$0xff]  ;;  %v9740_v25 = vcombine.low %v201_v6, %v205_v7 }
  0xf4   :  { %v9947_v27 = vcombine.high %v408_v22, %v412_v23  ;;  %v288_v28 = vld [vmem:[#allocation5 + $0x2c0] sm:$0xff]  ;;  %2618 = vmatprep.subr.bf16.mxu1 %v9819_v26  ;;  %v9946_v33 = vcombine.low %v408_v22, %v412_v23  ;;  %v184_v23 = vld [vmem:[#allocation2 + $0x28] sm:$0xff]  ;;  %v257_v11 = vld [vmem:[#allocation5 + $0x1c8] sm:$0xff] }
  0xf5   :  { %v292_v29 = vld [vmem:[#allocation5 + $0x2e0] sm:$0xff]  ;;  %2619 = vmatpush1.bf16.msra.mxu1 %v9818_v32  ;;  %v12200_v32 = vpack.c.bf16 %v191_v24, %v184_v23  ;;  %v261_v12 = vld [vmem:[#allocation5 + $0x1e8] sm:$0xff] }
  0xf6   :  { %v416_v30 = vld [vmem:[#allocation5 + $0x6c0] sm:$0xff]  ;;  %v9827_v34 = vcombine.high %v288_v28, %v292_v29  ;;  %2661 = vmatprep.subr.bf16.mxu0 %v9947_v27  ;;  %v9826_v40 = vcombine.low %v288_v28, %v292_v29  ;;  %v9749_v28 = vcombine.high %v209_v19, %v213_v20 }
  0xf7   :  { %v420_v31 = vld [vmem:[#allocation5 + $0x6e0] sm:$0xff]  ;;  %2662 = vmatpush1.bf16.msra.mxu0 %v9946_v33 }
  0xf8   :  { %v9955_v35 = vcombine.high %v416_v30, %v420_v31  ;;  %v296_v36 = vld [vmem:[#allocation5 + $0x300] sm:$0xff]  ;;  %2620 = vmatprep.subr.bf16.mxu1 %v9827_v34  ;;  %v9954_v41 = vcombine.low %v416_v30, %v420_v31  ;;  %v217_v30 = vld [vmem:[#allocation5 + $0x88] sm:$0xff] }
  0xf9   :  { %v300_v37 = vld [vmem:[#allocation5 + $0x320] sm:$0xff]  ;;  %2621 = vmatpush1.bf16.msra.mxu1 %v9826_v40  ;;  %v221_v31 = vld [vmem:[#allocation5 + $0xa8] sm:$0xff] }
  0xfa   :  { %v424_v38 = vld [vmem:[#allocation5 + $0x700] sm:$0xff]  ;;  %v9835_v42 = vcombine.high %v296_v36, %v300_v37  ;;  %2663 = vmatprep.subr.bf16.mxu0 %v9955_v35  ;;  %v9834_v48 = vcombine.low %v296_v36, %v300_v37  ;;  %v9748_v35 = vcombine.low %v209_v19, %v213_v20  ;;  %v9757_v37 = vcombine.high %v217_v30, %v221_v31  ;;  %v265_v19 = vld [vmem:[#allocation5 + $0x208] sm:$0xff] }
  0xfb   :  { %v428_v39 = vld [vmem:[#allocation5 + $0x720] sm:$0xff]  ;;  %2664 = vmatpush1.bf16.msra.mxu0 %v9954_v41  ;;  %v225_v41 = vld [vmem:[#allocation5 + $0xc8] sm:$0xff] }
  0xfc   :  { %v9963_v43 = vcombine.high %v424_v38, %v428_v39  ;;  %v304_v44 = vld [vmem:[#allocation5 + $0x340] sm:$0xff]  ;;  %2622 = vmatprep.subr.bf16.mxu1 %v9835_v42  ;;  %v9962_v49 = vcombine.low %v424_v38, %v428_v39  ;;  %v229_v42 = vld [vmem:[#allocation5 + $0xe8] sm:$0xff] }
  0xfd   :  { %v308_v45 = vld [vmem:[#allocation5 + $0x360] sm:$0xff]  ;;  %2623 = vmatpush1.bf16.msra.mxu1 %v9834_v48  ;;  %v269_v20 = vld [vmem:[#allocation5 + $0x228] sm:$0xff] }
  0xfe   :  { %v432_v46 = vld [vmem:[#allocation5 + $0x740] sm:$0xff]  ;;  %v9843_v50 = vcombine.high %v304_v44, %v308_v45  ;;  %2665 = vmatprep.subr.bf16.mxu0 %v9963_v43  ;;  %v9842_v56 = vcombine.low %v304_v44, %v308_v45  ;;  %v9756_v43 = vcombine.low %v217_v30, %v221_v31  ;;  %v9765_v45 = vcombine.high %v225_v41, %v229_v42  ;;  %v277_v30 = vld [vmem:[#allocation5 + $0x268] sm:$0xff] }
  0xff   :  { %v436_v47 = vld [vmem:[#allocation5 + $0x760] sm:$0xff]  ;;  %2666 = vmatpush1.bf16.msra.mxu0 %v9962_v49  ;;  %v233_v49 = vld [vmem:[#allocation5 + $0x108] sm:$0xff]  ;;  %v9805_v24 = vcombine.high %v265_v19, %v269_v20  ;;  %v9804_v31 = vcombine.low %v265_v19, %v269_v20 }
 0x100   :  { %v9971_v51 = vcombine.high %v432_v46, %v436_v47  ;;  %v312_v52 = vld [vmem:[#allocation5 + $0x380] sm:$0xff]  ;;  %2624 = vmatprep.subr.bf16.mxu1 %v9843_v50  ;;  %v9970_v57 = vcombine.low %v432_v46, %v436_v47  ;;  %v237_v50 = vld [vmem:[#allocation5 + $0x128] sm:$0xff] }
 0x101   :  { %v316_v53 = vld [vmem:[#allocation5 + $0x3a0] sm:$0xff]  ;;  %2625 = vmatpush1.bf16.msra.mxu1 %v9842_v56 }
 0x102   :  { %v440_v54 = vld [vmem:[#allocation5 + $0x780] sm:$0xff]  ;;  %v9851_v59 = vcombine.high %v312_v52, %v316_v53  ;;  %2667 = vmatprep.subr.bf16.mxu0 %v9971_v51  ;;  %v9850_v2 = vcombine.low %v312_v52, %v316_v53  ;;  %v9764_v51 = vcombine.low %v225_v41, %v229_v42  ;;  %v9773_v53 = vcombine.high %v233_v49, %v237_v50 }
 0x103   :  { %v444_v55 = vld [vmem:[#allocation5 + $0x7a0] sm:$0xff]  ;;  %2668 = vmatpush1.bf16.msra.mxu0 %v9970_v57  ;;  %v241_v57 = vld [vmem:[#allocation5 + $0x148] sm:$0xff] }
 0x104   :  { %v9979_v60 = vcombine.high %v440_v54, %v444_v55  ;;  %v320_v61 = vld [vmem:[#allocation5 + $0x3c0] sm:$0xff]  ;;  %2626 = vmatprep.subr.bf16.mxu1 %v9851_v59  ;;  %v9978_v3 = vcombine.low %v440_v54, %v444_v55  ;;  %v245_v59 = vld [vmem:[#allocation5 + $0x168] sm:$0xff] }
 0x105   :  { %v324_v62 = vld [vmem:[#allocation5 + $0x3e0] sm:$0xff]  ;;  %2627 = vmatpush1.bf16.msra.mxu1 %v9850_v2 }
 0x106   :  { %v448_v63 = vld [vmem:[#allocation5 + $0x7c0] sm:$0xff]  ;;  %v9859_v4 = vcombine.high %v320_v61, %v324_v62  ;;  %2669 = vmatprep.subr.bf16.mxu0 %v9979_v60  ;;  %v9858_v10 = vcombine.low %v320_v61, %v324_v62  ;;  %v9772_v60 = vcombine.low %v233_v49, %v237_v50  ;;  %v9781_v62 = vcombine.high %v241_v57, %v245_v59 }
 0x107   :  { %v452_v1 = vld [vmem:[#allocation5 + $0x7e0] sm:$0xff]  ;;  %2670 = vmatpush1.bf16.msra.mxu0 %v9978_v3  ;;  %v249_v3 = vld [vmem:[#allocation5 + $0x188] sm:$0xff] }
 0x108   :  { %v9987_v5 = vcombine.high %v448_v63, %v452_v1  ;;  %v456_v8 = vld [vmem:[#allocation5 + $0x800] sm:$0xff]  ;;  %2628 = vmatprep.subr.bf16.mxu1 %v9859_v4  ;;  %v9986_v13 = vcombine.low %v448_v63, %v452_v1  ;;  %v253_v4 = vld [vmem:[#allocation5 + $0x1a8] sm:$0xff] }
 0x109   :  { %v460_v9 = vld [vmem:[#allocation5 + $0x820] sm:$0xff]  ;;  %2629 = vmatpush1.bf16.msra.mxu1 %v9858_v10  ;;  %v9789_v7 = vcombine.high %v249_v3, %v253_v4 }
 0x10a   :  { %v181_v15 = vld [vmem:[#allocation2 + $0x10] sm:$0xff]  ;;  %2671 = vmatprep.subr.bf16.mxu0 %v9987_v5  ;;  %v9995_v17 = vcombine.high %v456_v8, %v460_v9  ;;  %v9994_v27 = vcombine.low %v456_v8, %v460_v9  ;;  %2770 = vmatprep.subr.bf16.mxu1 %v9741_v14  ;;  %v9780_v5 = vcombine.low %v241_v57, %v245_v59 }
 0x10b   :  { %v464_v18 = vld [vmem:[#allocation5 + $0x840] sm:$0xff]  ;;  %v12198_v26 = vpack.c.bf16 %v188_v16, %v181_v15  ;;  %2672 = vmatpush1.bf16.msra.mxu0 %v9986_v13  ;;  %v9788_v13 = vcombine.low %v249_v3, %v253_v4  ;;  %v9797_v15 = vcombine.high %v257_v11, %v261_v12 }
 0x10c   :  { %v468_v22 = vld [vmem:[#allocation5 + $0x860] sm:$0xff]  ;;  %2684 = vmatprep.subr.bf16.mxu0 %v9995_v17  ;;  %2631 = vmatmul.mubr.bf16.vlgmr.msra.gmra.mrb[0].mxu1 %v12196_v21 }
 0x10d   :  { %v10003_v29 = vcombine.high %v464_v18, %v468_v22  ;;  %v472_v33 = vld [vmem:[#allocation5 + $0x880] sm:$0xff]  ;;  %2771 = vmatpush1.bf16.msra.mxu1 %v9740_v25  ;;  %v10002_v36 = vcombine.low %v464_v18, %v468_v22  ;;  %2802 = vmatprep.mubr.bf16.mxu1 %v12190_v58  ;;  %v9796_v22 = vcombine.low %v257_v11, %v261_v12 }
 0x10e   :  { %v476_v34 = vld [vmem:[#allocation5 + $0x8a0] sm:$0xff]  ;;  %2674 = vmatmul.mubr.bf16.vlgmr.msra.gmra.mrb[0].mxu0 %v12198_v26  ;;  %2772 = vmatprep.subr.bf16.mxu1 %v9749_v28 }
 0x10f   :  { %2685 = vmatpush1.bf16.msra.mxu0 %v9994_v27  ;;  %v480_v38 = vld [vmem:[#allocation5 + $0x8c0] sm:$0xff]  ;;  %v10011_v40 = vcombine.high %v472_v33, %v476_v34  ;;  %2716 = vmatprep.mubr.bf16.mxu0 %v12200_v32  ;;  %v10010_v44 = vcombine.low %v472_v33, %v476_v34 }
 0x110   :  { %v484_v39 = vld [vmem:[#allocation5 + $0x8e0] sm:$0xff]  ;;  %2686 = vmatprep.subr.bf16.mxu0 %v10003_v29  ;;  %v273_v29 = vld [vmem:[#allocation5 + $0x248] sm:$0xff] }
 0x111   :  { %2773 = vmatpush1.bf16.msra.mxu1 %v9748_v35  ;;  %v488_v46 = vld [vmem:[#allocation5 + $0x900] sm:$0xff]  ;;  %v10019_v48 = vcombine.high %v480_v38, %v484_v39  ;;  %v10018_v52 = vcombine.low %v480_v38, %v484_v39  ;;  %v9813_v34 = vcombine.high %v273_v29, %v277_v30  ;;  %v281_v38 = vld [vmem:[#allocation5 + $0x288] sm:$0xff] }
 0x112   :  { %2774 = vmatprep.subr.bf16.mxu1 %v9757_v37  ;;  %v492_v47 = vld [vmem:[#allocation5 + $0x920] sm:$0xff]  ;;  %v285_v39 = vld [vmem:[#allocation5 + $0x2a8] sm:$0xff] }
 0x113   :  { %2687 = vmatpush1.bf16.msra.mxu0 %v10002_v36  ;;  %v496_v54 = vld [vmem:[#allocation5 + $0x940] sm:$0xff]  ;;  %v10027_v56 = vcombine.high %v488_v46, %v492_v47  ;;  %v10026_v61 = vcombine.low %v488_v46, %v492_v47  ;;  %v9821_v42 = vcombine.high %v281_v38, %v285_v39  ;;  %v289_v46 = vld [vmem:[#allocation5 + $0x2c8] sm:$0xff] }
 0x114   :  { %2688 = vmatprep.subr.bf16.mxu0 %v10011_v40  ;;  %v500_v55 = vld [vmem:[#allocation5 + $0x960] sm:$0xff]  ;;  %v9812_v40 = vcombine.low %v273_v29, %v277_v30  ;;  %v293_v47 = vld [vmem:[#allocation5 + $0x2e8] sm:$0xff] }
 0x115   :  { %2775 = vmatpush1.bf16.msra.mxu1 %v9756_v43  ;;  %v504_v63 = vld [vmem:[#allocation5 + $0x980] sm:$0xff]  ;;  %v10035_v2 = vcombine.high %v496_v54, %v500_v55  ;;  %v10034_v6 = vcombine.low %v496_v54, %v500_v55  ;;  %v9829_v50 = vcombine.high %v289_v46, %v293_v47  ;;  %v297_v54 = vld [vmem:[#allocation5 + $0x308] sm:$0xff] }
 0x116   :  { %2776 = vmatprep.subr.bf16.mxu1 %v9765_v45  ;;  %v508_v1 = vld [vmem:[#allocation5 + $0x9a0] sm:$0xff]  ;;  %v301_v55 = vld [vmem:[#allocation5 + $0x328] sm:$0xff] }
 0x117   :  { %2689 = vmatpush1.bf16.msra.mxu0 %v10010_v44  ;;  %v512_v8 = vld [vmem:[#allocation5 + $0x9c0] sm:$0xff]  ;;  %v10043_v10 = vcombine.high %v504_v63, %v508_v1  ;;  %v10042_v14 = vcombine.low %v504_v63, %v508_v1  ;;  %v9837_v59 = vcombine.high %v297_v54, %v301_v55  ;;  %v305_v63 = vld [vmem:[#allocation5 + $0x348] sm:$0xff] }
 0x118   :  { %2690 = vmatprep.subr.bf16.mxu0 %v10019_v48  ;;  %v516_v9 = vld [vmem:[#allocation5 + $0x9e0] sm:$0xff]  ;;  %v9820_v48 = vcombine.low %v281_v38, %v285_v39  ;;  %v309_v1 = vld [vmem:[#allocation5 + $0x368] sm:$0xff] }
 0x119   :  { %2777 = vmatpush1.bf16.msra.mxu1 %v9764_v51  ;;  %v520_v16 = vld [vmem:[#allocation5 + $0xa00] sm:$0xff]  ;;  %v10051_v18 = vcombine.high %v512_v8, %v516_v9  ;;  %v10050_v23 = vcombine.low %v512_v8, %v516_v9  ;;  %v9845_v4 = vcombine.high %v305_v63, %v309_v1  ;;  %v313_v8 = vld [vmem:[#allocation5 + $0x388] sm:$0xff] }
 0x11a   :  { %2778 = vmatprep.subr.bf16.mxu1 %v9773_v53  ;;  %v524_v17 = vld [vmem:[#allocation5 + $0xa20] sm:$0xff]  ;;  %v317_v9 = vld [vmem:[#allocation5 + $0x3a8] sm:$0xff] }
 0x11b   :  { %2691 = vmatpush1.bf16.msra.mxu0 %v10018_v52  ;;  %v528_v25 = vld [vmem:[#allocation5 + $0xa40] sm:$0xff]  ;;  %v10059_v28 = vcombine.high %v520_v16, %v524_v17  ;;  %v10058_v33 = vcombine.low %v520_v16, %v524_v17  ;;  %v9853_v12 = vcombine.high %v313_v8, %v317_v9  ;;  %v321_v16 = vld [vmem:[#allocation5 + $0x3c8] sm:$0xff] }
 0x11c   :  { %2692 = vmatprep.subr.bf16.mxu0 %v10027_v56  ;;  %v532_v27 = vld [vmem:[#allocation5 + $0xa60] sm:$0xff]  ;;  %v9828_v56 = vcombine.low %v289_v46, %v293_v47  ;;  %v325_v17 = vld [vmem:[#allocation5 + $0x3e8] sm:$0xff] }
 0x11d   :  { %2779 = vmatpush1.bf16.msra.mxu1 %v9772_v60  ;;  %v536_v35 = vld [vmem:[#allocation5 + $0xa80] sm:$0xff]  ;;  %v10067_v37 = vcombine.high %v528_v25, %v532_v27  ;;  %v10066_v41 = vcombine.low %v528_v25, %v532_v27  ;;  %v9861_v20 = vcombine.high %v321_v16, %v325_v17  ;;  %v190_v29 = vld [vmem:[#allocation2 + $0x58] sm:$0xff]  ;;  %v9860_v30 = vcombine.low %v321_v16, %v325_v17 }
 0x11e   :  { %2780 = vmatprep.subr.bf16.mxu1 %v9781_v62  ;;  %v540_v36 = vld [vmem:[#allocation5 + $0xaa0] sm:$0xff]  ;;  %v589_v38 = vld [vmem:[#allocation5 + $0xc28] sm:$0xff] }
 0x11f   :  { %2693 = vmatpush1.bf16.msra.mxu0 %v10026_v61  ;;  %v544_v43 = vld [vmem:[#allocation5 + $0xac0] sm:$0xff]  ;;  %v10075_v45 = vcombine.high %v536_v35, %v540_v36  ;;  %v10074_v49 = vcombine.low %v536_v35, %v540_v36  ;;  %v341_v35 = vld [vmem:[#allocation5 + $0x468] sm:$0xff] }
 0x120   :  { %2694 = vmatprep.subr.bf16.mxu0 %v10035_v2  ;;  %v548_v44 = vld [vmem:[#allocation5 + $0xae0] sm:$0xff]  ;;  %v9836_v2 = vcombine.low %v297_v54, %v301_v55  ;;  %v361_v55 = vld [vmem:[#allocation5 + $0x508] sm:$0xff] }
 0x121   :  { %2781 = vmatpush1.bf16.msra.mxu1 %v9780_v5  ;;  %v552_v51 = vld [vmem:[#allocation5 + $0xb00] sm:$0xff]  ;;  %v10083_v53 = vcombine.high %v544_v43, %v548_v44  ;;  %v10082_v57 = vcombine.low %v544_v43, %v548_v44  ;;  %v345_v43 = vld [vmem:[#allocation5 + $0x488] sm:$0xff] }
 0x122   :  { %2782 = vmatprep.subr.bf16.mxu1 %v9789_v7  ;;  %v556_v52 = vld [vmem:[#allocation5 + $0xb20] sm:$0xff]  ;;  %v349_v44 = vld [vmem:[#allocation5 + $0x4a8] sm:$0xff] }
 0x123   :  { %2695 = vmatpush1.bf16.msra.mxu0 %v10034_v6  ;;  %v560_v60 = vld [vmem:[#allocation5 + $0xb40] sm:$0xff]  ;;  %v10091_v62 = vcombine.high %v552_v51, %v556_v52  ;;  %v10090_v3 = vcombine.low %v552_v51, %v556_v52  ;;  %v9885_v47 = vcombine.high %v345_v43, %v349_v44  ;;  %v192_v52 = vld [vmem:[#allocation2 + $0x68] sm:$0xff]  ;;  %v385_v16 = vld [vmem:[#allocation5 + $0x5c8] sm:$0xff] }
 0x124   :  { %2696 = vmatprep.subr.bf16.mxu0 %v10043_v10  ;;  %v564_v61 = vld [vmem:[#allocation5 + $0xb60] sm:$0xff]  ;;  %v9844_v10 = vcombine.low %v305_v63, %v309_v1  ;;  %v389_v17 = vld [vmem:[#allocation5 + $0x5e8] sm:$0xff] }
 0x125   :  { %2783 = vmatpush1.bf16.msra.mxu1 %v9788_v13  ;;  %v568_v5 = vld [vmem:[#allocation5 + $0xb80] sm:$0xff]  ;;  %v10099_v7 = vcombine.high %v560_v60, %v564_v61  ;;  %v10098_v11 = vcombine.low %v560_v60, %v564_v61 }
 0x126   :  { %2784 = vmatprep.subr.bf16.mxu1 %v9797_v15  ;;  %v572_v6 = vld [vmem:[#allocation5 + $0xba0] sm:$0xff] }
 0x127   :  { %2697 = vmatpush1.bf16.msra.mxu0 %v10042_v14  ;;  %v576_v13 = vld [vmem:[#allocation5 + $0xbc0] sm:$0xff]  ;;  %v10107_v15 = vcombine.high %v568_v5, %v572_v6  ;;  %v10106_v19 = vcombine.low %v568_v5, %v572_v6  ;;  %v210_v6 = vld [vmem:[#allocation5 + $0x50] sm:$0xff] }
 0x128   :  { %2698 = vmatprep.subr.bf16.mxu0 %v10051_v18  ;;  %v580_v14 = vld [vmem:[#allocation5 + $0xbe0] sm:$0xff]  ;;  %v9852_v18 = vcombine.low %v313_v8, %v317_v9  ;;  %v377_v8 = vld [vmem:[#allocation5 + $0x588] sm:$0xff] }
 0x129   :  { %2785 = vmatpush1.bf16.msra.mxu1 %v9796_v22  ;;  %v329_v22 = vld [vmem:[#allocation5 + $0x408] sm:$0xff]  ;;  %v584_v25 = vld [vmem:[#allocation5 + $0xc00] sm:$0xff] }
 0x12a   :  { %2786 = vmatprep.subr.bf16.mxu1 %v9805_v24  ;;  %v10115_v24 = vcombine.high %v576_v13, %v580_v14  ;;  %v588_v27 = vld [vmem:[#allocation5 + $0xc20] sm:$0xff]  ;;  %v381_v9 = vld [vmem:[#allocation5 + $0x5a8] sm:$0xff] }
 0x12b   :  { %2699 = vmatpush1.bf16.msra.mxu0 %v10050_v23  ;;  %v333_v23 = vld [vmem:[#allocation5 + $0x428] sm:$0xff]  ;;  %v10123_v36 = vcombine.high %v584_v25, %v588_v27  ;;  %v185_v51 = vld [vmem:[#allocation2 + $0x30] sm:$0xff] }
 0x12c   :  { %2700 = vmatprep.subr.bf16.mxu0 %v10059_v28  ;;  %v183_v28 = vld [vmem:[#allocation2 + $0x20] sm:$0xff]  ;;  %v12212_v60 = vpack.c.bf16 %v192_v52, %v185_v51 }
 0x12d   :  { %2787 = vmatpush1.bf16.msra.mxu1 %v9804_v31  ;;  %v10114_v31 = vcombine.low %v576_v13, %v580_v14  ;;  %v12206_v39 = vpack.c.bf16 %v190_v29, %v183_v28  ;;  %v218_v13 = vld [vmem:[#allocation5 + $0x90] sm:$0xff]  ;;  %v9924_v28 = vcombine.low %v385_v16, %v389_v17 }
 0x12e   :  { %2788 = vmatprep.subr.bf16.mxu1 %v9813_v34  ;;  %v337_v34 = vld [vmem:[#allocation5 + $0x448] sm:$0xff]  ;;  %v222_v14 = vld [vmem:[#allocation5 + $0xb0] sm:$0xff] }
 0x12f   :  { %2701 = vmatpush1.bf16.msra.mxu0 %v10058_v33  ;;  %v9869_v33 = vcombine.high %v329_v22, %v333_v23  ;;  %v9876_v46 = vcombine.low %v337_v34, %v341_v35  ;;  %v9758_v29 = vcombine.low %v218_v13, %v222_v14  ;;  %v254_v51 = vld [vmem:[#allocation5 + $0x1b0] sm:$0xff] }
 0x130   :  { %2702 = vmatprep.subr.bf16.mxu0 %v10067_v37  ;;  %v585_v37 = vld [vmem:[#allocation5 + $0xc08] sm:$0xff] }
 0x131   :  { %2789 = vmatpush1.bf16.msra.mxu1 %v9812_v40  ;;  %v9868_v40 = vcombine.low %v329_v22, %v333_v23  ;;  %v226_v22 = vld [vmem:[#allocation5 + $0xd0] sm:$0xff] }
 0x132   :  { %2790 = vmatprep.subr.bf16.mxu1 %v9821_v42  ;;  %v10122_v42 = vcombine.low %v584_v25, %v588_v27  ;;  %v230_v23 = vld [vmem:[#allocation5 + $0xf0] sm:$0xff]  ;;  %v393_v25 = vld [vmem:[#allocation5 + $0x608] sm:$0xff] }
 0x133   :  { %2703 = vmatpush1.bf16.msra.mxu0 %v10066_v41  ;;  %v9877_v41 = vcombine.high %v337_v34, %v341_v35  ;;  %v397_v27 = vld [vmem:[#allocation5 + $0x628] sm:$0xff]  ;;  %v9767_v34 = vcombine.high %v226_v22, %v230_v23 }
 0x134   :  { %2704 = vmatprep.subr.bf16.mxu0 %v10075_v45  ;;  %v10125_v45 = vcombine.high %v585_v37, %v589_v38  ;;  %v401_v35 = vld [vmem:[#allocation5 + $0x648] sm:$0xff] }
 0x135   :  { %2791 = vmatpush1.bf16.msra.mxu1 %v9820_v48  ;;  %v11993_v48 = vmov 0  }
 0x136   :  { %2792 = vmatprep.subr.bf16.mxu1 %v9829_v50  ;;  %v357_v50 = vld [vmem:[#allocation5 + $0x4e8] sm:$0xff] }
 0x137   :  { %2705 = vmatpush1.bf16.msra.mxu0 %v10074_v49  ;;  %v353_v49 = vld [vmem:[#allocation5 + $0x4c8] sm:$0xff] }
 0x138   :  { %2706 = vmatprep.subr.bf16.mxu0 %v10083_v53  ;;  %v9884_v53 = vcombine.low %v345_v43, %v349_v44  ;;  %v9893_v54 = vcombine.high %v353_v49, %v357_v50  ;;  %v9892_v61 = vcombine.low %v353_v49, %v357_v50  ;;  %v409_v44 = vld [vmem:[#allocation5 + $0x688] sm:$0xff]  ;;  %v250_v50 = vld [vmem:[#allocation5 + $0x190] sm:$0xff] }
 0x139   :  { %2793 = vmatpush1.bf16.msra.mxu1 %v9828_v56  ;;  %v365_v56 = vld [vmem:[#allocation5 + $0x528] sm:$0xff] }
 0x13a   :  { %2794 = vmatprep.subr.bf16.mxu1 %v9837_v59  ;;  %v206_v59 = vld [vmem:[#allocation5 + $0x30] sm:$0xff]  ;;  %v9901_v63 = vcombine.high %v361_v55, %v365_v56 }
 0x13b   :  { %2707 = vmatpush1.bf16.msra.mxu0 %v10082_v57  ;;  %v202_v57 = vld [vmem:[#allocation5 + $0x10] sm:$0xff] }
 0x13c   :  { %2708 = vmatprep.subr.bf16.mxu0 %v10091_v62  ;;  %v10124_v62 = vcombine.low %v585_v37, %v589_v38  ;;  %v9743_v1 = vcombine.high %v202_v57, %v206_v59  ;;  %v9932_v37 = vcombine.low %v393_v25, %v397_v27  ;;  %v9766_v38 = vcombine.low %v226_v22, %v230_v23  ;;  %v282_v22 = vld [vmem:[#allocation5 + $0x290] sm:$0xff] }
 0x13d   :  { %2795 = vmatpush1.bf16.msra.mxu1 %v9836_v2  ;;  %v369_v2 = vld [vmem:[#allocation5 + $0x548] sm:$0xff]  ;;  %v286_v23 = vld [vmem:[#allocation5 + $0x2b0] sm:$0xff] }
 0x13e   :  { %2796 = vmatprep.subr.bf16.mxu1 %v9845_v4  ;;  %v9900_v4 = vcombine.low %v361_v55, %v365_v56 }
 0x13f   :  { %2709 = vmatpush1.bf16.msra.mxu0 %v10090_v3  ;;  %v373_v3 = vld [vmem:[#allocation5 + $0x568] sm:$0xff] }
 0x140   :  { %2710 = vmatprep.subr.bf16.mxu0 %v10099_v7  ;;  %v9909_v5 = vcombine.high %v369_v2, %v373_v3  ;;  %v214_v7 = vld [vmem:[#allocation5 + $0x70] sm:$0xff] }
 0x141   :  { %2797 = vmatpush1.bf16.msra.mxu1 %v9844_v10  ;;  %v9908_v10 = vcombine.low %v369_v2, %v373_v3  ;;  %v9790_v3 = vcombine.low %v250_v50, %v254_v51 }
 0x142   :  { %2798 = vmatprep.subr.bf16.mxu1 %v9853_v12  ;;  %v9917_v12 = vcombine.high %v377_v8, %v381_v9 }
 0x143   :  { %2711 = vmatpush1.bf16.msra.mxu0 %v10098_v11  ;;  %v9742_v11 = vcombine.low %v202_v57, %v206_v59  ;;  %v258_v59 = vld [vmem:[#allocation5 + $0x1d0] sm:$0xff] }
 0x144   :  { %2712 = vmatprep.subr.bf16.mxu0 %v10107_v15  ;;  %v9751_v15 = vcombine.high %v210_v6, %v214_v7 }
 0x145   :  { %2799 = vmatpush1.bf16.msra.mxu1 %v9852_v18  ;;  %v9916_v18 = vcombine.low %v377_v8, %v381_v9  ;;  %v433_v8 = vld [vmem:[#allocation5 + $0x748] sm:$0xff] }
 0x146   :  { %2800 = vmatprep.subr.bf16.mxu1 %v9861_v20  ;;  %v9925_v20 = vcombine.high %v385_v16, %v389_v17  ;;  %v437_v9 = vld [vmem:[#allocation5 + $0x768] sm:$0xff] }
 0x147   :  { %2713 = vmatpush1.bf16.msra.mxu0 %v10106_v19  ;;  %v9750_v19 = vcombine.low %v210_v6, %v214_v7  ;;  %v270_v6 = vld [vmem:[#allocation5 + $0x230] sm:$0xff]  ;;  %v441_v16 = vld [vmem:[#allocation5 + $0x788] sm:$0xff] }
 0x148   :  { %2714 = vmatprep.subr.bf16.mxu0 %v10115_v24  ;;  %v9759_v24 = vcombine.high %v218_v13, %v222_v14  ;;  %v274_v13 = vld [vmem:[#allocation5 + $0x250] sm:$0xff]  ;;  %v445_v17 = vld [vmem:[#allocation5 + $0x7a8] sm:$0xff] }
 0x149   :  { %2801 = vmatpush1.bf16.msra.mxu1 %v9860_v30  ;;  %v9933_v30 = vcombine.high %v393_v25, %v397_v27  ;;  %v278_v14 = vld [vmem:[#allocation5 + $0x270] sm:$0xff]  ;;  %v449_v25 = vld [vmem:[#allocation5 + $0x7c8] sm:$0xff] }
 0x14a   :  { %2813 = vmatprep.subr.bf16.mxu1 %v9869_v33  ;;  %v238_v33 = vld [vmem:[#allocation5 + $0x130] sm:$0xff]  ;;  %v453_v27 = vld [vmem:[#allocation5 + $0x7e8] sm:$0xff] }
 0x14b   :  { %2715 = vmatpush1.bf16.msra.mxu0 %v10114_v31  ;;  %v234_v31 = vld [vmem:[#allocation5 + $0x110] sm:$0xff] }
 0x14c   :  { %2727 = vmatprep.subr.bf16.mxu0 %v10123_v36  ;;  %2803 = vmatmul.mubr.bf16.vlgmr.msra.gmra.mrb[4].mxu1 %v12196_v21  ;;  %v405_v36 = vld [vmem:[#allocation5 + $0x668] sm:$0xff]  ;;  %v9775_v43 = vcombine.high %v234_v31, %v238_v33 }
 0x14d   :  { %2814 = vmatpush1.bf16.msra.mxu1 %v9868_v40  ;;  %2845 = vmatprep.mubr.bf16.mxu1 %v12193_v0  ;;  %v9941_v40 = vcombine.high %v401_v35, %v405_v36 }
 0x14e   :  { %2717 = vmatmul.mubr.bf16.vlgmr.msra.gmra.mrb[0].mxu0 %v12206_v39  ;;  %2815 = vmatprep.subr.bf16.mxu1 %v9877_v41  ;;  %v242_v41 = vld [vmem:[#allocation5 + $0x150] sm:$0xff] }
 0x14f   :  { %2728 = vmatpush1.bf16.msra.mxu0 %v10122_v42  ;;  %2759 = vmatprep.mubr.bf16.mxu0 %v11993_v48  ;;  %v246_v42 = vld [vmem:[#allocation5 + $0x170] sm:$0xff] }
 0x150   :  { %2899 = vmatprep.subr.bf16.mxu0 %v10125_v45  ;;  %v413_v45 = vld [vmem:[#allocation5 + $0x6a8] sm:$0xff]  ;;  %v9783_v52 = vcombine.high %v242_v41, %v246_v42  ;;  %v9782_v56 = vcombine.low %v242_v41, %v246_v42  ;;  %v298_v41 = vld [vmem:[#allocation5 + $0x310] sm:$0xff] }
 0x151   :  { %2816 = vmatpush1.bf16.msra.mxu1 %v9876_v46  ;;  %v9940_v46 = vcombine.low %v401_v35, %v405_v36  ;;  %v9949_v49 = vcombine.high %v409_v44, %v413_v45  ;;  %v9948_v55 = vcombine.low %v409_v44, %v413_v45  ;;  %v457_v35 = vld [vmem:[#allocation5 + $0x808] sm:$0xff]  ;;  %v302_v42 = vld [vmem:[#allocation5 + $0x330] sm:$0xff] }
 0x152   :  { %2817 = vmatprep.subr.bf16.mxu1 %v9885_v47  ;;  %v9774_v47 = vcombine.low %v234_v31, %v238_v33  ;;  %v290_v31 = vld [vmem:[#allocation5 + $0x2d0] sm:$0xff]  ;;  %v461_v36 = vld [vmem:[#allocation5 + $0x828] sm:$0xff] }
 0x153   :  { %v294_v33 = vld [vmem:[#allocation5 + $0x2f0] sm:$0xff]  ;;  %v465_v44 = vld [vmem:[#allocation5 + $0x848] sm:$0xff] }
 0x154   :  { %v469_v45 = vld [vmem:[#allocation5 + $0x868] sm:$0xff] }
 0x155   :  { %2818 = vmatpush1.bf16.msra.mxu1 %v9884_v53  ;;  %v417_v53 = vld [vmem:[#allocation5 + $0x6c8] sm:$0xff] }
 0x156   :  { %2819 = vmatprep.subr.bf16.mxu1 %v9893_v54  ;;  %v421_v54 = vld [vmem:[#allocation5 + $0x6e8] sm:$0xff] }
 0x157   :  { %v9957_v57 = vcombine.high %v417_v53, %v421_v54  ;;  %v9956_v2 = vcombine.low %v417_v53, %v421_v54  ;;  %v473_v53 = vld [vmem:[#allocation5 + $0x888] sm:$0xff] }
 0x158   :  { %v477_v54 = vld [vmem:[#allocation5 + $0x8a8] sm:$0xff] }
 0x159   :  { %2820 = vmatpush1.bf16.msra.mxu1 %v9892_v61  ;;  %v262_v61 = vld [vmem:[#allocation5 + $0x1f0] sm:$0xff] }
 0x15a   :  { %10130 = vmatmul.mubr.msk.bf16.vlgmr.msra.gmra.mrb[0].mxu0 %vm2594_vm0, %v12212_v60  ;;  %2821 = vmatprep.subr.bf16.mxu1 %v9901_v63  ;;  %v425_v63 = vld [vmem:[#allocation5 + $0x708] sm:$0xff]  ;;  %v9799_v7 = vcombine.high %v258_v59, %v262_v61 }
 0x15b   :  { %2900 = vmatpush1.bf16.msra.mxu0 %v10124_v62  ;;  %2931 = vmatprep.mubr.bf16.mxu0 %v11993_v48  ;;  %v9791_v62 = vcombine.high %v250_v50, %v254_v51  ;;  %v306_v50 = vld [vmem:[#allocation5 + $0x350] sm:$0xff] }
 0x15c   :  { %2942 = vmatprep.subr.bf16.mxu0 %v9743_v1  ;;  %v429_v1 = vld [vmem:[#allocation5 + $0x728] sm:$0xff]  ;;  %v310_v51 = vld [vmem:[#allocation5 + $0x370] sm:$0xff] }
 0x15d   :  { %2822 = vmatpush1.bf16.msra.mxu1 %v9900_v4  ;;  %v9965_v4 = vcombine.high %v425_v63, %v429_v1 }
 0x15e   :  { %2823 = vmatprep.subr.bf16.mxu1 %v9909_v5  ;;  %v266_v5 = vld [vmem:[#allocation5 + $0x210] sm:$0xff] }
 0x161   :  { %2824 = vmatpush1.bf16.msra.mxu1 %v9908_v10  ;;  %v9964_v10 = vcombine.low %v425_v63, %v429_v1  ;;  %v481_v63 = vld [vmem:[#allocation5 + $0x8c8] sm:$0xff] }
 0x162   :  { %10131 = vmatmul.mubr.msk.bf16.vlgmr.msra.gmra.mrb[4].mxu0 %vm2594_vm0, %v12212_v60  ;;  %2825 = vmatprep.subr.bf16.mxu1 %v9917_v12  ;;  %v9973_v12 = vcombine.high %v433_v8, %v437_v9  ;;  %v485_v1 = vld [vmem:[#allocation5 + $0x8e8] sm:$0xff] }
 0x163   :  { %2943 = vmatpush1.bf16.msra.mxu0 %v9742_v11  ;;  %2974 = vmatprep.mubr.bf16.mxu0 %v12190_v58  ;;  %v9798_v11 = vcombine.low %v258_v59, %v262_v61  ;;  %v314_v59 = vld [vmem:[#allocation5 + $0x390] sm:$0xff] }
 0x164   :  { %2944 = vmatprep.subr.bf16.mxu0 %v9751_v15  ;;  %v9807_v15 = vcombine.high %v266_v5, %v270_v6  ;;  %v318_v61 = vld [vmem:[#allocation5 + $0x3b0] sm:$0xff] }
 0x165   :  { %2826 = vmatpush1.bf16.msra.mxu1 %v9916_v18  ;;  %v9972_v18 = vcombine.low %v433_v8, %v437_v9  ;;  %v489_v8 = vld [vmem:[#allocation5 + $0x908] sm:$0xff] }
 0x166   :  { %2827 = vmatprep.subr.bf16.mxu1 %v9925_v20  ;;  %v9981_v20 = vcombine.high %v441_v16, %v445_v17  ;;  %v493_v9 = vld [vmem:[#allocation5 + $0x928] sm:$0xff] }
 0x167   :  { %2945 = vmatpush1.bf16.msra.mxu0 %v9750_v19  ;;  %v9806_v19 = vcombine.low %v266_v5, %v270_v6  ;;  %v322_v5 = vld [vmem:[#allocation5 + $0x3d0] sm:$0xff] }
 0x168   :  { %2946 = vmatprep.subr.bf16.mxu0 %v9759_v24  ;;  %v9815_v24 = vcombine.high %v274_v13, %v278_v14  ;;  %v326_v6 = vld [vmem:[#allocation5 + $0x3f0] sm:$0xff] }
 0x169   :  { %2828 = vmatpush1.bf16.msra.mxu1 %v9924_v28  ;;  %v9980_v28 = vcombine.low %v441_v16, %v445_v17  ;;  %v497_v16 = vld [vmem:[#allocation5 + $0x948] sm:$0xff] }
 0x16a   :  { %2829 = vmatprep.subr.bf16.mxu1 %v9933_v30  ;;  %v9989_v30 = vcombine.high %v449_v25, %v453_v27  ;;  %v501_v17 = vld [vmem:[#allocation5 + $0x968] sm:$0xff] }
 0x16b   :  { %2947 = vmatpush1.bf16.msra.mxu0 %v9758_v29  ;;  %v9814_v29 = vcombine.low %v274_v13, %v278_v14  ;;  %v330_v13 = vld [vmem:[#allocation5 + $0x410] sm:$0xff] }
 0x16c   :  { %2948 = vmatprep.subr.bf16.mxu0 %v9767_v34  ;;  %v9823_v34 = vcombine.high %v282_v22, %v286_v23  ;;  %v334_v14 = vld [vmem:[#allocation5 + $0x430] sm:$0xff] }
 0x16d   :  { %2830 = vmatpush1.bf16.msra.mxu1 %v9932_v37  ;;  %v9988_v37 = vcombine.low %v449_v25, %v453_v27  ;;  %v505_v25 = vld [vmem:[#allocation5 + $0x988] sm:$0xff] }
 0x16e   :  { %2831 = vmatprep.subr.bf16.mxu1 %v9941_v40  ;;  %v9997_v40 = vcombine.high %v457_v35, %v461_v36  ;;  %v509_v27 = vld [vmem:[#allocation5 + $0x9a8] sm:$0xff] }
 0x16f   :  { %2949 = vmatpush1.bf16.msra.mxu0 %v9766_v38  ;;  %v9822_v38 = vcombine.low %v282_v22, %v286_v23  ;;  %v338_v22 = vld [vmem:[#allocation5 + $0x450] sm:$0xff] }
 0x170   :  { %2950 = vmatprep.subr.bf16.mxu0 %v9775_v43  ;;  %v9831_v43 = vcombine.high %v290_v31, %v294_v33  ;;  %v342_v23 = vld [vmem:[#allocation5 + $0x470] sm:$0xff] }
 0x171   :  { %2832 = vmatpush1.bf16.msra.mxu1 %v9940_v46  ;;  %v9996_v46 = vcombine.low %v457_v35, %v461_v36  ;;  %v513_v35 = vld [vmem:[#allocation5 + $0x9c8] sm:$0xff] }
 0x172   :  { %2833 = vmatprep.subr.bf16.mxu1 %v9949_v49  ;;  %v10005_v49 = vcombine.high %v465_v44, %v469_v45  ;;  %v517_v36 = vld [vmem:[#allocation5 + $0x9e8] sm:$0xff] }
 0x173   :  { %2951 = vmatpush1.bf16.msra.mxu0 %v9774_v47  ;;  %v9830_v47 = vcombine.low %v290_v31, %v294_v33  ;;  %v346_v31 = vld [vmem:[#allocation5 + $0x490] sm:$0xff] }
 0x174   :  { %2952 = vmatprep.subr.bf16.mxu0 %v9783_v52  ;;  %v9839_v52 = vcombine.high %v298_v41, %v302_v42  ;;  %v350_v33 = vld [vmem:[#allocation5 + $0x4b0] sm:$0xff] }
 0x175   :  { %2834 = vmatpush1.bf16.msra.mxu1 %v9948_v55  ;;  %v10004_v55 = vcombine.low %v465_v44, %v469_v45  ;;  %v358_v44 = vld [vmem:[#allocation5 + $0x4f0] sm:$0xff]  ;;  %v9887_v45 = vcombine.high %v346_v31, %v350_v33 }
 0x176   :  { %2835 = vmatprep.subr.bf16.mxu1 %v9957_v57  ;;  %v10013_v57 = vcombine.high %v473_v53, %v477_v54 }
 0x177   :  { %2953 = vmatpush1.bf16.msra.mxu0 %v9782_v56  ;;  %v9838_v56 = vcombine.low %v298_v41, %v302_v42  ;;  %v9878_v41 = vcombine.low %v338_v22, %v342_v23  ;;  %v10053_v42 = vcombine.high %v513_v35, %v517_v36 }
 0x178   :  { %2954 = vmatprep.subr.bf16.mxu0 %v9791_v62  ;;  %v9847_v62 = vcombine.high %v306_v50, %v310_v51 }
 0x179   :  { %2836 = vmatpush1.bf16.msra.mxu1 %v9956_v2  ;;  %v10012_v2 = vcombine.low %v473_v53, %v477_v54  ;;  %v533_v53 = vld [vmem:[#allocation5 + $0xa68] sm:$0xff] }
 0x17a   :  { %2837 = vmatprep.subr.bf16.mxu1 %v9965_v4  ;;  %v10021_v4 = vcombine.high %v481_v63, %v485_v1 }
 0x17b   :  { %2955 = vmatpush1.bf16.msra.mxu0 %v9790_v3  ;;  %v9846_v3 = vcombine.low %v306_v50, %v310_v51  ;;  %v362_v51 = vld [vmem:[#allocation5 + $0x510] sm:$0xff] }
 0x17c   :  { %2956 = vmatprep.subr.bf16.mxu0 %v9799_v7  ;;  %v9855_v7 = vcombine.high %v314_v59, %v318_v61 }
 0x17d   :  { %2838 = vmatpush1.bf16.msra.mxu1 %v9964_v10  ;;  %v10020_v10 = vcombine.low %v481_v63, %v485_v1  ;;  %v537_v63 = vld [vmem:[#allocation5 + $0xa88] sm:$0xff] }
 0x17e   :  { %2839 = vmatprep.subr.bf16.mxu1 %v9973_v12  ;;  %v10029_v12 = vcombine.high %v489_v8, %v493_v9  ;;  %v541_v1 = vld [vmem:[#allocation5 + $0xaa8] sm:$0xff] }
 0x17f   :  { %2957 = vmatpush1.bf16.msra.mxu0 %v9798_v11  ;;  %v9854_v11 = vcombine.low %v314_v59, %v318_v61  ;;  %v370_v59 = vld [vmem:[#allocation5 + $0x550] sm:$0xff] }
 0x180   :  { %2958 = vmatprep.subr.bf16.mxu0 %v9807_v15  ;;  %v9863_v15 = vcombine.high %v322_v5, %v326_v6  ;;  %v374_v61 = vld [vmem:[#allocation5 + $0x570] sm:$0xff] }
 0x181   :  { %2840 = vmatpush1.bf16.msra.mxu1 %v9972_v18  ;;  %v10028_v18 = vcombine.low %v489_v8, %v493_v9  ;;  %v545_v8 = vld [vmem:[#allocation5 + $0xac8] sm:$0xff] }
 0x182   :  { %2841 = vmatprep.subr.bf16.mxu1 %v9981_v20  ;;  %v10037_v20 = vcombine.high %v497_v16, %v501_v17  ;;  %v549_v9 = vld [vmem:[#allocation5 + $0xae8] sm:$0xff] }
 0x183   :  { %2959 = vmatpush1.bf16.msra.mxu0 %v9806_v19  ;;  %v9862_v19 = vcombine.low %v322_v5, %v326_v6  ;;  %v378_v5 = vld [vmem:[#allocation5 + $0x590] sm:$0xff] }
 0x184   :  { %2960 = vmatprep.subr.bf16.mxu0 %v9815_v24  ;;  %v9871_v24 = vcombine.high %v330_v13, %v334_v14  ;;  %v382_v6 = vld [vmem:[#allocation5 + $0x5b0] sm:$0xff] }
 0x185   :  { %2842 = vmatpush1.bf16.msra.mxu1 %v9980_v28  ;;  %v10036_v28 = vcombine.low %v497_v16, %v501_v17  ;;  %v386_v16 = vld [vmem:[#allocation5 + $0x5d0] sm:$0xff] }
 0x186   :  { %2843 = vmatprep.subr.bf16.mxu1 %v9989_v30  ;;  %v10045_v30 = vcombine.high %v505_v25, %v509_v27  ;;  %v390_v17 = vld [vmem:[#allocation5 + $0x5f0] sm:$0xff] }
 0x187   :  { %2961 = vmatpush1.bf16.msra.mxu0 %v9814_v29  ;;  %v9870_v29 = vcombine.low %v330_v13, %v334_v14  ;;  %v9910_v13 = vcombine.low %v370_v59, %v374_v61  ;;  %v10085_v14 = vcombine.high %v545_v8, %v549_v9 }
 0x188   :  { %2962 = vmatprep.subr.bf16.mxu0 %v9823_v34  ;;  %v9879_v34 = vcombine.high %v338_v22, %v342_v23  ;;  %v561_v22 = vld [vmem:[#allocation5 + $0xb48] sm:$0xff] }
 0x189   :  { %2844 = vmatpush1.bf16.msra.mxu1 %v9988_v37  ;;  %v10044_v37 = vcombine.low %v505_v25, %v509_v27  ;;  %v565_v23 = vld [vmem:[#allocation5 + $0xb68] sm:$0xff]  ;;  %v394_v25 = vld [vmem:[#allocation5 + $0x610] sm:$0xff] }
 0x18a   :  { %2856 = vmatprep.subr.bf16.mxu1 %v9997_v40  ;;  %v525_v40 = vld [vmem:[#allocation5 + $0xa28] sm:$0xff]  ;;  %v398_v27 = vld [vmem:[#allocation5 + $0x630] sm:$0xff] }
 0x18b   :  { %2963 = vmatpush1.bf16.msra.mxu0 %v9822_v38  ;;  %v521_v38 = vld [vmem:[#allocation5 + $0xa08] sm:$0xff] }
 0x18c   :  { %2964 = vmatprep.subr.bf16.mxu0 %v9831_v43  ;;  %2846 = vmatmul.mubr.bf16.vlgmr.msra.gmra.mrb[4].mxu1 %v12198_v26  ;;  %v354_v43 = vld [vmem:[#allocation5 + $0x4d0] sm:$0xff]  ;;  %v10061_v50 = vcombine.high %v521_v38, %v525_v40 }
 0x18d   :  { %2857 = vmatpush1.bf16.msra.mxu1 %v9996_v46  ;;  %2888 = vmatprep.mubr.bf16.mxu1 %v12200_v32  ;;  %v10052_v46 = vcombine.low %v513_v35, %v517_v36  ;;  %v9895_v54 = vcombine.high %v354_v43, %v358_v44  ;;  %v402_v35 = vld [vmem:[#allocation5 + $0x650] sm:$0xff] }
 0x18e   :  { %2858 = vmatprep.subr.bf16.mxu1 %v10005_v49  ;;  %v9886_v49 = vcombine.low %v346_v31, %v350_v33  ;;  %v9935_v31 = vcombine.high %v394_v25, %v398_v27  ;;  %v569_v33 = vld [vmem:[#allocation5 + $0xb88] sm:$0xff]  ;;  %v406_v36 = vld [vmem:[#allocation5 + $0x670] sm:$0xff] }
 0x18f   :  { %2965 = vmatpush1.bf16.msra.mxu0 %v9830_v47  ;;  %v529_v47 = vld [vmem:[#allocation5 + $0xa48] sm:$0xff] }
 0x190   :  { %2966 = vmatprep.subr.bf16.mxu0 %v9839_v52  ;;  %v366_v52 = vld [vmem:[#allocation5 + $0x530] sm:$0xff] }
 0x191   :  { %2859 = vmatpush1.bf16.msra.mxu1 %v10004_v55  ;;  %v10060_v55 = vcombine.low %v521_v38, %v525_v40  ;;  %v9934_v38 = vcombine.low %v394_v25, %v398_v27  ;;  %v454_v25 = vld [vmem:[#allocation5 + $0x7f0] sm:$0xff] }
 0x192   :  { %2860 = vmatprep.subr.bf16.mxu1 %v10013_v57  ;;  %v10069_v57 = vcombine.high %v529_v47, %v533_v53 }
 0x193   :  { %2967 = vmatpush1.bf16.msra.mxu0 %v9838_v56  ;;  %v9894_v56 = vcombine.low %v354_v43, %v358_v44  ;;  %v581_v43 = vld [vmem:[#allocation5 + $0xbe8] sm:$0xff]  ;;  %v410_v44 = vld [vmem:[#allocation5 + $0x690] sm:$0xff] }
 0x194   :  { %2968 = vmatprep.subr.bf16.mxu0 %v9847_v62  ;;  %v9903_v62 = vcombine.high %v362_v51, %v366_v52 }
 0x195   :  { %2861 = vmatpush1.bf16.msra.mxu1 %v10012_v2  ;;  %v10068_v2 = vcombine.low %v529_v47, %v533_v53  ;;  %v9942_v47 = vcombine.low %v402_v35, %v406_v36  ;;  %v418_v53 = vld [vmem:[#allocation5 + $0x6d0] sm:$0xff] }
 0x196   :  { %2862 = vmatprep.subr.bf16.mxu1 %v10021_v4  ;;  %v10077_v4 = vcombine.high %v537_v63, %v541_v1 }
 0x197   :  { %2969 = vmatpush1.bf16.msra.mxu0 %v9846_v3  ;;  %v9902_v3 = vcombine.low %v362_v51, %v366_v52  ;;  %v203_v51 = vld [vmem:[#allocation5 + $0x18] sm:$0xff] }
 0x198   :  { %2970 = vmatprep.subr.bf16.mxu0 %v9855_v7  ;;  %v9911_v7 = vcombine.high %v370_v59, %v374_v61  ;;  %v207_v52 = vld [vmem:[#allocation5 + $0x38] sm:$0xff] }
 0x199   :  { %2863 = vmatpush1.bf16.msra.mxu1 %v10020_v10  ;;  %v10076_v10 = vcombine.low %v537_v63, %v541_v1  ;;  %v211_v61 = vld [vmem:[#allocation5 + $0x58] sm:$0xff]  ;;  %v426_v63 = vld [vmem:[#allocation5 + $0x710] sm:$0xff] }
 0x19a   :  { %2864 = vmatprep.subr.bf16.mxu1 %v10029_v12  ;;  %v557_v12 = vld [vmem:[#allocation5 + $0xb28] sm:$0xff]  ;;  %v430_v1 = vld [vmem:[#allocation5 + $0x730] sm:$0xff] }
 0x19b   :  { %2971 = vmatpush1.bf16.msra.mxu0 %v9854_v11  ;;  %v553_v11 = vld [vmem:[#allocation5 + $0xb08] sm:$0xff] }
 0x19c   :  { %2972 = vmatprep.subr.bf16.mxu0 %v9863_v15  ;;  %v9919_v15 = vcombine.high %v378_v5, %v382_v6 }
 0x19d   :  { %2865 = vmatpush1.bf16.msra.mxu1 %v10028_v18  ;;  %v10084_v18 = vcombine.low %v545_v8, %v549_v9  ;;  %v434_v8 = vld [vmem:[#allocation5 + $0x750] sm:$0xff] }
 0x19e   :  { %2866 = vmatprep.subr.bf16.mxu1 %v10037_v20  ;;  %v10093_v20 = vcombine.high %v553_v11, %v557_v12  ;;  %v438_v9 = vld [vmem:[#allocation5 + $0x770] sm:$0xff] }
 0x19f   :  { %2973 = vmatpush1.bf16.msra.mxu0 %v9862_v19  ;;  %v9918_v19 = vcombine.low %v378_v5, %v382_v6  ;;  %v9967_v5 = vcombine.high %v426_v63, %v430_v1  ;;  %v219_v6 = vld [vmem:[#allocation5 + $0x98] sm:$0xff] }
 0x1a0   :  { %2985 = vmatprep.subr.bf16.mxu0 %v9871_v24  ;;  %v9927_v24 = vcombine.high %v386_v16, %v390_v17 }
 0x1a1   :  { %2867 = vmatpush1.bf16.msra.mxu1 %v10036_v28  ;;  %v10092_v28 = vcombine.low %v553_v11, %v557_v12  ;;  %v9966_v11 = vcombine.low %v426_v63, %v430_v1  ;;  %v267_v1 = vld [vmem:[#allocation5 + $0x218] sm:$0xff] }
 0x1a2   :  { %2975 = vmatmul.mubr.bf16.vlgmr.msra.gmra.mrb[8].mxu0 %v12196_v21  ;;  %2868 = vmatprep.subr.bf16.mxu1 %v10045_v30  ;;  %v10101_v30 = vcombine.high %v561_v22, %v565_v23 }
 0x1a3   :  { %2986 = vmatpush1.bf16.msra.mxu0 %v9870_v29  ;;  %3017 = vmatprep.mubr.bf16.mxu0 %v12193_v0  ;;  %v9926_v29 = vcombine.low %v386_v16, %v390_v17  ;;  %v442_v16 = vld [vmem:[#allocation5 + $0x790] sm:$0xff] }
 0x1a4   :  { %2987 = vmatprep.subr.bf16.mxu0 %v9879_v34  ;;  %v573_v34 = vld [vmem:[#allocation5 + $0xba8] sm:$0xff]  ;;  %v446_v17 = vld [vmem:[#allocation5 + $0x7b0] sm:$0xff] }
 0x1a5   :  { %2869 = vmatpush1.bf16.msra.mxu1 %v10044_v37  ;;  %v10100_v37 = vcombine.low %v561_v22, %v565_v23  ;;  %v10109_v40 = vcombine.high %v569_v33, %v573_v34  ;;  %v9983_v22 = vcombine.high %v442_v16, %v446_v17  ;;  %v235_v23 = vld [vmem:[#allocation5 + $0x118] sm:$0xff] }
 0x1a6   :  { %2870 = vmatprep.subr.bf16.mxu1 %v10053_v42  ;;  %v577_v42 = vld [vmem:[#allocation5 + $0xbc8] sm:$0xff] }
 0x1a7   :  { %2988 = vmatpush1.bf16.msra.mxu0 %v9878_v41  ;;  %v9943_v41 = vcombine.high %v402_v35, %v406_v36  ;;  %v462_v35 = vld [vmem:[#allocation5 + $0x830] sm:$0xff] }
 0x1a8   :  { %2989 = vmatprep.subr.bf16.mxu0 %v9887_v45  ;;  %v414_v45 = vld [vmem:[#allocation5 + $0x6b0] sm:$0xff] }
 0x1a9   :  { %2871 = vmatpush1.bf16.msra.mxu1 %v10052_v46  ;;  %v10108_v46 = vcombine.low %v569_v33, %v573_v34  ;;  %v247_v33 = vld [vmem:[#allocation5 + $0x178] sm:$0xff]  ;;  %v458_v34 = vld [vmem:[#allocation5 + $0x810] sm:$0xff] }
 0x1aa   :  { %2872 = vmatprep.subr.bf16.mxu1 %v10061_v50  ;;  %v9951_v50 = vcombine.high %v410_v44, %v414_v45 }
 0x1ab   :  { %2990 = vmatpush1.bf16.msra.mxu0 %v9886_v49  ;;  %v10117_v49 = vcombine.high %v577_v42, %v581_v43 }
 0x1ac   :  { %2991 = vmatprep.subr.bf16.mxu0 %v9895_v54  ;;  %v422_v54 = vld [vmem:[#allocation5 + $0x6f0] sm:$0xff] }
 0x1ad   :  { %2873 = vmatpush1.bf16.msra.mxu1 %v10060_v55  ;;  %v10116_v55 = vcombine.low %v577_v42, %v581_v43  ;;  %v9959_v59 = vcombine.high %v418_v53, %v422_v54  ;;  %v255_v42 = vld [vmem:[#allocation5 + $0x1b8] sm:$0xff]  ;;  %v466_v43 = vld [vmem:[#allocation5 + $0x850] sm:$0xff] }
 0x1ae   :  { %2874 = vmatprep.subr.bf16.mxu1 %v10069_v57  ;;  %v9745_v57 = vcombine.high %v203_v51, %v207_v52 }
 0x1af   :  { %2992 = vmatpush1.bf16.msra.mxu0 %v9894_v56  ;;  %v9950_v56 = vcombine.low %v410_v44, %v414_v45  ;;  %v470_v44 = vld [vmem:[#allocation5 + $0x870] sm:$0xff] }
 0x1b0   :  { %2993 = vmatprep.subr.bf16.mxu0 %v9903_v62  ;;  %v215_v62 = vld [vmem:[#allocation5 + $0x78] sm:$0xff] }
 0x1b1   :  { %2875 = vmatpush1.bf16.msra.mxu1 %v10068_v2  ;;  %v9744_v2 = vcombine.low %v203_v51, %v207_v52  ;;  %v259_v51 = vld [vmem:[#allocation5 + $0x1d8] sm:$0xff] }
 0x1b2   :  { %2876 = vmatprep.subr.bf16.mxu1 %v10077_v4  ;;  %v9753_v4 = vcombine.high %v211_v61, %v215_v62  ;;  %v263_v52 = vld [vmem:[#allocation5 + $0x1f8] sm:$0xff] }
 0x1b3   :  { %2994 = vmatpush1.bf16.msra.mxu0 %v9902_v3  ;;  %v9958_v3 = vcombine.low %v418_v53, %v422_v54  ;;  %v474_v54 = vld [vmem:[#allocation5 + $0x890] sm:$0xff] }
 0x1b4   :  { %2995 = vmatprep.subr.bf16.mxu0 %v9911_v7  ;;  %v223_v7 = vld [vmem:[#allocation5 + $0xb8] sm:$0xff] }
 0x1b5   :  { %2877 = vmatpush1.bf16.msra.mxu1 %v10076_v10  ;;  %v9752_v10 = vcombine.low %v211_v61, %v215_v62  ;;  %v9761_v12 = vcombine.high %v219_v6, %v223_v7  ;;  %v10006_v61 = vcombine.low %v466_v43, %v470_v44  ;;  %v9801_v62 = vcombine.high %v259_v51, %v263_v52 }
 0x1b6   :  { %2878 = vmatprep.subr.bf16.mxu1 %v10085_v14  ;;  %v227_v14 = vld [vmem:[#allocation5 + $0xd8] sm:$0xff] }
 0x1b7   :  { %2996 = vmatpush1.bf16.msra.mxu0 %v9910_v13  ;;  %v9975_v13 = vcombine.high %v434_v8, %v438_v9 }
 0x1b8   :  { %2997 = vmatprep.subr.bf16.mxu0 %v9919_v15  ;;  %v231_v15 = vld [vmem:[#allocation5 + $0xf8] sm:$0xff] }
 0x1b9   :  { %2879 = vmatpush1.bf16.msra.mxu1 %v10084_v18  ;;  %v9760_v18 = vcombine.low %v219_v6, %v223_v7  ;;  %v9768_v27 = vcombine.low %v227_v14, %v231_v15 }
 0x1ba   :  { %2880 = vmatprep.subr.bf16.mxu1 %v10093_v20  ;;  %v9769_v20 = vcombine.high %v227_v14, %v231_v15 }
 0x1bb   :  { %2998 = vmatpush1.bf16.msra.mxu0 %v9918_v19  ;;  %v9974_v19 = vcombine.low %v434_v8, %v438_v9  ;;  %v275_v9 = vld [vmem:[#allocation5 + $0x258] sm:$0xff] }
 0x1bc   :  { %2999 = vmatprep.subr.bf16.mxu0 %v9927_v24  ;;  %v450_v24 = vld [vmem:[#allocation5 + $0x7d0] sm:$0xff] }
 0x1bd   :  { %2881 = vmatpush1.bf16.msra.mxu1 %v10092_v28  ;;  %v9982_v28 = vcombine.low %v442_v16, %v446_v17  ;;  %v283_v17 = vld [vmem:[#allocation5 + $0x298] sm:$0xff] }
 0x1be   :  { %2882 = vmatprep.subr.bf16.mxu1 %v10101_v30  ;;  %v9991_v30 = vcombine.high %v450_v24, %v454_v25 }
 0x1bf   :  { %3000 = vmatpush1.bf16.msra.mxu0 %v9926_v29 }
 0x1c0   :  { %3001 = vmatprep.subr.bf16.mxu0 %v9935_v31  ;;  %v243_v31 = vld [vmem:[#allocation5 + $0x158] sm:$0xff] }
 0x1c1   :  { %2883 = vmatpush1.bf16.msra.mxu1 %v10100_v37  ;;  %v9990_v37 = vcombine.low %v450_v24, %v454_v25  ;;  %v9784_v45 = vcombine.low %v243_v31, %v247_v33  ;;  %v291_v25 = vld [vmem:[#allocation5 + $0x2d8] sm:$0xff] }
 0x1c2   :  { %2884 = vmatprep.subr.bf16.mxu1 %v10109_v40  ;;  %v9999_v40 = vcombine.high %v458_v34, %v462_v35 }
 0x1c3   :  { %3002 = vmatpush1.bf16.msra.mxu0 %v9934_v38  ;;  %v9785_v38 = vcombine.high %v243_v31, %v247_v33 }
 0x1c4   :  { %3003 = vmatprep.subr.bf16.mxu0 %v9943_v41  ;;  %v251_v41 = vld [vmem:[#allocation5 + $0x198] sm:$0xff] }
 0x1c5   :  { %2885 = vmatpush1.bf16.msra.mxu1 %v10108_v46  ;;  %v9998_v46 = vcombine.low %v458_v34, %v462_v35  ;;  %v299_v35 = vld [vmem:[#allocation5 + $0x318] sm:$0xff] }
 0x1c6   :  { %2886 = vmatprep.subr.bf16.mxu1 %v10117_v49 }
 0x1c7   :  { %3004 = vmatpush1.bf16.msra.mxu0 %v9942_v47  ;;  %v9793_v47 = vcombine.high %v251_v41, %v255_v42 }
 0x1c8   :  { %3005 = vmatprep.subr.bf16.mxu0 %v9951_v50  ;;  %v10007_v50 = vcombine.high %v466_v43, %v470_v44  ;;  %v307_v44 = vld [vmem:[#allocation5 + $0x358] sm:$0xff] }
 0x1c9   :  { %2887 = vmatpush1.bf16.msra.mxu1 %v10116_v55  ;;  %v478_v55 = vld [vmem:[#allocation5 + $0x8b0] sm:$0xff] }
 0x1ca   :  { %3114 = vmatprep.subr.bf16.mxu1 %v9745_v57  ;;  %v9792_v57 = vcombine.low %v251_v41, %v255_v42  ;;  %v10015_v63 = vcombine.high %v474_v54, %v478_v55  ;;  %v10014_v6 = vcombine.low %v474_v54, %v478_v55  ;;  %v315_v55 = vld [vmem:[#allocation5 + $0x398] sm:$0xff] }
 0x1cb   :  { %3006 = vmatpush1.bf16.msra.mxu0 %v9950_v56 }
 0x1cc   :  { %3007 = vmatprep.subr.bf16.mxu0 %v9959_v59  ;;  %2889 = vmatmul.mubr.bf16.vlgmr.msra.gmra.mrb[4].mxu1 %v12206_v39 }
 0x1cd   :  { %3115 = vmatpush1.bf16.msra.mxu1 %v9744_v2  ;;  %3146 = vmatprep.mubr.bf16.mxu1 %v12190_v58  ;;  %v239_v58 = vld [vmem:[#allocation5 + $0x138] sm:$0xff] }
 0x1ce   :  { %3116 = vmatprep.subr.bf16.mxu1 %v9753_v4  ;;  %v9777_v29 = vcombine.high %v235_v23, %v239_v58  ;;  %v9776_v36 = vcombine.low %v235_v23, %v239_v58  ;;  %v271_v2 = vld [vmem:[#allocation5 + $0x238] sm:$0xff]  ;;  %v486_v4 = vld [vmem:[#allocation5 + $0x8f0] sm:$0xff] }
 0x1cf   :  { %3008 = vmatpush1.bf16.msra.mxu0 %v9958_v3  ;;  %v482_v3 = vld [vmem:[#allocation5 + $0x8d0] sm:$0xff]  ;;  %v9809_v7 = vcombine.high %v267_v1, %v271_v2 }
 0x1d0   :  { %3009 = vmatprep.subr.bf16.mxu0 %v9967_v5  ;;  %v9800_v5 = vcombine.low %v259_v51, %v263_v52  ;;  %v10023_v8 = vcombine.high %v482_v3, %v486_v4  ;;  %v10022_v14 = vcombine.low %v482_v3, %v486_v4  ;;  %v323_v4 = vld [vmem:[#allocation5 + $0x3d8] sm:$0xff] }
 0x1d1   :  { %3117 = vmatpush1.bf16.msra.mxu1 %v9752_v10  ;;  %v279_v10 = vld [vmem:[#allocation5 + $0x278] sm:$0xff] }
 0x1d2   :  { %3118 = vmatprep.subr.bf16.mxu1 %v9761_v12  ;;  %v494_v12 = vld [vmem:[#allocation5 + $0x930] sm:$0xff]  ;;  %v9817_v15 = vcombine.high %v275_v9, %v279_v10 }
 0x1d3   :  { %3010 = vmatpush1.bf16.msra.mxu0 %v9966_v11  ;;  %v490_v11 = vld [vmem:[#allocation5 + $0x910] sm:$0xff] }
 0x1d4   :  { %3011 = vmatprep.subr.bf16.mxu0 %v9975_v13  ;;  %v9808_v13 = vcombine.low %v267_v1, %v271_v2  ;;  %v10031_v16 = vcombine.high %v490_v11, %v494_v12  ;;  %v10030_v23 = vcombine.low %v490_v11, %v494_v12  ;;  %v331_v12 = vld [vmem:[#allocation5 + $0x418] sm:$0xff] }
 0x1d5   :  { %3119 = vmatpush1.bf16.msra.mxu1 %v9760_v18  ;;  %v287_v18 = vld [vmem:[#allocation5 + $0x2b8] sm:$0xff] }
 0x1d6   :  { %3120 = vmatprep.subr.bf16.mxu1 %v9769_v20  ;;  %v502_v20 = vld [vmem:[#allocation5 + $0x970] sm:$0xff]  ;;  %v9825_v58 = vcombine.high %v283_v17, %v287_v18 }
 0x1d7   :  { %3012 = vmatpush1.bf16.msra.mxu0 %v9974_v19  ;;  %v498_v19 = vld [vmem:[#allocation5 + $0x950] sm:$0xff] }
 0x1d8   :  { %3013 = vmatprep.subr.bf16.mxu0 %v9983_v22  ;;  %v9816_v22 = vcombine.low %v275_v9, %v279_v10  ;;  %v10039_v24 = vcombine.high %v498_v19, %v502_v20  ;;  %v10038_v31 = vcombine.low %v498_v19, %v502_v20  ;;  %v339_v20 = vld [vmem:[#allocation5 + $0x458] sm:$0xff] }
 0x1d9   :  { %3121 = vmatpush1.bf16.msra.mxu1 %v9768_v27  ;;  %v295_v27 = vld [vmem:[#allocation5 + $0x2f8] sm:$0xff] }
 0x1da   :  { %3122 = vmatprep.subr.bf16.mxu1 %v9777_v29  ;;  %v510_v29 = vld [vmem:[#allocation5 + $0x9b0] sm:$0xff]  ;;  %v9833_v33 = vcombine.high %v291_v25, %v295_v27 }
 0x1db   :  { %3014 = vmatpush1.bf16.msra.mxu0 %v9982_v28  ;;  %v506_v28 = vld [vmem:[#allocation5 + $0x990] sm:$0xff] }
 0x1dc   :  { %3015 = vmatprep.subr.bf16.mxu0 %v9991_v30  ;;  %v9824_v30 = vcombine.low %v283_v17, %v287_v18  ;;  %v10047_v34 = vcombine.high %v506_v28, %v510_v29  ;;  %v10046_v41 = vcombine.low %v506_v28, %v510_v29  ;;  %v347_v29 = vld [vmem:[#allocation5 + $0x498] sm:$0xff] }
 0x1dd   :  { %3123 = vmatpush1.bf16.msra.mxu1 %v9776_v36  ;;  %v303_v36 = vld [vmem:[#allocation5 + $0x338] sm:$0xff] }
 0x1de   :  { %3124 = vmatprep.subr.bf16.mxu1 %v9785_v38  ;;  %v518_v38 = vld [vmem:[#allocation5 + $0x9f0] sm:$0xff]  ;;  %v9841_v42 = vcombine.high %v299_v35, %v303_v36 }
 0x1df   :  { %3016 = vmatpush1.bf16.msra.mxu0 %v9990_v37  ;;  %v12226_v49 = vpop.f32.mrb[0].mxu1  ;;  %v514_v37 = vld [vmem:[#allocation5 + $0x9d0] sm:$0xff] }
 0x1e0   :  { %3028 = vmatprep.subr.bf16.mxu0 %v9999_v40  ;;  %v12228_v53 = vpop.f32.mrb[1].mxu1  ;;  %v9832_v40 = vcombine.low %v291_v25, %v295_v27  ;;  %v10055_v43 = vcombine.high %v514_v37, %v518_v38  ;;  %v10054_v51 = vcombine.low %v514_v37, %v518_v38  ;;  %v355_v38 = vld [vmem:[#allocation5 + $0x4d8] sm:$0xff] }
 0x1e1   :  { %v12231_v56 = vpop.f32.mrb[2].mxu1  ;;  %3125 = vmatpush1.bf16.msra.mxu1 %v9784_v45  ;;  %v311_v45 = vld [vmem:[#allocation5 + $0x378] sm:$0xff] }
 0x1e2   :  { %3018 = vmatmul.mubr.bf16.vlgmr.msra.gmra.mrb[8].mxu0 %v12198_v26  ;;  %v12233_v59 = vpop.f32.mrb[3].mxu1  ;;  %3126 = vmatprep.subr.bf16.mxu1 %v9793_v47  ;;  %v526_v47 = vld [vmem:[#allocation5 + $0xa30] sm:$0xff]  ;;  %v9849_v52 = vcombine.high %v307_v44, %v311_v45 }
 0x1e3   :  { %3029 = vmatpush1.bf16.msra.mxu0 %v9998_v46  ;;  %3060 = vmatprep.mubr.bf16.mxu0 %v12200_v32  ;;  %v522_v46 = vld [vmem:[#allocation5 + $0xa10] sm:$0xff] }
 0x1e4   :  { %3030 = vmatprep.subr.bf16.mxu0 %v10007_v50  ;;  %v9840_v50 = vcombine.low %v299_v35, %v303_v36  ;;  %v10063_v54 = vcombine.high %v522_v46, %v526_v47  ;;  %v10062_v1 = vcombine.low %v522_v46, %v526_v47  ;;  %v363_v46 = vld [vmem:[#allocation5 + $0x518] sm:$0xff]  ;;  %v578_v47 = vld [vmem:[#allocation5 + $0xbd0] sm:$0xff] }
 0x1e5   :  { %3127 = vmatpush1.bf16.msra.mxu1 %v9792_v57  ;;  %v319_v57 = vld [vmem:[#allocation5 + $0x3b8] sm:$0xff] }
 0x1e6   :  { %3128 = vmatprep.subr.bf16.mxu1 %v9801_v62  ;;  %v534_v62 = vld [vmem:[#allocation5 + $0xa70] sm:$0xff]  ;;  %v9857_v2 = vcombine.high %v315_v55, %v319_v57 }
 0x1e7   :  { %3031 = vmatpush1.bf16.msra.mxu0 %v10006_v61  ;;  %v530_v61 = vld [vmem:[#allocation5 + $0xa50] sm:$0xff] }
 0x1e8   :  { %3032 = vmatprep.subr.bf16.mxu0 %v10015_v63  ;;  %v9848_v63 = vcombine.low %v307_v44, %v311_v45  ;;  %v10071_v3 = vcombine.high %v530_v61, %v534_v62  ;;  %v10070_v9 = vcombine.low %v530_v61, %v534_v62  ;;  %v375_v61 = vld [vmem:[#allocation5 + $0x578] sm:$0xff]  ;;  %v586_v62 = vld [vmem:[#allocation5 + $0xc10] sm:$0xff] }
 0x1e9   :  { %3129 = vmatpush1.bf16.msra.mxu1 %v9800_v5  ;;  %v327_v5 = vld [vmem:[#allocation5 + $0x3f8] sm:$0xff] }
 0x1ea   :  { %3130 = vmatprep.subr.bf16.mxu1 %v9809_v7  ;;  %v542_v7 = vld [vmem:[#allocation5 + $0xab0] sm:$0xff]  ;;  %v9865_v10 = vcombine.high %v323_v4, %v327_v5 }
 0x1eb   :  { %3033 = vmatpush1.bf16.msra.mxu0 %v10014_v6  ;;  %v538_v6 = vld [vmem:[#allocation5 + $0xa90] sm:$0xff] }
 0x1ec   :  { %3034 = vmatprep.subr.bf16.mxu0 %v10023_v8  ;;  %v9856_v8 = vcombine.low %v315_v55, %v319_v57  ;;  %v10079_v11 = vcombine.high %v538_v6, %v542_v7  ;;  %v10078_v17 = vcombine.low %v538_v6, %v542_v7  ;;  %v371_v57 = vld [vmem:[#allocation5 + $0x558] sm:$0xff] }
 0x1ed   :  { %3131 = vmatpush1.bf16.msra.mxu1 %v9808_v13  ;;  %v335_v13 = vld [vmem:[#allocation5 + $0x438] sm:$0xff] }
 0x1ee   :  { %3132 = vmatprep.subr.bf16.mxu1 %v9817_v15  ;;  %v550_v15 = vld [vmem:[#allocation5 + $0xaf0] sm:$0xff]  ;;  %v9873_v18 = vcombine.high %v331_v12, %v335_v13  ;;  %v383_v6 = vld [vmem:[#allocation5 + $0x5b8] sm:$0xff] }
 0x1ef   :  { %3035 = vmatpush1.bf16.msra.mxu0 %v10022_v14  ;;  %v546_v14 = vld [vmem:[#allocation5 + $0xad0] sm:$0xff] }
 0x1f0   :  { %3036 = vmatprep.subr.bf16.mxu0 %v10031_v16  ;;  %v9864_v16 = vcombine.low %v323_v4, %v327_v5  ;;  %v10087_v19 = vcombine.high %v546_v14, %v550_v15  ;;  %v10086_v25 = vcombine.low %v546_v14, %v550_v15  ;;  %v594_v4 = vlaneseq  ;;  %v379_v5 = vld [vmem:[#allocation5 + $0x598] sm:$0xff] }
 0x1f1   :  { %3133 = vmatpush1.bf16.msra.mxu1 %v9816_v22  ;;  %v343_v22 = vld [vmem:[#allocation5 + $0x478] sm:$0xff] }
 0x1f2   :  { %3134 = vmatprep.subr.bf16.mxu1 %v9825_v58  ;;  %v558_v58 = vld [vmem:[#allocation5 + $0xb30] sm:$0xff]  ;;  %v9881_v27 = vcombine.high %v339_v20, %v343_v22  ;;  %v387_v14 = vld [vmem:[#allocation5 + $0x5d8] sm:$0xff] }
 0x1f3   :  { %3037 = vmatpush1.bf16.msra.mxu0 %v10030_v23  ;;  %v554_v23 = vld [vmem:[#allocation5 + $0xb10] sm:$0xff]  ;;  %v391_v15 = vld [vmem:[#allocation5 + $0x5f8] sm:$0xff] }
 0x1f4   :  { %3038 = vmatprep.subr.bf16.mxu0 %v10039_v24  ;;  %v9872_v24 = vcombine.low %v331_v12, %v335_v13  ;;  %v10095_v28 = vcombine.high %v554_v23, %v558_v58  ;;  %v10094_v35 = vcombine.low %v554_v23, %v558_v58  ;;  %v12238_v13 = vshrl.u32 %v594_v4, 7  ;;  %v12245_v23 = vld [vmem:[#allocation7] sm:$0xff] }
 0x1f5   :  { %3135 = vmatpush1.bf16.msra.mxu1 %v9824_v30  ;;  %v351_v30 = vld [vmem:[#allocation5 + $0x4b8] sm:$0xff] }
 0x1f6   :  { %3136 = vmatprep.subr.bf16.mxu1 %v9833_v33  ;;  %v566_v33 = vld [vmem:[#allocation5 + $0xb70] sm:$0xff]  ;;  %v9889_v36 = vcombine.high %v347_v29, %v351_v30  ;;  %v12248_v58 = vsub.s32 1, %v12238_v13 }
 0x1f7   :  { %3039 = vmatpush1.bf16.msra.mxu0 %v10038_v31  ;;  %v562_v31 = vld [vmem:[#allocation5 + $0xb50] sm:$0xff] }
 0x1f8   :  { %3040 = vmatprep.subr.bf16.mxu0 %v10047_v34  ;;  %v9880_v34 = vcombine.low %v339_v20, %v343_v22  ;;  %v10103_v37 = vcombine.high %v562_v31, %v566_v33  ;;  %v395_v20 = vld [vmem:[#allocation5 + $0x618] sm:$0xff] }
 0x1f9   :  { %3137 = vmatpush1.bf16.msra.mxu1 %v9832_v40  ;;  %v359_v40 = vld [vmem:[#allocation5 + $0x4f8] sm:$0xff] }
 0x1fa   :  { %3138 = vmatprep.subr.bf16.mxu1 %v9841_v42  ;;  %v574_v42 = vld [vmem:[#allocation5 + $0xbb0] sm:$0xff]  ;;  %v9897_v44 = vcombine.high %v355_v38, %v359_v40  ;;  %v399_v22 = vld [vmem:[#allocation5 + $0x638] sm:$0xff] }
 0x1fb   :  { %3041 = vmatpush1.bf16.msra.mxu0 %v10046_v41  ;;  %v570_v41 = vld [vmem:[#allocation5 + $0xb90] sm:$0xff] }
 0x1fc   :  { %3042 = vmatprep.subr.bf16.mxu0 %v10055_v43  ;;  %v9888_v43 = vcombine.low %v347_v29, %v351_v30  ;;  %v10111_v45 = vcombine.high %v570_v41, %v574_v42  ;;  %v407_v29 = vld [vmem:[#allocation5 + $0x678] sm:$0xff]  ;;  %v601_v30 = vrot.slane %v12245_v23, %v12248_v58 }
 0x1fd   :  { %3139 = vmatpush1.bf16.msra.mxu1 %v9840_v50  ;;  %v582_v50 = vld [vmem:[#allocation5 + $0xbf0] sm:$0xff] }
 0x1fe   :  { %3140 = vmatprep.subr.bf16.mxu1 %v9849_v52  ;;  %v10110_v52 = vcombine.low %v570_v41, %v574_v42  ;;  %v10119_v55 = vcombine.high %v578_v47, %v582_v50  ;;  %v415_v41 = vld [vmem:[#allocation5 + $0x6b8] sm:$0xff]  ;;  %v2635_v42 = vadd.f32 %v12228_v53, %v601_v30  ;;  %v3318_v53 = vld [vmem:[#allocation8 + $0x40] sm:$0xff] }
 0x1ff   :  { %3043 = vmatpush1.bf16.msra.mxu0 %v10054_v51  ;;  %v9896_v51 = vcombine.low %v355_v38, %v359_v40  ;;  %v411_v40 = vld [vmem:[#allocation5 + $0x698] sm:$0xff] }
 0x200   :  { %3044 = vmatprep.subr.bf16.mxu0 %v10063_v54 }
 0x201   :  { %3141 = vmatpush1.bf16.msra.mxu1 %v9848_v63  ;;  %v590_v63 = vld [vmem:[#allocation5 + $0xc30] sm:$0xff] }
 0x202   :  { %3142 = vmatprep.subr.bf16.mxu1 %v9857_v2  ;;  %v10118_v2 = vcombine.low %v578_v47, %v582_v50  ;;  %v10127_v7 = vcombine.high %v586_v62, %v590_v63  ;;  %v10126_v12 = vcombine.low %v586_v62, %v590_v63  ;;  %v9952_v63 = vcombine.low %v411_v40, %v415_v41 }
 0x203   :  { %3045 = vmatpush1.bf16.msra.mxu0 %v10062_v1 }
 0x204   :  { %3046 = vmatprep.subr.bf16.mxu0 %v10071_v3  ;;  %v9913_v3 = vcombine.high %v371_v57, %v375_v61 }
 0x205   :  { %3143 = vmatpush1.bf16.msra.mxu1 %v9856_v8  ;;  %v587_v8 = vld [vmem:[#allocation5 + $0xc18] sm:$0xff] }
 0x206   :  { %3144 = vmatprep.subr.bf16.mxu1 %v9865_v10  ;;  %v9912_v10 = vcombine.low %v371_v57, %v375_v61  ;;  %v423_v57 = vld [vmem:[#allocation5 + $0x6f8] sm:$0xff] }
 0x207   :  { %3047 = vmatpush1.bf16.msra.mxu0 %v10070_v9  ;;  %v591_v9 = vld [vmem:[#allocation5 + $0xc38] sm:$0xff] }
 0x208   :  { %3048 = vmatprep.subr.bf16.mxu0 %v10079_v11  ;;  %v9921_v11 = vcombine.high %v379_v5, %v383_v6 }
 0x209   :  { %3145 = vmatpush1.bf16.msra.mxu1 %v9864_v16  ;;  %v10129_v16 = vcombine.high %v587_v8, %v591_v9 }
 0x20a   :  { %3157 = vmatprep.subr.bf16.mxu1 %v9873_v18  ;;  %v9929_v18 = vcombine.high %v387_v14, %v391_v15 }
 0x20b   :  { %3049 = vmatpush1.bf16.msra.mxu0 %v10078_v17  ;;  %v9920_v17 = vcombine.low %v379_v5, %v383_v6  ;;  %v427_v6 = vld [vmem:[#allocation5 + $0x718] sm:$0xff] }
 0x20c   :  { %3050 = vmatprep.subr.bf16.mxu0 %v10087_v19  ;;  %3147 = vmatmul.mubr.bf16.vlgmr.msra.gmra.mrb[8].mxu1 %v12196_v21  ;;  %v10102_v21 = vcombine.low %v562_v31, %v566_v33  ;;  %v12242_v19 = vsub.s32 0, %v12238_v13  ;;  %v3310_v31 = vld [vmem:[#allocation8] sm:$0xff] }
 0x20d   :  { %3158 = vmatpush1.bf16.msra.mxu1 %v9872_v24  ;;  %3189 = vmatprep.mubr.bf16.mxu1 %v12193_v0  ;;  %v367_v0 = vld [vmem:[#allocation5 + $0x538] sm:$0xff]  ;;  %v9928_v24 = vcombine.low %v387_v14, %v391_v15  ;;  %v3314_v33 = vld [vmem:[#allocation8 + $0x20] sm:$0xff] }
 0x20e   :  { %3159 = vmatprep.subr.bf16.mxu1 %v9881_v27  ;;  %v9905_v54 = vcombine.high %v363_v46, %v367_v0  ;;  %v9904_v1 = vcombine.low %v363_v46, %v367_v0  ;;  %v597_v27 = vrot.slane %v12245_v23, %v12242_v19  ;;  %v10135_v38 = vcombine.high %v3310_v31, %v3314_v33 }
 0x20f   :  { %3051 = vmatpush1.bf16.msra.mxu0 %v10086_v25  ;;  %v9937_v25 = vcombine.high %v395_v20, %v399_v22  ;;  %v2639_v0 = vadd.f32 %v12233_v59, %v601_v30  ;;  %v443_v30 = vld [vmem:[#allocation5 + $0x798] sm:$0xff] }
 0x210   :  { %3052 = vmatprep.subr.bf16.mxu0 %v10095_v28  ;;  %v403_v28 = vld [vmem:[#allocation5 + $0x658] sm:$0xff] }
 0x211   :  { %3160 = vmatpush1.bf16.msra.mxu1 %v9880_v34  ;;  %v9936_v34 = vcombine.low %v395_v20, %v399_v22  ;;  %v9944_v46 = vcombine.low %v403_v28, %v407_v29  ;;  %v439_v20 = vld [vmem:[#allocation5 + $0x778] sm:$0xff] }
 0x212   :  { %3161 = vmatprep.subr.bf16.mxu1 %v9889_v36  ;;  %v9945_v36 = vcombine.high %v403_v28, %v407_v29 }
 0x213   :  { %3053 = vmatpush1.bf16.msra.mxu0 %v10094_v35  ;;  %v10128_v35 = vcombine.low %v587_v8, %v591_v9  ;;  %v3326_v8 = vld [vmem:[#allocation8 + $0x80] sm:$0xff] }
 0x214   :  { %3054 = vmatprep.subr.bf16.mxu0 %v10103_v37  ;;  %v2633_v37 = vadd.f32 %v12226_v49, %v597_v27  ;;  %v9953_v49 = vcombine.high %v411_v40, %v415_v41  ;;  %v3330_v9 = vld [vmem:[#allocation8 + $0xa0] sm:$0xff]  ;;  %v451_v40 = vld [vmem:[#allocation5 + $0x7d8] sm:$0xff] }
 0x215   :  { %3162 = vmatpush1.bf16.msra.mxu1 %v9888_v43  ;;  %v455_v41 = vld [vmem:[#allocation5 + $0x7f8] sm:$0xff] }
 0x216   :  { %3163 = vmatprep.subr.bf16.mxu1 %v9897_v44 }
 0x217   :  { %3055 = vmatpush1.bf16.msra.mxu0 %v10102_v21  ;;  %v2637_v21 = vadd.f32 %v12231_v56, %v597_v27  ;;  %v10150_v27 = vcombine.low %v3326_v8, %v3330_v9 }
 0x218   :  { %3056 = vmatprep.subr.bf16.mxu0 %v10111_v45 }
 0x219   :  { %3164 = vmatpush1.bf16.msra.mxu1 %v9896_v51 }
 0x21a   :  { %3165 = vmatprep.subr.bf16.mxu1 %v9905_v54  ;;  %v3322_v54 = vld [vmem:[#allocation8 + $0x60] sm:$0xff] }
 0x21b   :  { %3057 = vmatpush1.bf16.msra.mxu0 %v10110_v52  ;;  %v10143_v4 = vcombine.high %v3318_v53, %v3322_v54  ;;  %v10142_v14 = vcombine.low %v3318_v53, %v3322_v54  ;;  %v467_v54 = vld [vmem:[#allocation5 + $0x858] sm:$0xff] }
 0x21c   :  { %3058 = vmatprep.subr.bf16.mxu0 %v10119_v55  ;;  %v419_v55 = vld [vmem:[#allocation5 + $0x6d8] sm:$0xff] }
 0x21d   :  { %3166 = vmatpush1.bf16.msra.mxu1 %v9904_v1  ;;  %v9961_v5 = vcombine.high %v419_v55, %v423_v57 }
 0x21e   :  { %3167 = vmatprep.subr.bf16.mxu1 %v9913_v3 }
 0x21f   :  { %3059 = vmatpush1.bf16.msra.mxu0 %v10118_v2  ;;  %v10134_v2 = vcombine.low %v3310_v31, %v3314_v33  ;;  %v447_v31 = vld [vmem:[#allocation5 + $0x7b8] sm:$0xff]  ;;  %v3342_v33 = vld [vmem:[#allocation8 + $0x100] sm:$0xff] }
 0x220   :  { %3071 = vmatprep.subr.bf16.mxu0 %v10127_v7 }
 0x221   :  { %3168 = vmatpush1.bf16.msra.mxu1 %v9912_v10 }
 0x222   :  { %3061 = vmatmul.mubr.bf16.vlgmr.msra.gmra.mrb[8].mxu0 %v12206_v39  ;;  %3169 = vmatprep.subr.bf16.mxu1 %v9921_v11  ;;  %v9960_v11 = vcombine.low %v419_v55, %v423_v57  ;;  %v471_v55 = vld [vmem:[#allocation5 + $0x878] sm:$0xff]  ;;  %v3366_v57 = vld [vmem:[#allocation8 + $0x1c0] sm:$0xff] }
 0x223   :  { %3072 = vmatpush1.bf16.msra.mxu0 %v10126_v12  ;;  %3103 = vmatprep.mubr.bf16.mxu0 %v11993_v48 }
 0x224   :  { %3243 = vmatprep.subr.bf16.mxu0 %v10129_v16 }
 0x225   :  { %3170 = vmatpush1.bf16.msra.mxu1 %v9920_v17  ;;  %v10151_v17 = vcombine.high %v3326_v8, %v3330_v9 }
 0x226   :  { %3171 = vmatprep.subr.bf16.mxu1 %v9929_v18  ;;  %v435_v18 = vld [vmem:[#allocation5 + $0x758] sm:$0xff] }
 0x227   :  { %v9977_v28 = vcombine.high %v435_v18, %v439_v20 }
 0x229   :  { %3172 = vmatpush1.bf16.msra.mxu1 %v9928_v24  ;;  %v3334_v24 = vld [vmem:[#allocation8 + $0xc0] sm:$0xff] }
 0x22a   :  { %3173 = vmatprep.subr.bf16.mxu1 %v9937_v25 }
 0x22d   :  { %v2761_v43 = vpop.f32.mrb[0].mxu0  ;;  %3174 = vmatpush1.bf16.msra.mxu1 %v9936_v34  ;;  %v3346_v34 = vld [vmem:[#allocation8 + $0x120] sm:$0xff] }
 0x22e   :  { %v11006_v44 = vadd.f32 %v2761_v43, %v2633_v37  ;;  %10132 = vmatmul.mubr.msk.bf16.vlgmr.msra.gmra.mrb[8].mxu0 %vm2594_vm0, %v12212_v60  ;;  %v2763_v45 = vpop.f32.mrb[1].mxu0  ;;  %3175 = vmatprep.subr.bf16.mxu1 %v9945_v36  ;;  %v9985_v37 = vcombine.high %v443_v30, %v447_v31  ;;  %v3354_v43 = vld [vmem:[#allocation8 + $0x160] sm:$0xff] }
 0x22f   :  { %v11008_v47 = vadd.f32 %v2763_v45, %v2635_v42  ;;  %v2765_v50 = vpop.f32.mrb[2].mxu0  ;;  %3244 = vmatpush1.bf16.msra.mxu0 %v10128_v35  ;;  %3275 = vmatprep.mubr.bf16.mxu0 %v11993_v48  ;;  %v431_v48 = vld [vmem:[#allocation5 + $0x738] sm:$0xff]  ;;  %v9976_v35 = vcombine.low %v435_v18, %v439_v20  ;;  %v3350_v42 = vld [vmem:[#allocation8 + $0x140] sm:$0xff]  ;;  %v9993_v45 = vcombine.high %v451_v40, %v455_v41 }
 0x230   :  { %v11010_v51 = vadd.f32 %v2765_v50, %v2637_v21  ;;  %v2767_v52 = vpop.f32.mrb[3].mxu0  ;;  %6424 = vmatprep.subr.bf16.mxu0 %v10135_v38  ;;  %v3286_v61 = vmax.f32 %v11006_v44, 0.0  ;;  %v9969_v15 = vcombine.high %v427_v6, %v431_v48  ;;  %v9968_v25 = vcombine.low %v427_v6, %v431_v48  ;;  %v3358_v50 = vld [vmem:[#allocation8 + $0x180] sm:$0xff] }
 0x231   :  { %v11012_v56 = vadd.f32 %v2767_v52, %v2639_v0  ;;  %3176 = vmatpush1.bf16.msra.mxu1 %v9944_v46  ;;  %v3287_v59 = vmax.f32 %v11008_v47, 0.0  ;;  %v10167_v38 = vcombine.high %v3342_v33, %v3346_v34  ;;  %v9984_v21 = vcombine.low %v443_v30, %v447_v31  ;;  %v459_v0 = vld [vmem:[#allocation5 + $0x818] sm:$0xff]  ;;  %v3378_v6 = vld [vmem:[#allocation8 + $0x220] sm:$0xff] }
 0x232   :  { %v3294_v62 = vmax.f32 %v11010_v51, 0.0  ;;  %3177 = vmatprep.subr.bf16.mxu1 %v9953_v49  ;;  %v10166_v44 = vcombine.low %v3342_v33, %v3346_v34  ;;  %v10175_v46 = vcombine.high %v3350_v42, %v3354_v43  ;;  %v463_v47 = vld [vmem:[#allocation5 + $0x838] sm:$0xff]  ;;  %v3362_v49 = vld [vmem:[#allocation8 + $0x1a0] sm:$0xff]  ;;  %v9992_v51 = vcombine.low %v451_v40, %v455_v41 }
 0x233   :  { %v3295_v1 = vmax.f32 %v11012_v56, 0.0  ;;  %v10174_v52 = vcombine.low %v3350_v42, %v3354_v43  ;;  %v10001_v53 = vcombine.high %v459_v0, %v463_v47  ;;  %v10183_v56 = vcombine.high %v3358_v50, %v3362_v49  ;;  %v3386_v18 = vld [vmem:[#allocation8 + $0x260] sm:$0xff]  ;;  %v499_v34 = vld [vmem:[#allocation5 + $0x958] sm:$0xff] }
 0x234   :  { %v12261_v3 = vpack.c.bf16 %v3294_v62, %v3286_v61  ;;  %v3370_v61 = vld [vmem:[#allocation8 + $0x1e0] sm:$0xff]  ;;  %v10000_v62 = vcombine.low %v459_v0, %v463_v47  ;;  %v10008_v48 = vcombine.low %v467_v54, %v471_v55  ;;  %v507_v43 = vld [vmem:[#allocation5 + $0x998] sm:$0xff] }
 0x235   :  { %v12263_v7 = vpack.c.bf16 %v3295_v1, %v3287_v59  ;;  %v12265_v10 = vpop.f32.mrb[4].mxu0  ;;  %3178 = vmatpush1.bf16.msra.mxu1 %v9952_v63  ;;  %v10182_v63 = vcombine.low %v3358_v50, %v3362_v49  ;;  %v10009_v59 = vcombine.high %v467_v54, %v471_v55  ;;  %v10191_v1 = vcombine.high %v3366_v57, %v3370_v61  ;;  %v515_v49 = vld [vmem:[#allocation5 + $0x9d8] sm:$0xff] }
 0x236   :  { %10133 = vmatmul.mubr.msk.bf16.vlgmr.msra.gmra.mrb[12].mxu0 %vm2594_vm0, %v12212_v60  ;;  %v12269_v12 = vpop.f32.mrb[5].mxu0  ;;  %3179 = vmatprep.subr.bf16.mxu1 %v9961_v5  ;;  %v3338_v60 = vld [vmem:[#allocation8 + $0xe0] sm:$0xff]  ;;  %v10190_v8 = vcombine.low %v3366_v57, %v3370_v61  ;;  %v523_v61 = vld [vmem:[#allocation5 + $0xa18] sm:$0xff] }
 0x237   :  { %6425 = vmatpush1.bf16.msra.mxu0 %v10134_v2  ;;  %6456 = vmatprep.mubr.bf16.mxu0 %v12263_v7  ;;  %v12272_v16 = vpop.f32.mrb[6].mxu0  ;;  %v10159_v29 = vcombine.high %v3334_v24, %v3338_v60  ;;  %v10158_v36 = vcombine.low %v3334_v24, %v3338_v60  ;;  %v475_v2 = vld [vmem:[#allocation5 + $0x898] sm:$0xff]  ;;  %v3374_v5 = vld [vmem:[#allocation8 + $0x200] sm:$0xff] }
 0x238   :  { %6426 = vmatprep.subr.bf16.mxu0 %v10143_v4  ;;  %v12274_v22 = vpop.f32.mrb[7].mxu0  ;;  %v479_v4 = vld [vmem:[#allocation5 + $0x8b8] sm:$0xff] }
 0x239   :  { %3180 = vmatpush1.bf16.msra.mxu1 %v9960_v11  ;;  %v10017_v9 = vcombine.high %v475_v2, %v479_v4  ;;  %v10199_v11 = vcombine.high %v3374_v5, %v3378_v6  ;;  %v10016_v20 = vcombine.low %v475_v2, %v479_v4 }
 0x23a   :  { %3181 = vmatprep.subr.bf16.mxu1 %v9969_v15  ;;  %v487_v15 = vld [vmem:[#allocation5 + $0x8f8] sm:$0xff] }
 0x23b   :  { %6427 = vmatpush1.bf16.msra.mxu0 %v10142_v14  ;;  %v483_v14 = vld [vmem:[#allocation5 + $0x8d8] sm:$0xff] }
 0x23c   :  { %6428 = vmatprep.subr.bf16.mxu0 %v10151_v17  ;;  %v3382_v17 = vld [vmem:[#allocation8 + $0x240] sm:$0xff]  ;;  %v10025_v24 = vcombine.high %v483_v14, %v487_v15 }
 0x23d   :  { %3182 = vmatpush1.bf16.msra.mxu1 %v9968_v25  ;;  %v10207_v60 = vcombine.high %v3382_v17, %v3386_v18  ;;  %v491_v25 = vld [vmem:[#allocation5 + $0x918] sm:$0xff]  ;;  %v10206_v30 = vcombine.low %v3382_v17, %v3386_v18 }
 0x23e   :  { %3183 = vmatprep.subr.bf16.mxu1 %v9977_v28  ;;  %v3394_v28 = vld [vmem:[#allocation8 + $0x2a0] sm:$0xff]  ;;  %v539_v18 = vld [vmem:[#allocation5 + $0xa98] sm:$0xff] }
 0x23f   :  { %6429 = vmatpush1.bf16.msra.mxu0 %v10150_v27  ;;  %v3390_v27 = vld [vmem:[#allocation8 + $0x280] sm:$0xff] }
 0x240   :  { %6430 = vmatprep.subr.bf16.mxu0 %v10159_v29  ;;  %v10024_v29 = vcombine.low %v483_v14, %v487_v15  ;;  %v10215_v33 = vcombine.high %v3390_v27, %v3394_v28  ;;  %v10214_v40 = vcombine.low %v3390_v27, %v3394_v28  ;;  %v547_v28 = vld [vmem:[#allocation5 + $0xad8] sm:$0xff] }
 0x241   :  { %3184 = vmatpush1.bf16.msra.mxu1 %v9976_v35  ;;  %v503_v35 = vld [vmem:[#allocation5 + $0x978] sm:$0xff] }
 0x242   :  { %3185 = vmatprep.subr.bf16.mxu1 %v9985_v37  ;;  %v3402_v37 = vld [vmem:[#allocation8 + $0x2e0] sm:$0xff]  ;;  %v10041_v41 = vcombine.high %v499_v34, %v503_v35 }
 0x243   :  { %6431 = vmatpush1.bf16.msra.mxu0 %v10158_v36  ;;  %v3398_v36 = vld [vmem:[#allocation8 + $0x2c0] sm:$0xff] }
 0x244   :  { %6432 = vmatprep.subr.bf16.mxu0 %v10167_v38  ;;  %v10223_v42 = vcombine.high %v3398_v36, %v3402_v37  ;;  %v10222_v0 = vcombine.low %v3398_v36, %v3402_v37  ;;  %v555_v37 = vld [vmem:[#allocation5 + $0xb18] sm:$0xff] }
 0x245   :  { %3186 = vmatpush1.bf16.msra.mxu1 %v9984_v21  ;;  %v511_v21 = vld [vmem:[#allocation5 + $0x9b8] sm:$0xff] }
 0x246   :  { %3187 = vmatprep.subr.bf16.mxu1 %v9993_v45  ;;  %v3410_v45 = vld [vmem:[#allocation8 + $0x320] sm:$0xff]  ;;  %v10049_v47 = vcombine.high %v507_v43, %v511_v21 }
 0x247   :  { %6433 = vmatpush1.bf16.msra.mxu0 %v10166_v44  ;;  %v3406_v44 = vld [vmem:[#allocation8 + $0x300] sm:$0xff] }
 0x248   :  { %6434 = vmatprep.subr.bf16.mxu0 %v10175_v46  ;;  %v10040_v46 = vcombine.low %v499_v34, %v503_v35  ;;  %v10231_v50 = vcombine.high %v3406_v44, %v3410_v45  ;;  %v10230_v54 = vcombine.low %v3406_v44, %v3410_v45  ;;  %v563_v45 = vld [vmem:[#allocation5 + $0xb58] sm:$0xff] }
 0x249   :  { %3188 = vmatpush1.bf16.msra.mxu1 %v9992_v51  ;;  %v519_v51 = vld [vmem:[#allocation5 + $0x9f8] sm:$0xff] }
 0x24a   :  { %3200 = vmatprep.subr.bf16.mxu1 %v10001_v53  ;;  %v3418_v53 = vld [vmem:[#allocation8 + $0x360] sm:$0xff]  ;;  %v10057_v55 = vcombine.high %v515_v49, %v519_v51 }
 0x24b   :  { %6435 = vmatpush1.bf16.msra.mxu0 %v10174_v52  ;;  %v3414_v52 = vld [vmem:[#allocation8 + $0x340] sm:$0xff] }
 0x24c   :  { %6436 = vmatprep.subr.bf16.mxu0 %v10183_v56  ;;  %3190 = vmatmul.mubr.bf16.vlgmr.msra.gmra.mrb[8].mxu1 %v12198_v26  ;;  %v10198_v26 = vcombine.low %v3374_v5, %v3378_v6  ;;  %v10048_v56 = vcombine.low %v507_v43, %v511_v21  ;;  %v10239_v57 = vcombine.high %v3414_v52, %v3418_v53  ;;  %v531_v6 = vld [vmem:[#allocation5 + $0xa58] sm:$0xff] }
 0x24d   :  { %3201 = vmatpush1.bf16.msra.mxu1 %v10000_v62  ;;  %3232 = vmatprep.mubr.bf16.mxu1 %v12200_v32  ;;  %v495_v32 = vld [vmem:[#allocation5 + $0x938] sm:$0xff]  ;;  %v10238_v2 = vcombine.low %v3414_v52, %v3418_v53 }
 0x24e   :  { %3202 = vmatprep.subr.bf16.mxu1 %v10009_v59  ;;  %v10033_v31 = vcombine.high %v491_v25, %v495_v32  ;;  %v10032_v38 = vcombine.low %v491_v25, %v495_v32  ;;  %v527_v62 = vld [vmem:[#allocation5 + $0xa38] sm:$0xff]  ;;  %v3426_v59 = vld [vmem:[#allocation8 + $0x3a0] sm:$0xff] }
 0x24f   :  { %6437 = vmatpush1.bf16.msra.mxu0 %v10182_v63  ;;  %v3422_v63 = vld [vmem:[#allocation8 + $0x380] sm:$0xff]  ;;  %v10065_v4 = vcombine.high %v523_v61, %v527_v62  ;;  %v571_v53 = vld [vmem:[#allocation5 + $0xb98] sm:$0xff] }
 0x250   :  { %6438 = vmatprep.subr.bf16.mxu0 %v10191_v1  ;;  %v10056_v1 = vcombine.low %v515_v49, %v519_v51  ;;  %v10247_v5 = vcombine.high %v3422_v63, %v3426_v59  ;;  %v10246_v14 = vcombine.low %v3422_v63, %v3426_v59  ;;  %v579_v59 = vld [vmem:[#allocation5 + $0xbd8] sm:$0xff] }
 0x251   :  { %3203 = vmatpush1.bf16.msra.mxu1 %v10008_v48  ;;  %v535_v48 = vld [vmem:[#allocation5 + $0xa78] sm:$0xff] }
 0x252   :  { %3204 = vmatprep.subr.bf16.mxu1 %v10017_v9  ;;  %v3434_v9 = vld [vmem:[#allocation8 + $0x3e0] sm:$0xff]  ;;  %v10073_v15 = vcombine.high %v531_v6, %v535_v48 }
 0x253   :  { %6439 = vmatpush1.bf16.msra.mxu0 %v10190_v8  ;;  %v3430_v8 = vld [vmem:[#allocation8 + $0x3c0] sm:$0xff] }
 0x254   :  { %6440 = vmatprep.subr.bf16.mxu0 %v10199_v11  ;;  %v10064_v11 = vcombine.low %v523_v61, %v527_v62  ;;  %v10255_v17 = vcombine.high %v3430_v8, %v3434_v9  ;;  %v10254_v25 = vcombine.low %v3430_v8, %v3434_v9  ;;  %v3311_v9 = vld [vmem:[#allocation8 + $0x8] sm:$0xff] }
 0x255   :  { %3205 = vmatpush1.bf16.msra.mxu1 %v10016_v20  ;;  %v543_v20 = vld [vmem:[#allocation5 + $0xab8] sm:$0xff] }
 0x256   :  { %3206 = vmatprep.subr.bf16.mxu1 %v10025_v24  ;;  %v3442_v24 = vld [vmem:[#allocation8 + $0x420] sm:$0xff]  ;;  %v10081_v32 = vcombine.high %v539_v18, %v543_v20 }
 0x257   :  { %6441 = vmatpush1.bf16.msra.mxu0 %v10198_v26  ;;  %v3438_v26 = vld [vmem:[#allocation8 + $0x400] sm:$0xff] }
 0x258   :  { %6442 = vmatprep.subr.bf16.mxu0 %v10207_v60  ;;  %v10072_v60 = vcombine.low %v531_v6, %v535_v48  ;;  %v10263_v27 = vcombine.high %v3438_v26, %v3442_v24  ;;  %v10262_v34 = vcombine.low %v3438_v26, %v3442_v24  ;;  %v3319_v24 = vld [vmem:[#allocation8 + $0x48] sm:$0xff] }
 0x259   :  { %3207 = vmatpush1.bf16.msra.mxu1 %v10024_v29  ;;  %v551_v29 = vld [vmem:[#allocation5 + $0xaf8] sm:$0xff] }
 0x25a   :  { %3208 = vmatprep.subr.bf16.mxu1 %v10033_v31  ;;  %v3450_v31 = vld [vmem:[#allocation8 + $0x460] sm:$0xff]  ;;  %v10089_v35 = vcombine.high %v547_v28, %v551_v29 }
 0x25b   :  { %6443 = vmatpush1.bf16.msra.mxu0 %v10206_v30  ;;  %v3446_v30 = vld [vmem:[#allocation8 + $0x440] sm:$0xff] }
 0x25c   :  { %6444 = vmatprep.subr.bf16.mxu0 %v10215_v33  ;;  %v10080_v33 = vcombine.low %v539_v18, %v543_v20  ;;  %v10271_v36 = vcombine.high %v3446_v30, %v3450_v31  ;;  %v10270_v43 = vcombine.low %v3446_v30, %v3450_v31  ;;  %v3327_v31 = vld [vmem:[#allocation8 + $0x88] sm:$0xff] }
 0x25d   :  { %3209 = vmatpush1.bf16.msra.mxu1 %v10032_v38  ;;  %v559_v38 = vld [vmem:[#allocation5 + $0xb38] sm:$0xff] }
 0x25e   :  { %3210 = vmatprep.subr.bf16.mxu1 %v10041_v41  ;;  %v3458_v41 = vld [vmem:[#allocation8 + $0x4a0] sm:$0xff]  ;;  %v10097_v21 = vcombine.high %v555_v37, %v559_v38 }
 0x25f   :  { %6445 = vmatpush1.bf16.msra.mxu0 %v10214_v40  ;;  %v3454_v40 = vld [vmem:[#allocation8 + $0x480] sm:$0xff] }
 0x260   :  { %6446 = vmatprep.subr.bf16.mxu0 %v10223_v42  ;;  %v10088_v42 = vcombine.low %v547_v28, %v551_v29  ;;  %v10279_v44 = vcombine.high %v3454_v40, %v3458_v41  ;;  %v10278_v49 = vcombine.low %v3454_v40, %v3458_v41  ;;  %v3335_v41 = vld [vmem:[#allocation8 + $0xc8] sm:$0xff] }
 0x261   :  { %3211 = vmatpush1.bf16.msra.mxu1 %v10040_v46  ;;  %v567_v46 = vld [vmem:[#allocation5 + $0xb78] sm:$0xff] }
 0x262   :  { %3212 = vmatprep.subr.bf16.mxu1 %v10049_v47  ;;  %v3466_v47 = vld [vmem:[#allocation8 + $0x4e0] sm:$0xff]  ;;  %v10105_v51 = vcombine.high %v563_v45, %v567_v46 }
 0x263   :  { %6447 = vmatpush1.bf16.msra.mxu0 %v10222_v0  ;;  %v3462_v0 = vld [vmem:[#allocation8 + $0x4c0] sm:$0xff] }
 0x264   :  { %6448 = vmatprep.subr.bf16.mxu0 %v10231_v50  ;;  %v10096_v50 = vcombine.low %v555_v37, %v559_v38  ;;  %v10287_v52 = vcombine.high %v3462_v0, %v3466_v47  ;;  %v10286_v61 = vcombine.low %v3462_v0, %v3466_v47  ;;  %v3343_v0 = vld [vmem:[#allocation8 + $0x108] sm:$0xff] }
 0x265   :  { %3213 = vmatpush1.bf16.msra.mxu1 %v10048_v56  ;;  %v575_v56 = vld [vmem:[#allocation5 + $0xbb8] sm:$0xff]  ;;  %v3347_v47 = vld [vmem:[#allocation8 + $0x128] sm:$0xff] }
 0x266   :  { %3214 = vmatprep.subr.bf16.mxu1 %v10057_v55  ;;  %v3474_v55 = vld [vmem:[#allocation8 + $0x520] sm:$0xff]  ;;  %v10113_v62 = vcombine.high %v571_v53, %v575_v56 }
 0x267   :  { %6449 = vmatpush1.bf16.msra.mxu0 %v10230_v54  ;;  %v3470_v54 = vld [vmem:[#allocation8 + $0x500] sm:$0xff] }
 0x268   :  { %6450 = vmatprep.subr.bf16.mxu0 %v10239_v57  ;;  %v10104_v57 = vcombine.low %v563_v45, %v567_v46  ;;  %v10295_v63 = vcombine.high %v3470_v54, %v3474_v55  ;;  %v10294_v6 = vcombine.low %v3470_v54, %v3474_v55  ;;  %v3351_v54 = vld [vmem:[#allocation8 + $0x148] sm:$0xff] }
 0x269   :  { %3215 = vmatpush1.bf16.msra.mxu1 %v10056_v1  ;;  %v583_v1 = vld [vmem:[#allocation5 + $0xbf8] sm:$0xff]  ;;  %v3355_v55 = vld [vmem:[#allocation8 + $0x168] sm:$0xff] }
 0x26a   :  { %3216 = vmatprep.subr.bf16.mxu1 %v10065_v4  ;;  %v3482_v4 = vld [vmem:[#allocation8 + $0x560] sm:$0xff]  ;;  %v10121_v48 = vcombine.high %v579_v59, %v583_v1 }
 0x26b   :  { %6451 = vmatpush1.bf16.msra.mxu0 %v10238_v2  ;;  %v3478_v2 = vld [vmem:[#allocation8 + $0x540] sm:$0xff] }
 0x26c   :  { %6452 = vmatprep.subr.bf16.mxu0 %v10247_v5  ;;  %v10112_v5 = vcombine.low %v571_v53, %v575_v56  ;;  %v10303_v8 = vcombine.high %v3478_v2, %v3482_v4  ;;  %v10302_v18 = vcombine.low %v3478_v2, %v3482_v4  ;;  %v10169_v53 = vcombine.high %v3343_v0, %v3347_v47 }
 0x26d   :  { %3217 = vmatpush1.bf16.msra.mxu1 %v10064_v11  ;;  %v3315_v11 = vld [vmem:[#allocation8 + $0x28] sm:$0xff]  ;;  %v10177_v2 = vcombine.high %v3351_v54, %v3355_v55 }
 0x26e   :  { %3218 = vmatprep.subr.bf16.mxu1 %v10073_v15  ;;  %v3490_v15 = vld [vmem:[#allocation8 + $0x5a0] sm:$0xff]  ;;  %v10137_v20 = vcombine.high %v3311_v9, %v3315_v11 }
 0x26f   :  { %6453 = vmatpush1.bf16.msra.mxu0 %v10246_v14  ;;  %v3486_v14 = vld [vmem:[#allocation8 + $0x580] sm:$0xff] }
 0x270   :  { %6454 = vmatprep.subr.bf16.mxu0 %v10255_v17  ;;  %v10120_v17 = vcombine.low %v579_v59, %v583_v1  ;;  %v10311_v26 = vcombine.high %v3486_v14, %v3490_v15  ;;  %v10310_v28 = vcombine.low %v3486_v14, %v3490_v15  ;;  %v12285_v59 = vsub.s32 3, %v12238_v13 }
 0x271   :  { %3219 = vmatpush1.bf16.msra.mxu1 %v10072_v60  ;;  %v3323_v60 = vld [vmem:[#allocation8 + $0x68] sm:$0xff]  ;;  %v10176_v14 = vcombine.low %v3351_v54, %v3355_v55 }
 0x272   :  { %3220 = vmatprep.subr.bf16.mxu1 %v10081_v32  ;;  %v3498_v32 = vld [vmem:[#allocation8 + $0x5e0] sm:$0xff]  ;;  %v10145_v29 = vcombine.high %v3319_v24, %v3323_v60 }
 0x273   :  { %6455 = vmatpush1.bf16.msra.mxu0 %v10254_v25  ;;  %v3494_v25 = vld [vmem:[#allocation8 + $0x5c0] sm:$0xff] }
 0x274   :  { %6467 = vmatprep.subr.bf16.mxu0 %v10263_v27  ;;  %v10136_v27 = vcombine.low %v3311_v9, %v3315_v11  ;;  %v10319_v30 = vcombine.high %v3494_v25, %v3498_v32  ;;  %v10318_v37 = vcombine.low %v3494_v25, %v3498_v32  ;;  %v3538_v9 = vld [vmem:[#allocation8 + $0x720] sm:$0xff]  ;;  %v609_v11 = vrot.slane %v12245_v23, %v12285_v59 }
 0x275   :  { %3221 = vmatpush1.bf16.msra.mxu1 %v10080_v33  ;;  %v3331_v33 = vld [vmem:[#allocation8 + $0xa8] sm:$0xff]  ;;  %v3542_v32 = vld [vmem:[#allocation8 + $0x740] sm:$0xff] }
 0x276   :  { %6457 = vmatmul.mubr.bf16.vlgmr.msra.gmra.mrb[16].mxu0 %v12261_v3  ;;  %3222 = vmatprep.subr.bf16.mxu1 %v10089_v35  ;;  %v3506_v35 = vld [vmem:[#allocation8 + $0x620] sm:$0xff]  ;;  %v10153_v38 = vcombine.high %v3327_v31, %v3331_v33 }
 0x277   :  { %6468 = vmatpush1.bf16.msra.mxu0 %v10262_v34  ;;  %v3502_v34 = vld [vmem:[#allocation8 + $0x600] sm:$0xff] }
 0x278   :  { %6469 = vmatprep.subr.bf16.mxu0 %v10271_v36  ;;  %v10144_v36 = vcombine.low %v3319_v24, %v3323_v60  ;;  %v10327_v40 = vcombine.high %v3502_v34, %v3506_v35  ;;  %v3371_v24 = vld [vmem:[#allocation8 + $0x1e8] sm:$0xff] }
 0x279   :  { %3223 = vmatpush1.bf16.msra.mxu1 %v10088_v42  ;;  %v3339_v42 = vld [vmem:[#allocation8 + $0xe8] sm:$0xff] }
 0x27a   :  { %3224 = vmatprep.subr.bf16.mxu1 %v10097_v21  ;;  %v3514_v21 = vld [vmem:[#allocation8 + $0x660] sm:$0xff]  ;;  %v10161_v45 = vcombine.high %v3335_v41, %v3339_v42 }
 0x27b   :  { %6470 = vmatpush1.bf16.msra.mxu0 %v10270_v43  ;;  %v3510_v43 = vld [vmem:[#allocation8 + $0x640] sm:$0xff] }
 0x27c   :  { %6471 = vmatprep.subr.bf16.mxu0 %v10279_v44  ;;  %v10152_v44 = vcombine.low %v3327_v31, %v3331_v33  ;;  %v10335_v46 = vcombine.high %v3510_v43, %v3514_v21 }
 0x27d   :  { %3225 = vmatpush1.bf16.msra.mxu1 %v10096_v50  ;;  %v3518_v50 = vld [vmem:[#allocation8 + $0x680] sm:$0xff] }
 0x27e   :  { %3226 = vmatprep.subr.bf16.mxu1 %v10105_v51  ;;  %v10160_v51 = vcombine.low %v3335_v41, %v3339_v42  ;;  %v3379_v41 = vld [vmem:[#allocation8 + $0x228] sm:$0xff] }
 0x27f   :  { %6472 = vmatpush1.bf16.msra.mxu0 %v10278_v49  ;;  %v3522_v49 = vld [vmem:[#allocation8 + $0x6a0] sm:$0xff] }
 0x280   :  { %6473 = vmatprep.subr.bf16.mxu0 %v10287_v52  ;;  %v10334_v52 = vcombine.low %v3510_v43, %v3514_v21  ;;  %v10343_v56 = vcombine.high %v3518_v50, %v3522_v49  ;;  %v10342_v1 = vcombine.low %v3518_v50, %v3522_v49  ;;  %v3550_v43 = vld [vmem:[#allocation8 + $0x780] sm:$0xff]  ;;  %v3383_v49 = vld [vmem:[#allocation8 + $0x248] sm:$0xff] }
 0x281   :  { %3227 = vmatpush1.bf16.msra.mxu1 %v10104_v57  ;;  %v3526_v57 = vld [vmem:[#allocation8 + $0x6c0] sm:$0xff] }
 0x282   :  { %3228 = vmatprep.subr.bf16.mxu1 %v10113_v62  ;;  %v12282_v62 = vsub.s32 2, %v12238_v13  ;;  %v3554_v21 = vld [vmem:[#allocation8 + $0x7a0] sm:$0xff] }
 0x283   :  { %6474 = vmatpush1.bf16.msra.mxu0 %v10286_v61  ;;  %v3530_v61 = vld [vmem:[#allocation8 + $0x6e0] sm:$0xff]  ;;  %v10375_v50 = vcombine.high %v3550_v43, %v3554_v21  ;;  %v10374_v54 = vcombine.low %v3550_v43, %v3554_v21 }
 0x284   :  { %6475 = vmatprep.subr.bf16.mxu0 %v10295_v63  ;;  %v10168_v63 = vcombine.low %v3343_v0, %v3347_v47  ;;  %v10351_v4 = vcombine.high %v3526_v57, %v3530_v61  ;;  %v10350_v15 = vcombine.low %v3526_v57, %v3530_v61  ;;  %v3391_v61 = vld [vmem:[#allocation8 + $0x288] sm:$0xff] }
 0x285   :  { %3229 = vmatpush1.bf16.msra.mxu1 %v10112_v5  ;;  %v3359_v5 = vld [vmem:[#allocation8 + $0x188] sm:$0xff] }
 0x286   :  { %3230 = vmatprep.subr.bf16.mxu1 %v10121_v48  ;;  %v605_v48 = vrot.slane %v12245_v23, %v12282_v62 }
 0x287   :  { %6476 = vmatpush1.bf16.msra.mxu0 %v10294_v6  ;;  %v3363_v6 = vld [vmem:[#allocation8 + $0x1a8] sm:$0xff] }
 0x288   :  { %6477 = vmatprep.subr.bf16.mxu0 %v10303_v8  ;;  %v3534_v8 = vld [vmem:[#allocation8 + $0x700] sm:$0xff]  ;;  %v10184_v31 = vcombine.low %v3359_v5, %v3363_v6 }
 0x289   :  { %3231 = vmatpush1.bf16.msra.mxu1 %v10120_v17  ;;  %v10185_v17 = vcombine.high %v3359_v5, %v3363_v6 }
 0x28a   :  { %6596 = vmatprep.subr.bf16.mxu1 %v10137_v20  ;;  %v10359_v20 = vcombine.high %v3534_v8, %v3538_v9 }
 0x28b   :  { %6478 = vmatpush1.bf16.msra.mxu0 %v10302_v18 }
 0x28c   :  { %6479 = vmatprep.subr.bf16.mxu0 %v10311_v26  ;;  %3233 = vmatmul.mubr.bf16.vlgmr.msra.gmra.mrb[8].mxu1 %v12206_v39  ;;  %v10326_v39 = vcombine.low %v3502_v34, %v3506_v35  ;;  %v3367_v26 = vld [vmem:[#allocation8 + $0x1c8] sm:$0xff] }
 0x28d   :  { %6597 = vmatpush1.bf16.msra.mxu1 %v10136_v27  ;;  %6628 = vmatprep.mubr.bf16.mxu1 %v12263_v7  ;;  %v3546_v27 = vld [vmem:[#allocation8 + $0x760] sm:$0xff]  ;;  %v10193_v35 = vcombine.high %v3367_v26, %v3371_v24 }
 0x28e   :  { %6598 = vmatprep.subr.bf16.mxu1 %v10145_v29 }
 0x28f   :  { %6480 = vmatpush1.bf16.msra.mxu0 %v10310_v28 }
 0x290   :  { %6481 = vmatprep.subr.bf16.mxu0 %v10319_v30  ;;  %v10358_v30 = vcombine.low %v3534_v8, %v3538_v9  ;;  %v3403_v8 = vld [vmem:[#allocation8 + $0x2e8] sm:$0xff] }
 0x291   :  { %6599 = vmatpush1.bf16.msra.mxu1 %v10144_v36 }
 0x292   :  { %6600 = vmatprep.subr.bf16.mxu1 %v10153_v38  ;;  %v10367_v38 = vcombine.high %v3542_v32, %v3546_v27 }
 0x293   :  { %6482 = vmatpush1.bf16.msra.mxu0 %v10318_v37 }
 0x294   :  { %6483 = vmatprep.subr.bf16.mxu0 %v10327_v40  ;;  %v3375_v40 = vld [vmem:[#allocation8 + $0x208] sm:$0xff] }
 0x295   :  { %6601 = vmatpush1.bf16.msra.mxu1 %v10152_v44  ;;  %v10201_v0 = vcombine.high %v3375_v40, %v3379_v41 }
 0x296   :  { %6602 = vmatprep.subr.bf16.mxu1 %v10161_v45 }
 0x297   :  { %6484 = vmatpush1.bf16.msra.mxu0 %v10326_v39 }
 0x298   :  { %6485 = vmatprep.subr.bf16.mxu0 %v10335_v46  ;;  %v10366_v46 = vcombine.low %v3542_v32, %v3546_v27 }
 0x299   :  { %6603 = vmatpush1.bf16.msra.mxu1 %v10160_v51  ;;  %v3387_v51 = vld [vmem:[#allocation8 + $0x268] sm:$0xff] }
 0x29a   :  { %6604 = vmatprep.subr.bf16.mxu1 %v10169_v53  ;;  %v3562_v53 = vld [vmem:[#allocation8 + $0x7e0] sm:$0xff]  ;;  %v10209_v55 = vcombine.high %v3383_v49, %v3387_v51 }
 0x29b   :  { %6486 = vmatpush1.bf16.msra.mxu0 %v10334_v52 }
 0x29c   :  { %6487 = vmatprep.subr.bf16.mxu0 %v10343_v56 }
 0x29d   :  { %6605 = vmatpush1.bf16.msra.mxu1 %v10168_v63  ;;  %v3395_v63 = vld [vmem:[#allocation8 + $0x2a8] sm:$0xff] }
 0x29e   :  { %6606 = vmatprep.subr.bf16.mxu1 %v10177_v2  ;;  %v3570_v2 = vld [vmem:[#allocation8 + $0x820] sm:$0xff]  ;;  %v10217_v6 = vcombine.high %v3391_v61, %v3395_v63 }
 0x29f   :  { %6488 = vmatpush1.bf16.msra.mxu0 %v10342_v1  ;;  %v2890_v18 = vpop.f32.mrb[4].mxu1  ;;  %v3566_v1 = vld [vmem:[#allocation8 + $0x800] sm:$0xff] }
 0x2a0   :  { %6489 = vmatprep.subr.bf16.mxu0 %v10351_v4  ;;  %v11013_v60 = vadd.f32 %v2890_v18, %v605_v48  ;;  %v2892_v25 = vpop.f32.mrb[5].mxu1  ;;  %v10208_v4 = vcombine.low %v3383_v49, %v3387_v51  ;;  %v10391_v9 = vcombine.high %v3566_v1, %v3570_v2  ;;  %v10390_v18 = vcombine.low %v3566_v1, %v3570_v2  ;;  %v3439_v49 = vld [vmem:[#allocation8 + $0x408] sm:$0xff]  ;;  %v3622_v2 = vld [vmem:[#allocation8 + $0x9c0] sm:$0xff] }
 0x2a1   :  { %v11015_v28 = vadd.f32 %v2892_v25, %v609_v11  ;;  %v2894_v29 = vpop.f32.mrb[6].mxu1  ;;  %6607 = vmatpush1.bf16.msra.mxu1 %v10176_v14  ;;  %v3578_v14 = vld [vmem:[#allocation8 + $0x860] sm:$0xff]  ;;  %v3443_v51 = vld [vmem:[#allocation8 + $0x428] sm:$0xff] }
 0x2a2   :  { %v11014_v23 = vadd.f32 %v11013_v60, %v12265_v10  ;;  %v11017_v33 = vadd.f32 %v2894_v29, %v605_v48  ;;  %v2896_v34 = vpop.f32.mrb[7].mxu1  ;;  %6608 = vmatprep.subr.bf16.mxu1 %v10185_v17  ;;  %v10192_v10 = vcombine.low %v3367_v26, %v3371_v24  ;;  %v3399_v48 = vld [vmem:[#allocation8 + $0x2c8] sm:$0xff]  ;;  %v3582_v60 = vld [vmem:[#allocation8 + $0x880] sm:$0xff] }
 0x2a3   :  { %6490 = vmatpush1.bf16.msra.mxu0 %v10350_v15  ;;  %v11016_v36 = vadd.f32 %v11015_v28, %v12269_v12  ;;  %v11019_v37 = vadd.f32 %v2896_v34, %v609_v11  ;;  %v3574_v11 = vld [vmem:[#allocation8 + $0x840] sm:$0xff]  ;;  %v10216_v15 = vcombine.low %v3391_v61, %v3395_v63  ;;  %v10225_v17 = vcombine.high %v3399_v48, %v3403_v8  ;;  %v3411_v26 = vld [vmem:[#allocation8 + $0x328] sm:$0xff] }
 0x2a4   :  { %6491 = vmatprep.subr.bf16.mxu0 %v10359_v20  ;;  %v11018_v42 = vadd.f32 %v11017_v33, %v12272_v16  ;;  %v3288_v39 = vmax.f32 %v11014_v23, 0.0  ;;  %v3558_v16 = vld [vmem:[#allocation8 + $0x7c0] sm:$0xff]  ;;  %v3407_v20 = vld [vmem:[#allocation8 + $0x308] sm:$0xff]  ;;  %v10399_v24 = vcombine.high %v3574_v11, %v3578_v14  ;;  %v10224_v32 = vcombine.low %v3399_v48, %v3403_v8 }
 0x2a5   :  { %v11020_v44 = vadd.f32 %v11019_v37, %v12274_v22  ;;  %6609 = vmatpush1.bf16.msra.mxu1 %v10184_v31  ;;  %v3289_v12 = vmax.f32 %v11016_v36, 0.0  ;;  %v10200_v22 = vcombine.low %v3375_v40, %v3379_v41  ;;  %v10383_v57 = vcombine.high %v3558_v16, %v3562_v53  ;;  %v3586_v25 = vld [vmem:[#allocation8 + $0x8a0] sm:$0xff]  ;;  %v3415_v29 = vld [vmem:[#allocation8 + $0x348] sm:$0xff] }
 0x2a6   :  { %v3296_v45 = vmax.f32 %v11018_v42, 0.0  ;;  %6610 = vmatprep.subr.bf16.mxu1 %v10193_v35  ;;  %v10382_v5 = vcombine.low %v3558_v16, %v3562_v53  ;;  %v10233_v27 = vcombine.high %v3407_v20, %v3411_v26  ;;  %v10398_v28 = vcombine.low %v3574_v11, %v3578_v14  ;;  %v3590_v23 = vld [vmem:[#allocation8 + $0x8c0] sm:$0xff]  ;;  %v3423_v37 = vld [vmem:[#allocation8 + $0x388] sm:$0xff] }
 0x2a7   :  { %6492 = vmatpush1.bf16.msra.mxu0 %v10358_v30  ;;  %v3297_v47 = vmax.f32 %v11020_v44, 0.0  ;;  %v3419_v30 = vld [vmem:[#allocation8 + $0x368] sm:$0xff]  ;;  %v10407_v31 = vcombine.high %v3582_v60, %v3586_v25  ;;  %v3594_v33 = vld [vmem:[#allocation8 + $0x8e0] sm:$0xff]  ;;  %v10232_v34 = vcombine.low %v3407_v20, %v3411_v26  ;;  %v10406_v36 = vcombine.low %v3582_v60, %v3586_v25 }
 0x2a8   :  { %6493 = vmatprep.subr.bf16.mxu0 %v10367_v38  ;;  %v12295_v52 = vpack.c.bf16 %v3296_v45, %v3288_v39  ;;  %v10241_v35 = vcombine.high %v3415_v29, %v3419_v30  ;;  %v3427_v38 = vld [vmem:[#allocation8 + $0x3a8] sm:$0xff]  ;;  %v10415_v40 = vcombine.high %v3590_v23, %v3594_v33  ;;  %v3598_v41 = vld [vmem:[#allocation8 + $0x900] sm:$0xff]  ;;  %v10240_v43 = vcombine.low %v3415_v29, %v3419_v30 }
 0x2a9   :  { %v12297_v56 = vpack.c.bf16 %v3297_v47, %v3289_v12  ;;  %6611 = vmatpush1.bf16.msra.mxu1 %v10192_v10  ;;  %v3602_v42 = vld [vmem:[#allocation8 + $0x920] sm:$0xff]  ;;  %v10249_v21 = vcombine.high %v3423_v37, %v3427_v38  ;;  %v10414_v44 = vcombine.low %v3590_v23, %v3594_v33  ;;  %v3431_v10 = vld [vmem:[#allocation8 + $0x3c8] sm:$0xff]  ;;  %v10248_v12 = vcombine.low %v3423_v37, %v3427_v38 }
 0x2aa   :  { %6612 = vmatprep.subr.bf16.mxu1 %v10201_v0  ;;  %v3435_v39 = vld [vmem:[#allocation8 + $0x3e8] sm:$0xff]  ;;  %v10423_v45 = vcombine.high %v3598_v41, %v3602_v42  ;;  %v3610_v0 = vld [vmem:[#allocation8 + $0x960] sm:$0xff] }
 0x2ab   :  { %6494 = vmatpush1.bf16.msra.mxu0 %v10366_v46  ;;  %6499 = vmatprep.mubr.bf16.mxu0 %v12297_v56  ;;  %v3606_v46 = vld [vmem:[#allocation8 + $0x940] sm:$0xff]  ;;  %v10257_v47 = vcombine.high %v3431_v10, %v3435_v39  ;;  %v3447_v61 = vld [vmem:[#allocation8 + $0x448] sm:$0xff] }
 0x2ac   :  { %6495 = vmatprep.subr.bf16.mxu0 %v10375_v50  ;;  %v10422_v50 = vcombine.low %v3598_v41, %v3602_v42  ;;  %v10431_v16 = vcombine.high %v3606_v46, %v3610_v0  ;;  %v3614_v53 = vld [vmem:[#allocation8 + $0x980] sm:$0xff]  ;;  %v3451_v63 = vld [vmem:[#allocation8 + $0x468] sm:$0xff] }
 0x2ad   :  { %6613 = vmatpush1.bf16.msra.mxu1 %v10200_v22  ;;  %v3618_v22 = vld [vmem:[#allocation8 + $0x9a0] sm:$0xff]  ;;  %v3455_v8 = vld [vmem:[#allocation8 + $0x488] sm:$0xff] }
 0x2ae   :  { %6614 = vmatprep.subr.bf16.mxu1 %v10209_v55  ;;  %v10265_v55 = vcombine.high %v3439_v49, %v3443_v51  ;;  %v10439_v1 = vcombine.high %v3614_v53, %v3618_v22  ;;  %v10438_v48 = vcombine.low %v3614_v53, %v3618_v22  ;;  %v3630_v14 = vld [vmem:[#allocation8 + $0xa00] sm:$0xff]  ;;  %v3463_v26 = vld [vmem:[#allocation8 + $0x4c8] sm:$0xff] }
 0x2af   :  { %6496 = vmatpush1.bf16.msra.mxu0 %v10374_v54  ;;  %v10256_v54 = vcombine.low %v3431_v10, %v3435_v39  ;;  %v3638_v25 = vld [vmem:[#allocation8 + $0xa40] sm:$0xff]  ;;  %v3471_v30 = vld [vmem:[#allocation8 + $0x508] sm:$0xff] }
 0x2b0   :  { %6497 = vmatprep.subr.bf16.mxu0 %v10383_v57  ;;  %v10430_v57 = vcombine.low %v3606_v46, %v3610_v0  ;;  %v3646_v33 = vld [vmem:[#allocation8 + $0xa80] sm:$0xff]  ;;  %v3479_v38 = vld [vmem:[#allocation8 + $0x548] sm:$0xff] }
 0x2b1   :  { %6615 = vmatpush1.bf16.msra.mxu1 %v10208_v4  ;;  %v3626_v4 = vld [vmem:[#allocation8 + $0x9e0] sm:$0xff]  ;;  %v3487_v39 = vld [vmem:[#allocation8 + $0x588] sm:$0xff] }
 0x2b2   :  { %6616 = vmatprep.subr.bf16.mxu1 %v10217_v6  ;;  %v10273_v6 = vcombine.high %v3447_v61, %v3451_v63  ;;  %v10447_v11 = vcombine.high %v3622_v2, %v3626_v4  ;;  %v10446_v20 = vcombine.low %v3622_v2, %v3626_v4  ;;  %v3654_v42 = vld [vmem:[#allocation8 + $0xac0] sm:$0xff] }
 0x2b3   :  { %6498 = vmatpush1.bf16.msra.mxu0 %v10382_v5  ;;  %v10264_v5 = vcombine.low %v3439_v49, %v3443_v51  ;;  %v3662_v0 = vld [vmem:[#allocation8 + $0xb00] sm:$0xff]  ;;  %v3495_v51 = vld [vmem:[#allocation8 + $0x5c8] sm:$0xff] }
 0x2b4   :  { %6510 = vmatprep.subr.bf16.mxu0 %v10391_v9  ;;  %v3459_v9 = vld [vmem:[#allocation8 + $0x4a8] sm:$0xff]  ;;  %v3670_v22 = vld [vmem:[#allocation8 + $0xb40] sm:$0xff] }
 0x2b5   :  { %6617 = vmatpush1.bf16.msra.mxu1 %v10216_v15  ;;  %v3634_v15 = vld [vmem:[#allocation8 + $0xa20] sm:$0xff] }
 0x2b6   :  { %6500 = vmatmul.mubr.bf16.vlgmr.msra.gmra.mrb[16].mxu0 %v12295_v52  ;;  %6618 = vmatprep.subr.bf16.mxu1 %v10225_v17  ;;  %v10272_v17 = vcombine.low %v3447_v61, %v3451_v63  ;;  %v10455_v60 = vcombine.high %v3630_v14, %v3634_v15  ;;  %v10454_v29 = vcombine.low %v3630_v14, %v3634_v15  ;;  %v3503_v63 = vld [vmem:[#allocation8 + $0x608] sm:$0xff]  ;;  %v3678_v4 = vld [vmem:[#allocation8 + $0xb80] sm:$0xff] }
 0x2b7   :  { %6511 = vmatpush1.bf16.msra.mxu0 %v10390_v18  ;;  %v10281_v18 = vcombine.high %v3455_v8, %v3459_v9  ;;  %v3686_v15 = vld [vmem:[#allocation8 + $0xbc0] sm:$0xff] }
 0x2b8   :  { %6512 = vmatprep.subr.bf16.mxu0 %v10399_v24  ;;  %v3467_v24 = vld [vmem:[#allocation8 + $0x4e8] sm:$0xff] }
 0x2b9   :  { %6619 = vmatpush1.bf16.msra.mxu1 %v10224_v32  ;;  %v3642_v32 = vld [vmem:[#allocation8 + $0xa60] sm:$0xff] }
 0x2ba   :  { %6620 = vmatprep.subr.bf16.mxu1 %v10233_v27  ;;  %v10280_v27 = vcombine.low %v3455_v8, %v3459_v9  ;;  %v10463_v23 = vcombine.high %v3638_v25, %v3642_v32  ;;  %v10462_v37 = vcombine.low %v3638_v25, %v3642_v32  ;;  %v3511_v9 = vld [vmem:[#allocation8 + $0x648] sm:$0xff]  ;;  %v12303_v32 = vld [vmem:[#allocation8 + $0xc00] sm:$0xff] }
 0x2bb   :  { %6513 = vmatpush1.bf16.msra.mxu0 %v10398_v28  ;;  %v10289_v28 = vcombine.high %v3463_v26, %v3467_v24 }
 0x2bc   :  { %6514 = vmatprep.subr.bf16.mxu0 %v10407_v31  ;;  %v3475_v31 = vld [vmem:[#allocation8 + $0x528] sm:$0xff] }
 0x2bd   :  { %6621 = vmatpush1.bf16.msra.mxu1 %v10232_v34  ;;  %v3650_v34 = vld [vmem:[#allocation8 + $0xaa0] sm:$0xff] }
 0x2be   :  { %6622 = vmatprep.subr.bf16.mxu1 %v10241_v35  ;;  %v10288_v35 = vcombine.low %v3463_v26, %v3467_v24  ;;  %v10471_v41 = vcombine.high %v3646_v33, %v3650_v34  ;;  %v10470_v10 = vcombine.low %v3646_v33, %v3650_v34  ;;  %v3519_v24 = vld [vmem:[#allocation8 + $0x688] sm:$0xff] }
 0x2bf   :  { %6515 = vmatpush1.bf16.msra.mxu0 %v10406_v36  ;;  %v10297_v36 = vcombine.high %v3471_v30, %v3475_v31 }
 0x2c0   :  { %6516 = vmatprep.subr.bf16.mxu0 %v10415_v40  ;;  %v3483_v40 = vld [vmem:[#allocation8 + $0x568] sm:$0xff] }
 0x2c1   :  { %6623 = vmatpush1.bf16.msra.mxu1 %v10240_v43  ;;  %v3658_v43 = vld [vmem:[#allocation8 + $0xae0] sm:$0xff] }
 0x2c2   :  { %6624 = vmatprep.subr.bf16.mxu1 %v10249_v21  ;;  %v10296_v21 = vcombine.low %v3471_v30, %v3475_v31  ;;  %v10479_v46 = vcombine.high %v3654_v42, %v3658_v43  ;;  %v10478_v49 = vcombine.low %v3654_v42, %v3658_v43  ;;  %v3527_v31 = vld [vmem:[#allocation8 + $0x6c8] sm:$0xff] }
 0x2c3   :  { %6517 = vmatpush1.bf16.msra.mxu0 %v10414_v44  ;;  %v10305_v44 = vcombine.high %v3479_v38, %v3483_v40  ;;  %v3547_v42 = vld [vmem:[#allocation8 + $0x768] sm:$0xff] }
 0x2c4   :  { %6518 = vmatprep.subr.bf16.mxu0 %v10423_v45  ;;  %v3491_v45 = vld [vmem:[#allocation8 + $0x5a8] sm:$0xff] }
 0x2c5   :  { %6625 = vmatpush1.bf16.msra.mxu1 %v10248_v12  ;;  %v3666_v12 = vld [vmem:[#allocation8 + $0xb20] sm:$0xff] }
 0x2c6   :  { %6626 = vmatprep.subr.bf16.mxu1 %v10257_v47  ;;  %v10304_v47 = vcombine.low %v3479_v38, %v3483_v40  ;;  %v10487_v53 = vcombine.high %v3662_v0, %v3666_v12  ;;  %v10486_v61 = vcombine.low %v3662_v0, %v3666_v12 }
 0x2c7   :  { %6519 = vmatpush1.bf16.msra.mxu0 %v10422_v50  ;;  %v10313_v50 = vcombine.high %v3487_v39, %v3491_v45 }
 0x2c8   :  { %6520 = vmatprep.subr.bf16.mxu0 %v10431_v16  ;;  %v3499_v16 = vld [vmem:[#allocation8 + $0x5e8] sm:$0xff] }
 0x2c9   :  { %6627 = vmatpush1.bf16.msra.mxu1 %v10256_v54  ;;  %v3674_v54 = vld [vmem:[#allocation8 + $0xb60] sm:$0xff] }
 0x2ca   :  { %6639 = vmatprep.subr.bf16.mxu1 %v10265_v55  ;;  %v10312_v55 = vcombine.low %v3487_v39, %v3491_v45  ;;  %v10495_v2 = vcombine.high %v3670_v22, %v3674_v54  ;;  %v10494_v8 = vcombine.low %v3670_v22, %v3674_v54  ;;  %v3551_v39 = vld [vmem:[#allocation8 + $0x788] sm:$0xff] }
 0x2cb   :  { %6521 = vmatpush1.bf16.msra.mxu0 %v10430_v57  ;;  %v10321_v57 = vcombine.high %v3495_v51, %v3499_v16  ;;  %v3555_v45 = vld [vmem:[#allocation8 + $0x7a8] sm:$0xff] }
 0x2cc   :  { %6522 = vmatprep.subr.bf16.mxu0 %v10439_v1  ;;  %6629 = vmatmul.mubr.bf16.vlgmr.msra.gmra.mrb[12].mxu1 %v12261_v3  ;;  %v3507_v1 = vld [vmem:[#allocation8 + $0x628] sm:$0xff]  ;;  %v10376_v54 = vcombine.low %v3551_v39, %v3555_v45 }
 0x2cd   :  { %6640 = vmatpush1.bf16.msra.mxu1 %v10264_v5  ;;  %6671 = vmatprep.mubr.bf16.mxu1 %v12297_v56  ;;  %v3682_v5 = vld [vmem:[#allocation8 + $0xba0] sm:$0xff] }
 0x2ce   :  { %6641 = vmatprep.subr.bf16.mxu1 %v10273_v6  ;;  %v10320_v6 = vcombine.low %v3495_v51, %v3499_v16  ;;  %v10503_v14 = vcombine.high %v3678_v4, %v3682_v5  ;;  %v10502_v26 = vcombine.low %v3678_v4, %v3682_v5  ;;  %v3563_v51 = vld [vmem:[#allocation8 + $0x7e8] sm:$0xff] }
 0x2cf   :  { %6523 = vmatpush1.bf16.msra.mxu0 %v10438_v48  ;;  %v10329_v48 = vcombine.high %v3503_v63, %v3507_v1  ;;  %v3571_v4 = vld [vmem:[#allocation8 + $0x828] sm:$0xff] }
 0x2d0   :  { %6524 = vmatprep.subr.bf16.mxu0 %v10447_v11  ;;  %v3515_v11 = vld [vmem:[#allocation8 + $0x668] sm:$0xff] }
 0x2d1   :  { %6642 = vmatpush1.bf16.msra.mxu1 %v10272_v17  ;;  %v3690_v17 = vld [vmem:[#allocation8 + $0xbe0] sm:$0xff] }
 0x2d2   :  { %6643 = vmatprep.subr.bf16.mxu1 %v10281_v18  ;;  %v10328_v18 = vcombine.low %v3503_v63, %v3507_v1  ;;  %v10511_v25 = vcombine.high %v3686_v15, %v3690_v17  ;;  %v10510_v30 = vcombine.low %v3686_v15, %v3690_v17  ;;  %v3575_v15 = vld [vmem:[#allocation8 + $0x848] sm:$0xff] }
 0x2d3   :  { %6525 = vmatpush1.bf16.msra.mxu0 %v10446_v20  ;;  %v10337_v20 = vcombine.high %v3511_v9, %v3515_v11 }
 0x2d4   :  { %6526 = vmatprep.subr.bf16.mxu0 %v10455_v60  ;;  %v3523_v60 = vld [vmem:[#allocation8 + $0x6a8] sm:$0xff] }
 0x2d5   :  { %6644 = vmatpush1.bf16.msra.mxu1 %v10280_v27  ;;  %v12305_v27 = vld [vmem:[#allocation8 + $0xc20] sm:$0xff]  ;;  %v10344_v34 = vcombine.low %v3519_v24, %v3523_v60 }
 0x2d6   :  { %6645 = vmatprep.subr.bf16.mxu1 %v10289_v28  ;;  %v10336_v28 = vcombine.low %v3511_v9, %v3515_v11  ;;  %v10519_v33 = vcombine.high %v12303_v32, %v12305_v27 }
 0x2d7   :  { %6527 = vmatpush1.bf16.msra.mxu0 %v10454_v29  ;;  %v10345_v29 = vcombine.high %v3519_v24, %v3523_v60  ;;  %v10518_v60 = vcombine.low %v12303_v32, %v12305_v27 }
 0x2d8   :  { %6528 = vmatprep.subr.bf16.mxu0 %v10463_v23  ;;  %v3531_v23 = vld [vmem:[#allocation8 + $0x6e8] sm:$0xff] }
 0x2d9   :  { %6646 = vmatpush1.bf16.msra.mxu1 %v10288_v35  ;;  %v10353_v35 = vcombine.high %v3527_v31, %v3531_v23  ;;  %v10352_v38 = vcombine.low %v3527_v31, %v3531_v23  ;;  %v3710_v23 = vld [vmem:[#allocation8 + $0xc80] sm:$0xff] }
 0x2da   :  { %6647 = vmatprep.subr.bf16.mxu1 %v10297_v36  ;;  %v3535_v36 = vld [vmem:[#allocation8 + $0x708] sm:$0xff] }
 0x2db   :  { %6529 = vmatpush1.bf16.msra.mxu0 %v10462_v37  ;;  %v3539_v37 = vld [vmem:[#allocation8 + $0x728] sm:$0xff] }
 0x2dc   :  { %6530 = vmatprep.subr.bf16.mxu0 %v10471_v41  ;;  %v10361_v40 = vcombine.high %v3535_v36, %v3539_v37  ;;  %v3543_v41 = vld [vmem:[#allocation8 + $0x748] sm:$0xff]  ;;  %v10360_v43 = vcombine.low %v3535_v36, %v3539_v37 }
 0x2dd   :  { %6648 = vmatpush1.bf16.msra.mxu1 %v10296_v21  ;;  %v612_v21 = vsub.s32 4, %v12238_v13  ;;  %v10368_v12 = vcombine.low %v3543_v41, %v3547_v42  ;;  %v3587_v36 = vld [vmem:[#allocation8 + $0x8a8] sm:$0xff] }
 0x2de   :  { %6649 = vmatprep.subr.bf16.mxu1 %v10305_v44  ;;  %v616_v44 = vsub.s32 5, %v12238_v13 }
 0x2df   :  { %6531 = vmatpush1.bf16.msra.mxu0 %v10470_v10  ;;  %v10369_v10 = vcombine.high %v3543_v41, %v3547_v42  ;;  %v3718_v41 = vld [vmem:[#allocation8 + $0xcc0] sm:$0xff] }
 0x2e0   :  { %6532 = vmatprep.subr.bf16.mxu0 %v10479_v46  ;;  %v12311_v46 = vld [vmem:[#allocation7] sm:$0xff]  ;;  %v3722_v42 = vld [vmem:[#allocation8 + $0xce0] sm:$0xff] }
 0x2e1   :  { %6650 = vmatpush1.bf16.msra.mxu1 %v10304_v47  ;;  %v613_v0 = vrot.slane %v12311_v46, %v612_v21  ;;  %v617_v47 = vrot.slane %v12311_v46, %v616_v44 }
 0x2e2   :  { %6651 = vmatprep.subr.bf16.mxu1 %v10313_v50  ;;  %v10377_v50 = vcombine.high %v3551_v39, %v3555_v45 }
 0x2e3   :  { %6533 = vmatpush1.bf16.msra.mxu0 %v10478_v49  ;;  %v3559_v49 = vld [vmem:[#allocation8 + $0x7c8] sm:$0xff] }
 0x2e4   :  { %6534 = vmatprep.subr.bf16.mxu0 %v10487_v53 }
 0x2e5   :  { %6652 = vmatpush1.bf16.msra.mxu1 %v10312_v55 }
 0x2e6   :  { %6653 = vmatprep.subr.bf16.mxu1 %v10321_v57 }
 0x2e7   :  { %6535 = vmatpush1.bf16.msra.mxu0 %v10486_v61  ;;  %v10385_v61 = vcombine.high %v3559_v49, %v3563_v51 }
 0x2e8   :  { %6536 = vmatprep.subr.bf16.mxu0 %v10495_v2  ;;  %v3567_v2 = vld [vmem:[#allocation8 + $0x808] sm:$0xff] }
 0x2e9   :  { %6654 = vmatpush1.bf16.msra.mxu1 %v10320_v6 }
 0x2ea   :  { %6655 = vmatprep.subr.bf16.mxu1 %v10329_v48 }
 0x2eb   :  { %6537 = vmatpush1.bf16.msra.mxu0 %v10494_v8  ;;  %v10384_v8 = vcombine.low %v3559_v49, %v3563_v51  ;;  %v3599_v49 = vld [vmem:[#allocation8 + $0x908] sm:$0xff] }
 0x2ec   :  { %6538 = vmatprep.subr.bf16.mxu0 %v10503_v14  ;;  %v10393_v14 = vcombine.high %v3567_v2, %v3571_v4  ;;  %v3603_v51 = vld [vmem:[#allocation8 + $0x928] sm:$0xff] }
 0x2ed   :  { %6656 = vmatpush1.bf16.msra.mxu1 %v10328_v18  ;;  %v3579_v18 = vld [vmem:[#allocation8 + $0x868] sm:$0xff] }
 0x2ee   :  { %6657 = vmatprep.subr.bf16.mxu1 %v10337_v20  ;;  %v3702_v20 = vld [vmem:[#allocation8 + $0xc40] sm:$0xff]  ;;  %v10400_v37 = vcombine.low %v3575_v15, %v3579_v18 }
 0x2ef   :  { %6539 = vmatpush1.bf16.msra.mxu0 %v10502_v26  ;;  %v3706_v26 = vld [vmem:[#allocation8 + $0xc60] sm:$0xff] }
 0x2f0   :  { %6540 = vmatprep.subr.bf16.mxu0 %v10511_v25  ;;  %v10527_v31 = vcombine.high %v3702_v20, %v3706_v26  ;;  %v10526_v27 = vcombine.low %v3702_v20, %v3706_v26  ;;  %v3750_v20 = vld [vmem:[#allocation8 + $0xdc0] sm:$0xff] }
 0x2f1   :  { %6658 = vmatpush1.bf16.msra.mxu1 %v10336_v28  ;;  %v10392_v28 = vcombine.low %v3567_v2, %v3571_v4  ;;  %v10424_v2 = vcombine.low %v3599_v49, %v3603_v51  ;;  %v3754_v26 = vld [vmem:[#allocation8 + $0xde0] sm:$0xff] }
 0x2f2   :  { %6659 = vmatprep.subr.bf16.mxu1 %v10345_v29 }
 0x2f3   :  { %6541 = vmatpush1.bf16.msra.mxu0 %v10510_v30  ;;  %v10401_v30 = vcombine.high %v3575_v15, %v3579_v18 }
 0x2f4   :  { %6553 = vmatprep.subr.bf16.mxu0 %v10519_v33  ;;  %v3714_v33 = vld [vmem:[#allocation8 + $0xca0] sm:$0xff] }
 0x2f5   :  { %6660 = vmatpush1.bf16.msra.mxu1 %v10344_v34  ;;  %v10534_v39 = vcombine.low %v3710_v23, %v3714_v33 }
 0x2f6   :  { %6661 = vmatprep.subr.bf16.mxu1 %v10353_v35  ;;  %v3583_v35 = vld [vmem:[#allocation8 + $0x888] sm:$0xff] }
 0x2f7   :  { %v10408_v45 = vcombine.low %v3583_v35, %v3587_v36 }
 0x2f9   :  { %6662 = vmatpush1.bf16.msra.mxu1 %v10352_v38  ;;  %v10535_v38 = vcombine.high %v3710_v23, %v3714_v33  ;;  %v10575_v23 = vcombine.high %v3750_v20, %v3754_v26 }
 0x2fa   :  { %6663 = vmatprep.subr.bf16.mxu1 %v10361_v40  ;;  %v10409_v40 = vcombine.high %v3583_v35, %v3587_v36  ;;  %v3758_v35 = vld [vmem:[#allocation8 + $0xe00] sm:$0xff] }
 0x2fb   :  { %v3762_v36 = vld [vmem:[#allocation8 + $0xe20] sm:$0xff] }
 0x2fd   :  { %6664 = vmatpush1.bf16.msra.mxu1 %v10360_v43  ;;  %v3591_v43 = vld [vmem:[#allocation8 + $0x8c8] sm:$0xff] }
 0x2fe   :  { %6665 = vmatprep.subr.bf16.mxu1 %v10369_v10  ;;  %v3595_v10 = vld [vmem:[#allocation8 + $0x8e8] sm:$0xff] }
 0x301   :  { %v3105_v16 = vpop.f32.mrb[8].mxu0  ;;  %6666 = vmatpush1.bf16.msra.mxu1 %v10368_v12  ;;  %v10417_v12 = vcombine.high %v3591_v43, %v3595_v10 }
 0x302   :  { %v11021_v53 = vadd.f32 %v3105_v16, %v613_v0  ;;  %v3107_v22 = vpop.f32.mrb[9].mxu0  ;;  %6667 = vmatprep.subr.bf16.mxu1 %v10377_v50  ;;  %v3730_v50 = vld [vmem:[#allocation8 + $0xd20] sm:$0xff]  ;;  %v10542_v16 = vcombine.low %v3718_v41, %v3722_v42 }
 0x303   :  { %v11022_v55 = vadd.f32 %v3107_v22, %v617_v47  ;;  %v3109_v57 = vpop.f32.mrb[10].mxu0 }
 0x304   :  { %v11023_v63 = vadd.f32 %v3109_v57, %v613_v0  ;;  %v3111_v1 = vpop.f32.mrb[11].mxu0  ;;  %v3290_v6 = vmax.f32 %v11021_v53, 0.0  ;;  %v10543_v0 = vcombine.high %v3718_v41, %v3722_v42  ;;  %v10416_v53 = vcombine.low %v3591_v43, %v3595_v10  ;;  %v3738_v57 = vld [vmem:[#allocation8 + $0xd60] sm:$0xff] }
 0x305   :  { %v11024_v5 = vadd.f32 %v3111_v1, %v617_v47  ;;  %6668 = vmatpush1.bf16.msra.mxu1 %v10376_v54  ;;  %v3291_v9 = vmax.f32 %v11022_v55, 0.0  ;;  %v3726_v47 = vld [vmem:[#allocation8 + $0xd00] sm:$0xff]  ;;  %v10425_v54 = vcombine.high %v3599_v49, %v3603_v51  ;;  %v10583_v41 = vcombine.high %v3758_v35, %v3762_v36 }
 0x306   :  { %v3298_v48 = vmax.f32 %v11023_v63, 0.0  ;;  %6669 = vmatprep.subr.bf16.mxu1 %v10385_v61  ;;  %v10551_v22 = vcombine.high %v3726_v47, %v3730_v50  ;;  %v3734_v55 = vld [vmem:[#allocation8 + $0xd40] sm:$0xff]  ;;  %v3607_v61 = vld [vmem:[#allocation8 + $0x948] sm:$0xff]  ;;  %v10550_v1 = vcombine.low %v3726_v47, %v3730_v50 }
 0x307   :  { %v3299_v11 = vmax.f32 %v11024_v5, 0.0  ;;  %v3611_v63 = vld [vmem:[#allocation8 + $0x968] sm:$0xff]  ;;  %v10559_v4 = vcombine.high %v3734_v55, %v3738_v57  ;;  %v3766_v43 = vld [vmem:[#allocation8 + $0xe40] sm:$0xff] }
 0x308   :  { %v12319_v17 = vpack.c.bf16 %v3298_v48, %v3290_v6  ;;  %v10433_v5 = vcombine.high %v3607_v61, %v3611_v63  ;;  %v3742_v6 = vld [vmem:[#allocation8 + $0xd80] sm:$0xff] }
 0x309   :  { %v12321_v24 = vpack.c.bf16 %v3299_v11, %v3291_v9  ;;  %v12325_v25 = vpop.f32.mrb[12].mxu0  ;;  %6670 = vmatpush1.bf16.msra.mxu1 %v10384_v8  ;;  %v3746_v48 = vld [vmem:[#allocation8 + $0xda0] sm:$0xff]  ;;  %v3615_v8 = vld [vmem:[#allocation8 + $0x988] sm:$0xff]  ;;  %v10558_v11 = vcombine.low %v3734_v55, %v3738_v57 }
 0x30a   :  { %v12327_v29 = vpop.f32.mrb[13].mxu0  ;;  %6682 = vmatprep.subr.bf16.mxu1 %v10393_v14  ;;  %v3619_v9 = vld [vmem:[#allocation8 + $0x9a8] sm:$0xff]  ;;  %v10432_v14 = vcombine.low %v3607_v61, %v3611_v63  ;;  %v10567_v15 = vcombine.high %v3742_v6, %v3746_v48  ;;  %v3770_v10 = vld [vmem:[#allocation8 + $0xe60] sm:$0xff] }
 0x30b   :  { %6542 = vmatprep.mubr.bf16.mxu0 %v12321_v24  ;;  %v12330_v34 = vpop.f32.mrb[14].mxu0  ;;  %v10441_v18 = vcombine.high %v3615_v8, %v3619_v9  ;;  %v10591_v47 = vcombine.high %v3766_v43, %v3770_v10  ;;  %v3774_v49 = vld [vmem:[#allocation8 + $0xe80] sm:$0xff] }
 0x30c   :  { %6543 = vmatmul.mubr.bf16.vlgmr.msra.gmra.mrb[16].mxu0 %v12319_v17  ;;  %v12333_v32 = vpop.f32.mrb[15].mxu0  ;;  %6672 = vmatmul.mubr.bf16.vlgmr.msra.gmra.mrb[12].mxu1 %v12295_v52  ;;  %v3778_v51 = vld [vmem:[#allocation8 + $0xea0] sm:$0xff] }
 0x30d   :  { %6554 = vmatpush1.bf16.msra.mxu0 %v10518_v60  ;;  %6683 = vmatpush1.bf16.msra.mxu1 %v10392_v28  ;;  %v3623_v60 = vld [vmem:[#allocation8 + $0x9c8] sm:$0xff]  ;;  %v10599_v55 = vcombine.high %v3774_v49, %v3778_v51  ;;  %v3782_v61 = vld [vmem:[#allocation8 + $0xec0] sm:$0xff] }
 0x30e   :  { %6714 = vmatprep.mubr.bf16.mxu1 %v12321_v24  ;;  %6684 = vmatprep.subr.bf16.mxu1 %v10401_v30  ;;  %v3627_v28 = vld [vmem:[#allocation8 + $0x9e8] sm:$0xff]  ;;  %v10566_v30 = vcombine.low %v3742_v6, %v3746_v48  ;;  %v3786_v63 = vld [vmem:[#allocation8 + $0xee0] sm:$0xff] }
 0x30f   :  { %6555 = vmatprep.subr.bf16.mxu0 %v10527_v31  ;;  %v10440_v31 = vcombine.low %v3615_v8, %v3619_v9  ;;  %v10449_v33 = vcombine.high %v3623_v60, %v3627_v28  ;;  %v10607_v6 = vcombine.high %v3782_v61, %v3786_v63  ;;  %v3790_v8 = vld [vmem:[#allocation8 + $0xf00] sm:$0xff] }
 0x310   :  { %v3794_v9 = vld [vmem:[#allocation8 + $0xf20] sm:$0xff] }
 0x311   :  { %6556 = vmatpush1.bf16.msra.mxu0 %v10526_v27  ;;  %6685 = vmatpush1.bf16.msra.mxu1 %v10400_v37  ;;  %v3631_v27 = vld [vmem:[#allocation8 + $0xa08] sm:$0xff] }
 0x312   :  { %6557 = vmatprep.subr.bf16.mxu0 %v10535_v38  ;;  %6686 = vmatprep.subr.bf16.mxu1 %v10409_v40  ;;  %v3635_v37 = vld [vmem:[#allocation8 + $0xa28] sm:$0xff]  ;;  %v10574_v38 = vcombine.low %v3750_v20, %v3754_v26  ;;  %v10448_v40 = vcombine.low %v3623_v60, %v3627_v28  ;;  %v10615_v20 = vcombine.high %v3790_v8, %v3794_v9  ;;  %v3798_v60 = vld [vmem:[#allocation8 + $0xf40] sm:$0xff] }
 0x313   :  { %v10457_v42 = vcombine.high %v3631_v27, %v3635_v37  ;;  %v3802_v28 = vld [vmem:[#allocation8 + $0xf60] sm:$0xff] }
 0x315   :  { %6558 = vmatpush1.bf16.msra.mxu0 %v10534_v39  ;;  %6687 = vmatpush1.bf16.msra.mxu1 %v10408_v45  ;;  %v3639_v39 = vld [vmem:[#allocation8 + $0xa48] sm:$0xff] }
 0x316   :  { %6559 = vmatprep.subr.bf16.mxu0 %v10543_v0  ;;  %6688 = vmatprep.subr.bf16.mxu1 %v10417_v12  ;;  %v3643_v45 = vld [vmem:[#allocation8 + $0xa68] sm:$0xff]  ;;  %v10582_v0 = vcombine.low %v3758_v35, %v3762_v36  ;;  %v10456_v12 = vcombine.low %v3631_v27, %v3635_v37  ;;  %v10623_v35 = vcombine.high %v3798_v60, %v3802_v28  ;;  %v3806_v27 = vld [vmem:[#allocation8 + $0xf80] sm:$0xff] }
 0x317   :  { %v10465_v50 = vcombine.high %v3639_v39, %v3643_v45  ;;  %v3810_v37 = vld [vmem:[#allocation8 + $0xfa0] sm:$0xff] }
 0x319   :  { %6560 = vmatpush1.bf16.msra.mxu0 %v10542_v16  ;;  %6689 = vmatpush1.bf16.msra.mxu1 %v10416_v53  ;;  %v3647_v16 = vld [vmem:[#allocation8 + $0xa88] sm:$0xff] }
 0x31a   :  { %6561 = vmatprep.subr.bf16.mxu0 %v10551_v22  ;;  %6690 = vmatprep.subr.bf16.mxu1 %v10425_v54  ;;  %v3651_v53 = vld [vmem:[#allocation8 + $0xaa8] sm:$0xff]  ;;  %v10590_v22 = vcombine.low %v3766_v43, %v3770_v10  ;;  %v10464_v54 = vcombine.low %v3639_v39, %v3643_v45  ;;  %v10631_v43 = vcombine.high %v3806_v27, %v3810_v37  ;;  %v3814_v39 = vld [vmem:[#allocation8 + $0xfc0] sm:$0xff] }
 0x31b   :  { %v10473_v57 = vcombine.high %v3647_v16, %v3651_v53  ;;  %v3818_v45 = vld [vmem:[#allocation8 + $0xfe0] sm:$0xff] }
 0x31d   :  { %6562 = vmatpush1.bf16.msra.mxu0 %v10550_v1  ;;  %6691 = vmatpush1.bf16.msra.mxu1 %v10424_v2  ;;  %v3655_v1 = vld [vmem:[#allocation8 + $0xac8] sm:$0xff] }
 0x31e   :  { %6563 = vmatprep.subr.bf16.mxu0 %v10559_v4  ;;  %6692 = vmatprep.subr.bf16.mxu1 %v10433_v5  ;;  %v3659_v2 = vld [vmem:[#allocation8 + $0xae8] sm:$0xff]  ;;  %v10598_v4 = vcombine.low %v3774_v49, %v3778_v51  ;;  %v10472_v5 = vcombine.low %v3647_v16, %v3651_v53  ;;  %v10639_v49 = vcombine.high %v3814_v39, %v3818_v45  ;;  %v12337_v16 = vld [vmem:[#allocation8 + $0x10] sm:$0xff] }
 0x31f   :  { %v10481_v48 = vcombine.high %v3655_v1, %v3659_v2  ;;  %v12339_v53 = vld [vmem:[#allocation8 + $0x30] sm:$0xff] }
 0x321   :  { %6564 = vmatpush1.bf16.msra.mxu0 %v10558_v11  ;;  %6693 = vmatpush1.bf16.msra.mxu1 %v10432_v14  ;;  %v3663_v11 = vld [vmem:[#allocation8 + $0xb08] sm:$0xff] }
 0x322   :  { %6565 = vmatprep.subr.bf16.mxu0 %v10567_v15  ;;  %6694 = vmatprep.subr.bf16.mxu1 %v10441_v18  ;;  %v3667_v14 = vld [vmem:[#allocation8 + $0xb28] sm:$0xff]  ;;  %v10606_v15 = vcombine.low %v3782_v61, %v3786_v63  ;;  %v10480_v18 = vcombine.low %v3655_v1, %v3659_v2  ;;  %v10139_v61 = vcombine.high %v12337_v16, %v12339_v53 }
 0x323   :  { %v10489_v26 = vcombine.high %v3663_v11, %v3667_v14  ;;  %v3703_v1 = vld [vmem:[#allocation8 + $0xc48] sm:$0xff] }
 0x324   :  { %v3707_v2 = vld [vmem:[#allocation8 + $0xc68] sm:$0xff] }
 0x325   :  { %6566 = vmatpush1.bf16.msra.mxu0 %v10566_v30  ;;  %6695 = vmatpush1.bf16.msra.mxu1 %v10440_v31  ;;  %v3671_v30 = vld [vmem:[#allocation8 + $0xb48] sm:$0xff] }
 0x326   :  { %6567 = vmatprep.subr.bf16.mxu0 %v10575_v23  ;;  %6696 = vmatprep.subr.bf16.mxu1 %v10449_v33  ;;  %v3675_v31 = vld [vmem:[#allocation8 + $0xb68] sm:$0xff]  ;;  %v10614_v23 = vcombine.low %v3790_v8, %v3794_v9  ;;  %v10488_v33 = vcombine.low %v3663_v11, %v3667_v14  ;;  %v10528_v8 = vcombine.low %v3703_v1, %v3707_v2 }
 0x327   :  { %v10497_v36 = vcombine.high %v3671_v30, %v3675_v31  ;;  %v3719_v11 = vld [vmem:[#allocation8 + $0xcc8] sm:$0xff] }
 0x328   :  { %v3723_v14 = vld [vmem:[#allocation8 + $0xce8] sm:$0xff] }
 0x329   :  { %6568 = vmatpush1.bf16.msra.mxu0 %v10574_v38  ;;  %6697 = vmatpush1.bf16.msra.mxu1 %v10448_v40  ;;  %v3679_v38 = vld [vmem:[#allocation8 + $0xb88] sm:$0xff] }
 0x32a   :  { %6569 = vmatprep.subr.bf16.mxu0 %v10583_v41  ;;  %6698 = vmatprep.subr.bf16.mxu1 %v10457_v42  ;;  %v3683_v40 = vld [vmem:[#allocation8 + $0xba8] sm:$0xff]  ;;  %v10622_v41 = vcombine.low %v3798_v60, %v3802_v28  ;;  %v10496_v42 = vcombine.low %v3671_v30, %v3675_v31  ;;  %v10544_v60 = vcombine.low %v3719_v11, %v3723_v14 }
 0x32b   :  { %v10505_v10 = vcombine.high %v3679_v38, %v3683_v40  ;;  %v3735_v30 = vld [vmem:[#allocation8 + $0xd48] sm:$0xff] }
 0x32c   :  { %v3739_v31 = vld [vmem:[#allocation8 + $0xd68] sm:$0xff] }
 0x32d   :  { %6570 = vmatpush1.bf16.msra.mxu0 %v10582_v0  ;;  %6699 = vmatpush1.bf16.msra.mxu1 %v10456_v12  ;;  %v3687_v0 = vld [vmem:[#allocation8 + $0xbc8] sm:$0xff] }
 0x32e   :  { %6571 = vmatprep.subr.bf16.mxu0 %v10591_v47  ;;  %6700 = vmatprep.subr.bf16.mxu1 %v10465_v50  ;;  %v3691_v12 = vld [vmem:[#allocation8 + $0xbe8] sm:$0xff]  ;;  %v10630_v47 = vcombine.low %v3806_v27, %v3810_v37  ;;  %v10504_v50 = vcombine.low %v3679_v38, %v3683_v40 }
 0x32f   :  { %v10513_v51 = vcombine.high %v3687_v0, %v3691_v12  ;;  %v3743_v27 = vld [vmem:[#allocation8 + $0xd88] sm:$0xff] }
 0x330   :  { %v3747_v37 = vld [vmem:[#allocation8 + $0xda8] sm:$0xff] }
 0x331   :  { %6572 = vmatpush1.bf16.msra.mxu0 %v10590_v22  ;;  %6701 = vmatpush1.bf16.msra.mxu1 %v10464_v54  ;;  %v3695_v22 = vld [vmem:[#allocation8 + $0xc08] sm:$0xff] }
 0x332   :  { %6573 = vmatprep.subr.bf16.mxu0 %v10599_v55  ;;  %6702 = vmatprep.subr.bf16.mxu1 %v10473_v57  ;;  %v3699_v54 = vld [vmem:[#allocation8 + $0xc28] sm:$0xff]  ;;  %v10638_v55 = vcombine.low %v3814_v39, %v3818_v45  ;;  %v10512_v57 = vcombine.low %v3687_v0, %v3691_v12 }
 0x333   :  { %v10521_v63 = vcombine.high %v3695_v22, %v3699_v54  ;;  %v3755_v39 = vld [vmem:[#allocation8 + $0xde8] sm:$0xff] }
 0x335   :  { %6574 = vmatpush1.bf16.msra.mxu0 %v10598_v4  ;;  %6703 = vmatpush1.bf16.msra.mxu1 %v10472_v5  ;;  %v10520_v4 = vcombine.low %v3695_v22, %v3699_v54  ;;  %v10529_v5 = vcombine.high %v3703_v1, %v3707_v2 }
 0x336   :  { %6575 = vmatprep.subr.bf16.mxu0 %v10607_v6  ;;  %6704 = vmatprep.subr.bf16.mxu1 %v10481_v48  ;;  %v3711_v6 = vld [vmem:[#allocation8 + $0xc88] sm:$0xff] }
 0x337   :  { %v3715_v48 = vld [vmem:[#allocation8 + $0xca8] sm:$0xff] }
 0x338   :  { %v10537_v9 = vcombine.high %v3711_v6, %v3715_v48 }
 0x339   :  { %6576 = vmatpush1.bf16.msra.mxu0 %v10606_v15  ;;  %6705 = vmatpush1.bf16.msra.mxu1 %v10480_v18  ;;  %v10536_v15 = vcombine.low %v3711_v6, %v3715_v48  ;;  %v10545_v18 = vcombine.high %v3719_v11, %v3723_v14  ;;  %v3771_v14 = vld [vmem:[#allocation8 + $0xe68] sm:$0xff] }
 0x33a   :  { %6577 = vmatprep.subr.bf16.mxu0 %v10615_v20  ;;  %6706 = vmatprep.subr.bf16.mxu1 %v10489_v26  ;;  %v3727_v20 = vld [vmem:[#allocation8 + $0xd08] sm:$0xff] }
 0x33b   :  { %v3731_v26 = vld [vmem:[#allocation8 + $0xd28] sm:$0xff] }
 0x33c   :  { %v10553_v28 = vcombine.high %v3727_v20, %v3731_v26 }
 0x33d   :  { %6578 = vmatpush1.bf16.msra.mxu0 %v10614_v23  ;;  %6707 = vmatpush1.bf16.msra.mxu1 %v10488_v33  ;;  %v620_v23 = vsub.s32 6, %v12238_v13  ;;  %v10552_v33 = vcombine.low %v3727_v20, %v3731_v26  ;;  %v3328_v20 = vld [vmem:[#allocation8 + $0x90] sm:$0xff] }
 0x33e   :  { %6579 = vmatprep.subr.bf16.mxu0 %v10623_v35  ;;  %6708 = vmatprep.subr.bf16.mxu1 %v10497_v36  ;;  %v624_v35 = vsub.s32 7, %v12238_v13  ;;  %v10561_v36 = vcombine.high %v3735_v30, %v3739_v31  ;;  %v11523_v13 = vld [vmem:[#allocation11 + $0x6e0] ss:$16 sps:$4 sm:$0xff]  }
 0x33f   :  { %v621_v38 = vrot.slane %v12311_v46, %v620_v23 }
 0x340   :  { %v625_v40 = vrot.slane %v12311_v46, %v624_v35 }
 0x341   :  { %6580 = vmatpush1.bf16.msra.mxu0 %v10622_v41  ;;  %6709 = vmatpush1.bf16.msra.mxu1 %v10496_v42  ;;  %v10560_v41 = vcombine.low %v3735_v30, %v3739_v31  ;;  %v10569_v42 = vcombine.high %v3743_v27, %v3747_v37  ;;  %v3779_v30 = vld [vmem:[#allocation8 + $0xea8] sm:$0xff] }
 0x342   :  { %6581 = vmatprep.subr.bf16.mxu0 %v10631_v43  ;;  %6710 = vmatprep.subr.bf16.mxu1 %v10505_v10  ;;  %v3751_v10 = vld [vmem:[#allocation8 + $0xdc8] sm:$0xff] }
 0x343   :  { %v10577_v54 = vcombine.high %v3751_v10, %v3755_v39  ;;  %v10576_v2 = vcombine.low %v3751_v10, %v3755_v39  ;;  %v3344_v10 = vld [vmem:[#allocation8 + $0x110] sm:$0xff] }
 0x344   :  { %v3348_v39 = vld [vmem:[#allocation8 + $0x130] sm:$0xff] }
 0x345   :  { %6582 = vmatpush1.bf16.msra.mxu0 %v10630_v47  ;;  %6711 = vmatpush1.bf16.msra.mxu1 %v10504_v50  ;;  %v10568_v50 = vcombine.low %v3743_v27, %v3747_v37  ;;  %v3340_v27 = vld [vmem:[#allocation8 + $0xf0] sm:$0xff]  ;;  %v3783_v37 = vld [vmem:[#allocation8 + $0xec8] sm:$0xff] }
 0x346   :  { %6583 = vmatprep.subr.bf16.mxu0 %v10639_v49  ;;  %6712 = vmatprep.subr.bf16.mxu1 %v10513_v51 }
 0x349   :  { %6584 = vmatpush1.bf16.msra.mxu0 %v10638_v55  ;;  %6713 = vmatpush1.bf16.msra.mxu1 %v10512_v57  ;;  %v3759_v57 = vld [vmem:[#allocation8 + $0xe08] sm:$0xff] }
 0x34a   :  { %6768 = vmatprep.subr.bf16.mxu0 %v10139_v61  ;;  %6725 = vmatprep.subr.bf16.mxu1 %v10521_v63  ;;  %v3763_v61 = vld [vmem:[#allocation8 + $0xe28] sm:$0xff] }
 0x34b   :  { %v10585_v6 = vcombine.high %v3759_v57, %v3763_v61 }
 0x34c   :  { %6715 = vmatmul.mubr.bf16.vlgmr.msra.gmra.mrb[12].mxu1 %v12319_v17 }
 0x34d   :  { %6726 = vmatpush1.bf16.msra.mxu1 %v10520_v4 }
 0x34e   :  { %6727 = vmatprep.subr.bf16.mxu1 %v10529_v5 }
 0x351   :  { %6728 = vmatpush1.bf16.msra.mxu1 %v10528_v8  ;;  %v3320_v8 = vld [vmem:[#allocation8 + $0x50] sm:$0xff] }
 0x352   :  { %6729 = vmatprep.subr.bf16.mxu1 %v10537_v9  ;;  %v3324_v9 = vld [vmem:[#allocation8 + $0x70] sm:$0xff] }
 0x353   :  { %v10146_v31 = vcombine.low %v3320_v8, %v3324_v9 }
 0x355   :  { %6730 = vmatpush1.bf16.msra.mxu1 %v10536_v15 }
 0x356   :  { %6731 = vmatprep.subr.bf16.mxu1 %v10545_v18  ;;  %v10147_v18 = vcombine.high %v3320_v8, %v3324_v9  ;;  %v3368_v9 = vld [vmem:[#allocation8 + $0x1d0] sm:$0xff] }
 0x359   :  { %6732 = vmatpush1.bf16.msra.mxu1 %v10544_v60  ;;  %v3332_v60 = vld [vmem:[#allocation8 + $0xb0] sm:$0xff] }
 0x35a   :  { %6733 = vmatprep.subr.bf16.mxu1 %v10553_v28  ;;  %v3775_v28 = vld [vmem:[#allocation8 + $0xe88] sm:$0xff] }
 0x35d   :  { %6734 = vmatpush1.bf16.msra.mxu1 %v10552_v33 }
 0x35e   :  { %6735 = vmatprep.subr.bf16.mxu1 %v10561_v36  ;;  %v3336_v36 = vld [vmem:[#allocation8 + $0xd0] sm:$0xff] }
 0x35f   :  { %v3234_v43 = vpop.f32.mrb[8].mxu1 }
 0x360   :  { %v11025_v45 = vadd.f32 %v3234_v43, %v621_v38  ;;  %v3236_v0 = vpop.f32.mrb[9].mxu1 }
 0x361   :  { %v11027_v12 = vadd.f32 %v3236_v0, %v625_v40  ;;  %v3238_v47 = vpop.f32.mrb[10].mxu1  ;;  %6736 = vmatpush1.bf16.msra.mxu1 %v10560_v41  ;;  %v10600_v41 = vcombine.low %v3775_v28, %v3779_v30  ;;  %v3795_v0 = vld [vmem:[#allocation8 + $0xf28] sm:$0xff] }
 0x362   :  { %v11026_v49 = vadd.f32 %v11025_v45, %v12325_v25  ;;  %v11029_v51 = vadd.f32 %v3238_v47, %v621_v38  ;;  %v3240_v22 = vpop.f32.mrb[11].mxu1  ;;  %6737 = vmatprep.subr.bf16.mxu1 %v10569_v42  ;;  %v3787_v38 = vld [vmem:[#allocation8 + $0xee8] sm:$0xff]  ;;  %v10163_v42 = vcombine.high %v3336_v36, %v3340_v27 }
 0x363   :  { %v11028_v46 = vadd.f32 %v11027_v12, %v12327_v29  ;;  %v11031_v55 = vadd.f32 %v3240_v22, %v625_v40  ;;  %v3767_v29 = vld [vmem:[#allocation8 + $0xe48] sm:$0xff]  ;;  %v10154_v40 = vcombine.low %v3328_v20, %v3332_v60  ;;  %v10609_v43 = vcombine.high %v3783_v37, %v3787_v38  ;;  %v3356_v22 = vld [vmem:[#allocation8 + $0x170] sm:$0xff] }
 0x364   :  { %v11030_v63 = vadd.f32 %v11029_v51, %v12330_v34  ;;  %v3292_v4 = vmax.f32 %v11026_v49, 0.0  ;;  %v10138_v34 = vcombine.low %v12337_v16, %v12339_v53  ;;  %v10593_v26 = vcombine.high %v3767_v29, %v3771_v14  ;;  %v3791_v45 = vld [vmem:[#allocation8 + $0xf08] sm:$0xff]  ;;  %v3352_v51 = vld [vmem:[#allocation8 + $0x150] sm:$0xff] }
 0x365   :  { %v11032_v1 = vadd.f32 %v11031_v55, %v12333_v32  ;;  %6738 = vmatpush1.bf16.msra.mxu1 %v10568_v50  ;;  %v3293_v25 = vmax.f32 %v11028_v46, 0.0  ;;  %v10584_v32 = vcombine.low %v3759_v57, %v3763_v61  ;;  %v10592_v33 = vcombine.low %v3767_v29, %v3771_v14  ;;  %v3803_v46 = vld [vmem:[#allocation8 + $0xf68] sm:$0xff]  ;;  %v3372_v29 = vld [vmem:[#allocation8 + $0x1f0] sm:$0xff] }
 0x366   :  { %v3300_v5 = vmax.f32 %v11030_v63, 0.0  ;;  %6739 = vmatprep.subr.bf16.mxu1 %v10577_v54  ;;  %v10155_v16 = vcombine.high %v3328_v20, %v3332_v60  ;;  %v10601_v53 = vcombine.high %v3775_v28, %v3779_v30  ;;  %v10162_v12 = vcombine.low %v3336_v36, %v3340_v27  ;;  %v3799_v54 = vld [vmem:[#allocation8 + $0xf48] sm:$0xff]  ;;  %v3376_v60 = vld [vmem:[#allocation8 + $0x210] sm:$0xff]  ;;  %v3313_v30 = vld [vmem:[#allocation8 + $0x18] sm:$0xff] }
 0x367   :  { %v3301_v48 = vmax.f32 %v11032_v1, 0.0  ;;  %v10608_v47 = vcombine.low %v3783_v37, %v3787_v38  ;;  %v10171_v50 = vcombine.high %v3344_v10, %v3348_v39  ;;  %v10617_v49 = vcombine.high %v3791_v45, %v3795_v0  ;;  %v3360_v1 = vld [vmem:[#allocation8 + $0x190] sm:$0xff]  ;;  %v3815_v14 = vld [vmem:[#allocation8 + $0xfc8] sm:$0xff]  ;;  %v3321_v38 = vld [vmem:[#allocation8 + $0x58] sm:$0xff] }
 0x368   :  { %v12356_v11 = vpack.c.bf16 %v3300_v5, %v3292_v4  ;;  %v10170_v55 = vcombine.low %v3344_v10, %v3348_v39  ;;  %v10616_v57 = vcombine.low %v3791_v45, %v3795_v0  ;;  %v10179_v61 = vcombine.high %v3352_v51, %v3356_v22  ;;  %v3807_v4 = vld [vmem:[#allocation8 + $0xf88] sm:$0xff]  ;;  %v3380_v28 = vld [vmem:[#allocation8 + $0x230] sm:$0xff]  ;;  %v3329_v0 = vld [vmem:[#allocation8 + $0x98] sm:$0xff] }
 0x369   :  { %v12358_v15 = vpack.c.bf16 %v3301_v48, %v3293_v25  ;;  %6740 = vmatpush1.bf16.msra.mxu1 %v10576_v2  ;;  %v10625_v63 = vcombine.high %v3799_v54, %v3803_v46  ;;  %v3364_v2 = vld [vmem:[#allocation8 + $0x1b0] sm:$0xff]  ;;  %v3811_v5 = vld [vmem:[#allocation8 + $0xfa8] sm:$0xff]  ;;  %v10624_v25 = vcombine.low %v3799_v54, %v3803_v46  ;;  %v10195_v20 = vcombine.high %v3368_v9, %v3372_v29  ;;  %v3337_v46 = vld [vmem:[#allocation8 + $0xd8] sm:$0xff] }
 0x36a   :  { %6741 = vmatprep.subr.bf16.mxu1 %v10585_v6  ;;  %v10178_v6 = vcombine.low %v3352_v51, %v3356_v22  ;;  %v10187_v48 = vcombine.high %v3360_v1, %v3364_v2  ;;  %v10633_v8 = vcombine.high %v3807_v4, %v3811_v5  ;;  %v3384_v27 = vld [vmem:[#allocation8 + $0x250] sm:$0xff] }
 0x36b   :  { %6585 = vmatprep.mubr.bf16.mxu0 %v12358_v15  ;;  %6757 = vmatprep.mubr.bf16.mxu1 %v12358_v15  ;;  %v3388_v37 = vld [vmem:[#allocation8 + $0x270] sm:$0xff] }
 0x36c   :  { %6586 = vmatmul.mubr.bf16.vlgmr.msra.gmra.mrb[16].mxu0 %v12356_v11  ;;  %v3392_v10 = vld [vmem:[#allocation8 + $0x290] sm:$0xff] }
 0x36d   :  { %6769 = vmatpush1.bf16.msra.mxu0 %v10138_v34  ;;  %6742 = vmatpush1.bf16.msra.mxu1 %v10584_v32  ;;  %v3819_v34 = vld [vmem:[#allocation8 + $0xfe8] sm:$0xff]  ;;  %v10186_v32 = vcombine.low %v3360_v1, %v3364_v2  ;;  %v3396_v45 = vld [vmem:[#allocation8 + $0x2b0] sm:$0xff] }
 0x36e   :  { %6800 = vmatprep.mubr.bf16.mxu0 %v12263_v7  ;;  %6770 = vmatprep.subr.bf16.mxu0 %v10147_v18  ;;  %v10632_v18 = vcombine.low %v3807_v4, %v3811_v5  ;;  %v3400_v22 = vld [vmem:[#allocation8 + $0x2d0] sm:$0xff]  ;;  %v3345_v5 = vld [vmem:[#allocation8 + $0x118] sm:$0xff] }
 0x36f   :  { %6743 = vmatprep.subr.bf16.mxu1 %v10593_v26  ;;  %v10641_v26 = vcombine.high %v3815_v14, %v3819_v34  ;;  %v3404_v54 = vld [vmem:[#allocation8 + $0x2f0] sm:$0xff] }
 0x370   :  { %v3408_v2 = vld [vmem:[#allocation8 + $0x310] sm:$0xff] }
 0x371   :  { %6771 = vmatpush1.bf16.msra.mxu0 %v10146_v31  ;;  %6744 = vmatpush1.bf16.msra.mxu1 %v10592_v33  ;;  %v3317_v31 = vld [vmem:[#allocation8 + $0x38] sm:$0xff]  ;;  %v10194_v33 = vcombine.low %v3368_v9, %v3372_v29  ;;  %v3412_v4 = vld [vmem:[#allocation8 + $0x330] sm:$0xff] }
 0x372   :  { %6772 = vmatprep.subr.bf16.mxu0 %v10155_v16  ;;  %6745 = vmatprep.subr.bf16.mxu1 %v10601_v53  ;;  %v10640_v16 = vcombine.low %v3815_v14, %v3819_v34  ;;  %v10203_v53 = vcombine.high %v3376_v60, %v3380_v28  ;;  %v10141_v36 = vcombine.high %v3313_v30, %v3317_v31  ;;  %v3416_v9 = vld [vmem:[#allocation8 + $0x350] sm:$0xff]  ;;  %v3353_v14 = vld [vmem:[#allocation8 + $0x158] sm:$0xff] }
 0x373   :  { %v3420_v29 = vld [vmem:[#allocation8 + $0x370] sm:$0xff]  ;;  %v3357_v34 = vld [vmem:[#allocation8 + $0x178] sm:$0xff] }
 0x375   :  { %6773 = vmatpush1.bf16.msra.mxu0 %v10154_v40  ;;  %6746 = vmatpush1.bf16.msra.mxu1 %v10600_v41  ;;  %v3325_v40 = vld [vmem:[#allocation8 + $0x78] sm:$0xff]  ;;  %v10202_v41 = vcombine.low %v3376_v60, %v3380_v28  ;;  %v3424_v60 = vld [vmem:[#allocation8 + $0x390] sm:$0xff] }
 0x376   :  { %6774 = vmatprep.subr.bf16.mxu0 %v10163_v42  ;;  %6747 = vmatprep.subr.bf16.mxu1 %v10609_v43  ;;  %v10140_v42 = vcombine.low %v3313_v30, %v3317_v31  ;;  %v10211_v43 = vcombine.high %v3384_v27, %v3388_v37  ;;  %v10149_v39 = vcombine.high %v3321_v38, %v3325_v40  ;;  %v3428_v28 = vld [vmem:[#allocation8 + $0x3b0] sm:$0xff]  ;;  %v3361_v30 = vld [vmem:[#allocation8 + $0x198] sm:$0xff] }
 0x377   :  { %v3365_v31 = vld [vmem:[#allocation8 + $0x1b8] sm:$0xff] }
 0x379   :  { %6775 = vmatpush1.bf16.msra.mxu0 %v10162_v12  ;;  %6748 = vmatpush1.bf16.msra.mxu1 %v10608_v47  ;;  %v3333_v12 = vld [vmem:[#allocation8 + $0xb8] sm:$0xff]  ;;  %v10210_v47 = vcombine.low %v3384_v27, %v3388_v37  ;;  %v3432_v27 = vld [vmem:[#allocation8 + $0x3d0] sm:$0xff] }
 0x37a   :  { %6776 = vmatprep.subr.bf16.mxu0 %v10171_v50  ;;  %6749 = vmatprep.subr.bf16.mxu1 %v10617_v49  ;;  %v10148_v50 = vcombine.low %v3321_v38, %v3325_v40  ;;  %v10219_v49 = vcombine.high %v3392_v10, %v3396_v45  ;;  %v10157_v51 = vcombine.high %v3329_v0, %v3333_v12  ;;  %v3436_v37 = vld [vmem:[#allocation8 + $0x3f0] sm:$0xff]  ;;  %v3369_v38 = vld [vmem:[#allocation8 + $0x1d8] sm:$0xff] }
 0x37b   :  { %v3373_v40 = vld [vmem:[#allocation8 + $0x1f8] sm:$0xff] }
 0x37d   :  { %6777 = vmatpush1.bf16.msra.mxu0 %v10170_v55  ;;  %6750 = vmatpush1.bf16.msra.mxu1 %v10616_v57  ;;  %v3341_v55 = vld [vmem:[#allocation8 + $0xf8] sm:$0xff]  ;;  %v10218_v57 = vcombine.low %v3392_v10, %v3396_v45  ;;  %v10197_v10 = vcombine.high %v3369_v38, %v3373_v40  ;;  %v3444_v45 = vld [vmem:[#allocation8 + $0x430] sm:$0xff] }
 0x37e   :  { %6778 = vmatprep.subr.bf16.mxu0 %v10179_v61  ;;  %6751 = vmatprep.subr.bf16.mxu1 %v10625_v63  ;;  %v10156_v61 = vcombine.low %v3329_v0, %v3333_v12  ;;  %v10227_v63 = vcombine.high %v3400_v22, %v3404_v54  ;;  %v10165_v1 = vcombine.high %v3337_v46, %v3341_v55  ;;  %v3377_v0 = vld [vmem:[#allocation8 + $0x218] sm:$0xff] }
 0x37f   :  { %v3381_v12 = vld [vmem:[#allocation8 + $0x238] sm:$0xff] }
 0x381   :  { %6779 = vmatpush1.bf16.msra.mxu0 %v10178_v6  ;;  %6752 = vmatpush1.bf16.msra.mxu1 %v10624_v25  ;;  %v10226_v6 = vcombine.low %v3400_v22, %v3404_v54  ;;  %v10164_v25 = vcombine.low %v3337_v46, %v3341_v55  ;;  %v3448_v22 = vld [vmem:[#allocation8 + $0x450] sm:$0xff]  ;;  %v3385_v46 = vld [vmem:[#allocation8 + $0x258] sm:$0xff] }
 0x382   :  { %6780 = vmatprep.subr.bf16.mxu0 %v10187_v48  ;;  %6753 = vmatprep.subr.bf16.mxu1 %v10633_v8  ;;  %v10235_v48 = vcombine.high %v3408_v2, %v3412_v4  ;;  %v3452_v54 = vld [vmem:[#allocation8 + $0x470] sm:$0xff]  ;;  %v3389_v55 = vld [vmem:[#allocation8 + $0x278] sm:$0xff] }
 0x385   :  { %6781 = vmatpush1.bf16.msra.mxu0 %v10186_v32  ;;  %6754 = vmatpush1.bf16.msra.mxu1 %v10632_v18  ;;  %v10234_v32 = vcombine.low %v3408_v2, %v3412_v4  ;;  %v3456_v2 = vld [vmem:[#allocation8 + $0x490] sm:$0xff] }
 0x386   :  { %6782 = vmatprep.subr.bf16.mxu0 %v10195_v20  ;;  %6755 = vmatprep.subr.bf16.mxu1 %v10641_v26  ;;  %v10243_v20 = vcombine.high %v3416_v9, %v3420_v29  ;;  %v10181_v26 = vcombine.high %v3353_v14, %v3357_v34  ;;  %v3460_v4 = vld [vmem:[#allocation8 + $0x4b0] sm:$0xff] }
 0x389   :  { %6783 = vmatpush1.bf16.msra.mxu0 %v10194_v33  ;;  %6756 = vmatpush1.bf16.msra.mxu1 %v10640_v16  ;;  %v10242_v33 = vcombine.low %v3416_v9, %v3420_v29  ;;  %v10180_v16 = vcombine.low %v3353_v14, %v3357_v34  ;;  %v3464_v9 = vld [vmem:[#allocation8 + $0x4d0] sm:$0xff]  ;;  %v3401_v14 = vld [vmem:[#allocation8 + $0x2d8] sm:$0xff] }
 0x38a   :  { %6784 = vmatprep.subr.bf16.mxu0 %v10203_v53  ;;  %6940 = vmatprep.subr.bf16.mxu1 %v10141_v36  ;;  %v10251_v53 = vcombine.high %v3424_v60, %v3428_v28  ;;  %v10189_v36 = vcombine.high %v3361_v30, %v3365_v31  ;;  %v3468_v29 = vld [vmem:[#allocation8 + $0x4f0] sm:$0xff]  ;;  %v3405_v34 = vld [vmem:[#allocation8 + $0x2f8] sm:$0xff] }
 0x38c   :  { %6758 = vmatmul.mubr.bf16.vlgmr.msra.gmra.mrb[12].mxu1 %v12356_v11 }
 0x38d   :  { %6785 = vmatpush1.bf16.msra.mxu0 %v10202_v41  ;;  %6941 = vmatpush1.bf16.msra.mxu1 %v10140_v42  ;;  %v10250_v41 = vcombine.low %v3424_v60, %v3428_v28  ;;  %v10188_v42 = vcombine.low %v3361_v30, %v3365_v31  ;;  %v3472_v60 = vld [vmem:[#allocation8 + $0x510] sm:$0xff]  ;;  %v3409_v30 = vld [vmem:[#allocation8 + $0x318] sm:$0xff] }
 0x38e   :  { %6972 = vmatprep.mubr.bf16.mxu1 %v12263_v7  ;;  %6786 = vmatprep.subr.bf16.mxu0 %v10211_v43  ;;  %v3349_v7 = vld [vmem:[#allocation8 + $0x138] sm:$0xff]  ;;  %v10259_v43 = vcombine.high %v3432_v27, %v3436_v37  ;;  %v3476_v28 = vld [vmem:[#allocation8 + $0x530] sm:$0xff] }
 0x38f   :  { %6942 = vmatprep.subr.bf16.mxu1 %v10149_v39  ;;  %v10173_v8 = vcombine.high %v3345_v5, %v3349_v7  ;;  %v10172_v18 = vcombine.low %v3345_v5, %v3349_v7  ;;  %v3440_v39 = vld [vmem:[#allocation8 + $0x410] sm:$0xff]  ;;  %v3393_v5 = vld [vmem:[#allocation8 + $0x298] sm:$0xff] }
 0x390   :  { %v3397_v7 = vld [vmem:[#allocation8 + $0x2b8] sm:$0xff] }
 0x391   :  { %6787 = vmatpush1.bf16.msra.mxu0 %v10210_v47  ;;  %6943 = vmatpush1.bf16.msra.mxu1 %v10148_v50  ;;  %v10258_v47 = vcombine.low %v3432_v27, %v3436_v37  ;;  %v10196_v50 = vcombine.low %v3369_v38, %v3373_v40  ;;  %v3413_v31 = vld [vmem:[#allocation8 + $0x338] sm:$0xff]  ;;  %v3480_v27 = vld [vmem:[#allocation8 + $0x550] sm:$0xff] }
 0x392   :  { %6788 = vmatprep.subr.bf16.mxu0 %v10219_v49  ;;  %6944 = vmatprep.subr.bf16.mxu1 %v10157_v51  ;;  %v10267_v49 = vcombine.high %v3440_v39, %v3444_v45  ;;  %v10205_v51 = vcombine.high %v3377_v0, %v3381_v12  ;;  %v3484_v37 = vld [vmem:[#allocation8 + $0x570] sm:$0xff]  ;;  %v3417_v38 = vld [vmem:[#allocation8 + $0x358] sm:$0xff] }
 0x393   :  { %v3421_v40 = vld [vmem:[#allocation8 + $0x378] sm:$0xff] }
 0x395   :  { %6789 = vmatpush1.bf16.msra.mxu0 %v10218_v57  ;;  %6945 = vmatpush1.bf16.msra.mxu1 %v10156_v61  ;;  %v10266_v57 = vcombine.low %v3440_v39, %v3444_v45  ;;  %v10204_v61 = vcombine.low %v3377_v0, %v3381_v12  ;;  %v3488_v39 = vld [vmem:[#allocation8 + $0x590] sm:$0xff]  ;;  %v3425_v0 = vld [vmem:[#allocation8 + $0x398] sm:$0xff] }
 0x396   :  { %6790 = vmatprep.subr.bf16.mxu0 %v10227_v63  ;;  %6946 = vmatprep.subr.bf16.mxu1 %v10165_v1  ;;  %v10275_v63 = vcombine.high %v3448_v22, %v3452_v54  ;;  %v10213_v1 = vcombine.high %v3385_v46, %v3389_v55  ;;  %v3492_v45 = vld [vmem:[#allocation8 + $0x5b0] sm:$0xff]  ;;  %v3429_v12 = vld [vmem:[#allocation8 + $0x3b8] sm:$0xff] }
 0x399   :  { %6791 = vmatpush1.bf16.msra.mxu0 %v10226_v6  ;;  %6947 = vmatpush1.bf16.msra.mxu1 %v10164_v25  ;;  %v10274_v6 = vcombine.low %v3448_v22, %v3452_v54  ;;  %v10212_v25 = vcombine.low %v3385_v46, %v3389_v55  ;;  %v3496_v22 = vld [vmem:[#allocation8 + $0x5d0] sm:$0xff]  ;;  %v3433_v46 = vld [vmem:[#allocation8 + $0x3d8] sm:$0xff] }
 0x39a   :  { %6792 = vmatprep.subr.bf16.mxu0 %v10235_v48  ;;  %6948 = vmatprep.subr.bf16.mxu1 %v10173_v8  ;;  %v10283_v48 = vcombine.high %v3456_v2, %v3460_v4  ;;  %v10221_v8 = vcombine.high %v3393_v5, %v3397_v7  ;;  %v3500_v54 = vld [vmem:[#allocation8 + $0x5f0] sm:$0xff]  ;;  %v3437_v55 = vld [vmem:[#allocation8 + $0x3f8] sm:$0xff] }
 0x39d   :  { %6793 = vmatpush1.bf16.msra.mxu0 %v10234_v32  ;;  %6949 = vmatpush1.bf16.msra.mxu1 %v10172_v18  ;;  %v10282_v32 = vcombine.low %v3456_v2, %v3460_v4  ;;  %v10220_v18 = vcombine.low %v3393_v5, %v3397_v7  ;;  %v3504_v2 = vld [vmem:[#allocation8 + $0x610] sm:$0xff]  ;;  %v3441_v5 = vld [vmem:[#allocation8 + $0x418] sm:$0xff] }
 0x39e   :  { %6794 = vmatprep.subr.bf16.mxu0 %v10243_v20  ;;  %6950 = vmatprep.subr.bf16.mxu1 %v10181_v26  ;;  %v10291_v20 = vcombine.high %v3464_v9, %v3468_v29  ;;  %v10229_v26 = vcombine.high %v3401_v14, %v3405_v34  ;;  %v3508_v4 = vld [vmem:[#allocation8 + $0x630] sm:$0xff]  ;;  %v3445_v7 = vld [vmem:[#allocation8 + $0x438] sm:$0xff] }
 0x3a1   :  { %6795 = vmatpush1.bf16.msra.mxu0 %v10242_v33  ;;  %6951 = vmatpush1.bf16.msra.mxu1 %v10180_v16  ;;  %v10290_v33 = vcombine.low %v3464_v9, %v3468_v29  ;;  %v10228_v16 = vcombine.low %v3401_v14, %v3405_v34  ;;  %v3512_v9 = vld [vmem:[#allocation8 + $0x650] sm:$0xff]  ;;  %v3449_v14 = vld [vmem:[#allocation8 + $0x458] sm:$0xff] }
 0x3a2   :  { %6796 = vmatprep.subr.bf16.mxu0 %v10251_v53  ;;  %6952 = vmatprep.subr.bf16.mxu1 %v10189_v36  ;;  %v10299_v53 = vcombine.high %v3472_v60, %v3476_v28  ;;  %v10237_v36 = vcombine.high %v3409_v30, %v3413_v31  ;;  %v3516_v29 = vld [vmem:[#allocation8 + $0x670] sm:$0xff]  ;;  %v3453_v34 = vld [vmem:[#allocation8 + $0x478] sm:$0xff] }
 0x3a5   :  { %6797 = vmatpush1.bf16.msra.mxu0 %v10250_v41  ;;  %6953 = vmatpush1.bf16.msra.mxu1 %v10188_v42  ;;  %v10298_v41 = vcombine.low %v3472_v60, %v3476_v28  ;;  %v10236_v42 = vcombine.low %v3409_v30, %v3413_v31  ;;  %v3520_v60 = vld [vmem:[#allocation8 + $0x690] sm:$0xff]  ;;  %v3457_v30 = vld [vmem:[#allocation8 + $0x498] sm:$0xff] }
 0x3a6   :  { %6798 = vmatprep.subr.bf16.mxu0 %v10259_v43  ;;  %6954 = vmatprep.subr.bf16.mxu1 %v10197_v10  ;;  %v10307_v43 = vcombine.high %v3480_v27, %v3484_v37  ;;  %v10245_v10 = vcombine.high %v3417_v38, %v3421_v40  ;;  %v3524_v28 = vld [vmem:[#allocation8 + $0x6b0] sm:$0xff]  ;;  %v3461_v31 = vld [vmem:[#allocation8 + $0x4b8] sm:$0xff] }
 0x3a9   :  { %6799 = vmatpush1.bf16.msra.mxu0 %v10258_v47  ;;  %6955 = vmatpush1.bf16.msra.mxu1 %v10196_v50  ;;  %v10306_v47 = vcombine.low %v3480_v27, %v3484_v37  ;;  %v10244_v50 = vcombine.low %v3417_v38, %v3421_v40  ;;  %v3528_v27 = vld [vmem:[#allocation8 + $0x6d0] sm:$0xff]  ;;  %v3465_v38 = vld [vmem:[#allocation8 + $0x4d8] sm:$0xff] }
 0x3aa   :  { %6811 = vmatprep.subr.bf16.mxu0 %v10267_v49  ;;  %6956 = vmatprep.subr.bf16.mxu1 %v10205_v51  ;;  %v10315_v49 = vcombine.high %v3488_v39, %v3492_v45  ;;  %v10253_v51 = vcombine.high %v3425_v0, %v3429_v12  ;;  %v3532_v37 = vld [vmem:[#allocation8 + $0x6f0] sm:$0xff]  ;;  %v3469_v40 = vld [vmem:[#allocation8 + $0x4f8] sm:$0xff] }
 0x3ac   :  { %6801 = vmatmul.mubr.bf16.vlgmr.msra.gmra.mrb[20].mxu0 %v12261_v3 }
 0x3ad   :  { %6812 = vmatpush1.bf16.msra.mxu0 %v10266_v57  ;;  %6843 = vmatprep.mubr.bf16.mxu0 %v12297_v56  ;;  %v10314_v57 = vcombine.low %v3488_v39, %v3492_v45  ;;  %v3540_v39 = vld [vmem:[#allocation8 + $0x730] sm:$0xff]  ;;  %v3477_v45 = vld [vmem:[#allocation8 + $0x538] sm:$0xff] }
 0x3ae   :  { %6957 = vmatpush1.bf16.msra.mxu1 %v10204_v61  ;;  %6813 = vmatprep.subr.bf16.mxu0 %v10275_v63  ;;  %v10252_v61 = vcombine.low %v3425_v0, %v3429_v12  ;;  %v10323_v63 = vcombine.high %v3496_v22, %v3500_v54  ;;  %v10354_v0 = vcombine.low %v3528_v27, %v3532_v37 }
 0x3af   :  { %6958 = vmatprep.subr.bf16.mxu1 %v10213_v1  ;;  %v10261_v1 = vcombine.high %v3433_v46, %v3437_v55  ;;  %v10292_v12 = vcombine.low %v3465_v38, %v3469_v40 }
 0x3b1   :  { %6814 = vmatpush1.bf16.msra.mxu0 %v10274_v6  ;;  %v10322_v6 = vcombine.low %v3496_v22, %v3500_v54  ;;  %v3481_v22 = vld [vmem:[#allocation8 + $0x558] sm:$0xff] }
 0x3b2   :  { %6959 = vmatpush1.bf16.msra.mxu1 %v10212_v25  ;;  %6815 = vmatprep.subr.bf16.mxu0 %v10283_v48  ;;  %v10260_v25 = vcombine.low %v3433_v46, %v3437_v55  ;;  %v10331_v48 = vcombine.high %v3504_v2, %v3508_v4  ;;  %v3485_v54 = vld [vmem:[#allocation8 + $0x578] sm:$0xff] }
 0x3b3   :  { %6960 = vmatprep.subr.bf16.mxu1 %v10221_v8  ;;  %v10269_v8 = vcombine.high %v3441_v5, %v3445_v7 }
 0x3b5   :  { %6816 = vmatpush1.bf16.msra.mxu0 %v10282_v32  ;;  %v10330_v32 = vcombine.low %v3504_v2, %v3508_v4  ;;  %v3489_v2 = vld [vmem:[#allocation8 + $0x598] sm:$0xff] }
 0x3b6   :  { %6961 = vmatpush1.bf16.msra.mxu1 %v10220_v18  ;;  %6817 = vmatprep.subr.bf16.mxu0 %v10291_v20  ;;  %v10268_v18 = vcombine.low %v3441_v5, %v3445_v7  ;;  %v10339_v20 = vcombine.high %v3512_v9, %v3516_v29  ;;  %v3493_v4 = vld [vmem:[#allocation8 + $0x5b8] sm:$0xff]  ;;  %v10308_v7 = vcombine.low %v3481_v22, %v3485_v54 }
 0x3b7   :  { %6962 = vmatprep.subr.bf16.mxu1 %v10229_v26  ;;  %v10277_v26 = vcombine.high %v3449_v14, %v3453_v34 }
 0x3b9   :  { %6818 = vmatpush1.bf16.msra.mxu0 %v10290_v33  ;;  %v10338_v33 = vcombine.low %v3512_v9, %v3516_v29  ;;  %v3497_v9 = vld [vmem:[#allocation8 + $0x5d8] sm:$0xff] }
 0x3ba   :  { %6963 = vmatpush1.bf16.msra.mxu1 %v10228_v16  ;;  %6819 = vmatprep.subr.bf16.mxu0 %v10299_v53  ;;  %v10276_v16 = vcombine.low %v3449_v14, %v3453_v34  ;;  %v10347_v53 = vcombine.high %v3520_v60, %v3524_v28  ;;  %v3501_v29 = vld [vmem:[#allocation8 + $0x5f8] sm:$0xff]  ;;  %v10316_v34 = vcombine.low %v3489_v2, %v3493_v4 }
 0x3bb   :  { %6964 = vmatprep.subr.bf16.mxu1 %v10237_v36  ;;  %v10285_v36 = vcombine.high %v3457_v30, %v3461_v31 }
 0x3bd   :  { %6820 = vmatpush1.bf16.msra.mxu0 %v10298_v41  ;;  %v10346_v41 = vcombine.low %v3520_v60, %v3524_v28  ;;  %v3505_v60 = vld [vmem:[#allocation8 + $0x618] sm:$0xff] }
 0x3be   :  { %6965 = vmatpush1.bf16.msra.mxu1 %v10236_v42  ;;  %6821 = vmatprep.subr.bf16.mxu0 %v10307_v43  ;;  %v10284_v42 = vcombine.low %v3457_v30, %v3461_v31  ;;  %v10355_v43 = vcombine.high %v3528_v27, %v3532_v37  ;;  %v3509_v28 = vld [vmem:[#allocation8 + $0x638] sm:$0xff]  ;;  %v10324_v31 = vcombine.low %v3497_v9, %v3501_v29 }
 0x3bf   :  { %6966 = vmatprep.subr.bf16.mxu1 %v10245_v10  ;;  %v3536_v10 = vld [vmem:[#allocation8 + $0x710] sm:$0xff]  ;;  %v3513_v27 = vld [vmem:[#allocation8 + $0x658] sm:$0xff] }
 0x3c0   :  { %v10362_v46 = vcombine.low %v3536_v10, %v3540_v39  ;;  %v3517_v37 = vld [vmem:[#allocation8 + $0x678] sm:$0xff] }
 0x3c1   :  { %6822 = vmatpush1.bf16.msra.mxu0 %v10306_v47  ;;  %v10363_v47 = vcombine.high %v3536_v10, %v3540_v39  ;;  %v3521_v10 = vld [vmem:[#allocation8 + $0x698] sm:$0xff] }
 0x3c2   :  { %6967 = vmatpush1.bf16.msra.mxu1 %v10244_v50  ;;  %6823 = vmatprep.subr.bf16.mxu0 %v10315_v49  ;;  %v3544_v49 = vld [vmem:[#allocation8 + $0x750] sm:$0xff]  ;;  %v3525_v39 = vld [vmem:[#allocation8 + $0x6b8] sm:$0xff] }
 0x3c3   :  { %6968 = vmatprep.subr.bf16.mxu1 %v10253_v51  ;;  %v3548_v51 = vld [vmem:[#allocation8 + $0x770] sm:$0xff] }
 0x3c4   :  { %v10370_v5 = vcombine.low %v3544_v49, %v3548_v51 }
 0x3c5   :  { %6824 = vmatpush1.bf16.msra.mxu0 %v10314_v57  ;;  %v10371_v57 = vcombine.high %v3544_v49, %v3548_v51  ;;  %v3529_v49 = vld [vmem:[#allocation8 + $0x6d8] sm:$0xff] }
 0x3c6   :  { %6969 = vmatpush1.bf16.msra.mxu1 %v10252_v61  ;;  %6825 = vmatprep.subr.bf16.mxu0 %v10323_v63  ;;  %v10309_v61 = vcombine.high %v3481_v22, %v3485_v54  ;;  %v3552_v63 = vld [vmem:[#allocation8 + $0x790] sm:$0xff]  ;;  %v3533_v51 = vld [vmem:[#allocation8 + $0x6f8] sm:$0xff]  ;;  %v10348_v54 = vcombine.low %v3521_v10, %v3525_v39 }
 0x3c7   :  { %6970 = vmatprep.subr.bf16.mxu1 %v10261_v1  ;;  %v3556_v1 = vld [vmem:[#allocation8 + $0x7b0] sm:$0xff] }
 0x3c8   :  { %v10378_v14 = vcombine.low %v3552_v63, %v3556_v1 }
 0x3c9   :  { %6826 = vmatpush1.bf16.msra.mxu0 %v10322_v6  ;;  %v10379_v6 = vcombine.high %v3552_v63, %v3556_v1  ;;  %v3537_v63 = vld [vmem:[#allocation8 + $0x718] sm:$0xff] }
 0x3ca   :  { %6971 = vmatpush1.bf16.msra.mxu1 %v10260_v25  ;;  %6827 = vmatprep.subr.bf16.mxu0 %v10331_v48  ;;  %v10317_v25 = vcombine.high %v3489_v2, %v3493_v4  ;;  %v3560_v48 = vld [vmem:[#allocation8 + $0x7d0] sm:$0xff]  ;;  %v3541_v1 = vld [vmem:[#allocation8 + $0x738] sm:$0xff]  ;;  %v10356_v4 = vcombine.low %v3529_v49, %v3533_v51 }
 0x3cb   :  { %6983 = vmatprep.subr.bf16.mxu1 %v10269_v8  ;;  %v3564_v8 = vld [vmem:[#allocation8 + $0x7f0] sm:$0xff] }
 0x3cc   :  { %v10386_v30 = vcombine.low %v3560_v48, %v3564_v8 }
 0x3cd   :  { %6828 = vmatpush1.bf16.msra.mxu0 %v10330_v32  ;;  %6973 = vmatmul.mubr.bf16.vlgmr.msra.gmra.mrb[16].mxu1 %v12261_v3  ;;  %v10293_v3 = vcombine.high %v3465_v38, %v3469_v40  ;;  %v10387_v32 = vcombine.high %v3560_v48, %v3564_v8  ;;  %v10332_v40 = vcombine.low %v3505_v60, %v3509_v28  ;;  %v3545_v48 = vld [vmem:[#allocation8 + $0x758] sm:$0xff] }
 0x3ce   :  { %6984 = vmatpush1.bf16.msra.mxu1 %v10268_v18  ;;  %7015 = vmatprep.mubr.bf16.mxu1 %v12297_v56  ;;  %v3473_v56 = vld [vmem:[#allocation8 + $0x518] sm:$0xff]  ;;  %v10325_v18 = vcombine.high %v3497_v9, %v3501_v29  ;;  %v10364_v29 = vcombine.low %v3537_v63, %v3541_v1 }
 0x3cf   :  { %6829 = vmatprep.subr.bf16.mxu0 %v10339_v20  ;;  %6985 = vmatprep.subr.bf16.mxu1 %v10277_v26  ;;  %v10301_v50 = vcombine.high %v3473_v56, %v3477_v45  ;;  %v10300_v55 = vcombine.low %v3473_v56, %v3477_v45  ;;  %v3568_v20 = vld [vmem:[#allocation8 + $0x810] sm:$0xff]  ;;  %v10340_v45 = vcombine.low %v3513_v27, %v3517_v37  ;;  %v3549_v8 = vld [vmem:[#allocation8 + $0x778] sm:$0xff] }
 0x3d0   :  { %v3572_v26 = vld [vmem:[#allocation8 + $0x830] sm:$0xff] }
 0x3d1   :  { %6830 = vmatpush1.bf16.msra.mxu0 %v10338_v33  ;;  %v10395_v33 = vcombine.high %v3568_v20, %v3572_v26  ;;  %v10394_v38 = vcombine.low %v3568_v20, %v3572_v26  ;;  %v3553_v20 = vld [vmem:[#allocation8 + $0x798] sm:$0xff] }
 0x3d2   :  { %6986 = vmatpush1.bf16.msra.mxu1 %v10276_v16  ;;  %6831 = vmatprep.subr.bf16.mxu0 %v10347_v53  ;;  %v10333_v16 = vcombine.high %v3505_v60, %v3509_v28  ;;  %v3576_v53 = vld [vmem:[#allocation8 + $0x850] sm:$0xff]  ;;  %v3557_v26 = vld [vmem:[#allocation8 + $0x7b8] sm:$0xff]  ;;  %v10372_v28 = vcombine.low %v3545_v48, %v3549_v8 }
 0x3d3   :  { %6987 = vmatprep.subr.bf16.mxu1 %v10285_v36  ;;  %v3580_v36 = vld [vmem:[#allocation8 + $0x870] sm:$0xff] }
 0x3d4   :  { %v10402_v56 = vcombine.low %v3576_v53, %v3580_v36 }
 0x3d5   :  { %6832 = vmatpush1.bf16.msra.mxu0 %v10346_v41  ;;  %v10403_v41 = vcombine.high %v3576_v53, %v3580_v36  ;;  %v3561_v53 = vld [vmem:[#allocation8 + $0x7d8] sm:$0xff] }
 0x3d6   :  { %6988 = vmatpush1.bf16.msra.mxu1 %v10284_v42  ;;  %6833 = vmatprep.subr.bf16.mxu0 %v10355_v43  ;;  %v10341_v42 = vcombine.high %v3513_v27, %v3517_v37  ;;  %v3584_v43 = vld [vmem:[#allocation8 + $0x890] sm:$0xff]  ;;  %v3565_v36 = vld [vmem:[#allocation8 + $0x7f8] sm:$0xff]  ;;  %v10380_v37 = vcombine.low %v3553_v20, %v3557_v26 }
 0x3d7   :  { %6989 = vmatprep.subr.bf16.mxu1 %v10293_v3  ;;  %v3588_v3 = vld [vmem:[#allocation8 + $0x8b0] sm:$0xff] }
 0x3d8   :  { %v10410_v22 = vcombine.low %v3584_v43, %v3588_v3 }
 0x3d9   :  { %6834 = vmatpush1.bf16.msra.mxu0 %v10354_v0  ;;  %v10411_v0 = vcombine.high %v3584_v43, %v3588_v3  ;;  %v3569_v43 = vld [vmem:[#allocation8 + $0x818] sm:$0xff] }
 0x3da   :  { %6990 = vmatpush1.bf16.msra.mxu1 %v10292_v12  ;;  %6835 = vmatprep.subr.bf16.mxu0 %v10363_v47  ;;  %v10349_v12 = vcombine.high %v3521_v10, %v3525_v39  ;;  %v3592_v47 = vld [vmem:[#allocation8 + $0x8d0] sm:$0xff]  ;;  %v3573_v3 = vld [vmem:[#allocation8 + $0x838] sm:$0xff]  ;;  %v10388_v39 = vcombine.low %v3561_v53, %v3565_v36 }
 0x3db   :  { %6991 = vmatprep.subr.bf16.mxu1 %v10301_v50  ;;  %v3596_v50 = vld [vmem:[#allocation8 + $0x8f0] sm:$0xff] }
 0x3dc   :  { %v10418_v2 = vcombine.low %v3592_v47, %v3596_v50 }
 0x3dd   :  { %6836 = vmatpush1.bf16.msra.mxu0 %v10362_v46  ;;  %v10419_v46 = vcombine.high %v3592_v47, %v3596_v50  ;;  %v3577_v47 = vld [vmem:[#allocation8 + $0x858] sm:$0xff] }
 0x3de   :  { %6992 = vmatpush1.bf16.msra.mxu1 %v10300_v55  ;;  %6837 = vmatprep.subr.bf16.mxu0 %v10371_v57  ;;  %v10357_v55 = vcombine.high %v3529_v49, %v3533_v51  ;;  %v3600_v57 = vld [vmem:[#allocation8 + $0x910] sm:$0xff]  ;;  %v3581_v50 = vld [vmem:[#allocation8 + $0x878] sm:$0xff]  ;;  %v10396_v51 = vcombine.low %v3569_v43, %v3573_v3 }
 0x3df   :  { %6993 = vmatprep.subr.bf16.mxu1 %v10309_v61  ;;  %v3604_v61 = vld [vmem:[#allocation8 + $0x930] sm:$0xff] }
 0x3e0   :  { %v10426_v9 = vcombine.low %v3600_v57, %v3604_v61 }
 0x3e1   :  { %6838 = vmatpush1.bf16.msra.mxu0 %v10370_v5  ;;  %v10427_v5 = vcombine.high %v3600_v57, %v3604_v61  ;;  %v3585_v57 = vld [vmem:[#allocation8 + $0x898] sm:$0xff] }
 0x3e2   :  { %6994 = vmatpush1.bf16.msra.mxu1 %v10308_v7  ;;  %6839 = vmatprep.subr.bf16.mxu0 %v10379_v6  ;;  %v10365_v7 = vcombine.high %v3537_v63, %v3541_v1  ;;  %v3608_v6 = vld [vmem:[#allocation8 + $0x950] sm:$0xff]  ;;  %v3589_v61 = vld [vmem:[#allocation8 + $0x8b8] sm:$0xff]  ;;  %v10404_v1 = vcombine.low %v3577_v47, %v3581_v50 }
 0x3e3   :  { %6995 = vmatprep.subr.bf16.mxu1 %v10317_v25  ;;  %v3612_v25 = vld [vmem:[#allocation8 + $0x970] sm:$0xff] }
 0x3e4   :  { %v10434_v60 = vcombine.low %v3608_v6, %v3612_v25 }
 0x3e5   :  { %6840 = vmatpush1.bf16.msra.mxu0 %v10378_v14  ;;  %v10435_v14 = vcombine.high %v3608_v6, %v3612_v25  ;;  %v3593_v6 = vld [vmem:[#allocation8 + $0x8d8] sm:$0xff] }
 0x3e6   :  { %6996 = vmatpush1.bf16.msra.mxu1 %v10316_v34  ;;  %6841 = vmatprep.subr.bf16.mxu0 %v10387_v32  ;;  %v10373_v34 = vcombine.high %v3545_v48, %v3549_v8  ;;  %v3616_v32 = vld [vmem:[#allocation8 + $0x990] sm:$0xff]  ;;  %v3597_v25 = vld [vmem:[#allocation8 + $0x8f8] sm:$0xff]  ;;  %v10412_v8 = vcombine.low %v3585_v57, %v3589_v61 }
 0x3e7   :  { %6997 = vmatprep.subr.bf16.mxu1 %v10325_v18  ;;  %v3620_v18 = vld [vmem:[#allocation8 + $0x9b0] sm:$0xff] }
 0x3e8   :  { %v10442_v27 = vcombine.low %v3616_v32, %v3620_v18 }
 0x3e9   :  { %6842 = vmatpush1.bf16.msra.mxu0 %v10386_v30  ;;  %v10443_v30 = vcombine.high %v3616_v32, %v3620_v18  ;;  %v10420_v18 = vcombine.low %v3593_v6, %v3597_v25 }
 0x3ea   :  { %6998 = vmatpush1.bf16.msra.mxu1 %v10324_v31  ;;  %6854 = vmatprep.subr.bf16.mxu0 %v10395_v33  ;;  %v10381_v31 = vcombine.high %v3553_v20, %v3557_v26  ;;  %v3624_v33 = vld [vmem:[#allocation8 + $0x9d0] sm:$0xff] }
 0x3eb   :  { %6999 = vmatprep.subr.bf16.mxu1 %v10333_v16  ;;  %v3628_v16 = vld [vmem:[#allocation8 + $0x9f0] sm:$0xff] }
 0x3ec   :  { %6844 = vmatmul.mubr.bf16.vlgmr.msra.gmra.mrb[20].mxu0 %v12295_v52  ;;  %v10450_v10 = vcombine.low %v3624_v33, %v3628_v16 }
 0x3ed   :  { %6855 = vmatpush1.bf16.msra.mxu0 %v10394_v38  ;;  %6886 = vmatprep.mubr.bf16.mxu0 %v12321_v24  ;;  %v10451_v38 = vcombine.high %v3624_v33, %v3628_v16 }
 0x3ee   :  { %7000 = vmatpush1.bf16.msra.mxu1 %v10332_v40  ;;  %6856 = vmatprep.subr.bf16.mxu0 %v10403_v41  ;;  %v10389_v40 = vcombine.high %v3561_v53, %v3565_v36  ;;  %v3632_v41 = vld [vmem:[#allocation8 + $0xa10] sm:$0xff] }
 0x3ef   :  { %7001 = vmatprep.subr.bf16.mxu1 %v10341_v42  ;;  %v3636_v42 = vld [vmem:[#allocation8 + $0xa30] sm:$0xff] }
 0x3f0   :  { %v10458_v49 = vcombine.low %v3632_v41, %v3636_v42 }
 0x3f1   :  { %6857 = vmatpush1.bf16.msra.mxu0 %v10402_v56  ;;  %v10459_v56 = vcombine.high %v3632_v41, %v3636_v42 }
 0x3f2   :  { %7002 = vmatpush1.bf16.msra.mxu1 %v10340_v45  ;;  %6858 = vmatprep.subr.bf16.mxu0 %v10411_v0  ;;  %v10397_v45 = vcombine.high %v3569_v43, %v3573_v3  ;;  %v3640_v0 = vld [vmem:[#allocation8 + $0xa50] sm:$0xff] }
 0x3f3   :  { %7003 = vmatprep.subr.bf16.mxu1 %v10349_v12  ;;  %v3644_v12 = vld [vmem:[#allocation8 + $0xa70] sm:$0xff] }
 0x3f4   :  { %v10466_v63 = vcombine.low %v3640_v0, %v3644_v12 }
 0x3f5   :  { %6859 = vmatpush1.bf16.msra.mxu0 %v10410_v22  ;;  %v10467_v22 = vcombine.high %v3640_v0, %v3644_v12 }
 0x3f6   :  { %7004 = vmatpush1.bf16.msra.mxu1 %v10348_v54  ;;  %6860 = vmatprep.subr.bf16.mxu0 %v10419_v46  ;;  %v10405_v54 = vcombine.high %v3577_v47, %v3581_v50  ;;  %v3648_v46 = vld [vmem:[#allocation8 + $0xa90] sm:$0xff] }
 0x3f7   :  { %7005 = vmatprep.subr.bf16.mxu1 %v10357_v55  ;;  %v3652_v55 = vld [vmem:[#allocation8 + $0xab0] sm:$0xff] }
 0x3f8   :  { %v10474_v48 = vcombine.low %v3648_v46, %v3652_v55 }
 0x3f9   :  { %6861 = vmatpush1.bf16.msra.mxu0 %v10418_v2  ;;  %v10475_v2 = vcombine.high %v3648_v46, %v3652_v55 }
 0x3fa   :  { %7006 = vmatpush1.bf16.msra.mxu1 %v10356_v4  ;;  %6862 = vmatprep.subr.bf16.mxu0 %v10427_v5  ;;  %v10413_v4 = vcombine.high %v3585_v57, %v3589_v61  ;;  %v3656_v5 = vld [vmem:[#allocation8 + $0xad0] sm:$0xff] }
 0x3fb   :  { %7007 = vmatprep.subr.bf16.mxu1 %v10365_v7  ;;  %v3660_v7 = vld [vmem:[#allocation8 + $0xaf0] sm:$0xff] }
 0x3fc   :  { %v10482_v32 = vcombine.low %v3656_v5, %v3660_v7 }
 0x3fd   :  { %6863 = vmatpush1.bf16.msra.mxu0 %v10426_v9  ;;  %v10483_v9 = vcombine.high %v3656_v5, %v3660_v7 }
 0x3fe   :  { %7008 = vmatpush1.bf16.msra.mxu1 %v10364_v29  ;;  %6864 = vmatprep.subr.bf16.mxu0 %v10435_v14  ;;  %v3664_v29 = vld [vmem:[#allocation8 + $0xb10] sm:$0xff] }
 0x3ff   :  { %7009 = vmatprep.subr.bf16.mxu1 %v10373_v34  ;;  %v3668_v14 = vld [vmem:[#allocation8 + $0xb30] sm:$0xff]  ;;  %v3605_v34 = vld [vmem:[#allocation8 + $0x938] sm:$0xff] }
 0x400   :  { %v10491_v20 = vcombine.high %v3664_v29, %v3668_v14  ;;  %v10490_v33 = vcombine.low %v3664_v29, %v3668_v14 }
 0x401   :  { %6865 = vmatpush1.bf16.msra.mxu0 %v10434_v60  ;;  %v3672_v60 = vld [vmem:[#allocation8 + $0xb50] sm:$0xff] }
 0x402   :  { %7010 = vmatpush1.bf16.msra.mxu1 %v10372_v28  ;;  %6866 = vmatprep.subr.bf16.mxu0 %v10443_v30  ;;  %v3676_v28 = vld [vmem:[#allocation8 + $0xb70] sm:$0xff]  ;;  %v3609_v30 = vld [vmem:[#allocation8 + $0x958] sm:$0xff] }
 0x403   :  { %7011 = vmatprep.subr.bf16.mxu1 %v10381_v31  ;;  %v3613_v31 = vld [vmem:[#allocation8 + $0x978] sm:$0xff]  ;;  %v10499_v53 = vcombine.high %v3672_v60, %v3676_v28  ;;  %v10498_v41 = vcombine.low %v3672_v60, %v3676_v28 }
 0x404   :  { %v10437_v36 = vcombine.high %v3609_v30, %v3613_v31  ;;  %v10436_v42 = vcombine.low %v3609_v30, %v3613_v31 }
 0x405   :  { %6867 = vmatpush1.bf16.msra.mxu0 %v10442_v27  ;;  %v3680_v27 = vld [vmem:[#allocation8 + $0xb90] sm:$0xff] }
 0x406   :  { %7012 = vmatpush1.bf16.msra.mxu1 %v10380_v37  ;;  %6868 = vmatprep.subr.bf16.mxu0 %v10451_v38  ;;  %v3684_v37 = vld [vmem:[#allocation8 + $0xbb0] sm:$0xff]  ;;  %v3617_v38 = vld [vmem:[#allocation8 + $0x998] sm:$0xff] }
 0x407   :  { %7013 = vmatprep.subr.bf16.mxu1 %v10389_v40  ;;  %v3621_v40 = vld [vmem:[#allocation8 + $0x9b8] sm:$0xff]  ;;  %v10507_v43 = vcombine.high %v3680_v27, %v3684_v37  ;;  %v10506_v0 = vcombine.low %v3680_v27, %v3684_v37 }
 0x408   :  { %v10445_v3 = vcombine.high %v3617_v38, %v3621_v40  ;;  %v10444_v12 = vcombine.low %v3617_v38, %v3621_v40 }
 0x409   :  { %6869 = vmatpush1.bf16.msra.mxu0 %v10450_v10  ;;  %v3688_v10 = vld [vmem:[#allocation8 + $0xbd0] sm:$0xff] }
 0x40a   :  { %7014 = vmatpush1.bf16.msra.mxu1 %v10388_v39  ;;  %6870 = vmatprep.subr.bf16.mxu0 %v10459_v56  ;;  %v3692_v39 = vld [vmem:[#allocation8 + $0xbf0] sm:$0xff]  ;;  %v3625_v56 = vld [vmem:[#allocation8 + $0x9d8] sm:$0xff] }
 0x40b   :  { %7026 = vmatprep.subr.bf16.mxu1 %v10397_v45  ;;  %v3629_v45 = vld [vmem:[#allocation8 + $0x9f8] sm:$0xff]  ;;  %v10515_v47 = vcombine.high %v3688_v10, %v3692_v39  ;;  %v10514_v46 = vcombine.low %v3688_v10, %v3692_v39  ;;  %v12378_v39 = vld [vmem:[#allocation10] sm:$0xff] }
 0x40c   :  { %v10453_v50 = vcombine.high %v3625_v56, %v3629_v45  ;;  %v10452_v55 = vcombine.low %v3625_v56, %v3629_v45 }
 0x40d   :  { %6871 = vmatpush1.bf16.msra.mxu0 %v10458_v49  ;;  %7016 = vmatmul.mubr.bf16.vlgmr.msra.gmra.mrb[16].mxu1 %v12295_v52  ;;  %v10421_v52 = vcombine.high %v3593_v6, %v3597_v25  ;;  %v3696_v49 = vld [vmem:[#allocation8 + $0xc10] sm:$0xff] }
 0x40e   :  { %7027 = vmatpush1.bf16.msra.mxu1 %v10396_v51  ;;  %7058 = vmatprep.mubr.bf16.mxu1 %v12321_v24  ;;  %v3601_v24 = vld [vmem:[#allocation8 + $0x918] sm:$0xff]  ;;  %v3700_v51 = vld [vmem:[#allocation8 + $0xc30] sm:$0xff] }
 0x40f   :  { %6872 = vmatprep.subr.bf16.mxu0 %v10467_v22  ;;  %7028 = vmatprep.subr.bf16.mxu1 %v10405_v54  ;;  %v10429_v26 = vcombine.high %v3601_v24, %v3605_v34  ;;  %v10428_v16 = vcombine.low %v3601_v24, %v3605_v34  ;;  %v3633_v22 = vld [vmem:[#allocation8 + $0xa18] sm:$0xff]  ;;  %v10523_v57 = vcombine.high %v3696_v49, %v3700_v51 }
 0x410   :  { %v3637_v54 = vld [vmem:[#allocation8 + $0xa38] sm:$0xff]  ;;  %v10522_v5 = vcombine.low %v3696_v49, %v3700_v51 }
 0x411   :  { %6873 = vmatpush1.bf16.msra.mxu0 %v10466_v63  ;;  %v10461_v61 = vcombine.high %v3633_v22, %v3637_v54  ;;  %v3704_v63 = vld [vmem:[#allocation8 + $0xc50] sm:$0xff]  ;;  %v10460_v7 = vcombine.low %v3633_v22, %v3637_v54  ;;  %v3681_v49 = vld [vmem:[#allocation8 + $0xb98] sm:$0xff]  ;;  %v3831_v54 = vrot.slane %v12378_v39, %v12248_v58 }
 0x412   :  { %7029 = vmatpush1.bf16.msra.mxu1 %v10404_v1  ;;  %6874 = vmatprep.subr.bf16.mxu0 %v10475_v2  ;;  %v3708_v1 = vld [vmem:[#allocation8 + $0xc70] sm:$0xff]  ;;  %v3641_v2 = vld [vmem:[#allocation8 + $0xa58] sm:$0xff] }
 0x413   :  { %7030 = vmatprep.subr.bf16.mxu1 %v10413_v4  ;;  %v3645_v4 = vld [vmem:[#allocation8 + $0xa78] sm:$0xff]  ;;  %v10531_v6 = vcombine.high %v3704_v63, %v3708_v1  ;;  %v10530_v29 = vcombine.low %v3704_v63, %v3708_v1  ;;  %v3752_v63 = vld [vmem:[#allocation8 + $0xdd0] sm:$0xff] }
 0x414   :  { %v10469_v25 = vcombine.high %v3641_v2, %v3645_v4  ;;  %v10468_v14 = vcombine.low %v3641_v2, %v3645_v4  ;;  %v3685_v51 = vld [vmem:[#allocation8 + $0xbb8] sm:$0xff]  ;;  %v3756_v1 = vld [vmem:[#allocation8 + $0xdf0] sm:$0xff] }
 0x415   :  { %6875 = vmatpush1.bf16.msra.mxu0 %v10474_v48  ;;  %v3712_v48 = vld [vmem:[#allocation8 + $0xc90] sm:$0xff] }
 0x416   :  { %7031 = vmatpush1.bf16.msra.mxu1 %v10412_v8  ;;  %6876 = vmatprep.subr.bf16.mxu0 %v10483_v9  ;;  %v3716_v8 = vld [vmem:[#allocation8 + $0xcb0] sm:$0xff]  ;;  %v3649_v9 = vld [vmem:[#allocation8 + $0xa98] sm:$0xff] }
 0x417   :  { %7032 = vmatprep.subr.bf16.mxu1 %v10421_v52  ;;  %v3653_v52 = vld [vmem:[#allocation8 + $0xab8] sm:$0xff]  ;;  %v10539_v24 = vcombine.high %v3712_v48, %v3716_v8  ;;  %v10538_v60 = vcombine.low %v3712_v48, %v3716_v8 }
 0x418   :  { %v10477_v34 = vcombine.high %v3649_v9, %v3653_v52  ;;  %v10476_v28 = vcombine.low %v3649_v9, %v3653_v52  ;;  %v10508_v52 = vcombine.low %v3681_v49, %v3685_v51 }
 0x419   :  { %6877 = vmatpush1.bf16.msra.mxu0 %v10482_v32  ;;  %v3720_v32 = vld [vmem:[#allocation8 + $0xcd0] sm:$0xff] }
 0x41a   :  { %7033 = vmatpush1.bf16.msra.mxu1 %v10420_v18  ;;  %6878 = vmatprep.subr.bf16.mxu0 %v10491_v20  ;;  %v3724_v18 = vld [vmem:[#allocation8 + $0xcf0] sm:$0xff]  ;;  %v3657_v20 = vld [vmem:[#allocation8 + $0xad8] sm:$0xff] }
 0x41b   :  { %7034 = vmatprep.subr.bf16.mxu1 %v10429_v26  ;;  %v3661_v26 = vld [vmem:[#allocation8 + $0xaf8] sm:$0xff]  ;;  %v10547_v30 = vcombine.high %v3720_v32, %v3724_v18  ;;  %v10546_v27 = vcombine.low %v3720_v32, %v3724_v18  ;;  %v3764_v32 = vld [vmem:[#allocation8 + $0xe30] sm:$0xff] }
 0x41c   :  { %v10485_v31 = vcombine.high %v3657_v20, %v3661_v26  ;;  %v10484_v37 = vcombine.low %v3657_v20, %v3661_v26  ;;  %v3697_v26 = vld [vmem:[#allocation8 + $0xc18] sm:$0xff] }
 0x41d   :  { %6879 = vmatpush1.bf16.msra.mxu0 %v10490_v33  ;;  %v3728_v33 = vld [vmem:[#allocation8 + $0xd10] sm:$0xff] }
 0x41e   :  { %7035 = vmatpush1.bf16.msra.mxu1 %v10428_v16  ;;  %6880 = vmatprep.subr.bf16.mxu0 %v10499_v53  ;;  %v3732_v16 = vld [vmem:[#allocation8 + $0xd30] sm:$0xff]  ;;  %v3665_v53 = vld [vmem:[#allocation8 + $0xb18] sm:$0xff] }
 0x41f   :  { %7036 = vmatprep.subr.bf16.mxu1 %v10437_v36  ;;  %v3669_v36 = vld [vmem:[#allocation8 + $0xb38] sm:$0xff]  ;;  %v10555_v38 = vcombine.high %v3728_v33, %v3732_v16  ;;  %v10554_v10 = vcombine.low %v3728_v33, %v3732_v16 }
 0x420   :  { %v10493_v40 = vcombine.high %v3665_v53, %v3669_v36  ;;  %v10492_v56 = vcombine.low %v3665_v53, %v3669_v36 }
 0x421   :  { %6881 = vmatpush1.bf16.msra.mxu0 %v10498_v41  ;;  %v3736_v41 = vld [vmem:[#allocation8 + $0xd50] sm:$0xff] }
 0x422   :  { %7037 = vmatpush1.bf16.msra.mxu1 %v10436_v42  ;;  %6882 = vmatprep.subr.bf16.mxu0 %v10507_v43  ;;  %v3740_v42 = vld [vmem:[#allocation8 + $0xd70] sm:$0xff]  ;;  %v3673_v43 = vld [vmem:[#allocation8 + $0xb58] sm:$0xff] }
 0x423   :  { %7038 = vmatprep.subr.bf16.mxu1 %v10445_v3  ;;  %v3677_v3 = vld [vmem:[#allocation8 + $0xb78] sm:$0xff]  ;;  %v10563_v45 = vcombine.high %v3736_v41, %v3740_v42  ;;  %v10562_v22 = vcombine.low %v3736_v41, %v3740_v42 }
 0x424   :  { %v3709_v41 = vld [vmem:[#allocation8 + $0xc78] sm:$0xff] }
 0x425   :  { %6883 = vmatpush1.bf16.msra.mxu0 %v10506_v0  ;;  %v10501_v0 = vcombine.high %v3673_v43, %v3677_v3 }
 0x426   :  { %7039 = vmatpush1.bf16.msra.mxu1 %v10444_v12  ;;  %6884 = vmatprep.subr.bf16.mxu0 %v10515_v47  ;;  %v3744_v12 = vld [vmem:[#allocation8 + $0xd90] sm:$0xff] }
 0x427   :  { %7040 = vmatprep.subr.bf16.mxu1 %v10453_v50  ;;  %v3748_v47 = vld [vmem:[#allocation8 + $0xdb0] sm:$0xff]  ;;  %v3827_v50 = vrot.slane %v12378_v39, %v12242_v19 }
 0x428   :  { %v10570_v48 = vcombine.low %v3744_v12, %v3748_v47 }
 0x429   :  { %6885 = vmatpush1.bf16.msra.mxu0 %v10514_v46  ;;  %v10500_v46 = vcombine.low %v3673_v43, %v3677_v3 }
 0x42a   :  { %7041 = vmatpush1.bf16.msra.mxu1 %v10452_v55  ;;  %6897 = vmatprep.subr.bf16.mxu0 %v10523_v57  ;;  %v10571_v55 = vcombine.high %v3744_v12, %v3748_v47  ;;  %v3717_v12 = vld [vmem:[#allocation8 + $0xcb8] sm:$0xff] }
 0x42b   :  { %7042 = vmatprep.subr.bf16.mxu1 %v10461_v61  ;;  %v10509_v61 = vcombine.high %v3681_v49, %v3685_v51 }
 0x42c   :  { %6887 = vmatmul.mubr.bf16.vlgmr.msra.gmra.mrb[20].mxu0 %v12319_v17 }
 0x42d   :  { %6898 = vmatpush1.bf16.msra.mxu0 %v10522_v5  ;;  %6929 = vmatprep.mubr.bf16.mxu0 %v12358_v15  ;;  %v3689_v5 = vld [vmem:[#allocation8 + $0xbd8] sm:$0xff] }
 0x42e   :  { %7043 = vmatpush1.bf16.msra.mxu1 %v10460_v7  ;;  %6899 = vmatprep.subr.bf16.mxu0 %v10531_v6  ;;  %v3693_v7 = vld [vmem:[#allocation8 + $0xbf8] sm:$0xff] }
 0x42f   :  { %7044 = vmatprep.subr.bf16.mxu1 %v10469_v25  ;;  %v10516_v16 = vcombine.low %v3689_v5, %v3693_v7 }
 0x431   :  { %6900 = vmatpush1.bf16.msra.mxu0 %v10530_v29  ;;  %v10579_v29 = vcombine.high %v3752_v63, %v3756_v1 }
 0x432   :  { %7045 = vmatpush1.bf16.msra.mxu1 %v10468_v14  ;;  %6901 = vmatprep.subr.bf16.mxu0 %v10539_v24  ;;  %v10517_v24 = vcombine.high %v3689_v5, %v3693_v7 }
 0x433   :  { %7046 = vmatprep.subr.bf16.mxu1 %v10477_v34  ;;  %v3760_v34 = vld [vmem:[#allocation8 + $0xe10] sm:$0xff] }
 0x434   :  { %v10587_v53 = vcombine.high %v3760_v34, %v3764_v32  ;;  %v10586_v42 = vcombine.low %v3760_v34, %v3764_v32  ;;  %v3808_v32 = vld [vmem:[#allocation8 + $0xf90] sm:$0xff] }
 0x435   :  { %6902 = vmatpush1.bf16.msra.mxu0 %v10538_v60  ;;  %v3701_v60 = vld [vmem:[#allocation8 + $0xc38] sm:$0xff] }
 0x436   :  { %7047 = vmatpush1.bf16.msra.mxu1 %v10476_v28  ;;  %6903 = vmatprep.subr.bf16.mxu0 %v10547_v30  ;;  %v10524_v43 = vcombine.low %v3697_v26, %v3701_v60 }
 0x437   :  { %7048 = vmatprep.subr.bf16.mxu1 %v10485_v31  ;;  %v10578_v31 = vcombine.low %v3752_v63, %v3756_v1  ;;  %v3792_v1 = vld [vmem:[#allocation8 + $0xf10] sm:$0xff] }
 0x439   :  { %6904 = vmatpush1.bf16.msra.mxu0 %v10546_v27  ;;  %v10525_v27 = vcombine.high %v3697_v26, %v3701_v60  ;;  %v3745_v26 = vld [vmem:[#allocation8 + $0xd98] sm:$0xff] }
 0x43a   :  { %7049 = vmatpush1.bf16.msra.mxu1 %v10484_v37  ;;  %6905 = vmatprep.subr.bf16.mxu0 %v10555_v38  ;;  %v3768_v37 = vld [vmem:[#allocation8 + $0xe50] sm:$0xff]  ;;  %v3749_v60 = vld [vmem:[#allocation8 + $0xdb8] sm:$0xff] }
 0x43b   :  { %7050 = vmatprep.subr.bf16.mxu1 %v10493_v40  ;;  %v3772_v38 = vld [vmem:[#allocation8 + $0xe70] sm:$0xff]  ;;  %v3705_v40 = vld [vmem:[#allocation8 + $0xc58] sm:$0xff] }
 0x43c   :  { %v10595_v3 = vcombine.high %v3768_v37, %v3772_v38  ;;  %v10594_v47 = vcombine.low %v3768_v37, %v3772_v38  ;;  %v3816_v37 = vld [vmem:[#allocation8 + $0xfd0] sm:$0xff] }
 0x43d   :  { %6906 = vmatpush1.bf16.msra.mxu0 %v10554_v10  ;;  %v10533_v10 = vcombine.high %v3705_v40, %v3709_v41  ;;  %v3820_v38 = vld [vmem:[#allocation8 + $0xff0] sm:$0xff] }
 0x43e   :  { %7051 = vmatpush1.bf16.msra.mxu1 %v10492_v56  ;;  %6907 = vmatprep.subr.bf16.mxu0 %v10563_v45  ;;  %v3776_v56 = vld [vmem:[#allocation8 + $0xe90] sm:$0xff] }
 0x43f   :  { %v6587_v57 = vpop.f32.mrb[16].mxu0  ;;  %7052 = vmatprep.subr.bf16.mxu1 %v10501_v0  ;;  %v3780_v45 = vld [vmem:[#allocation8 + $0xeb0] sm:$0xff]  ;;  %v3713_v0 = vld [vmem:[#allocation8 + $0xc98] sm:$0xff] }
 0x440   :  { %v11033_v2 = vadd.f32 %v6587_v57, %v3827_v50  ;;  %v6589_v4 = vpop.f32.mrb[17].mxu0  ;;  %v10603_v49 = vcombine.high %v3776_v56, %v3780_v45  ;;  %v10541_v51 = vcombine.high %v3713_v0, %v3717_v12  ;;  %v10602_v57 = vcombine.low %v3776_v56, %v3780_v45 }
 0x441   :  { %v11034_v6 = vadd.f32 %v6589_v4, %v3831_v54  ;;  %6908 = vmatpush1.bf16.msra.mxu0 %v10562_v22  ;;  %v6591_v25 = vpop.f32.mrb[18].mxu0  ;;  %v3784_v22 = vld [vmem:[#allocation8 + $0xed0] sm:$0xff]  ;;  %v3733_v4 = vld [vmem:[#allocation8 + $0xd38] sm:$0xff] }
 0x442   :  { %v11035_v8 = vadd.f32 %v6591_v25, %v3827_v50  ;;  %7053 = vmatpush1.bf16.msra.mxu1 %v10500_v46  ;;  %v6593_v9 = vpop.f32.mrb[19].mxu0  ;;  %6909 = vmatprep.subr.bf16.mxu0 %v10571_v55  ;;  %v7112_v18 = vmax.f32 %v11033_v2, 0.0  ;;  %v10532_v50 = vcombine.low %v3705_v40, %v3709_v41  ;;  %v3721_v46 = vld [vmem:[#allocation8 + $0xcd8] sm:$0xff]  ;;  %v3796_v2 = vld [vmem:[#allocation8 + $0xf30] sm:$0xff] }
 0x443   :  { %v11036_v14 = vadd.f32 %v6593_v9, %v3831_v54  ;;  %7054 = vmatprep.subr.bf16.mxu1 %v10509_v61  ;;  %v7113_v28 = vmax.f32 %v11034_v6, 0.0  ;;  %v3788_v54 = vld [vmem:[#allocation8 + $0xef0] sm:$0xff]  ;;  %v3725_v55 = vld [vmem:[#allocation8 + $0xcf8] sm:$0xff]  ;;  %v10540_v61 = vcombine.low %v3713_v0, %v3717_v12  ;;  %v10619_v6 = vcombine.high %v3792_v1, %v3796_v2 }
 0x444   :  { %v7120_v20 = vmax.f32 %v11035_v8, 0.0  ;;  %v10611_v63 = vcombine.high %v3784_v22, %v3788_v54  ;;  %v10610_v5 = vcombine.low %v3784_v22, %v3788_v54  ;;  %v10548_v7 = vcombine.low %v3721_v46, %v3725_v55  ;;  %v3804_v8 = vld [vmem:[#allocation8 + $0xf70] sm:$0xff]  ;;  %v3737_v9 = vld [vmem:[#allocation8 + $0xd58] sm:$0xff] }
 0x445   :  { %v7121_v30 = vmax.f32 %v11036_v14, 0.0  ;;  %6910 = vmatpush1.bf16.msra.mxu0 %v10570_v48  ;;  %v3800_v48 = vld [vmem:[#allocation8 + $0xf50] sm:$0xff]  ;;  %v10572_v0 = vcombine.low %v3745_v26, %v3749_v60  ;;  %v10643_v12 = vcombine.high %v3816_v37, %v3820_v38  ;;  %v3761_v22 = vld [vmem:[#allocation8 + $0xe18] sm:$0xff] }
 0x446   :  { %v12384_v33 = vpack.c.bf16 %v7120_v20, %v7112_v18  ;;  %7055 = vmatpush1.bf16.msra.mxu1 %v10508_v52  ;;  %6911 = vmatprep.subr.bf16.mxu0 %v10579_v29  ;;  %v3741_v52 = vld [vmem:[#allocation8 + $0xd78] sm:$0xff]  ;;  %v10618_v29 = vcombine.low %v3792_v1, %v3796_v2  ;;  %v3812_v18 = vld [vmem:[#allocation8 + $0xfb0] sm:$0xff]  ;;  %v3835_v20 = vrot.slane %v12378_v39, %v12282_v62 }
 0x447   :  { %v12386_v36 = vpack.c.bf16 %v7121_v30, %v7113_v28  ;;  %7056 = vmatprep.subr.bf16.mxu1 %v10517_v24  ;;  %v10627_v24 = vcombine.high %v3800_v48, %v3804_v8  ;;  %v10565_v34 = vcombine.high %v3737_v9, %v3741_v52  ;;  %v10626_v28 = vcombine.low %v3800_v48, %v3804_v8  ;;  %v3765_v54 = vld [vmem:[#allocation8 + $0xe38] sm:$0xff] }
 0x448   :  { %v3839_v30 = vrot.slane %v12378_v39, %v12285_v59  ;;  %v10634_v56 = vcombine.low %v3808_v32, %v3812_v18  ;;  %v10589_v2 = vcombine.high %v3761_v22, %v3765_v54  ;;  %v3777_v48 = vld [vmem:[#allocation8 + $0xe98] sm:$0xff] }
 0x449   :  { %6912 = vmatpush1.bf16.msra.mxu0 %v10578_v31  ;;  %v10564_v31 = vcombine.low %v3737_v9, %v3741_v52  ;;  %v3781_v8 = vld [vmem:[#allocation8 + $0xeb8] sm:$0xff] }
 0x44a   :  { %7057 = vmatpush1.bf16.msra.mxu1 %v10516_v16  ;;  %6913 = vmatprep.subr.bf16.mxu0 %v10587_v53  ;;  %v10635_v16 = vcombine.high %v3808_v32, %v3812_v18  ;;  %v11199_v9 = vld [vmem:[#allocation11 + $0x20] ss:$16 sps:$4 sm:$0xff]   ;;  %v10604_v18 = vcombine.low %v3777_v48, %v3781_v8 }
 0x44b   :  { %7069 = vmatprep.subr.bf16.mxu1 %v10525_v27  ;;  %v10573_v27 = vcombine.high %v3745_v26, %v3749_v60  ;;  %v11202_v32 = vld [vmem:[#allocation11 + $0x40] ss:$16 sps:$4 sm:$0xff]  }
 0x44c   :  { %v3793_v60 = vld [vmem:[#allocation8 + $0xf18] sm:$0xff] }
 0x44d   :  { %6914 = vmatpush1.bf16.msra.mxu0 %v10586_v42  ;;  %7059 = vmatmul.mubr.bf16.vlgmr.msra.gmra.mrb[16].mxu1 %v12319_v17  ;;  %v10549_v17 = vcombine.high %v3721_v46, %v3725_v55  ;;  %v3753_v42 = vld [vmem:[#allocation8 + $0xdd8] sm:$0xff] }
 0x44e   :  { %7070 = vmatpush1.bf16.msra.mxu1 %v10524_v43  ;;  %7101 = vmatprep.mubr.bf16.mxu1 %v12358_v15  ;;  %v3729_v15 = vld [vmem:[#allocation8 + $0xd18] sm:$0xff] }
 0x44f   :  { %6915 = vmatprep.subr.bf16.mxu0 %v10595_v3  ;;  %7071 = vmatprep.subr.bf16.mxu1 %v10533_v10  ;;  %v10557_v25 = vcombine.high %v3729_v15, %v3733_v4  ;;  %v10556_v14 = vcombine.low %v3729_v15, %v3733_v4  ;;  %v3757_v43 = vld [vmem:[#allocation8 + $0xdf8] sm:$0xff] }
 0x450   :  { %v3769_v15 = vld [vmem:[#allocation8 + $0xe58] sm:$0xff] }
 0x451   :  { %6916 = vmatpush1.bf16.msra.mxu0 %v10594_v47  ;;  %v3773_v4 = vld [vmem:[#allocation8 + $0xe78] sm:$0xff] }
 0x452   :  { %7072 = vmatpush1.bf16.msra.mxu1 %v10532_v50  ;;  %6917 = vmatprep.subr.bf16.mxu0 %v10603_v49  ;;  %v10581_v50 = vcombine.high %v3753_v42, %v3757_v43  ;;  %v10596_v52 = vcombine.low %v3769_v15, %v3773_v4 }
 0x453   :  { %7073 = vmatprep.subr.bf16.mxu1 %v10541_v51 }
 0x455   :  { %6918 = vmatpush1.bf16.msra.mxu0 %v10602_v57  ;;  %v10642_v57 = vcombine.low %v3816_v37, %v3820_v38  ;;  %v3805_v37 = vld [vmem:[#allocation8 + $0xf78] sm:$0xff] }
 0x456   :  { %7074 = vmatpush1.bf16.msra.mxu1 %v10540_v61  ;;  %6919 = vmatprep.subr.bf16.mxu0 %v10611_v63  ;;  %v10580_v63 = vcombine.low %v3753_v42, %v3757_v43  ;;  %v11208_v38 = vld [vmem:[#allocation11 + $0x80] ss:$16 sps:$4 sm:$0xff]  }
 0x457   :  { %7075 = vmatprep.subr.bf16.mxu1 %v10549_v17  ;;  %v11198_v17 = vld [vmem:[#allocation11 + $0x4] ss:$16 sps:$4 sm:$0xff]  }
 0x458   :  { %v3809_v43 = vld [vmem:[#allocation8 + $0xf98] sm:$0xff] }
 0x459   :  { %6920 = vmatpush1.bf16.msra.mxu0 %v10610_v5  ;;  %v11196_v5 = vld [vmem:[#allocation11] ss:$16 sps:$4 sm:$0xff]  }
 0x45a   :  { %7076 = vmatpush1.bf16.msra.mxu1 %v10548_v7  ;;  %6921 = vmatprep.subr.bf16.mxu0 %v10619_v6  ;;  %v10588_v7 = vcombine.low %v3761_v22, %v3765_v54  ;;  %v11201_v6 = vld [vmem:[#allocation11 + $0x24] ss:$16 sps:$4 sm:$0xff]   ;;  %v11217_v22 = vld [vmem:[#allocation11 + $0xe0] ss:$16 sps:$4 sm:$0xff]  }
 0x45b   :  { %7077 = vmatprep.subr.bf16.mxu1 %v10557_v25  ;;  %v10597_v25 = vcombine.high %v3769_v15, %v3773_v4  ;;  %v11226_v15 = vld [vmem:[#allocation11 + $0x120] ss:$16 sps:$4 sm:$0xff]   ;;  %v11229_v4 = vld [vmem:[#allocation11 + $0x28] ss:$16 sps:$4 sm:$0xff]  }
 0x45d   :  { %6922 = vmatpush1.bf16.msra.mxu0 %v10618_v29  ;;  %v11204_v29 = vld [vmem:[#allocation11 + $0x44] ss:$16 sps:$4 sm:$0xff]  }
 0x45e   :  { %7078 = vmatpush1.bf16.msra.mxu1 %v10556_v14  ;;  %6923 = vmatprep.subr.bf16.mxu0 %v10627_v24  ;;  %v10605_v14 = vcombine.high %v3777_v48, %v3781_v8  ;;  %v3785_v24 = vld [vmem:[#allocation8 + $0xed8] sm:$0xff]  ;;  %v11243_v8 = vld [vmem:[#allocation11 + $0x6c] ss:$16 sps:$4 sm:$0xff]  }
 0x45f   :  { %v6759_v53 = vpop.f32.mrb[12].mxu1  ;;  %7079 = vmatprep.subr.bf16.mxu1 %v10565_v34  ;;  %v3789_v34 = vld [vmem:[#allocation8 + $0xef8] sm:$0xff] }
 0x460   :  { %v11037_v40 = vadd.f32 %v6759_v53, %v3835_v20  ;;  %v6761_v41 = vpop.f32.mrb[13].mxu1  ;;  %v10613_v26 = vcombine.high %v3785_v24, %v3789_v34  ;;  %v11240_v48 = vld [vmem:[#allocation11 + $0x164] ss:$16 sps:$4 sm:$0xff]  }
 0x461   :  { %v11038_v3 = vadd.f32 %v6761_v41, %v3839_v30  ;;  %6924 = vmatpush1.bf16.msra.mxu0 %v10626_v28  ;;  %v6763_v10 = vpop.f32.mrb[14].mxu1  ;;  %v3797_v28 = vld [vmem:[#allocation8 + $0xf38] sm:$0xff] }
 0x462   :  { %v11039_v45 = vadd.f32 %v6763_v10, %v3835_v20  ;;  %7080 = vmatpush1.bf16.msra.mxu1 %v10564_v31  ;;  %v6765_v39 = vpop.f32.mrb[15].mxu1  ;;  %6925 = vmatprep.subr.bf16.mxu0 %v10635_v16  ;;  %v7114_v49 = vmax.f32 %v11037_v40, 0.0  ;;  %v11207_v20 = vld [vmem:[#allocation11 + $0x64] ss:$16 sps:$4 sm:$0xff]   ;;  %v10612_v31 = vcombine.low %v3785_v24, %v3789_v34  ;;  %v10621_v53 = vcombine.high %v3793_v60, %v3797_v28  ;;  %v11211_v10 = vld [vmem:[#allocation11 + $0xa0] ss:$16 sps:$4 sm:$0xff]  }
 0x463   :  { %v11040_v47 = vadd.f32 %v6765_v39, %v3839_v30  ;;  %7081 = vmatprep.subr.bf16.mxu1 %v10573_v27  ;;  %v7115_v46 = vmax.f32 %v11038_v3, 0.0  ;;  %v11205_v30 = vld [vmem:[#allocation11 + $0x60] ss:$16 sps:$4 sm:$0xff]   ;;  %v11210_v16 = vld [vmem:[#allocation11 + $0x84] ss:$16 sps:$4 sm:$0xff]   ;;  %v10620_v40 = vcombine.low %v3793_v60, %v3797_v28 }
 0x464   :  { %v7122_v51 = vmax.f32 %v11039_v45, 0.0  ;;  %v3801_v27 = vld [vmem:[#allocation8 + $0xf58] sm:$0xff]  ;;  %v11255_v34 = vld [vmem:[#allocation11 + $0xac] ss:$16 sps:$4 sm:$0xff]   ;;  %v11259_v28 = vld [vmem:[#allocation11 + $0xc8] ss:$16 sps:$4 sm:$0xff]  }
 0x465   :  { %v7123_v55 = vmax.f32 %v11040_v47, 0.0  ;;  %6926 = vmatpush1.bf16.msra.mxu0 %v10634_v56  ;;  %v11213_v41 = vld [vmem:[#allocation11 + $0xa4] ss:$16 sps:$4 sm:$0xff]   ;;  %v10629_v42 = vcombine.high %v3801_v27, %v3805_v37  ;;  %v10628_v56 = vcombine.low %v3801_v27, %v3805_v37  ;;  %v11214_v47 = vld [vmem:[#allocation11 + $0xc0] ss:$16 sps:$4 sm:$0xff]  }
 0x466   :  { %v12394_v61 = vpack.c.bf16 %v7122_v51, %v7114_v49  ;;  %7082 = vmatpush1.bf16.msra.mxu1 %v10572_v0  ;;  %6927 = vmatprep.subr.bf16.mxu0 %v10643_v12  ;;  %v3813_v3 = vld [vmem:[#allocation8 + $0xfb8] sm:$0xff]  ;;  %v11273_v37 = vld [vmem:[#allocation11 + $0x10c] ss:$16 sps:$4 sm:$0xff]  }
 0x467   :  { %v12396_v1 = vpack.c.bf16 %v7123_v55, %v7115_v46  ;;  %7083 = vmatprep.subr.bf16.mxu1 %v10581_v50  ;;  %v11216_v45 = vld [vmem:[#allocation11 + $0xc4] ss:$16 sps:$4 sm:$0xff]   ;;  %v10637_v39 = vcombine.high %v3809_v43, %v3813_v3  ;;  %v10636_v50 = vcombine.low %v3809_v43, %v3813_v3  ;;  %v11225_v55 = vld [vmem:[#allocation11 + $0xc] ss:$16 sps:$4 sm:$0xff]   ;;  %v11256_v60 = vld [vmem:[#allocation11 + $0x1c0] ss:$16 sps:$4 sm:$0xff]  }
 0x468   :  { %v3817_v0 = vld [vmem:[#allocation8 + $0xfd8] sm:$0xff]  ;;  %v11277_v3 = vld [vmem:[#allocation11 + $0x128] ss:$16 sps:$4 sm:$0xff]  }
 0x469   :  { %6928 = vmatpush1.bf16.msra.mxu0 %v10642_v57  ;;  %v3821_v12 = vld [vmem:[#allocation8 + $0xff8] sm:$0xff] }
 0x46a   :  { %7084 = vmatpush1.bf16.msra.mxu1 %v10580_v63  ;;  %8694 = vmatprep.subr.bf16.mxu0 %v11198_v17  ;;  %v11219_v49 = vld [vmem:[#allocation11 + $0xe4] ss:$16 sps:$4 sm:$0xff]   ;;  %v10645_v51 = vcombine.high %v3817_v0, %v3821_v12  ;;  %v10644_v54 = vcombine.low %v3817_v0, %v3821_v12  ;;  %v11220_v57 = vld [vmem:[#allocation11 + $0x100] ss:$16 sps:$4 sm:$0xff]   ;;  %v11223_v63 = vld [vmem:[#allocation11 + $0x8] ss:$16 sps:$4 sm:$0xff]  }
 0x46b   :  { %7085 = vmatprep.subr.bf16.mxu1 %v10589_v2  ;;  %v11222_v46 = vld [vmem:[#allocation11 + $0x104] ss:$16 sps:$4 sm:$0xff]   ;;  %v11231_v2 = vld [vmem:[#allocation11 + $0x2c] ss:$16 sps:$4 sm:$0xff]   ;;  %v11274_v43 = vld [vmem:[#allocation11 + $0x220] ss:$16 sps:$4 sm:$0xff]  }
 0x46c   :  { %6930 = vmatmul.mubr.bf16.vlgmr.msra.gmra.mrb[20].mxu0 %v12356_v11  ;;  %v11228_v17 = vld [vmem:[#allocation11 + $0x124] ss:$16 sps:$4 sm:$0xff]   ;;  %v11291_v12 = vld [vmem:[#allocation11 + $0x16c] ss:$16 sps:$4 sm:$0xff]  }
 0x46d   :  { %8695 = vmatpush1.bf16.msra.mxu0 %v11196_v5  ;;  %8726 = vmatprep.mubr.bf16.mxu0 %v12386_v36  ;;  %v11234_v5 = vld [vmem:[#allocation11 + $0x144] ss:$16 sps:$4 sm:$0xff]  }
 0x46e   :  { %7086 = vmatpush1.bf16.msra.mxu1 %v10588_v7  ;;  %8696 = vmatprep.subr.bf16.mxu0 %v11201_v6  ;;  %v11237_v7 = vld [vmem:[#allocation11 + $0x4c] ss:$16 sps:$4 sm:$0xff]   ;;  %v11232_v6 = vld [vmem:[#allocation11 + $0x140] ss:$16 sps:$4 sm:$0xff]   ;;  %v11252_v24 = vld [vmem:[#allocation11 + $0x1a4] ss:$16 sps:$4 sm:$0xff]  }
 0x46f   :  { %7087 = vmatprep.subr.bf16.mxu1 %v10597_v25  ;;  %v11235_v25 = vld [vmem:[#allocation11 + $0x48] ss:$16 sps:$4 sm:$0xff]   ;;  %v11270_v27 = vld [vmem:[#allocation11 + $0x204] ss:$16 sps:$4 sm:$0xff]  }
 0x470   :  { %v11288_v0 = vld [vmem:[#allocation11 + $0x264] ss:$16 sps:$4 sm:$0xff]  }
 0x471   :  { %8697 = vmatpush1.bf16.msra.mxu0 %v11199_v9  ;;  %v11241_v9 = vld [vmem:[#allocation11 + $0x68] ss:$16 sps:$4 sm:$0xff]  }
 0x472   :  { %7088 = vmatpush1.bf16.msra.mxu1 %v10596_v52  ;;  %8698 = vmatprep.subr.bf16.mxu0 %v11204_v29  ;;  %v11246_v52 = vld [vmem:[#allocation11 + $0x184] ss:$16 sps:$4 sm:$0xff]   ;;  %v11244_v29 = vld [vmem:[#allocation11 + $0x180] ss:$16 sps:$4 sm:$0xff]  }
 0x473   :  { %7089 = vmatprep.subr.bf16.mxu1 %v10605_v14  ;;  %v11247_v14 = vld [vmem:[#allocation11 + $0x88] ss:$16 sps:$4 sm:$0xff]  }
 0x475   :  { %8699 = vmatpush1.bf16.msra.mxu0 %v11202_v32  ;;  %v11250_v32 = vld [vmem:[#allocation11 + $0x1a0] ss:$16 sps:$4 sm:$0xff]  }
 0x476   :  { %7090 = vmatpush1.bf16.msra.mxu1 %v10604_v18  ;;  %8700 = vmatprep.subr.bf16.mxu0 %v11207_v20  ;;  %v11253_v18 = vld [vmem:[#allocation11 + $0xa8] ss:$16 sps:$4 sm:$0xff]   ;;  %v11258_v20 = vld [vmem:[#allocation11 + $0x1c4] ss:$16 sps:$4 sm:$0xff]  }
 0x477   :  { %7091 = vmatprep.subr.bf16.mxu1 %v10613_v26  ;;  %v11261_v26 = vld [vmem:[#allocation11 + $0xcc] ss:$16 sps:$4 sm:$0xff]  }
 0x479   :  { %8701 = vmatpush1.bf16.msra.mxu0 %v11205_v30  ;;  %v11264_v30 = vld [vmem:[#allocation11 + $0x1e4] ss:$16 sps:$4 sm:$0xff]  }
 0x47a   :  { %7092 = vmatpush1.bf16.msra.mxu1 %v10612_v31  ;;  %8702 = vmatprep.subr.bf16.mxu0 %v11210_v16  ;;  %v11267_v31 = vld [vmem:[#allocation11 + $0xec] ss:$16 sps:$4 sm:$0xff]   ;;  %v11262_v16 = vld [vmem:[#allocation11 + $0x1e0] ss:$16 sps:$4 sm:$0xff]  }
 0x47b   :  { %7093 = vmatprep.subr.bf16.mxu1 %v10621_v53  ;;  %v11265_v53 = vld [vmem:[#allocation11 + $0xe8] ss:$16 sps:$4 sm:$0xff]  }
 0x47d   :  { %8703 = vmatpush1.bf16.msra.mxu0 %v11208_v38  ;;  %v11268_v38 = vld [vmem:[#allocation11 + $0x200] ss:$16 sps:$4 sm:$0xff]  }
 0x47e   :  { %7094 = vmatpush1.bf16.msra.mxu1 %v10620_v40  ;;  %8704 = vmatprep.subr.bf16.mxu0 %v11213_v41  ;;  %v11271_v40 = vld [vmem:[#allocation11 + $0x108] ss:$16 sps:$4 sm:$0xff]   ;;  %v11276_v41 = vld [vmem:[#allocation11 + $0x224] ss:$16 sps:$4 sm:$0xff]  }
 0x47f   :  { %7095 = vmatprep.subr.bf16.mxu1 %v10629_v42  ;;  %v11279_v42 = vld [vmem:[#allocation11 + $0x12c] ss:$16 sps:$4 sm:$0xff]  }
 0x481   :  { %8705 = vmatpush1.bf16.msra.mxu0 %v11211_v10  ;;  %v11282_v10 = vld [vmem:[#allocation11 + $0x244] ss:$16 sps:$4 sm:$0xff]  }
 0x482   :  { %7096 = vmatpush1.bf16.msra.mxu1 %v10628_v56  ;;  %8706 = vmatprep.subr.bf16.mxu0 %v11216_v45  ;;  %v11285_v56 = vld [vmem:[#allocation11 + $0x14c] ss:$16 sps:$4 sm:$0xff]   ;;  %v11280_v45 = vld [vmem:[#allocation11 + $0x240] ss:$16 sps:$4 sm:$0xff]  }
 0x483   :  { %7097 = vmatprep.subr.bf16.mxu1 %v10637_v39  ;;  %v11283_v39 = vld [vmem:[#allocation11 + $0x148] ss:$16 sps:$4 sm:$0xff]  }
 0x485   :  { %8707 = vmatpush1.bf16.msra.mxu0 %v11214_v47  ;;  %v11286_v47 = vld [vmem:[#allocation11 + $0x260] ss:$16 sps:$4 sm:$0xff]  }
 0x486   :  { %7098 = vmatpush1.bf16.msra.mxu1 %v10636_v50  ;;  %8708 = vmatprep.subr.bf16.mxu0 %v11219_v49  ;;  %v11289_v50 = vld [vmem:[#allocation11 + $0x168] ss:$16 sps:$4 sm:$0xff]   ;;  %v11294_v49 = vld [vmem:[#allocation11 + $0x284] ss:$16 sps:$4 sm:$0xff]  }
 0x487   :  { %7099 = vmatprep.subr.bf16.mxu1 %v10645_v51  ;;  %v11297_v51 = vld [vmem:[#allocation11 + $0x18c] ss:$16 sps:$4 sm:$0xff]  }
 0x489   :  { %8709 = vmatpush1.bf16.msra.mxu0 %v11217_v22  ;;  %v11292_v22 = vld [vmem:[#allocation11 + $0x280] ss:$16 sps:$4 sm:$0xff]  }
 0x48a   :  { %7100 = vmatpush1.bf16.msra.mxu1 %v10644_v54  ;;  %8710 = vmatprep.subr.bf16.mxu0 %v11222_v46  ;;  %v11295_v54 = vld [vmem:[#allocation11 + $0x188] ss:$16 sps:$4 sm:$0xff]   ;;  %v11300_v46 = vld [vmem:[#allocation11 + $0x2a4] ss:$16 sps:$4 sm:$0xff]  }
 0x48b   :  { %8866 = vmatprep.subr.bf16.mxu1 %v11225_v55  ;;  %v11303_v55 = vld [vmem:[#allocation11 + $0x1ac] ss:$16 sps:$4 sm:$0xff]  }
 0x48d   :  { %7102 = vmatmul.mubr.bf16.vlgmr.msra.gmra.mrb[16].mxu1 %v12356_v11  ;;  %8711 = vmatpush1.bf16.msra.mxu0 %v11220_v57  ;;  %v11238_v11 = vld [vmem:[#allocation11 + $0x160] ss:$16 sps:$4 sm:$0xff]  }
 0x48e   :  { %8867 = vmatpush1.bf16.msra.mxu1 %v11223_v63  ;;  %8898 = vmatprep.mubr.bf16.mxu1 %v12386_v36  ;;  %v11249_v36 = vld [vmem:[#allocation11 + $0x8c] ss:$16 sps:$4 sm:$0xff]   ;;  %v11298_v57 = vld [vmem:[#allocation11 + $0x2a0] ss:$16 sps:$4 sm:$0xff]   ;;  %v11301_v63 = vld [vmem:[#allocation11 + $0x1a8] ss:$16 sps:$4 sm:$0xff]  }
 0x48f   :  { %8712 = vmatprep.subr.bf16.mxu0 %v11228_v17  ;;  %8868 = vmatprep.subr.bf16.mxu1 %v11231_v2  ;;  %v11306_v17 = vld [vmem:[#allocation11 + $0x2c4] ss:$16 sps:$4 sm:$0xff]   ;;  %v11309_v2 = vld [vmem:[#allocation11 + $0x1cc] ss:$16 sps:$4 sm:$0xff]  }
 0x491   :  { %8713 = vmatpush1.bf16.msra.mxu0 %v11226_v15  ;;  %v11304_v15 = vld [vmem:[#allocation11 + $0x2c0] ss:$16 sps:$4 sm:$0xff]  }
 0x492   :  { %8869 = vmatpush1.bf16.msra.mxu1 %v11229_v4  ;;  %8714 = vmatprep.subr.bf16.mxu0 %v11234_v5  ;;  %v11307_v4 = vld [vmem:[#allocation11 + $0x1c8] ss:$16 sps:$4 sm:$0xff]   ;;  %v11312_v5 = vld [vmem:[#allocation11 + $0x2e4] ss:$16 sps:$4 sm:$0xff]  }
 0x493   :  { %8870 = vmatprep.subr.bf16.mxu1 %v11237_v7  ;;  %v11315_v7 = vld [vmem:[#allocation11 + $0x1ec] ss:$16 sps:$4 sm:$0xff]  }
 0x495   :  { %8715 = vmatpush1.bf16.msra.mxu0 %v11232_v6  ;;  %v11310_v6 = vld [vmem:[#allocation11 + $0x2e0] ss:$16 sps:$4 sm:$0xff]  }
 0x496   :  { %8871 = vmatpush1.bf16.msra.mxu1 %v11235_v25  ;;  %8716 = vmatprep.subr.bf16.mxu0 %v11240_v48  ;;  %v11313_v25 = vld [vmem:[#allocation11 + $0x1e8] ss:$16 sps:$4 sm:$0xff]   ;;  %v11318_v48 = vld [vmem:[#allocation11 + $0x304] ss:$16 sps:$4 sm:$0xff]  }
 0x497   :  { %8872 = vmatprep.subr.bf16.mxu1 %v11243_v8  ;;  %v11321_v8 = vld [vmem:[#allocation11 + $0x20c] ss:$16 sps:$4 sm:$0xff]  }
 0x499   :  { %8717 = vmatpush1.bf16.msra.mxu0 %v11238_v11  ;;  %v11316_v11 = vld [vmem:[#allocation11 + $0x300] ss:$16 sps:$4 sm:$0xff]  }
 0x49a   :  { %8873 = vmatpush1.bf16.msra.mxu1 %v11241_v9  ;;  %8718 = vmatprep.subr.bf16.mxu0 %v11246_v52  ;;  %v11319_v9 = vld [vmem:[#allocation11 + $0x208] ss:$16 sps:$4 sm:$0xff]   ;;  %v11324_v52 = vld [vmem:[#allocation11 + $0x324] ss:$16 sps:$4 sm:$0xff]  }
 0x49b   :  { %8874 = vmatprep.subr.bf16.mxu1 %v11249_v36  ;;  %v11327_v36 = vld [vmem:[#allocation11 + $0x22c] ss:$16 sps:$4 sm:$0xff]  }
 0x49d   :  { %8719 = vmatpush1.bf16.msra.mxu0 %v11244_v29  ;;  %v11322_v29 = vld [vmem:[#allocation11 + $0x320] ss:$16 sps:$4 sm:$0xff]  }
 0x49e   :  { %8875 = vmatpush1.bf16.msra.mxu1 %v11247_v14  ;;  %8720 = vmatprep.subr.bf16.mxu0 %v11252_v24  ;;  %v11325_v14 = vld [vmem:[#allocation11 + $0x228] ss:$16 sps:$4 sm:$0xff]   ;;  %v11330_v24 = vld [vmem:[#allocation11 + $0x344] ss:$16 sps:$4 sm:$0xff]  }
 0x49f   :  { %8876 = vmatprep.subr.bf16.mxu1 %v11255_v34  ;;  %v11333_v34 = vld [vmem:[#allocation11 + $0x24c] ss:$16 sps:$4 sm:$0xff]  }
 0x4a1   :  { %8721 = vmatpush1.bf16.msra.mxu0 %v11250_v32  ;;  %v11328_v32 = vld [vmem:[#allocation11 + $0x340] ss:$16 sps:$4 sm:$0xff]  }
 0x4a2   :  { %8877 = vmatpush1.bf16.msra.mxu1 %v11253_v18  ;;  %8722 = vmatprep.subr.bf16.mxu0 %v11258_v20  ;;  %v11331_v18 = vld [vmem:[#allocation11 + $0x248] ss:$16 sps:$4 sm:$0xff]   ;;  %v11336_v20 = vld [vmem:[#allocation11 + $0x364] ss:$16 sps:$4 sm:$0xff]  }
 0x4a3   :  { %8878 = vmatprep.subr.bf16.mxu1 %v11261_v26  ;;  %v11339_v26 = vld [vmem:[#allocation11 + $0x26c] ss:$16 sps:$4 sm:$0xff]  }
 0x4a5   :  { %8723 = vmatpush1.bf16.msra.mxu0 %v11256_v60  ;;  %v11334_v60 = vld [vmem:[#allocation11 + $0x360] ss:$16 sps:$4 sm:$0xff]  }
 0x4a6   :  { %8879 = vmatpush1.bf16.msra.mxu1 %v11259_v28  ;;  %8724 = vmatprep.subr.bf16.mxu0 %v11264_v30  ;;  %v11342_v28 = vld [vmem:[#allocation11 + $0x384] ss:$16 sps:$4 sm:$0xff]   ;;  %v11340_v30 = vld [vmem:[#allocation11 + $0x380] ss:$16 sps:$4 sm:$0xff]  }
 0x4a7   :  { %8880 = vmatprep.subr.bf16.mxu1 %v11267_v31  ;;  %v11343_v31 = vld [vmem:[#allocation11 + $0x288] ss:$16 sps:$4 sm:$0xff]  }
 0x4a9   :  { %8725 = vmatpush1.bf16.msra.mxu0 %v11262_v16  ;;  %v11348_v16 = vld [vmem:[#allocation11 + $0x3a4] ss:$16 sps:$4 sm:$0xff]  }
 0x4aa   :  { %8881 = vmatpush1.bf16.msra.mxu1 %v11265_v53  ;;  %8737 = vmatprep.subr.bf16.mxu0 %v11270_v27  ;;  %v11351_v53 = vld [vmem:[#allocation11 + $0x2ac] ss:$16 sps:$4 sm:$0xff]   ;;  %v11346_v27 = vld [vmem:[#allocation11 + $0x3a0] ss:$16 sps:$4 sm:$0xff]  }
 0x4ab   :  { %8882 = vmatprep.subr.bf16.mxu1 %v11273_v37  ;;  %v11349_v37 = vld [vmem:[#allocation11 + $0x2a8] ss:$16 sps:$4 sm:$0xff]  }
 0x4ac   :  { %8727 = vmatmul.mubr.bf16.vlgmr.msra.gmra.mrb[24].mxu0 %v12384_v33 }
 0x4ad   :  { %8738 = vmatpush1.bf16.msra.mxu0 %v11268_v38  ;;  %8769 = vmatprep.mubr.bf16.mxu0 %v12396_v1  ;;  %v11354_v38 = vld [vmem:[#allocation11 + $0x3c4] ss:$16 sps:$4 sm:$0xff]  }
 0x4ae   :  { %8883 = vmatpush1.bf16.msra.mxu1 %v11271_v40  ;;  %8739 = vmatprep.subr.bf16.mxu0 %v11276_v41  ;;  %v11357_v40 = vld [vmem:[#allocation11 + $0x2cc] ss:$16 sps:$4 sm:$0xff]   ;;  %v11352_v41 = vld [vmem:[#allocation11 + $0x3c0] ss:$16 sps:$4 sm:$0xff]  }
 0x4af   :  { %8884 = vmatprep.subr.bf16.mxu1 %v11279_v42  ;;  %v11355_v42 = vld [vmem:[#allocation11 + $0x2c8] ss:$16 sps:$4 sm:$0xff]  }
 0x4b1   :  { %8740 = vmatpush1.bf16.msra.mxu0 %v11274_v43  ;;  %v11360_v43 = vld [vmem:[#allocation11 + $0x3e4] ss:$16 sps:$4 sm:$0xff]  }
 0x4b2   :  { %8885 = vmatpush1.bf16.msra.mxu1 %v11277_v3  ;;  %8741 = vmatprep.subr.bf16.mxu0 %v11282_v10  ;;  %v11363_v3 = vld [vmem:[#allocation11 + $0x2ec] ss:$16 sps:$4 sm:$0xff]   ;;  %v11358_v10 = vld [vmem:[#allocation11 + $0x3e0] ss:$16 sps:$4 sm:$0xff]  }
 0x4b3   :  { %8886 = vmatprep.subr.bf16.mxu1 %v11285_v56  ;;  %v11361_v56 = vld [vmem:[#allocation11 + $0x2e8] ss:$16 sps:$4 sm:$0xff]  }
 0x4b5   :  { %8742 = vmatpush1.bf16.msra.mxu0 %v11280_v45  ;;  %v11387_v45 = vld [vmem:[#allocation11 + $0x404] ss:$16 sps:$4 sm:$0xff]  }
 0x4b6   :  { %8887 = vmatpush1.bf16.msra.mxu1 %v11283_v39  ;;  %8743 = vmatprep.subr.bf16.mxu0 %v11288_v0  ;;  %v11366_v39 = vld [vmem:[#allocation11 + $0x30c] ss:$16 sps:$4 sm:$0xff]   ;;  %v11385_v0 = vld [vmem:[#allocation11 + $0x400] ss:$16 sps:$4 sm:$0xff]  }
 0x4b7   :  { %8888 = vmatprep.subr.bf16.mxu1 %v11291_v12  ;;  %v11364_v12 = vld [vmem:[#allocation11 + $0x308] ss:$16 sps:$4 sm:$0xff]  }
 0x4b9   :  { %8744 = vmatpush1.bf16.msra.mxu0 %v11286_v47  ;;  %v11393_v47 = vld [vmem:[#allocation11 + $0x424] ss:$16 sps:$4 sm:$0xff]  }
 0x4ba   :  { %8889 = vmatpush1.bf16.msra.mxu1 %v11289_v50  ;;  %8745 = vmatprep.subr.bf16.mxu0 %v11294_v49  ;;  %v11369_v50 = vld [vmem:[#allocation11 + $0x32c] ss:$16 sps:$4 sm:$0xff]   ;;  %v11391_v49 = vld [vmem:[#allocation11 + $0x420] ss:$16 sps:$4 sm:$0xff]  }
 0x4bb   :  { %8890 = vmatprep.subr.bf16.mxu1 %v11297_v51  ;;  %v11367_v51 = vld [vmem:[#allocation11 + $0x328] ss:$16 sps:$4 sm:$0xff]  }
 0x4bd   :  { %8746 = vmatpush1.bf16.msra.mxu0 %v11292_v22  ;;  %v11399_v22 = vld [vmem:[#allocation11 + $0x444] ss:$16 sps:$4 sm:$0xff]  }
 0x4be   :  { %8891 = vmatpush1.bf16.msra.mxu1 %v11295_v54  ;;  %8747 = vmatprep.subr.bf16.mxu0 %v11300_v46  ;;  %v11372_v54 = vld [vmem:[#allocation11 + $0x34c] ss:$16 sps:$4 sm:$0xff]   ;;  %v11397_v46 = vld [vmem:[#allocation11 + $0x440] ss:$16 sps:$4 sm:$0xff]  }
 0x4bf   :  { %8892 = vmatprep.subr.bf16.mxu1 %v11303_v55  ;;  %v11370_v55 = vld [vmem:[#allocation11 + $0x348] ss:$16 sps:$4 sm:$0xff]  }
 0x4c1   :  { %8748 = vmatpush1.bf16.msra.mxu0 %v11298_v57  ;;  %v11405_v57 = vld [vmem:[#allocation11 + $0x464] ss:$16 sps:$4 sm:$0xff]  }
 0x4c2   :  { %8893 = vmatpush1.bf16.msra.mxu1 %v11301_v63  ;;  %8749 = vmatprep.subr.bf16.mxu0 %v11306_v17  ;;  %v11375_v63 = vld [vmem:[#allocation11 + $0x36c] ss:$16 sps:$4 sm:$0xff]   ;;  %v11403_v17 = vld [vmem:[#allocation11 + $0x460] ss:$16 sps:$4 sm:$0xff]  }
 0x4c3   :  { %8894 = vmatprep.subr.bf16.mxu1 %v11309_v2  ;;  %v11373_v2 = vld [vmem:[#allocation11 + $0x368] ss:$16 sps:$4 sm:$0xff]  }
 0x4c5   :  { %8750 = vmatpush1.bf16.msra.mxu0 %v11304_v15  ;;  %v11411_v15 = vld [vmem:[#allocation11 + $0x484] ss:$16 sps:$4 sm:$0xff]  }
 0x4c6   :  { %8895 = vmatpush1.bf16.msra.mxu1 %v11307_v4  ;;  %8751 = vmatprep.subr.bf16.mxu0 %v11312_v5  ;;  %v11378_v4 = vld [vmem:[#allocation11 + $0x38c] ss:$16 sps:$4 sm:$0xff]   ;;  %v11409_v5 = vld [vmem:[#allocation11 + $0x480] ss:$16 sps:$4 sm:$0xff]  }
 0x4c7   :  { %8896 = vmatprep.subr.bf16.mxu1 %v11315_v7  ;;  %v11376_v7 = vld [vmem:[#allocation11 + $0x388] ss:$16 sps:$4 sm:$0xff]  }
 0x4c9   :  { %8752 = vmatpush1.bf16.msra.mxu0 %v11310_v6  ;;  %v11417_v6 = vld [vmem:[#allocation11 + $0x4a4] ss:$16 sps:$4 sm:$0xff]  }
 0x4ca   :  { %8897 = vmatpush1.bf16.msra.mxu1 %v11313_v25  ;;  %8753 = vmatprep.subr.bf16.mxu0 %v11318_v48  ;;  %v11381_v25 = vld [vmem:[#allocation11 + $0x3ac] ss:$16 sps:$4 sm:$0xff]   ;;  %v11415_v48 = vld [vmem:[#allocation11 + $0x4a0] ss:$16 sps:$4 sm:$0xff]  }
 0x4cb   :  { %8909 = vmatprep.subr.bf16.mxu1 %v11321_v8  ;;  %v11379_v8 = vld [vmem:[#allocation11 + $0x3a8] ss:$16 sps:$4 sm:$0xff]  }
 0x4cd   :  { %8754 = vmatpush1.bf16.msra.mxu0 %v11316_v11  ;;  %8899 = vmatmul.mubr.bf16.vlgmr.msra.gmra.mrb[20].mxu1 %v12384_v33  ;;  %v11337_v33 = vld [vmem:[#allocation11 + $0x268] ss:$16 sps:$4 sm:$0xff]   ;;  %v11423_v11 = vld [vmem:[#allocation11 + $0x4c4] ss:$16 sps:$4 sm:$0xff]  }
 0x4ce   :  { %8910 = vmatpush1.bf16.msra.mxu1 %v11319_v9  ;;  %8941 = vmatprep.mubr.bf16.mxu1 %v12396_v1  ;;  %v11345_v1 = vld [vmem:[#allocation11 + $0x28c] ss:$16 sps:$4 sm:$0xff]  }
 0x4cf   :  { %8755 = vmatprep.subr.bf16.mxu0 %v11324_v52  ;;  %8911 = vmatprep.subr.bf16.mxu1 %v11327_v36  ;;  %v11384_v9 = vld [vmem:[#allocation11 + $0x3cc] ss:$16 sps:$4 sm:$0xff]   ;;  %v11421_v52 = vld [vmem:[#allocation11 + $0x4c0] ss:$16 sps:$4 sm:$0xff]   ;;  %v11382_v36 = vld [vmem:[#allocation11 + $0x3c8] ss:$16 sps:$4 sm:$0xff]  }
 0x4d1   :  { %8756 = vmatpush1.bf16.msra.mxu0 %v11322_v29  ;;  %v11429_v29 = vld [vmem:[#allocation11 + $0x4e4] ss:$16 sps:$4 sm:$0xff]  }
 0x4d2   :  { %8912 = vmatpush1.bf16.msra.mxu1 %v11325_v14  ;;  %8757 = vmatprep.subr.bf16.mxu0 %v11330_v24  ;;  %v11390_v14 = vld [vmem:[#allocation11 + $0x3ec] ss:$16 sps:$4 sm:$0xff]   ;;  %v11427_v24 = vld [vmem:[#allocation11 + $0x4e0] ss:$16 sps:$4 sm:$0xff]  }
 0x4d3   :  { %8913 = vmatprep.subr.bf16.mxu1 %v11333_v34  ;;  %v11388_v34 = vld [vmem:[#allocation11 + $0x3e8] ss:$16 sps:$4 sm:$0xff]  }
 0x4d5   :  { %8758 = vmatpush1.bf16.msra.mxu0 %v11328_v32  ;;  %v11435_v32 = vld [vmem:[#allocation11 + $0x504] ss:$16 sps:$4 sm:$0xff]  }
 0x4d6   :  { %8914 = vmatpush1.bf16.msra.mxu1 %v11331_v18  ;;  %8759 = vmatprep.subr.bf16.mxu0 %v11336_v20  ;;  %v11396_v18 = vld [vmem:[#allocation11 + $0x40c] ss:$16 sps:$4 sm:$0xff]   ;;  %v11433_v20 = vld [vmem:[#allocation11 + $0x500] ss:$16 sps:$4 sm:$0xff]  }
 0x4d7   :  { %8915 = vmatprep.subr.bf16.mxu1 %v11339_v26  ;;  %v11394_v26 = vld [vmem:[#allocation11 + $0x408] ss:$16 sps:$4 sm:$0xff]  }
 0x4d9   :  { %8760 = vmatpush1.bf16.msra.mxu0 %v11334_v60  ;;  %v11441_v60 = vld [vmem:[#allocation11 + $0x524] ss:$16 sps:$4 sm:$0xff]  }
 0x4da   :  { %8916 = vmatpush1.bf16.msra.mxu1 %v11337_v33  ;;  %8761 = vmatprep.subr.bf16.mxu0 %v11342_v28  ;;  %v11402_v33 = vld [vmem:[#allocation11 + $0x42c] ss:$16 sps:$4 sm:$0xff]   ;;  %v11439_v28 = vld [vmem:[#allocation11 + $0x520] ss:$16 sps:$4 sm:$0xff]  }
 0x4db   :  { %8917 = vmatprep.subr.bf16.mxu1 %v11345_v1  ;;  %v11400_v1 = vld [vmem:[#allocation11 + $0x428] ss:$16 sps:$4 sm:$0xff]  }
 0x4dd   :  { %8762 = vmatpush1.bf16.msra.mxu0 %v11340_v30  ;;  %v11447_v30 = vld [vmem:[#allocation11 + $0x544] ss:$16 sps:$4 sm:$0xff]  }
 0x4de   :  { %8918 = vmatpush1.bf16.msra.mxu1 %v11343_v31  ;;  %8763 = vmatprep.subr.bf16.mxu0 %v11348_v16  ;;  %v11408_v31 = vld [vmem:[#allocation11 + $0x44c] ss:$16 sps:$4 sm:$0xff]   ;;  %v11445_v16 = vld [vmem:[#allocation11 + $0x540] ss:$16 sps:$4 sm:$0xff]  }
 0x4df   :  { %8919 = vmatprep.subr.bf16.mxu1 %v11351_v53  ;;  %v11406_v53 = vld [vmem:[#allocation11 + $0x448] ss:$16 sps:$4 sm:$0xff]  }
 0x4e1   :  { %8764 = vmatpush1.bf16.msra.mxu0 %v11346_v27  ;;  %v11453_v27 = vld [vmem:[#allocation11 + $0x564] ss:$16 sps:$4 sm:$0xff]  }
 0x4e2   :  { %8920 = vmatpush1.bf16.msra.mxu1 %v11349_v37  ;;  %8765 = vmatprep.subr.bf16.mxu0 %v11354_v38  ;;  %v11414_v37 = vld [vmem:[#allocation11 + $0x46c] ss:$16 sps:$4 sm:$0xff]   ;;  %v11451_v38 = vld [vmem:[#allocation11 + $0x560] ss:$16 sps:$4 sm:$0xff]  }
 0x4e3   :  { %8921 = vmatprep.subr.bf16.mxu1 %v11357_v40  ;;  %v11459_v40 = vld [vmem:[#allocation11 + $0x584] ss:$16 sps:$4 sm:$0xff]  }
 0x4e5   :  { %8766 = vmatpush1.bf16.msra.mxu0 %v11352_v41  ;;  %v11420_v41 = vld [vmem:[#allocation11 + $0x48c] ss:$16 sps:$4 sm:$0xff]  }
 0x4e6   :  { %8922 = vmatpush1.bf16.msra.mxu1 %v11355_v42  ;;  %8767 = vmatprep.subr.bf16.mxu0 %v11360_v43  ;;  %v11457_v42 = vld [vmem:[#allocation11 + $0x580] ss:$16 sps:$4 sm:$0xff]   ;;  %v11418_v43 = vld [vmem:[#allocation11 + $0x488] ss:$16 sps:$4 sm:$0xff]  }
 0x4e7   :  { %8923 = vmatprep.subr.bf16.mxu1 %v11363_v3  ;;  %v11465_v3 = vld [vmem:[#allocation11 + $0x5a4] ss:$16 sps:$4 sm:$0xff]  }
 0x4e9   :  { %8768 = vmatpush1.bf16.msra.mxu0 %v11358_v10  ;;  %v11426_v10 = vld [vmem:[#allocation11 + $0x4ac] ss:$16 sps:$4 sm:$0xff]  }
 0x4ea   :  { %8924 = vmatpush1.bf16.msra.mxu1 %v11361_v56  ;;  %8780 = vmatprep.subr.bf16.mxu0 %v11387_v45  ;;  %v11463_v56 = vld [vmem:[#allocation11 + $0x5a0] ss:$16 sps:$4 sm:$0xff]   ;;  %v11424_v45 = vld [vmem:[#allocation11 + $0x4a8] ss:$16 sps:$4 sm:$0xff]  }
 0x4eb   :  { %8925 = vmatprep.subr.bf16.mxu1 %v11366_v39  ;;  %v11471_v39 = vld [vmem:[#allocation11 + $0x5c4] ss:$16 sps:$4 sm:$0xff]  }
 0x4ec   :  { %8770 = vmatmul.mubr.bf16.vlgmr.msra.gmra.mrb[24].mxu0 %v12394_v61 }
 0x4ed   :  { %8781 = vmatpush1.bf16.msra.mxu0 %v11385_v0  ;;  %v11432_v0 = vld [vmem:[#allocation11 + $0x4cc] ss:$16 sps:$4 sm:$0xff]  }
 0x4ee   :  { %8926 = vmatpush1.bf16.msra.mxu1 %v11364_v12  ;;  %8782 = vmatprep.subr.bf16.mxu0 %v11393_v47  ;;  %v11469_v12 = vld [vmem:[#allocation11 + $0x5c0] ss:$16 sps:$4 sm:$0xff]   ;;  %v11430_v47 = vld [vmem:[#allocation11 + $0x4c8] ss:$16 sps:$4 sm:$0xff]  }
 0x4ef   :  { %8927 = vmatprep.subr.bf16.mxu1 %v11369_v50  ;;  %v11477_v50 = vld [vmem:[#allocation11 + $0x5e4] ss:$16 sps:$4 sm:$0xff]  }
 0x4f1   :  { %8783 = vmatpush1.bf16.msra.mxu0 %v11391_v49  ;;  %v11438_v49 = vld [vmem:[#allocation11 + $0x4ec] ss:$16 sps:$4 sm:$0xff]  }
 0x4f2   :  { %8928 = vmatpush1.bf16.msra.mxu1 %v11367_v51  ;;  %8784 = vmatprep.subr.bf16.mxu0 %v11399_v22  ;;  %v11475_v51 = vld [vmem:[#allocation11 + $0x5e0] ss:$16 sps:$4 sm:$0xff]   ;;  %v11436_v22 = vld [vmem:[#allocation11 + $0x4e8] ss:$16 sps:$4 sm:$0xff]  }
 0x4f3   :  { %8929 = vmatprep.subr.bf16.mxu1 %v11372_v54  ;;  %v11483_v54 = vld [vmem:[#allocation11 + $0x604] ss:$16 sps:$4 sm:$0xff]  }
 0x4f5   :  { %8785 = vmatpush1.bf16.msra.mxu0 %v11397_v46  ;;  %v11444_v46 = vld [vmem:[#allocation11 + $0x50c] ss:$16 sps:$4 sm:$0xff]  }
 0x4f6   :  { %8930 = vmatpush1.bf16.msra.mxu1 %v11370_v55  ;;  %8786 = vmatprep.subr.bf16.mxu0 %v11405_v57  ;;  %v11442_v55 = vld [vmem:[#allocation11 + $0x508] ss:$16 sps:$4 sm:$0xff]   ;;  %v11450_v57 = vld [vmem:[#allocation11 + $0x52c] ss:$16 sps:$4 sm:$0xff]  }
 0x4f7   :  { %8931 = vmatprep.subr.bf16.mxu1 %v11375_v63  ;;  %v11448_v63 = vld [vmem:[#allocation11 + $0x528] ss:$16 sps:$4 sm:$0xff]  }
 0x4f9   :  { %8787 = vmatpush1.bf16.msra.mxu0 %v11403_v17  ;;  %v11456_v17 = vld [vmem:[#allocation11 + $0x54c] ss:$16 sps:$4 sm:$0xff]  }
 0x4fa   :  { %8932 = vmatpush1.bf16.msra.mxu1 %v11373_v2  ;;  %8788 = vmatprep.subr.bf16.mxu0 %v11411_v15  ;;  %v11454_v2 = vld [vmem:[#allocation11 + $0x548] ss:$16 sps:$4 sm:$0xff]   ;;  %v11462_v15 = vld [vmem:[#allocation11 + $0x56c] ss:$16 sps:$4 sm:$0xff]  }
 0x4fb   :  { %8933 = vmatprep.subr.bf16.mxu1 %v11378_v4  ;;  %v11460_v4 = vld [vmem:[#allocation11 + $0x568] ss:$16 sps:$4 sm:$0xff]  }
 0x4fd   :  { %8789 = vmatpush1.bf16.msra.mxu0 %v11409_v5  ;;  %v11468_v5 = vld [vmem:[#allocation11 + $0x58c] ss:$16 sps:$4 sm:$0xff]  }
 0x4fe   :  { %8934 = vmatpush1.bf16.msra.mxu1 %v11376_v7  ;;  %8790 = vmatprep.subr.bf16.mxu0 %v11417_v6  ;;  %v11466_v7 = vld [vmem:[#allocation11 + $0x588] ss:$16 sps:$4 sm:$0xff]   ;;  %v11474_v6 = vld [vmem:[#allocation11 + $0x5ac] ss:$16 sps:$4 sm:$0xff]  }
 0x4ff   :  { %8935 = vmatprep.subr.bf16.mxu1 %v11381_v25  ;;  %v12408_v25 = vld [vmem:[#allocation10] sm:$0xff] }
 0x501   :  { %8791 = vmatpush1.bf16.msra.mxu0 %v11415_v48  ;;  %v3843_v48 = vrot.slane %v12408_v25, %v612_v21  ;;  %v11486_v21 = vld [vmem:[#allocation11 + $0x5ec] ss:$16 sps:$4 sm:$0xff]  }
 0x502   :  { %8936 = vmatpush1.bf16.msra.mxu1 %v11379_v8  ;;  %8792 = vmatprep.subr.bf16.mxu0 %v11423_v11  ;;  %v3847_v8 = vrot.slane %v12408_v25, %v616_v44  ;;  %v11472_v11 = vld [vmem:[#allocation11 + $0x5a8] ss:$16 sps:$4 sm:$0xff]  }
 0x503   :  { %8937 = vmatprep.subr.bf16.mxu1 %v11384_v9 }
 0x505   :  { %8793 = vmatpush1.bf16.msra.mxu0 %v11421_v52  ;;  %v11480_v52 = vld [vmem:[#allocation11 + $0x5cc] ss:$16 sps:$4 sm:$0xff]  }
 0x506   :  { %8938 = vmatpush1.bf16.msra.mxu1 %v11382_v36  ;;  %8794 = vmatprep.subr.bf16.mxu0 %v11429_v29 }
 0x507   :  { %8939 = vmatprep.subr.bf16.mxu1 %v11390_v14 }
 0x509   :  { %8795 = vmatpush1.bf16.msra.mxu0 %v11427_v24 }
 0x50a   :  { %8940 = vmatpush1.bf16.msra.mxu1 %v11388_v34  ;;  %8796 = vmatprep.subr.bf16.mxu0 %v11435_v32 }
 0x50b   :  { %8952 = vmatprep.subr.bf16.mxu1 %v11396_v18  ;;  %v11478_v18 = vld [vmem:[#allocation11 + $0x5c8] ss:$16 sps:$4 sm:$0xff]  }
 0x50d   :  { %8942 = vmatmul.mubr.bf16.vlgmr.msra.gmra.mrb[20].mxu1 %v12394_v61  ;;  %8797 = vmatpush1.bf16.msra.mxu0 %v11433_v20  ;;  %v11412_v61 = vld [vmem:[#allocation11 + $0x468] ss:$16 sps:$4 sm:$0xff]  }
 0x50e   :  { %8953 = vmatpush1.bf16.msra.mxu1 %v11394_v26  ;;  %8798 = vmatprep.subr.bf16.mxu0 %v11441_v60 }
 0x50f   :  { %8954 = vmatprep.subr.bf16.mxu1 %v11402_v33 }
 0x511   :  { %8799 = vmatpush1.bf16.msra.mxu0 %v11439_v28 }
 0x512   :  { %8955 = vmatpush1.bf16.msra.mxu1 %v11400_v1  ;;  %8800 = vmatprep.subr.bf16.mxu0 %v11447_v30  ;;  %v11484_v1 = vld [vmem:[#allocation11 + $0x5e8] ss:$16 sps:$4 sm:$0xff]  }
 0x513   :  { %8956 = vmatprep.subr.bf16.mxu1 %v11408_v31  ;;  %v11481_v31 = vld [vmem:[#allocation11 + $0x600] ss:$16 sps:$4 sm:$0xff]  }
 0x515   :  { %8801 = vmatpush1.bf16.msra.mxu0 %v11445_v16  ;;  %v11492_v16 = vld [vmem:[#allocation11 + $0x60c] ss:$16 sps:$4 sm:$0xff]  }
 0x516   :  { %8957 = vmatpush1.bf16.msra.mxu1 %v11406_v53  ;;  %8802 = vmatprep.subr.bf16.mxu0 %v11453_v27  ;;  %v11489_v53 = vld [vmem:[#allocation11 + $0x624] ss:$16 sps:$4 sm:$0xff]   ;;  %v11490_v27 = vld [vmem:[#allocation11 + $0x608] ss:$16 sps:$4 sm:$0xff]  }
 0x517   :  { %8958 = vmatprep.subr.bf16.mxu1 %v11414_v37  ;;  %v11487_v37 = vld [vmem:[#allocation11 + $0x620] ss:$16 sps:$4 sm:$0xff]  }
 0x519   :  { %8803 = vmatpush1.bf16.msra.mxu0 %v11451_v38  ;;  %v11498_v38 = vld [vmem:[#allocation11 + $0x62c] ss:$16 sps:$4 sm:$0xff]  }
 0x51a   :  { %8959 = vmatpush1.bf16.msra.mxu1 %v11412_v61  ;;  %8804 = vmatprep.subr.bf16.mxu0 %v11459_v40  ;;  %v11495_v61 = vld [vmem:[#allocation11 + $0x644] ss:$16 sps:$4 sm:$0xff]   ;;  %v11496_v40 = vld [vmem:[#allocation11 + $0x628] ss:$16 sps:$4 sm:$0xff]  }
 0x51b   :  { %8960 = vmatprep.subr.bf16.mxu1 %v11420_v41  ;;  %v11493_v41 = vld [vmem:[#allocation11 + $0x640] ss:$16 sps:$4 sm:$0xff]  }
 0x51d   :  { %8805 = vmatpush1.bf16.msra.mxu0 %v11457_v42  ;;  %v11504_v42 = vld [vmem:[#allocation11 + $0x64c] ss:$16 sps:$4 sm:$0xff]  }
 0x51e   :  { %8961 = vmatpush1.bf16.msra.mxu1 %v11418_v43  ;;  %8806 = vmatprep.subr.bf16.mxu0 %v11465_v3  ;;  %v11501_v43 = vld [vmem:[#allocation11 + $0x664] ss:$16 sps:$4 sm:$0xff]   ;;  %v11502_v3 = vld [vmem:[#allocation11 + $0x648] ss:$16 sps:$4 sm:$0xff]  }
 0x51f   :  { %8962 = vmatprep.subr.bf16.mxu1 %v11426_v10  ;;  %v11499_v10 = vld [vmem:[#allocation11 + $0x660] ss:$16 sps:$4 sm:$0xff]  }
 0x521   :  { %8807 = vmatpush1.bf16.msra.mxu0 %v11463_v56  ;;  %v11510_v56 = vld [vmem:[#allocation11 + $0x66c] ss:$16 sps:$4 sm:$0xff]  }
 0x522   :  { %8963 = vmatpush1.bf16.msra.mxu1 %v11424_v45  ;;  %8808 = vmatprep.subr.bf16.mxu0 %v11471_v39  ;;  %v11507_v45 = vld [vmem:[#allocation11 + $0x684] ss:$16 sps:$4 sm:$0xff]   ;;  %v11508_v39 = vld [vmem:[#allocation11 + $0x668] ss:$16 sps:$4 sm:$0xff]  }
 0x523   :  { %8964 = vmatprep.subr.bf16.mxu1 %v11432_v0  ;;  %v11505_v0 = vld [vmem:[#allocation11 + $0x680] ss:$16 sps:$4 sm:$0xff]  }
 0x525   :  { %8809 = vmatpush1.bf16.msra.mxu0 %v11469_v12  ;;  %v11516_v12 = vld [vmem:[#allocation11 + $0x68c] ss:$16 sps:$4 sm:$0xff]  }
 0x526   :  { %8965 = vmatpush1.bf16.msra.mxu1 %v11430_v47  ;;  %8810 = vmatprep.subr.bf16.mxu0 %v11477_v50  ;;  %v11513_v47 = vld [vmem:[#allocation11 + $0x6a4] ss:$16 sps:$4 sm:$0xff]   ;;  %v11514_v50 = vld [vmem:[#allocation11 + $0x688] ss:$16 sps:$4 sm:$0xff]  }
 0x527   :  { %8966 = vmatprep.subr.bf16.mxu1 %v11438_v49  ;;  %v11511_v49 = vld [vmem:[#allocation11 + $0x6a0] ss:$16 sps:$4 sm:$0xff]  }
 0x529   :  { %8811 = vmatpush1.bf16.msra.mxu0 %v11475_v51  ;;  %v11522_v51 = vld [vmem:[#allocation11 + $0x6ac] ss:$16 sps:$4 sm:$0xff]  }
 0x52a   :  { %8967 = vmatpush1.bf16.msra.mxu1 %v11436_v22  ;;  %8823 = vmatprep.subr.bf16.mxu0 %v11483_v54  ;;  %v11519_v22 = vld [vmem:[#allocation11 + $0x6c4] ss:$16 sps:$4 sm:$0xff]   ;;  %v3851_v54 = vrot.slane %v12408_v25, %v620_v23 }
 0x52b   :  { %8968 = vmatprep.subr.bf16.mxu1 %v11444_v46  ;;  %v3855_v46 = vrot.slane %v12408_v25, %v624_v35  ;;  %v11534_v35 = vld [vmem:[#allocation11 + $0x6ec] ss:$16 sps:$4 sm:$0xff]  }
 0x52e   :  { %8969 = vmatpush1.bf16.msra.mxu1 %v11442_v55  ;;  %v11520_v55 = vld [vmem:[#allocation11 + $0x6a8] ss:$16 sps:$4 sm:$0xff]  }
 0x52f   :  { %8970 = vmatprep.subr.bf16.mxu1 %v11450_v57  ;;  %v11517_v57 = vld [vmem:[#allocation11 + $0x6c0] ss:$16 sps:$4 sm:$0xff]  }
 0x532   :  { %8971 = vmatpush1.bf16.msra.mxu1 %v11448_v63  ;;  %v11528_v63 = vld [vmem:[#allocation11 + $0x6cc] ss:$16 sps:$4 sm:$0xff]  }
 0x533   :  { %8972 = vmatprep.subr.bf16.mxu1 %v11456_v17 }
 0x536   :  { %8973 = vmatpush1.bf16.msra.mxu1 %v11454_v2  ;;  %v11525_v2 = vld [vmem:[#allocation11 + $0x6e4] ss:$16 sps:$4 sm:$0xff]  }
 0x537   :  { %8974 = vmatprep.subr.bf16.mxu1 %v11462_v15 }
 0x53a   :  { %8975 = vmatpush1.bf16.msra.mxu1 %v11460_v4 }
 0x53b   :  { %8976 = vmatprep.subr.bf16.mxu1 %v11468_v5 }
 0x53e   :  { %8977 = vmatpush1.bf16.msra.mxu1 %v11466_v7 }
 0x53f   :  { %v6931_v9 = vpop.f32.mrb[20].mxu0  ;;  %8978 = vmatprep.subr.bf16.mxu1 %v11474_v6  ;;  %v11526_v6 = vld [vmem:[#allocation11 + $0x6c8] ss:$16 sps:$4 sm:$0xff]  }
 0x540   :  { %v11041_v36 = vadd.f32 %v6931_v9, %v3843_v48  ;;  %v6933_v29 = vpop.f32.mrb[21].mxu0 }
 0x541   :  { %v11042_v14 = vadd.f32 %v6933_v29, %v3847_v8  ;;  %v6935_v24 = vpop.f32.mrb[22].mxu0  ;;  %v11532_v29 = vld [vmem:[#allocation11 + $0x6e8] ss:$16 sps:$4 sm:$0xff]  }
 0x542   :  { %v11043_v34 = vadd.f32 %v6935_v24, %v3843_v48  ;;  %v6937_v32 = vpop.f32.mrb[23].mxu0  ;;  %8979 = vmatpush1.bf16.msra.mxu1 %v11472_v11  ;;  %v7116_v26 = vmax.f32 %v11041_v36, 0.0  ;;  %v11529_v24 = vld [vmem:[#allocation11 + $0x700] ss:$16 sps:$4 sm:$0xff]  }
 0x543   :  { %v11044_v20 = vadd.f32 %v6937_v32, %v3847_v8  ;;  %8980 = vmatprep.subr.bf16.mxu1 %v11480_v52  ;;  %v7117_v33 = vmax.f32 %v11042_v14, 0.0  ;;  %v11531_v8 = vld [vmem:[#allocation11 + $0x704] ss:$16 sps:$4 sm:$0xff]  }
 0x544   :  { %v7124_v60 = vmax.f32 %v11043_v34, 0.0  ;;  %v11537_v32 = vld [vmem:[#allocation11 + $0x724] ss:$16 sps:$4 sm:$0xff]  }
 0x545   :  { %v7125_v44 = vmax.f32 %v11044_v20, 0.0  ;;  %v11538_v20 = vld [vmem:[#allocation11 + $0x708] ss:$16 sps:$4 sm:$0xff]  }
 0x546   :  { %v7132_v28 = vpack.c.bf16 %v7124_v60, %v7116_v26  ;;  %8981 = vmatpush1.bf16.msra.mxu1 %v11478_v18  ;;  %v11540_v18 = vld [vmem:[#allocation11 + $0x70c] ss:$16 sps:$4 sm:$0xff]   ;;  %v11543_v60 = vld [vmem:[#allocation11 + $0x744] ss:$16 sps:$4 sm:$0xff]  }
 0x547   :  { %v7133_v30 = vpack.c.bf16 %v7125_v44, %v7117_v33  ;;  %8982 = vmatprep.subr.bf16.mxu1 %v11486_v21  ;;  %v11535_v21 = vld [vmem:[#allocation11 + $0x720] ss:$16 sps:$4 sm:$0xff]   ;;  %v11546_v26 = vld [vmem:[#allocation11 + $0x72c] ss:$16 sps:$4 sm:$0xff]   ;;  %v11544_v33 = vld [vmem:[#allocation11 + $0x728] ss:$16 sps:$4 sm:$0xff]  }
 0x548   :  { %v11541_v44 = vld [vmem:[#allocation11 + $0x740] ss:$16 sps:$4 sm:$0xff]  }
 0x549   :  { %8812 = vmatprep.mubr.bf16.mxu0 %v7133_v30  ;;  %8984 = vmatprep.mubr.bf16.mxu1 %v7133_v30  ;;  %v11550_v30 = vld [vmem:[#allocation11 + $0x748] ss:$16 sps:$4 sm:$0xff]  }
 0x54a   :  { %8813 = vmatmul.mubr.bf16.vlgmr.msra.gmra.mrb[24].mxu0 %v7132_v28  ;;  %8983 = vmatpush1.bf16.msra.mxu1 %v11484_v1  ;;  %v11549_v1 = vld [vmem:[#allocation11 + $0x764] ss:$16 sps:$4 sm:$0xff]  }
 0x54b   :  { %8824 = vmatpush1.bf16.msra.mxu0 %v11481_v31  ;;  %8995 = vmatprep.subr.bf16.mxu1 %v11492_v16  ;;  %v11547_v31 = vld [vmem:[#allocation11 + $0x760] ss:$16 sps:$4 sm:$0xff]   ;;  %v11558_v16 = vld [vmem:[#allocation11 + $0x76c] ss:$16 sps:$4 sm:$0xff]  }
 0x54c   :  { %8825 = vmatprep.subr.bf16.mxu0 %v11489_v53  ;;  %v11555_v53 = vld [vmem:[#allocation11 + $0x784] ss:$16 sps:$4 sm:$0xff]  }
 0x54d   :  { %8985 = vmatmul.mubr.bf16.vlgmr.msra.gmra.mrb[20].mxu1 %v7132_v28  ;;  %v11552_v28 = vld [vmem:[#allocation11 + $0x74c] ss:$16 sps:$4 sm:$0xff]  }
 0x54e   :  { %8996 = vmatpush1.bf16.msra.mxu1 %v11490_v27  ;;  %v11556_v27 = vld [vmem:[#allocation11 + $0x768] ss:$16 sps:$4 sm:$0xff]  }
 0x54f   :  { %8826 = vmatpush1.bf16.msra.mxu0 %v11487_v37  ;;  %8997 = vmatprep.subr.bf16.mxu1 %v11498_v38  ;;  %v11553_v37 = vld [vmem:[#allocation11 + $0x780] ss:$16 sps:$4 sm:$0xff]   ;;  %v11564_v38 = vld [vmem:[#allocation11 + $0x78c] ss:$16 sps:$4 sm:$0xff]  }
 0x550   :  { %8827 = vmatprep.subr.bf16.mxu0 %v11495_v61  ;;  %v11561_v61 = vld [vmem:[#allocation11 + $0x7a4] ss:$16 sps:$4 sm:$0xff]  }
 0x552   :  { %8998 = vmatpush1.bf16.msra.mxu1 %v11496_v40  ;;  %v11562_v40 = vld [vmem:[#allocation11 + $0x788] ss:$16 sps:$4 sm:$0xff]  }
 0x553   :  { %8828 = vmatpush1.bf16.msra.mxu0 %v11493_v41  ;;  %8999 = vmatprep.subr.bf16.mxu1 %v11504_v42  ;;  %v11559_v41 = vld [vmem:[#allocation11 + $0x7a0] ss:$16 sps:$4 sm:$0xff]   ;;  %v11570_v42 = vld [vmem:[#allocation11 + $0x7ac] ss:$16 sps:$4 sm:$0xff]  }
 0x554   :  { %8829 = vmatprep.subr.bf16.mxu0 %v11501_v43  ;;  %v11567_v43 = vld [vmem:[#allocation11 + $0x7c4] ss:$16 sps:$4 sm:$0xff]  }
 0x556   :  { %9000 = vmatpush1.bf16.msra.mxu1 %v11502_v3  ;;  %v11568_v3 = vld [vmem:[#allocation11 + $0x7a8] ss:$16 sps:$4 sm:$0xff]  }
 0x557   :  { %8830 = vmatpush1.bf16.msra.mxu0 %v11499_v10  ;;  %9001 = vmatprep.subr.bf16.mxu1 %v11510_v56  ;;  %v11565_v10 = vld [vmem:[#allocation11 + $0x7c0] ss:$16 sps:$4 sm:$0xff]   ;;  %v11576_v56 = vld [vmem:[#allocation11 + $0x7cc] ss:$16 sps:$4 sm:$0xff]  }
 0x558   :  { %8831 = vmatprep.subr.bf16.mxu0 %v11507_v45  ;;  %v11573_v45 = vld [vmem:[#allocation11 + $0x7e4] ss:$16 sps:$4 sm:$0xff]  }
 0x55a   :  { %9002 = vmatpush1.bf16.msra.mxu1 %v11508_v39  ;;  %v11574_v39 = vld [vmem:[#allocation11 + $0x7c8] ss:$16 sps:$4 sm:$0xff]  }
 0x55b   :  { %8832 = vmatpush1.bf16.msra.mxu0 %v11505_v0  ;;  %9003 = vmatprep.subr.bf16.mxu1 %v11516_v12  ;;  %v11571_v0 = vld [vmem:[#allocation11 + $0x7e0] ss:$16 sps:$4 sm:$0xff]   ;;  %v11579_v12 = vld [vmem:[#allocation11 + $0x7ec] ss:$16 sps:$4 sm:$0xff]  }
 0x55c   :  { %8833 = vmatprep.subr.bf16.mxu0 %v11513_v47  ;;  %v11582_v47 = vld [vmem:[#allocation14 + $0x4] ss:$8 sps:$4 sm:$0xff]  }
 0x55e   :  { %9004 = vmatpush1.bf16.msra.mxu1 %v11514_v50  ;;  %v11577_v50 = vld [vmem:[#allocation11 + $0x7e8] ss:$16 sps:$4 sm:$0xff]  }
 0x55f   :  { %8834 = vmatpush1.bf16.msra.mxu0 %v11511_v49  ;;  %9005 = vmatprep.subr.bf16.mxu1 %v11522_v51  ;;  %v11580_v49 = vld [vmem:[#allocation14] ss:$8 sps:$4 sm:$0xff]   ;;  %v11585_v51 = vld [vmem:[#allocation14 + $0x14] ss:$8 sps:$4 sm:$0xff]  }
 0x560   :  { %v7103_v17 = vpop.f32.mrb[16].mxu1  ;;  %8835 = vmatprep.subr.bf16.mxu0 %v11519_v22  ;;  %v11583_v22 = vld [vmem:[#allocation14 + $0x10] ss:$8 sps:$4 sm:$0xff]  }
 0x561   :  { %v11045_v15 = vadd.f32 %v7103_v17, %v3851_v54  ;;  %v7105_v4 = vpop.f32.mrb[17].mxu1  ;;  %v11592_v17 = vld [vmem:[#allocation14 + $0x40] ss:$8 sps:$4 sm:$0xff]  }
 0x562   :  { %v11046_v5 = vadd.f32 %v7105_v4, %v3855_v46  ;;  %v7107_v7 = vpop.f32.mrb[18].mxu1  ;;  %9006 = vmatpush1.bf16.msra.mxu1 %v11520_v55  ;;  %v11591_v55 = vld [vmem:[#allocation14 + $0x34] ss:$8 sps:$4 sm:$0xff]   ;;  %v11600_v4 = vld [vmem:[#allocation14 + $0x64] ss:$8 sps:$4 sm:$0xff]  }
 0x563   :  { %v11047_v23 = vadd.f32 %v7107_v7, %v3851_v54  ;;  %8836 = vmatpush1.bf16.msra.mxu0 %v11517_v57  ;;  %v7109_v48 = vpop.f32.mrb[19].mxu1  ;;  %9007 = vmatprep.subr.bf16.mxu1 %v11528_v63  ;;  %v7118_v11 = vmax.f32 %v11045_v15, 0.0  ;;  %v11588_v54 = vld [vmem:[#allocation14 + $0x24] ss:$8 sps:$4 sm:$0xff]   ;;  %v11589_v57 = vld [vmem:[#allocation14 + $0x30] ss:$8 sps:$4 sm:$0xff]  }
 0x564   :  { %v11048_v25 = vadd.f32 %v7109_v48, %v3855_v46  ;;  %8837 = vmatprep.subr.bf16.mxu0 %v11525_v2  ;;  %v7119_v52 = vmax.f32 %v11046_v5, 0.0  ;;  %v11586_v46 = vld [vmem:[#allocation14 + $0x20] ss:$8 sps:$4 sm:$0xff]   ;;  %v11594_v63 = vld [vmem:[#allocation14 + $0x44] ss:$8 sps:$4 sm:$0xff]  }
 0x565   :  { %v7126_v9 = vmax.f32 %v11047_v23, 0.0  ;;  %v11597_v2 = vld [vmem:[#allocation14 + $0x54] ss:$8 sps:$4 sm:$0xff]   ;;  %v11595_v15 = vld [vmem:[#allocation14 + $0x50] ss:$8 sps:$4 sm:$0xff]  }
 0x566   :  { %v7127_v36 = vmax.f32 %v11048_v25, 0.0  ;;  %9008 = vmatpush1.bf16.msra.mxu1 %v11526_v6  ;;  %v11598_v5 = vld [vmem:[#allocation14 + $0x60] ss:$8 sps:$4 sm:$0xff]   ;;  %v11603_v7 = vld [vmem:[#allocation14 + $0x74] ss:$8 sps:$4 sm:$0xff]  }
 0x567   :  { %v12422_v14 = vpack.c.bf16 %v7126_v9, %v7118_v11  ;;  %8838 = vmatpush1.bf16.msra.mxu0 %v11523_v13  ;;  %9009 = vmatprep.subr.bf16.mxu1 %v11534_v35  ;;  %v11601_v6 = vld [vmem:[#allocation14 + $0x70] ss:$8 sps:$4 sm:$0xff]   ;;  %v11606_v23 = vld [vmem:[#allocation14 + $0x84] ss:$8 sps:$4 sm:$0xff]   ;;  %v11604_v48 = vld [vmem:[#allocation14 + $0x80] ss:$8 sps:$4 sm:$0xff]  }
 0x568   :  { %v7135_v34 = vpack.c.bf16 %v7127_v36, %v7119_v52  ;;  %8839 = vmatprep.subr.bf16.mxu0 %v11531_v8  ;;  %v11609_v13 = vld [vmem:[#allocation14 + $0x94] ss:$8 sps:$4 sm:$0xff]   ;;  %v11607_v35 = vld [vmem:[#allocation14 + $0x90] ss:$8 sps:$4 sm:$0xff]   ;;  %v11612_v25 = vld [vmem:[#allocation14 + $0xa4] ss:$8 sps:$4 sm:$0xff]  }
 0x569   :  { %v11610_v8 = vld [vmem:[#allocation14 + $0xa0] ss:$8 sps:$4 sm:$0xff]   ;;  %v11615_v11 = vld [vmem:[#allocation14 + $0xb4] ss:$8 sps:$4 sm:$0xff]   ;;  %v11613_v9 = vld [vmem:[#allocation14 + $0xb0] ss:$8 sps:$4 sm:$0xff]  }
 0x56a   :  { %8855 = vmatprep.mubr.bf16.mxu0 %v7135_v34  ;;  %9010 = vmatpush1.bf16.msra.mxu1 %v11532_v29  ;;  %v11618_v52 = vld [vmem:[#allocation14 + $0xc4] ss:$8 sps:$4 sm:$0xff]   ;;  %v11616_v36 = vld [vmem:[#allocation14 + $0xc0] ss:$8 sps:$4 sm:$0xff]   ;;  %v11621_v29 = vld [vmem:[#allocation14 + $0xd4] ss:$8 sps:$4 sm:$0xff]  }
 0x56b   :  { %8840 = vmatpush1.bf16.msra.mxu0 %v11529_v24  ;;  %9027 = vmatprep.mubr.bf16.mxu1 %v7135_v34  ;;  %v11624_v24 = vld [vmem:[#allocation14 + $0xe4] ss:$8 sps:$4 sm:$0xff]   ;;  %v11622_v34 = vld [vmem:[#allocation14 + $0xe0] ss:$8 sps:$4 sm:$0xff]  }
 0x56c   :  { %8841 = vmatprep.subr.bf16.mxu0 %v11537_v32  ;;  %9011 = vmatprep.subr.bf16.mxu1 %v11540_v18  ;;  %v11627_v32 = vld [vmem:[#allocation14 + $0xf4] ss:$8 sps:$4 sm:$0xff]   ;;  %v11625_v18 = vld [vmem:[#allocation14 + $0xf0] ss:$8 sps:$4 sm:$0xff]  }
 0x56e   :  { %9012 = vmatpush1.bf16.msra.mxu1 %v11538_v20  ;;  %v11630_v20 = vld [vmem:[#allocation14 + $0x104] ss:$8 sps:$4 sm:$0xff]  }
 0x56f   :  { %8842 = vmatpush1.bf16.msra.mxu0 %v11535_v21  ;;  %9013 = vmatprep.subr.bf16.mxu1 %v11546_v26  ;;  %v11676_v21 = vld [vmem:[#allocation17 + $0x40] sm:$0xff]  }
 0x570   :  { %8843 = vmatprep.subr.bf16.mxu0 %v11543_v60  ;;  %v11677_v26 = vld [vmem:[#allocation17] sm:$0xff]   ;;  %v11678_v60 = vld [vmem:[#allocation17 + $0x48] sm:$0xff]  }
 0x572   :  { %9014 = vmatpush1.bf16.msra.mxu1 %v11544_v33  ;;  %v11679_v33 = vld [vmem:[#allocation17 + $0x8] sm:$0xff]  }
 0x573   :  { %8844 = vmatpush1.bf16.msra.mxu0 %v11541_v44  ;;  %9015 = vmatprep.subr.bf16.mxu1 %v11552_v28  ;;  %v11680_v44 = vld [vmem:[#allocation17 + $0x50] sm:$0xff]  }
 0x574   :  { %8845 = vmatprep.subr.bf16.mxu0 %v11549_v1  ;;  %v11681_v28 = vld [vmem:[#allocation17 + $0x10] sm:$0xff]   ;;  %v11682_v1 = vld [vmem:[#allocation17 + $0x58] sm:$0xff]  }
 0x576   :  { %9016 = vmatpush1.bf16.msra.mxu1 %v11550_v30  ;;  %v11683_v30 = vld [vmem:[#allocation17 + $0x18] sm:$0xff]  }
 0x577   :  { %8846 = vmatpush1.bf16.msra.mxu0 %v11547_v31  ;;  %9017 = vmatprep.subr.bf16.mxu1 %v11558_v16  ;;  %v11684_v31 = vld [vmem:[#allocation17 + $0x60] sm:$0xff]  }
 0x578   :  { %8847 = vmatprep.subr.bf16.mxu0 %v11555_v53  ;;  %v11685_v16 = vld [vmem:[#allocation17 + $0x20] sm:$0xff]   ;;  %v11686_v53 = vld [vmem:[#allocation17 + $0x68] sm:$0xff]  }
 0x57a   :  { %9018 = vmatpush1.bf16.msra.mxu1 %v11556_v27  ;;  %v7392_v27 = vld [vmem:[#allocation13] sm:$0xf] }
 0x57b   :  { %8848 = vmatpush1.bf16.msra.mxu0 %v11553_v37  ;;  %9019 = vmatprep.subr.bf16.mxu1 %v11564_v38  ;;  %v7397_v37 = vrot.slane %v7392_v27, %v12242_v19  ;;  %v7401_v38 = vrot.slane %v7392_v27, %v12248_v58 }
 0x57c   :  { %8849 = vmatprep.subr.bf16.mxu0 %v11561_v61 }
 0x57e   :  { %9020 = vmatpush1.bf16.msra.mxu1 %v11562_v40  ;;  %v7405_v40 = vrot.slane %v7392_v27, %v12282_v62 }
 0x57f   :  { %8850 = vmatpush1.bf16.msra.mxu0 %v11559_v41  ;;  %9021 = vmatprep.subr.bf16.mxu1 %v11570_v42 }
 0x580   :  { %8851 = vmatprep.subr.bf16.mxu0 %v11567_v43  ;;  %v7409_v43 = vrot.slane %v7392_v27, %v12285_v59  ;;  %v11675_v27 = vld [vmem:[#allocation14 + $0x1f4] ss:$8 sps:$4 sm:$0xff]  }
 0x582   :  { %9022 = vmatpush1.bf16.msra.mxu1 %v11568_v3 }
 0x583   :  { %8852 = vmatpush1.bf16.msra.mxu0 %v11565_v10  ;;  %9023 = vmatprep.subr.bf16.mxu1 %v11576_v56 }
 0x584   :  { %8853 = vmatprep.subr.bf16.mxu0 %v11573_v45 }
 0x586   :  { %9024 = vmatpush1.bf16.msra.mxu1 %v11574_v39 }
 0x587   :  { %8854 = vmatpush1.bf16.msra.mxu0 %v11571_v0  ;;  %9025 = vmatprep.subr.bf16.mxu1 %v11579_v12 }
 0x588   :  { %9446 = vmatprep.subr.bf16.mxu0 %v11582_v47 }
 0x58a   :  { %8856 = vmatmul.mubr.bf16.vlgmr.msra.gmra.mrb[24].mxu0 %v12422_v14  ;;  %9026 = vmatpush1.bf16.msra.mxu1 %v11577_v50 }
 0x58b   :  { %9447 = vmatpush1.bf16.msra.mxu0 %v11580_v49  ;;  %10983 = vmatprep.subr.bf16.mxu1 %v11676_v21  ;;  %v11655_v21 = vld [vmem:[#allocation14 + $0x190] ss:$8 sps:$4 sm:$0xff]  }
 0x58c   :  { %9448 = vmatprep.subr.bf16.mxu0 %v11585_v51 }
 0x58d   :  { %9028 = vmatmul.mubr.bf16.vlgmr.msra.gmra.mrb[20].mxu1 %v12422_v14  ;;  %v11619_v14 = vld [vmem:[#allocation14 + $0xd0] ss:$8 sps:$4 sm:$0xff]  }
 0x58e   :  { %10984 = vmatpush3.bf16.msra.mxu1 %v11677_v26  ;;  %v11660_v26 = vld [vmem:[#allocation14 + $0x1a4] ss:$8 sps:$4 sm:$0xff]  }
 0x58f   :  { %9449 = vmatpush1.bf16.msra.mxu0 %v11583_v22  ;;  %10985 = vmatprep.subr.bf16.mxu1 %v11678_v60  ;;  %v11658_v60 = vld [vmem:[#allocation14 + $0x1a0] ss:$8 sps:$4 sm:$0xff]  }
 0x590   :  { %9450 = vmatprep.subr.bf16.mxu0 %v11588_v54 }
 0x592   :  { %10986 = vmatpush3.bf16.msra.mxu1 %v11679_v33  ;;  %v11663_v33 = vld [vmem:[#allocation14 + $0x1b4] ss:$8 sps:$4 sm:$0xff]  }
 0x593   :  { %9451 = vmatpush1.bf16.msra.mxu0 %v11586_v46  ;;  %10987 = vmatprep.subr.bf16.mxu1 %v11680_v44  ;;  %v11661_v44 = vld [vmem:[#allocation14 + $0x1b0] ss:$8 sps:$4 sm:$0xff]  }
 0x594   :  { %9452 = vmatprep.subr.bf16.mxu0 %v11591_v55 }
 0x596   :  { %10988 = vmatpush3.bf16.msra.mxu1 %v11681_v28  ;;  %v11666_v28 = vld [vmem:[#allocation14 + $0x1c4] ss:$8 sps:$4 sm:$0xff]  }
 0x597   :  { %9453 = vmatpush1.bf16.msra.mxu0 %v11589_v57  ;;  %10989 = vmatprep.subr.bf16.mxu1 %v11682_v1  ;;  %v11664_v1 = vld [vmem:[#allocation14 + $0x1c0] ss:$8 sps:$4 sm:$0xff]  }
 0x598   :  { %9454 = vmatprep.subr.bf16.mxu0 %v11594_v63 }
 0x59a   :  { %10990 = vmatpush3.bf16.msra.mxu1 %v11683_v30  ;;  %v11669_v30 = vld [vmem:[#allocation14 + $0x1d4] ss:$8 sps:$4 sm:$0xff]  }
 0x59b   :  { %9455 = vmatpush1.bf16.msra.mxu0 %v11592_v17  ;;  %10991 = vmatprep.subr.bf16.mxu1 %v11684_v31  ;;  %v11667_v31 = vld [vmem:[#allocation14 + $0x1d0] ss:$8 sps:$4 sm:$0xff]  }
 0x59c   :  { %9456 = vmatprep.subr.bf16.mxu0 %v11597_v2 }
 0x59e   :  { %10992 = vmatpush3.bf16.msra.mxu1 %v11685_v16  ;;  %v11672_v16 = vld [vmem:[#allocation14 + $0x1e4] ss:$8 sps:$4 sm:$0xff]  }
 0x59f   :  { %9457 = vmatpush1.bf16.msra.mxu0 %v11595_v15  ;;  %10993 = vmatprep.subr.bf16.mxu1 %v11686_v53  ;;  %v11628_v15 = vld [vmem:[#allocation14 + $0x100] ss:$8 sps:$4 sm:$0xff]  }
 0x5a0   :  { %9458 = vmatprep.subr.bf16.mxu0 %v11600_v4  ;;  %v11670_v53 = vld [vmem:[#allocation14 + $0x1e0] ss:$8 sps:$4 sm:$0xff]  }
 0x5a3   :  { %9459 = vmatpush1.bf16.msra.mxu0 %v11598_v5 }
 0x5a4   :  { %9460 = vmatprep.subr.bf16.mxu0 %v11603_v7  ;;  %v11633_v7 = vld [vmem:[#allocation14 + $0x114] ss:$8 sps:$4 sm:$0xff]  }
 0x5a7   :  { %9461 = vmatpush1.bf16.msra.mxu0 %v11601_v6 }
 0x5a8   :  { %9462 = vmatprep.subr.bf16.mxu0 %v11606_v23 }
 0x5ab   :  { %9463 = vmatpush1.bf16.msra.mxu0 %v11604_v48  ;;  %v11631_v48 = vld [vmem:[#allocation14 + $0x110] ss:$8 sps:$4 sm:$0xff]  }
 0x5ac   :  { %9464 = vmatprep.subr.bf16.mxu0 %v11609_v13  ;;  %v11636_v13 = vld [vmem:[#allocation14 + $0x124] ss:$8 sps:$4 sm:$0xff]  }
 0x5af   :  { %9465 = vmatpush1.bf16.msra.mxu0 %v11607_v35  ;;  %v11634_v35 = vld [vmem:[#allocation14 + $0x120] ss:$8 sps:$4 sm:$0xff]  }
 0x5b0   :  { %9466 = vmatprep.subr.bf16.mxu0 %v11612_v25  ;;  %v11639_v25 = vld [vmem:[#allocation14 + $0x134] ss:$8 sps:$4 sm:$0xff]  }
 0x5b3   :  { %9467 = vmatpush1.bf16.msra.mxu0 %v11610_v8  ;;  %v11637_v8 = vld [vmem:[#allocation14 + $0x130] ss:$8 sps:$4 sm:$0xff]  }
 0x5b4   :  { %9468 = vmatprep.subr.bf16.mxu0 %v11615_v11  ;;  %v11642_v11 = vld [vmem:[#allocation14 + $0x144] ss:$8 sps:$4 sm:$0xff]  }
 0x5b7   :  { %9469 = vmatpush1.bf16.msra.mxu0 %v11613_v9  ;;  %v11640_v9 = vld [vmem:[#allocation14 + $0x140] ss:$8 sps:$4 sm:$0xff]  }
 0x5b8   :  { %9470 = vmatprep.subr.bf16.mxu0 %v11618_v52  ;;  %v11645_v52 = vld [vmem:[#allocation14 + $0x154] ss:$8 sps:$4 sm:$0xff]  }
 0x5bb   :  { %9471 = vmatpush1.bf16.msra.mxu0 %v11616_v36  ;;  %v11643_v36 = vld [vmem:[#allocation14 + $0x150] ss:$8 sps:$4 sm:$0xff]  }
 0x5bc   :  { %9472 = vmatprep.subr.bf16.mxu0 %v11621_v29  ;;  %v11648_v29 = vld [vmem:[#allocation14 + $0x164] ss:$8 sps:$4 sm:$0xff]  }
 0x5bf   :  { %9473 = vmatpush1.bf16.msra.mxu0 %v11619_v14  ;;  %v11646_v14 = vld [vmem:[#allocation14 + $0x160] ss:$8 sps:$4 sm:$0xff]  }
 0x5c0   :  { %9474 = vmatprep.subr.bf16.mxu0 %v11624_v24  ;;  %v11651_v24 = vld [vmem:[#allocation14 + $0x174] ss:$8 sps:$4 sm:$0xff]  }
 0x5c3   :  { %9475 = vmatpush1.bf16.msra.mxu0 %v11622_v34  ;;  %v11649_v34 = vld [vmem:[#allocation14 + $0x170] ss:$8 sps:$4 sm:$0xff]  }
 0x5c4   :  { %9476 = vmatprep.subr.bf16.mxu0 %v11627_v32  ;;  %v11654_v32 = vld [vmem:[#allocation14 + $0x184] ss:$8 sps:$4 sm:$0xff]  }
 0x5c7   :  { %9477 = vmatpush1.bf16.msra.mxu0 %v11625_v18  ;;  %v11652_v18 = vld [vmem:[#allocation14 + $0x180] ss:$8 sps:$4 sm:$0xff]  }
 0x5c8   :  { %9489 = vmatprep.subr.bf16.mxu0 %v11630_v20  ;;  %v11657_v20 = vld [vmem:[#allocation14 + $0x194] ss:$8 sps:$4 sm:$0xff]  }
 0x65d   :  { %v8857_v61 = vpop.f32.mrb[24].mxu0 }
 0x65e   :  { %v11049_v41 = vadd.f32 %v8857_v61, %v7397_v37  ;;  %v8859_v42 = vpop.f32.mrb[25].mxu0  ;;  %v11688_v61 = vld [vmem:[#allocation17 + $0x70] sm:$0xff]  }
 0x65f   :  { %v11050_v3 = vadd.f32 %v8859_v42, %v7401_v38  ;;  %v8861_v10 = vpop.f32.mrb[26].mxu0  ;;  %v11691_v42 = vld [vmem:[#allocation17 + $0x38] sm:$0xff]  }
 0x660   :  { %v11051_v56 = vadd.f32 %v8861_v10, %v7397_v37  ;;  %v8863_v45 = vpop.f32.mrb[27].mxu0  ;;  %v9029_v39 = vpop.f32.mrb[20].mxu1  ;;  %v9038_v50 = vmax.f32 %v11049_v41, 0.0  ;;  %v11673_v37 = vld [vmem:[#allocation14 + $0x1f0] ss:$8 sps:$4 sm:$0xff]  }
 0x661   :  { %v11052_v0 = vadd.f32 %v8863_v45, %v7401_v38  ;;  %v11053_v12 = vadd.f32 %v9029_v39, %v7405_v40  ;;  %v9031_v47 = vpop.f32.mrb[21].mxu1  ;;  %v9039_v54 = vmax.f32 %v11050_v3, 0.0  ;;  %v11687_v38 = vld [vmem:[#allocation17 + $0x28] sm:$0xff]   ;;  %v11690_v41 = vld [vmem:[#allocation17 + $0x78] sm:$0xff]  }
 0x662   :  { %v9042_v49 = vmax.f32 %v11051_v56, 0.0  ;;  %v11054_v51 = vadd.f32 %v9031_v47, %v7409_v43  ;;  %v9033_v22 = vpop.f32.mrb[22].mxu1  ;;  %10994 = vmatpush3.bf16.msra.mxu1 %v11687_v38 }
 0x663   :  { %v9043_v46 = vmax.f32 %v11052_v0, 0.0  ;;  %v11055_v55 = vadd.f32 %v9033_v22, %v7405_v40  ;;  %v9035_v62 = vpop.f32.mrb[23].mxu1  ;;  %v9040_v59 = vmax.f32 %v11053_v12, 0.0  ;;  %v11689_v40 = vld [vmem:[#allocation17 + $0x30] sm:$0xff]   ;;  %10995 = vmatprep.subr.bf16.mxu1 %v11688_v61 }
 0x664   :  { %v9046_v57 = vpack.c.bf16 %v9042_v49, %v9038_v50  ;;  %v11056_v63 = vadd.f32 %v9035_v62, %v7409_v43  ;;  %v9041_v4 = vmax.f32 %v11054_v51, 0.0  ;;  %v9114_v43 = vld [vmem:[#allocation16] sm:$0x3] }
 0x665   :  { %v9047_v17 = vpack.c.bf16 %v9043_v46, %v9039_v54  ;;  %v9044_v2 = vmax.f32 %v11055_v55, 0.0  ;;  %v9119_v3 = vrot.slane %v9114_v43, %v12242_v19  ;;  %v9123_v10 = vrot.slane %v9114_v43, %v12248_v58  ;;  %v10966_v19 = vld [vmem:[#allocation19] ss:$0 sm:$0xff] }
 0x666   :  { %v9045_v5 = vmax.f32 %v11056_v63, 0.0  ;;  %10996 = vmatpush3.bf16.msra.mxu1 %v11689_v40 }
 0x667   :  { %v12430_v6 = vpack.c.bf16 %v9044_v2, %v9040_v59  ;;  %9478 = vmatprep.mubr.bf16.mxu0 %v9047_v17  ;;  %10997 = vmatprep.subr.bf16.mxu1 %v11690_v41 }
 0x668   :  { %v9049_v23 = vpack.c.bf16 %v9045_v5, %v9041_v4  ;;  %9479 = vmatmul.mubr.bf16.vlgmr.msra.gmra.mrb[28].mxu0 %v9046_v57 }
 0x669   :  { %9490 = vmatpush1.bf16.msra.mxu0 %v11628_v15 }
 0x66a   :  { %9491 = vmatprep.subr.bf16.mxu0 %v11633_v7  ;;  %9521 = vmatprep.mubr.bf16.mxu0 %v9049_v23 }
 0x66b   :  { %10998 = vmatpush3.bf16.msra.mxu1 %v11691_v42 }
 0x66d   :  { %9492 = vmatpush1.bf16.msra.mxu0 %v11631_v48 }
 0x66e   :  { %9493 = vmatprep.subr.bf16.mxu0 %v11636_v13 }
 0x671   :  { %9494 = vmatpush1.bf16.msra.mxu0 %v11634_v35 }
 0x672   :  { %9495 = vmatprep.subr.bf16.mxu0 %v11639_v25 }
 0x675   :  { %9496 = vmatpush1.bf16.msra.mxu0 %v11637_v8 }
 0x676   :  { %9497 = vmatprep.subr.bf16.mxu0 %v11642_v11 }
 0x679   :  { %9498 = vmatpush1.bf16.msra.mxu0 %v11640_v9 }
 0x67a   :  { %9499 = vmatprep.subr.bf16.mxu0 %v11645_v52 }
 0x67d   :  { %9500 = vmatpush1.bf16.msra.mxu0 %v11643_v36 }
 0x67e   :  { %9501 = vmatprep.subr.bf16.mxu0 %v11648_v29 }
 0x681   :  { %9502 = vmatpush1.bf16.msra.mxu0 %v11646_v14 }
 0x682   :  { %9503 = vmatprep.subr.bf16.mxu0 %v11651_v24 }
 0x685   :  { %9504 = vmatpush1.bf16.msra.mxu0 %v11649_v34 }
 0x686   :  { %9505 = vmatprep.subr.bf16.mxu0 %v11654_v32 }
 0x689   :  { %9506 = vmatpush1.bf16.msra.mxu0 %v11652_v18 }
 0x68a   :  { %9507 = vmatprep.subr.bf16.mxu0 %v11657_v20 }
 0x68d   :  { %9508 = vmatpush1.bf16.msra.mxu0 %v11655_v21 }
 0x68e   :  { %9509 = vmatprep.subr.bf16.mxu0 %v11660_v26 }
 0x691   :  { %9510 = vmatpush1.bf16.msra.mxu0 %v11658_v60 }
 0x692   :  { %9511 = vmatprep.subr.bf16.mxu0 %v11663_v33 }
 0x695   :  { %9512 = vmatpush1.bf16.msra.mxu0 %v11661_v44 }
 0x696   :  { %9513 = vmatprep.subr.bf16.mxu0 %v11666_v28 }
 0x699   :  { %9514 = vmatpush1.bf16.msra.mxu0 %v11664_v1 }
 0x69a   :  { %9515 = vmatprep.subr.bf16.mxu0 %v11669_v30 }
 0x69d   :  { %9516 = vmatpush1.bf16.msra.mxu0 %v11667_v31 }
 0x69e   :  { %9517 = vmatprep.subr.bf16.mxu0 %v11672_v16 }
 0x6a1   :  { %9518 = vmatpush1.bf16.msra.mxu0 %v11670_v53 }
 0x6a2   :  { %9519 = vmatprep.subr.bf16.mxu0 %v11675_v27 }
 0x6a5   :  { %9520 = vmatpush1.bf16.msra.mxu0 %v11673_v37 }
 0x6a8   :  { %9522 = vmatmul.mubr.bf16.vlgmr.msra.gmra.mrb[28].mxu0 %v12430_v6 }
 0x77b   :  { %v9523_v56 = vpop.f32.mrb[28].mxu0 }
 0x77c   :  { %v11057_v45 = vadd.f32 %v9523_v56, %v9119_v3  ;;  %v9525_v39 = vpop.f32.mrb[29].mxu0 }
 0x77d   :  { %v11058_v0 = vadd.f32 %v9525_v39, %v9123_v10  ;;  %v9527_v12 = vpop.f32.mrb[30].mxu0 }
 0x77e   :  { %v11059_v47 = vadd.f32 %v9527_v12, %v9119_v3  ;;  %v9529_v50 = vpop.f32.mrb[31].mxu0  ;;  %v9532_v51 = vmax.f32 %v11057_v45, 0.0 }
 0x77f   :  { %v11060_v49 = vadd.f32 %v9529_v50, %v9123_v10  ;;  %v9533_v54 = vmax.f32 %v11058_v0, 0.0 }
 0x780   :  { %v9534_v22 = vmax.f32 %v11059_v47, 0.0 }
 0x781   :  { %v9535_v46 = vmax.f32 %v11060_v49, 0.0 }
 0x782   :  { %v9536_v55 = vpack.c.bf16 %v9534_v22, %v9532_v51 }
 0x783   :  { %v9537_v62 = vpack.c.bf16 %v9535_v46, %v9533_v54 }
 0x785   :  { %9705 = vmatprep.mubr.bf16.mxu1 %v9537_v62 }
 0x786   :  { %9706 = vmatmul.mubr.bf16.vlgmr.msra.gmra.mrb[24].mxu1 %v9536_v55 }
 0x859   :  { %v10999_v57 = vpop.f32.mrb[24].mxu1 }
 0x85a   :  { %v11000_v63 = vpop.f32.mrb[25].mxu1 }
 0x85b   :  { %v11001_v58 = vadd.f32 %v11000_v63, %v10999_v57  ;;  %v11002_v17 = vpop.f32.mrb[26].mxu1 }
 0x85c   :  { %v11003_v59 = vpop.f32.mrb[27].mxu1 }
 0x85d   :  { %v9708_v2 = vadd.f32 %v11001_v58, %v10966_v19  ;;  %v11004_v15 = vadd.f32 %v11003_v59, %v11002_v17 }
 0x85f   :  { %9714 = vst [vmem:[#allocation20] sm:$0xff] %v9708_v2  ;;  %v9711_v4 = vadd.f32 %v11004_v15, %v10966_v19 }
 0x861   :  { %9715 = vst [vmem:[#allocation20 + $0x8] sm:$0xff] %v9711_v4 }
 0x862   :  { %11947 = shalt.err (!%p11944_p8)
}
 0x863   :  { %s11948_s26 = scalar_lea.hbm %s12461_s11, 256 }
 0x864   :  { %p11949_p9 = scmp.ne.s32.totalorder %s12461_s11, %s11948_s26  ;;  %p11952_p10 = scmp.lt.u32.totalorder %s11948_s26, %s12461_s11 }
 0x866   :  { %p11954_p11 = pnand %p11952_p10, %p11949_p9 }
 0x868   :  { %11957 = shalt.err (!%p11954_p11)
}
 0x869   :  { %9727 = dma.vmem_to_hbm [thread:$0]  %s9722_s0, 256, %s12461_s11, [#allocation4], %s11980_s5, %s11980_s5, %s11981_s15  }
 0x86a   :  { %11970 = dma.done.wait [#allocation4], 256  }
 0x86b   :  { %11971 = vsyncadd [#allocation4], 4294967040 }
 0x86c   :  { %9731 = vsyncpa [#allocation3], 1 }
 0x86d   :  { %9732 = vsyncpa [#allocation6], 1 }
 0x86e   :  { %9733 = vsyncpa [#allocation9], 1 }
 0x86f   :  { %9734 = vsyncpa [#allocation12], 1 }
 0x870   :  { %9735 = vsyncpa [#allocation15], 1 }
 0x871   :  { %9736 = vsyncpa [#allocation18], 1 }
 0x872   :  { %9737 = vsyncpa [#allocation4], 1 }

</bundles_post_ra>
